<compile_context>
chip_gen: v7x
topology: tpu7x:2x2x1
jax: 0.10.0
libtpu: 0.0.40
codegen_flags: <defaults>
</compile_context>

<pallas_src>
import functools

import numpy as np
import jax
import jax.numpy as jnp
from jax.experimental import pallas as pl
from jax.experimental.pallas import tpu as pltpu


# ----------------------------------------------------------------------------
# Model configuration (small Swin-T-like config)
# ----------------------------------------------------------------------------

IMG = 32
IN_CH = 3
PATCH = 4
EMBED = 32
WINDOW = 4
DEPTHS = (2, 2)
HEADS = (2, 4)
MLP_RATIO = 4
NUM_CLASSES = 10

NEG_INF = -1e9   # structural blocking of cross-window / cross-image pairs


# ----------------------------------------------------------------------------
# Dense attention-bias construction (tiny, XLA side)
# ----------------------------------------------------------------------------

def _build_attn_bias(table, num_heads, batch, H, W, ws, shift):
    """Dense (num_heads, B*H*W, B*H*W) additive bias that encodes Swin
    (shifted-)window attention on the flat raster-ordered token axis:
      * relative-position bias within each (rolled) window,
      * the standard -100 shifted-window region mask,
      * -1e9 for every cross-window / cross-image pair (softmax -> exactly 0).
    """
    L = H * W
    hh, ww = np.meshgrid(np.arange(H), np.arange(W), indexing="ij")
    rolled_h = (hh - shift) % H              # position in the rolled map
    rolled_w = (ww - shift) % W
    win = ((rolled_h // ws) * (W // ws) + (rolled_w // ws)).reshape(-1)
    rh = (rolled_h % ws).reshape(-1)         # within-window coordinates
    rw = (rolled_w % ws).reshape(-1)

    rel = ((rh[:, None] - rh[None, :] + ws - 1) * (2 * ws - 1)
           + (rw[:, None] - rw[None, :] + ws - 1))          # (L, L) table index
    same_win = win[:, None] == win[None, :]                 # (L, L) bool

    if shift > 0:
        def region(p, size):
            r = np.zeros_like(p)
            r = np.where(p >= size - ws, 1, r)
            r = np.where(p >= size - shift, 2, r)
            return r
        reg = (region(rolled_h, H) * 3 + region(rolled_w, W)).reshape(-1)
        smask = np.where(reg[:, None] != reg[None, :], -100.0, 0.0)
    else:
        smask = np.zeros((L, L))

    per_img = jnp.take(table, jnp.asarray(rel.reshape(-1), jnp.int32), axis=0)
    per_img = per_img.reshape(L, L, num_heads).transpose(2, 0, 1)   # (nh, L, L)
    per_img = jnp.where(jnp.asarray(same_win)[None],
                        per_img + jnp.asarray(smask, jnp.float32)[None],
                        NEG_INF)

    full = jnp.full((num_heads, batch * L, batch * L), NEG_INF, jnp.float32)
    for b in range(batch):
        full = full.at[:, b * L:(b + 1) * L, b * L:(b + 1) * L].set(per_img)
    return full


# ----------------------------------------------------------------------------
# In-kernel helpers
# ----------------------------------------------------------------------------

def _ln(x, g, b, eps=1e-5):
    mu = jnp.mean(x, axis=-1, keepdims=True)
    var = jnp.mean((x - mu) ** 2, axis=-1, keepdims=True)
    return (x - mu) * jax.lax.rsqrt(var + eps) * g + b


def _mm(a, b):
    """MXU matmul with bf16 operands and f32 accumulation."""
    return jnp.dot(a.astype(jnp.bfloat16), b.astype(jnp.bfloat16),
                   preferred_element_type=jnp.float32)


def _attention(xn, qkvw, qkvb, pw, pb, bias_ref, num_heads, scale):
    """Window attention on flat tokens; windowing enforced by `bias_ref`."""
    M, C = xn.shape
    hd = C // num_heads
    qkv = _mm(xn, qkvw) + qkvb                           # (M, 3C) f32
    head_outs = []
    for h in range(num_heads):                           # static unroll (2 / 4)
        q = qkv[:, h * hd:(h + 1) * hd]
        k = qkv[:, C + h * hd:C + (h + 1) * hd]
        v = qkv[:, 2 * C + h * hd:2 * C + (h + 1) * hd]
        # dense (M, M) scores; cross-window pairs are killed by the bias
        s = jax.lax.dot_general(
            q.astype(jnp.bfloat16), k.astype(jnp.bfloat16),
            dimension_numbers=(((1,), (1,)), ((), ())),
            preferred_element_type=jnp.float32)
        s = s * scale + bias_ref[h]
        m = jnp.max(s, axis=-1, keepdims=True)
        p = jnp.exp(s - m)
        p = p * pl.reciprocal(jnp.sum(p, axis=-1, keepdims=True), approx=True)
        head_outs.append(_mm(p, v))                      # (M, hd)
    o = jnp.concatenate(head_outs, axis=-1)              # (M, C)
    return _mm(o, pw) + pb                               # single output proj


def _block_body(x, g1, b1, qkvw, qkvb, pw, pb, g2, b2, w1, b1f, w2, b2f,
                bias_ref, num_heads, scale):
    """LN1 -> MHA -> +res -> LN2 -> fc1 -> GELU -> fc2 -> +res (all in VMEM)."""
    x = x + _attention(_ln(x, g1, b1), qkvw, qkvb, pw, pb, bias_ref,
                       num_heads, scale)
    h = _mm(_ln(x, g2, b2), w1) + b1f
    # TODO(synk): torchvision uses exact (erf) GELU; tanh approximation is used
    # so the transcendental stays on the EUP and is guaranteed to lower.
    h = jax.nn.gelu(h, approximate=True)
    return x + _mm(h, w2) + b2f


# ----------------------------------------------------------------------------
# Fused kernels (one pallas_call per Swin block)
# ----------------------------------------------------------------------------

def _embed_block_kernel(p_ref, ew, eb, eg, ebt,
                        g1, b1, qkvw, qkvb, pw, pb,
                        g2, b2, w1, b1f, w2, b2f, bias, o_ref,
                        *, num_heads, scale):
    """patch-embed (matmul + LN) fused with the first Swin block."""
    x = _mm(p_ref[...], ew[...]) + eb[...]
    x = _ln(x, eg[...], ebt[...])
    o_ref[...] = _block_body(
        x, g1[...], b1[...], qkvw[...], qkvb[...], pw[...], pb[...],
        g2[...], b2[...], w1[...], b1f[...], w2[...], b2f[...],
        bias, num_heads, scale)


def _plain_block_kernel(x_ref,
                        g1, b1, qkvw, qkvb, pw, pb,
                        g2, b2, w1, b1f, w2, b2f, bias, o_ref,
                        *, num_heads, scale):
    o_ref[...] = _block_body(
        x_ref[...], g1[...], b1[...], qkvw[...], qkvb[...], pw[...], pb[...],
        g2[...], b2[...], w1[...], b1f[...], w2[...], b2f[...],
        bias, num_heads, scale)


def _merge_block_kernel(xm_ref, mg, mb, mw,
                        g1, b1, qkvw, qkvb, pw, pb,
                        g2, b2, w1, b1f, w2, b2f, bias, o_ref,
                        *, num_heads, scale):
    """patch-merging LN + 4C->2C projection fused with the next Swin block."""
    x = _mm(_ln(xm_ref[...], mg[...], mb[...]), mw[...])
    o_ref[...] = _block_body(
        x, g1[...], b1[...], qkvw[...], qkvb[...], pw[...], pb[...],
        g2[...], b2[...], w1[...], b1f[...], w2[...], b2f[...],
        bias, num_heads, scale)


def _block_tail_kernel(x_ref,
                       g1, b1, qkvw, qkvb, pw, pb,
                       g2, b2, w1, b1f, w2, b2f, bias,
                       pool, fg, fb, hw, hb, o_ref,
                       *, num_heads, scale):
    """last Swin block fused with final LN -> global avg pool -> head."""
    x = _block_body(
        x_ref[...], g1[...], b1[...], qkvw[...], qkvb[...], pw[...], pb[...],
        g2[...], b2[...], w1[...], b1f[...], w2[...], b2f[...],
        bias, num_heads, scale)
    xn = _ln(x, fg[...], fb[...])
    pooled = jnp.dot(pool[...], xn, preferred_element_type=jnp.float32)
    o_ref[...] = _mm(pooled, hw[...]) + hb[...]


def _tail_kernel(x_ref, pool, fg, fb, hw, hb, o_ref):
    """standalone final LN -> pool -> head (fallback for configs where the
    last block kernel already plays another fused role)."""
    xn = _ln(x_ref[...], fg[...], fb[...])
    pooled = jnp.dot(pool[...], xn, preferred_element_type=jnp.float32)
    o_ref[...] = _mm(pooled, hw[...]) + hb[...]


# ----------------------------------------------------------------------------
# pallas_call plumbing
# ----------------------------------------------------------------------------

def _zeros_map(nd):
    return lambda i: (0,) * nd


def _run(kernel, inputs, out_shape):
    """Single-step pallas_call: every operand is one full-array VMEM block."""
    return pl.pallas_call(
        kernel,
        out_shape=jax.ShapeDtypeStruct(out_shape, jnp.float32),
        grid=(1,),
        in_specs=[pl.BlockSpec(tuple(a.shape), _zeros_map(a.ndim))
                  for a in inputs],
        out_specs=pl.BlockSpec(out_shape, _zeros_map(len(out_shape))),
        compiler_params=pltpu.CompilerParams(
            dimension_semantics=("arbitrary",)),
    )(*inputs)


def _block_inputs(blk, dim):
    return (blk["ln1_g"].reshape(1, dim), blk["ln1_b"].reshape(1, dim),
            blk["qkv_w"].astype(jnp.bfloat16), blk["qkv_b"].reshape(1, 3 * dim),
            blk["proj_w"].astype(jnp.bfloat16), blk["proj_b"].reshape(1, dim),
            blk["ln2_g"].reshape(1, dim), blk["ln2_b"].reshape(1, dim),
            blk["fc1_w"].astype(jnp.bfloat16),
            blk["fc1_b"].reshape(1, MLP_RATIO * dim),
            blk["fc2_w"].astype(jnp.bfloat16), blk["fc2_b"].reshape(1, dim))


def _tail_inputs(params, dim, batch, tokens_per_image):
    pool = np.zeros((batch, batch * tokens_per_image), np.float32)
    for b in range(batch):
        pool[b, b * tokens_per_image:(b + 1) * tokens_per_image] = (
            1.0 / tokens_per_image)
    return (jnp.asarray(pool),
            params["final_ln_g"].reshape(1, dim),
            params["final_ln_b"].reshape(1, dim),
            params["head_w"].astype(jnp.bfloat16),
            params["head_b"].reshape(1, NUM_CLASSES))


# ----------------------------------------------------------------------------
# Parameters
# ----------------------------------------------------------------------------

def init_params():
    base = jax.random.PRNGKey(0)
    counter = [0]

    def rnd(shape, scale=0.02):
        counter[0] += 1
        return scale * jax.random.normal(jax.random.fold_in(base, counter[0]),
                                         shape, jnp.float32)

    p = {}
    # TODO(synk): real torchvision Conv2d weights (EMBED, 3, P, P) would need a
    # transpose to this (P*P*C_in, EMBED) matmul layout.
    p["patch_w"] = rnd((PATCH * PATCH * IN_CH, EMBED))
    p["patch_b"] = jnp.zeros((EMBED,), jnp.float32)
    p["patch_ln_g"] = jnp.ones((EMBED,), jnp.float32)
    p["patch_ln_b"] = jnp.zeros((EMBED,), jnp.float32)

    dim = EMBED
    p["stages"] = []
    for si, (depth, nh) in enumerate(zip(DEPTHS, HEADS)):
        blocks = []
        for _ in range(depth):
            blk = {
                "ln1_g": jnp.ones((dim,), jnp.float32),
                "ln1_b": jnp.zeros((dim,), jnp.float32),
                "qkv_w": rnd((dim, 3 * dim)),
                "qkv_b": jnp.zeros((3 * dim,), jnp.float32),
                "proj_w": rnd((dim, dim)),
                "proj_b": jnp.zeros((dim,), jnp.float32),
                "rel_bias": rnd(((2 * WINDOW - 1) ** 2, nh)),
                "ln2_g": jnp.ones((dim,), jnp.float32),
                "ln2_b": jnp.zeros((dim,), jnp.float32),
                "fc1_w": rnd((dim, MLP_RATIO * dim)),
                "fc1_b": jnp.zeros((MLP_RATIO * dim,), jnp.float32),
                "fc2_w": rnd((MLP_RATIO * dim, dim)),
                "fc2_b": jnp.zeros((dim,), jnp.float32),
            }
            blocks.append(blk)
        stage = {"blocks": blocks}
        if si < len(DEPTHS) - 1:   # patch merging after all but last stage
            stage["merge_ln_g"] = jnp.ones((4 * dim,), jnp.float32)
            stage["merge_ln_b"] = jnp.zeros((4 * dim,), jnp.float32)
            stage["merge_w"] = rnd((4 * dim, 2 * dim))
            dim = 2 * dim
        p["stages"].append(stage)

    p["final_ln_g"] = jnp.ones((dim,), jnp.float32)
    p["final_ln_b"] = jnp.zeros((dim,), jnp.float32)
    p["head_w"] = rnd((dim, NUM_CLASSES))
    p["head_b"] = jnp.zeros((NUM_CLASSES,), jnp.float32)
    return p


# ----------------------------------------------------------------------------
# Forward pass
# ----------------------------------------------------------------------------

def swin_forward(x_nchw, params):
    """x_nchw: (B, 3, 32, 32) float32. Returns {'swin': (B, NUM_CLASSES)}."""
    B = x_nchw.shape[0]
    Hs = Ws = IMG // PATCH

    # Patch extraction (single cheap XLA permute); the embed matmul + LN is
    # fused into the first block's kernel.
    x = jnp.transpose(x_nchw, (0, 2, 3, 1))
    tokens = (x.reshape(B, Hs, PATCH, Ws, PATCH, IN_CH)
                .transpose(0, 1, 3, 2, 4, 5)
                .reshape(B * Hs * Ws, PATCH * PATCH * IN_CH))

    embed_in = (params["patch_w"].astype(jnp.bfloat16),
                params["patch_b"].reshape(1, EMBED),
                params["patch_ln_g"].reshape(1, EMBED),
                params["patch_ln_b"].reshape(1, EMBED))

    dim = EMBED
    n_stages = len(params["stages"])
    merge_in = None
    logits = None

    for si, stage in enumerate(params["stages"]):
        nh = HEADS[si]
        scale = (dim // nh) ** -0.5
        nblocks = len(stage["blocks"])
        for bi, blk in enumerate(stage["blocks"]):
            shift = 0 if bi % 2 == 0 else WINDOW // 2
            if WINDOW >= Hs and WINDOW >= Ws:   # window covers the whole map
                shift = 0
            bias = _build_attn_bias(blk["rel_bias"], nh, B, Hs, Ws, WINDOW,
                                    shift)
            bp = _block_inputs(blk, dim)
            M = B * Hs * Ws
            is_last = (si == n_stages - 1 and bi == nblocks - 1)

            if si == 0 and bi == 0:                        # embed + block
                tokens = _run(
                    functools.partial(_embed_block_kernel,
                                      num_heads=nh, scale=scale),
                    (tokens,) + embed_in + bp + (bias,), (M, dim))
            elif bi == 0 and merge_in is not None:         # merge + block
                tokens = _run(
                    functools.partial(_merge_block_kernel,
                                      num_heads=nh, scale=scale),
                    (tokens,) + merge_in + bp + (bias,), (M, dim))
                merge_in = None
            elif is_last:                                  # block + LN/pool/head
                logits = _run(
                    functools.partial(_block_tail_kernel,
                                      num_heads=nh, scale=scale),
                    (tokens,) + bp + (bias,)
                    + _tail_inputs(params, dim, B, Hs * Ws),
                    (B, NUM_CLASSES))
            else:                                          # plain block
                tokens = _run(
                    functools.partial(_plain_block_kernel,
                                      num_heads=nh, scale=scale),
                    (tokens,) + bp + (bias,), (M, dim))

        if si < n_stages - 1:
            # Patch merging: the 2x2 spatial gather stays in XLA (one tiny
            # slice/concat fusion of a 16 KB tensor); its LayerNorm + 4C->2C
            # projection are fused into the next stage's first block kernel.
            xg = tokens.reshape(B, Hs, Ws, dim)
            xm = jnp.concatenate(
                [xg[:, 0::2, 0::2, :], xg[:, 1::2, 0::2, :],
                 xg[:, 0::2, 1::2, :], xg[:, 1::2, 1::2, :]], axis=-1)
            Hs, Ws = Hs // 2, Ws // 2
            tokens = xm.reshape(B * Hs * Ws, 4 * dim)
            merge_in = (stage["merge_ln_g"].reshape(1, 4 * dim),
                        stage["merge_ln_b"].reshape(1, 4 * dim),
                        stage["merge_w"].astype(jnp.bfloat16))
            dim = 2 * dim

    if logits is None:   # tail could not be fused into the last block kernel
        logits = _run(_tail_kernel,
                      (tokens,) + _tail_inputs(params, dim, B, Hs * Ws),
                      (B, NUM_CLASSES))
    return {"swin": logits}


# ----------------------------------------------------------------------------
# Main
# ----------------------------------------------------------------------------

if __name__ == "__main__":
    key = jax.random.PRNGKey(0)
    x = jax.random.normal(key, (2, IN_CH, IMG, IMG), jnp.float32)

    params = init_params()
    out = jax.jit(swin_forward)(x, params)
    feats = jax.block_until_ready(out["swin"])
    assert feats.shape == (2, NUM_CLASSES)
    assert bool(jnp.all(jnp.isfinite(feats)))
    print("KERNEL_OK")
</pallas_src>

<mosaic_0001>
module attributes {stable_mosaic.version = 11 : i64} {
  func.func @_plain_block_kernel(%arg0: i32, %arg1: memref<128x32xf32, #tpu.memory_space<vmem>>, %arg2: memref<1x32xf32, #tpu.memory_space<vmem>>, %arg3: memref<1x32xf32, #tpu.memory_space<vmem>>, %arg4: memref<32x96xbf16, #tpu.memory_space<vmem>>, %arg5: memref<1x96xf32, #tpu.memory_space<vmem>>, %arg6: memref<32x32xbf16, #tpu.memory_space<vmem>>, %arg7: memref<1x32xf32, #tpu.memory_space<vmem>>, %arg8: memref<1x32xf32, #tpu.memory_space<vmem>>, %arg9: memref<1x32xf32, #tpu.memory_space<vmem>>, %arg10: memref<32x128xbf16, #tpu.memory_space<vmem>>, %arg11: memref<1x128xf32, #tpu.memory_space<vmem>>, %arg12: memref<128x32xbf16, #tpu.memory_space<vmem>>, %arg13: memref<1x32xf32, #tpu.memory_space<vmem>>, %arg14: memref<2x128x128xf32, #tpu.memory_space<vmem>>, %arg15: memref<128x32xf32, #tpu.memory_space<vmem>>) attributes {dimension_semantics = [#tpu.dimension_semantics<arbitrary>], iteration_bounds = array<i64: 1>, scalar_prefetch = 0 : i64, scratch_operands = 0 : i64, tpu.core_type = #tpu.core_type<tc>, window_params = [{pipeline_mode = #tpu.pipeline_mode<synchronous>, transform_indices = @transform_0, window_bounds = array<i64: 128, 32>}, {pipeline_mode = #tpu.pipeline_mode<synchronous>, transform_indices = @transform_1, window_bounds = array<i64: 1, 32>}, {pipeline_mode = #tpu.pipeline_mode<synchronous>, transform_indices = @transform_2, window_bounds = array<i64: 1, 32>}, {pipeline_mode = #tpu.pipeline_mode<synchronous>, transform_indices = @transform_3, window_bounds = array<i64: 32, 96>}, {pipeline_mode = #tpu.pipeline_mode<synchronous>, transform_indices = @transform_4, window_bounds = array<i64: 1, 96>}, {pipeline_mode = #tpu.pipeline_mode<synchronous>, transform_indices = @transform_5, window_bounds = array<i64: 32, 32>}, {pipeline_mode = #tpu.pipeline_mode<synchronous>, transform_indices = @transform_6, window_bounds = array<i64: 1, 32>}, {pipeline_mode = #tpu.pipeline_mode<synchronous>, transform_indices = @transform_7, window_bounds = array<i64: 1, 32>}, {pipeline_mode = #tpu.pipeline_mode<synchronous>, transform_indices = @transform_8, window_bounds = array<i64: 1, 32>}, {pipeline_mode = #tpu.pipeline_mode<synchronous>, transform_indices = @transform_9, window_bounds = array<i64: 32, 128>}, {pipeline_mode = #tpu.pipeline_mode<synchronous>, transform_indices = @transform_10, window_bounds = array<i64: 1, 128>}, {pipeline_mode = #tpu.pipeline_mode<synchronous>, transform_indices = @transform_11, window_bounds = array<i64: 128, 32>}, {pipeline_mode = #tpu.pipeline_mode<synchronous>, transform_indices = @transform_12, window_bounds = array<i64: 1, 32>}, {pipeline_mode = #tpu.pipeline_mode<synchronous>, transform_indices = @transform_13, window_bounds = array<i64: 2, 128, 128>}, {pipeline_mode = #tpu.pipeline_mode<synchronous>, transform_indices = @transform_14, window_bounds = array<i64: 128, 32>}]} {
    %c0 = arith.constant 0 : index
    %c0_0 = arith.constant 0 : index
    %0 = vector.load %arg1[%c0, %c0_0] : memref<128x32xf32, #tpu.memory_space<vmem>>, vector<128x32xf32>
    %c0_1 = arith.constant 0 : index
    %c0_2 = arith.constant 0 : index
    %1 = vector.load %arg2[%c0_1, %c0_2] : memref<1x32xf32, #tpu.memory_space<vmem>>, vector<1x32xf32>
    %c0_3 = arith.constant 0 : index
    %c0_4 = arith.constant 0 : index
    %2 = vector.load %arg3[%c0_3, %c0_4] : memref<1x32xf32, #tpu.memory_space<vmem>>, vector<1x32xf32>
    %c0_5 = arith.constant 0 : index
    %c0_6 = arith.constant 0 : index
    %3 = vector.load %arg4[%c0_5, %c0_6] : memref<32x96xbf16, #tpu.memory_space<vmem>>, vector<32x96xbf16>
    %c0_7 = arith.constant 0 : index
    %c0_8 = arith.constant 0 : index
    %4 = vector.load %arg5[%c0_7, %c0_8] : memref<1x96xf32, #tpu.memory_space<vmem>>, vector<1x96xf32>
    %c0_9 = arith.constant 0 : index
    %c0_10 = arith.constant 0 : index
    %5 = vector.load %arg6[%c0_9, %c0_10] : memref<32x32xbf16, #tpu.memory_space<vmem>>, vector<32x32xbf16>
    %c0_11 = arith.constant 0 : index
    %c0_12 = arith.constant 0 : index
    %6 = vector.load %arg7[%c0_11, %c0_12] : memref<1x32xf32, #tpu.memory_space<vmem>>, vector<1x32xf32>
    %c0_13 = arith.constant 0 : index
    %c0_14 = arith.constant 0 : index
    %7 = vector.load %arg8[%c0_13, %c0_14] : memref<1x32xf32, #tpu.memory_space<vmem>>, vector<1x32xf32>
    %c0_15 = arith.constant 0 : index
    %c0_16 = arith.constant 0 : index
    %8 = vector.load %arg9[%c0_15, %c0_16] : memref<1x32xf32, #tpu.memory_space<vmem>>, vector<1x32xf32>
    %c0_17 = arith.constant 0 : index
    %c0_18 = arith.constant 0 : index
    %9 = vector.load %arg10[%c0_17, %c0_18] : memref<32x128xbf16, #tpu.memory_space<vmem>>, vector<32x128xbf16>
    %c0_19 = arith.constant 0 : index
    %c0_20 = arith.constant 0 : index
    %10 = vector.load %arg11[%c0_19, %c0_20] : memref<1x128xf32, #tpu.memory_space<vmem>>, vector<1x128xf32>
    %c0_21 = arith.constant 0 : index
    %c0_22 = arith.constant 0 : index
    %11 = vector.load %arg12[%c0_21, %c0_22] : memref<128x32xbf16, #tpu.memory_space<vmem>>, vector<128x32xbf16>
    %c0_23 = arith.constant 0 : index
    %c0_24 = arith.constant 0 : index
    %12 = vector.load %arg13[%c0_23, %c0_24] : memref<1x32xf32, #tpu.memory_space<vmem>>, vector<1x32xf32>
    %cst = arith.constant dense<0.000000e+00> : vector<128xf32>
    %13 = vector.multi_reduction <add>, %0, %cst [1] : vector<128x32xf32> to vector<128xf32>
    %14 = vector.shape_cast %13 : vector<128xf32> to vector<128x1xf32>
    %cst_25 = arith.constant 3.200000e+01 : f32
    %15 = vector.broadcast %cst_25 : f32 to vector<128x1xf32>
    %16 = arith.divf %14, %15 : vector<128x1xf32>
    %17 = vector.broadcast %16 : vector<128x1xf32> to vector<128x32xf32>
    %18 = arith.subf %0, %17 : vector<128x32xf32>
    %19 = arith.mulf %18, %18 : vector<128x32xf32>
    %cst_26 = arith.constant dense<0.000000e+00> : vector<128xf32>
    %20 = vector.multi_reduction <add>, %19, %cst_26 [1] : vector<128x32xf32> to vector<128xf32>
    %21 = vector.shape_cast %20 : vector<128xf32> to vector<128x1xf32>
    %cst_27 = arith.constant 3.200000e+01 : f32
    %22 = vector.broadcast %cst_27 : f32 to vector<128x1xf32>
    %23 = arith.divf %21, %22 : vector<128x1xf32>
    %24 = vector.broadcast %16 : vector<128x1xf32> to vector<128x32xf32>
    %25 = arith.subf %0, %24 : vector<128x32xf32>
    %cst_28 = arith.constant 9.99999974E-6 : f32
    %26 = vector.broadcast %cst_28 : f32 to vector<128x1xf32>
    %27 = arith.addf %23, %26 : vector<128x1xf32>
    %28 = math.rsqrt %27 : vector<128x1xf32>
    %29 = vector.broadcast %28 : vector<128x1xf32> to vector<128x32xf32>
    %30 = arith.mulf %25, %29 : vector<128x32xf32>
    %31 = vector.broadcast %1 : vector<1x32xf32> to vector<128x32xf32>
    %32 = arith.mulf %30, %31 : vector<128x32xf32>
    %33 = vector.broadcast %2 : vector<1x32xf32> to vector<128x32xf32>
    %34 = arith.addf %32, %33 : vector<128x32xf32>
    %35 = arith.truncf %34 : vector<128x32xf32> to vector<128x32xbf16>
    %cst_29 = arith.constant dense<0.000000e+00> : vector<128x96xf32>
    %36 = tpu.matmul %35, %3, %cst_29 {dimension_numbers = #tpu.dot_dimension_numbers<[1], [0], [0], [1], [0, 0, 1, 1], [], []>} : vector<128x32xbf16>, vector<32x96xbf16>, vector<128x96xf32> -> vector<128x96xf32>
    %37 = vector.broadcast %4 : vector<1x96xf32> to vector<128x96xf32>
    %38 = arith.addf %36, %37 : vector<128x96xf32>
    %39 = vector.extract_strided_slice %38 {offsets = [0, 0], sizes = [128, 16], strides = [1, 1]} : vector<128x96xf32> to vector<128x16xf32>
    %40 = vector.extract_strided_slice %38 {offsets = [0, 32], sizes = [128, 16], strides = [1, 1]} : vector<128x96xf32> to vector<128x16xf32>
    %41 = vector.extract_strided_slice %38 {offsets = [0, 64], sizes = [128, 16], strides = [1, 1]} : vector<128x96xf32> to vector<128x16xf32>
    %42 = arith.truncf %39 : vector<128x16xf32> to vector<128x16xbf16>
    %43 = arith.truncf %40 : vector<128x16xf32> to vector<128x16xbf16>
    %cst_30 = arith.constant dense<0.000000e+00> : vector<128x128xf32>
    %44 = tpu.matmul %42, %43, %cst_30 {dimension_numbers = #tpu.dot_dimension_numbers<[1], [1], [0], [0], [0, 0, 1, 0], [], []>} : vector<128x16xbf16>, vector<128x16xbf16>, vector<128x128xf32> -> vector<128x128xf32>
    %cst_31 = arith.constant 2.500000e-01 : f32
    %45 = vector.broadcast %cst_31 : f32 to vector<128x128xf32>
    %46 = arith.mulf %44, %45 : vector<128x128xf32>
    %c0_32 = arith.constant 0 : index
    %c0_33 = arith.constant 0 : index
    %c0_34 = arith.constant 0 : index
    %47 = vector.load %arg14[%c0_32, %c0_33, %c0_34] : memref<2x128x128xf32, #tpu.memory_space<vmem>>, vector<1x128x128xf32>
    %48 = vector.shape_cast %47 : vector<1x128x128xf32> to vector<128x128xf32>
    %49 = arith.addf %46, %48 : vector<128x128xf32>
    %cst_35 = arith.constant dense<0xFF800000> : vector<128xf32>
    %50 = vector.multi_reduction <maximumf>, %49, %cst_35 [1] : vector<128x128xf32> to vector<128xf32>
    %51 = vector.shape_cast %50 : vector<128xf32> to vector<128x1xf32>
    %52 = vector.broadcast %51 : vector<128x1xf32> to vector<128x128xf32>
    %53 = arith.subf %49, %52 : vector<128x128xf32>
    %54 = math.exp %53 : vector<128x128xf32>
    %cst_36 = arith.constant dense<0.000000e+00> : vector<128xf32>
    %55 = vector.multi_reduction <add>, %54, %cst_36 [1] : vector<128x128xf32> to vector<128xf32>
    %56 = vector.shape_cast %55 : vector<128xf32> to vector<128x1xf32>
    %57 = tpu.reciprocal %56 {approx = true} : vector<128x1xf32> -> vector<128x1xf32>
    %58 = vector.broadcast %57 : vector<128x1xf32> to vector<128x128xf32>
    %59 = arith.mulf %54, %58 : vector<128x128xf32>
    %60 = arith.truncf %59 : vector<128x128xf32> to vector<128x128xbf16>
    %61 = arith.truncf %41 : vector<128x16xf32> to vector<128x16xbf16>
    %cst_37 = arith.constant dense<0.000000e+00> : vector<128x16xf32>
    %62 = tpu.matmul %60, %61, %cst_37 {dimension_numbers = #tpu.dot_dimension_numbers<[1], [0], [0], [1], [0, 0, 1, 1], [], []>} : vector<128x128xbf16>, vector<128x16xbf16>, vector<128x16xf32> -> vector<128x16xf32>
    %63 = vector.extract_strided_slice %38 {offsets = [0, 16], sizes = [128, 16], strides = [1, 1]} : vector<128x96xf32> to vector<128x16xf32>
    %64 = vector.extract_strided_slice %38 {offsets = [0, 48], sizes = [128, 16], strides = [1, 1]} : vector<128x96xf32> to vector<128x16xf32>
    %65 = vector.extract_strided_slice %38 {offsets = [0, 80], sizes = [128, 16], strides = [1, 1]} : vector<128x96xf32> to vector<128x16xf32>
    %66 = arith.truncf %63 : vector<128x16xf32> to vector<128x16xbf16>
    %67 = arith.truncf %64 : vector<128x16xf32> to vector<128x16xbf16>
    %cst_38 = arith.constant dense<0.000000e+00> : vector<128x128xf32>
    %68 = tpu.matmul %66, %67, %cst_38 {dimension_numbers = #tpu.dot_dimension_numbers<[1], [1], [0], [0], [0, 0, 1, 0], [], []>} : vector<128x16xbf16>, vector<128x16xbf16>, vector<128x128xf32> -> vector<128x128xf32>
    %cst_39 = arith.constant 2.500000e-01 : f32
    %69 = vector.broadcast %cst_39 : f32 to vector<128x128xf32>
    %70 = arith.mulf %68, %69 : vector<128x128xf32>
    %c1 = arith.constant 1 : index
    %c0_40 = arith.constant 0 : index
    %c0_41 = arith.constant 0 : index
    %71 = vector.load %arg14[%c1, %c0_40, %c0_41] : memref<2x128x128xf32, #tpu.memory_space<vmem>>, vector<1x128x128xf32>
    %72 = vector.shape_cast %71 : vector<1x128x128xf32> to vector<128x128xf32>
    %73 = arith.addf %70, %72 : vector<128x128xf32>
    %cst_42 = arith.constant dense<0xFF800000> : vector<128xf32>
    %74 = vector.multi_reduction <maximumf>, %73, %cst_42 [1] : vector<128x128xf32> to vector<128xf32>
    %75 = vector.shape_cast %74 : vector<128xf32> to vector<128x1xf32>
    %76 = vector.broadcast %75 : vector<128x1xf32> to vector<128x128xf32>
    %77 = arith.subf %73, %76 : vector<128x128xf32>
    %78 = math.exp %77 : vector<128x128xf32>
    %cst_43 = arith.constant dense<0.000000e+00> : vector<128xf32>
    %79 = vector.multi_reduction <add>, %78, %cst_43 [1] : vector<128x128xf32> to vector<128xf32>
    %80 = vector.shape_cast %79 : vector<128xf32> to vector<128x1xf32>
    %81 = tpu.reciprocal %80 {approx = true} : vector<128x1xf32> -> vector<128x1xf32>
    %82 = vector.broadcast %81 : vector<128x1xf32> to vector<128x128xf32>
    %83 = arith.mulf %78, %82 : vector<128x128xf32>
    %84 = arith.truncf %83 : vector<128x128xf32> to vector<128x128xbf16>
    %85 = arith.truncf %65 : vector<128x16xf32> to vector<128x16xbf16>
    %cst_44 = arith.constant dense<0.000000e+00> : vector<128x16xf32>
    %86 = tpu.matmul %84, %85, %cst_44 {dimension_numbers = #tpu.dot_dimension_numbers<[1], [0], [0], [1], [0, 0, 1, 1], [], []>} : vector<128x128xbf16>, vector<128x16xbf16>, vector<128x16xf32> -> vector<128x16xf32>
    %87 = tpu.concatenate %62, %86 in 1 : vector<128x16xf32>, vector<128x16xf32> -> vector<128x32xf32>
    %88 = arith.truncf %87 : vector<128x32xf32> to vector<128x32xbf16>
    %cst_45 = arith.constant dense<0.000000e+00> : vector<128x32xf32>
    %89 = tpu.matmul %88, %5, %cst_45 {dimension_numbers = #tpu.dot_dimension_numbers<[1], [0], [0], [1], [0, 0, 1, 1], [], []>} : vector<128x32xbf16>, vector<32x32xbf16>, vector<128x32xf32> -> vector<128x32xf32>
    %90 = vector.broadcast %6 : vector<1x32xf32> to vector<128x32xf32>
    %91 = arith.addf %89, %90 : vector<128x32xf32>
    %92 = arith.addf %0, %91 : vector<128x32xf32>
    %cst_46 = arith.constant dense<0.000000e+00> : vector<128xf32>
    %93 = vector.multi_reduction <add>, %92, %cst_46 [1] : vector<128x32xf32> to vector<128xf32>
    %94 = vector.shape_cast %93 : vector<128xf32> to vector<128x1xf32>
    %cst_47 = arith.constant 3.200000e+01 : f32
    %95 = vector.broadcast %cst_47 : f32 to vector<128x1xf32>
    %96 = arith.divf %94, %95 : vector<128x1xf32>
    %97 = vector.broadcast %96 : vector<128x1xf32> to vector<128x32xf32>
    %98 = arith.subf %92, %97 : vector<128x32xf32>
    %99 = arith.mulf %98, %98 : vector<128x32xf32>
    %cst_48 = arith.constant dense<0.000000e+00> : vector<128xf32>
    %100 = vector.multi_reduction <add>, %99, %cst_48 [1] : vector<128x32xf32> to vector<128xf32>
    %101 = vector.shape_cast %100 : vector<128xf32> to vector<128x1xf32>
    %cst_49 = arith.constant 3.200000e+01 : f32
    %102 = vector.broadcast %cst_49 : f32 to vector<128x1xf32>
    %103 = arith.divf %101, %102 : vector<128x1xf32>
    %104 = vector.broadcast %96 : vector<128x1xf32> to vector<128x32xf32>
    %105 = arith.subf %92, %104 : vector<128x32xf32>
    %cst_50 = arith.constant 9.99999974E-6 : f32
    %106 = vector.broadcast %cst_50 : f32 to vector<128x1xf32>
    %107 = arith.addf %103, %106 : vector<128x1xf32>
    %108 = math.rsqrt %107 : vector<128x1xf32>
    %109 = vector.broadcast %108 : vector<128x1xf32> to vector<128x32xf32>
    %110 = arith.mulf %105, %109 : vector<128x32xf32>
    %111 = vector.broadcast %7 : vector<1x32xf32> to vector<128x32xf32>
    %112 = arith.mulf %110, %111 : vector<128x32xf32>
    %113 = vector.broadcast %8 : vector<1x32xf32> to vector<128x32xf32>
    %114 = arith.addf %112, %113 : vector<128x32xf32>
    %115 = arith.truncf %114 : vector<128x32xf32> to vector<128x32xbf16>
    %cst_51 = arith.constant dense<0.000000e+00> : vector<128x128xf32>
    %116 = tpu.matmul %115, %9, %cst_51 {dimension_numbers = #tpu.dot_dimension_numbers<[1], [0], [0], [1], [0, 0, 1, 1], [], []>} : vector<128x32xbf16>, vector<32x128xbf16>, vector<128x128xf32> -> vector<128x128xf32>
    %117 = vector.broadcast %10 : vector<1x128xf32> to vector<128x128xf32>
    %118 = arith.addf %116, %117 : vector<128x128xf32>
    %119 = arith.mulf %118, %118 : vector<128x128xf32>
    %120 = arith.mulf %118, %119 : vector<128x128xf32>
    %cst_52 = arith.constant 4.471500e-02 : f32
    %121 = vector.broadcast %cst_52 : f32 to vector<128x128xf32>
    %122 = arith.mulf %121, %120 : vector<128x128xf32>
    %123 = arith.addf %118, %122 : vector<128x128xf32>
    %cst_53 = arith.constant 0.797884583 : f32
    %124 = vector.broadcast %cst_53 : f32 to vector<128x128xf32>
    %125 = arith.mulf %124, %123 : vector<128x128xf32>
    %126 = math.tanh %125 : vector<128x128xf32>
    %cst_54 = arith.constant 1.000000e+00 : f32
    %127 = vector.broadcast %cst_54 : f32 to vector<128x128xf32>
    %128 = arith.addf %127, %126 : vector<128x128xf32>
    %cst_55 = arith.constant 5.000000e-01 : f32
    %129 = vector.broadcast %cst_55 : f32 to vector<128x128xf32>
    %130 = arith.mulf %129, %128 : vector<128x128xf32>
    %131 = arith.mulf %118, %130 : vector<128x128xf32>
    %132 = arith.truncf %131 : vector<128x128xf32> to vector<128x128xbf16>
    %cst_56 = arith.constant dense<0.000000e+00> : vector<128x32xf32>
    %133 = tpu.matmul %132, %11, %cst_56 {dimension_numbers = #tpu.dot_dimension_numbers<[1], [0], [0], [1], [0, 0, 1, 1], [], []>} : vector<128x128xbf16>, vector<128x32xbf16>, vector<128x32xf32> -> vector<128x32xf32>
    %134 = arith.addf %92, %133 : vector<128x32xf32>
    %135 = vector.broadcast %12 : vector<1x32xf32> to vector<128x32xf32>
    %136 = arith.addf %134, %135 : vector<128x32xf32>
    %c0_57 = arith.constant 0 : index
    %c0_58 = arith.constant 0 : index
    %137 = vector.load %arg15[%c0_57, %c0_58] : memref<128x32xf32, #tpu.memory_space<vmem>>, vector<128x32xf32>
    tpu.vector_store %arg15[%c0_57, %c0_58], %136 {strides = array<i32>} : memref<128x32xf32, #tpu.memory_space<vmem>>, vector<128x32xf32>,
    return
  }
  func.func @transform_0(%arg0: i32) -> (i32, i32) {
    %c0_i32 = arith.constant 0 : i32
    %c0_i32_0 = arith.constant 0 : i32
    %c0_i32_1 = arith.constant 0 : i32
    return %c0_i32, %c0_i32_0 : i32, i32
  }
  func.func @transform_1(%arg0: i32) -> (i32, i32) {
    %c0_i32 = arith.constant 0 : i32
    %c0_i32_0 = arith.constant 0 : i32
    %c0_i32_1 = arith.constant 0 : i32
    return %c0_i32, %c0_i32_0 : i32, i32
  }
  func.func @transform_2(%arg0: i32) -> (i32, i32) {
    %c0_i32 = arith.constant 0 : i32
    %c0_i32_0 = arith.constant 0 : i32
    %c0_i32_1 = arith.constant 0 : i32
    return %c0_i32, %c0_i32_0 : i32, i32
  }
  func.func @transform_3(%arg0: i32) -> (i32, i32) {
    %c0_i32 = arith.constant 0 : i32
    %c0_i32_0 = arith.constant 0 : i32
    %c0_i32_1 = arith.constant 0 : i32
    return %c0_i32, %c0_i32_0 : i32, i32
  }
  func.func @transform_4(%arg0: i32) -> (i32, i32) {
    %c0_i32 = arith.constant 0 : i32
    %c0_i32_0 = arith.constant 0 : i32
    %c0_i32_1 = arith.constant 0 : i32
    return %c0_i32, %c0_i32_0 : i32, i32
  }
  func.func @transform_5(%arg0: i32) -> (i32, i32) {
    %c0_i32 = arith.constant 0 : i32
    %c0_i32_0 = arith.constant 0 : i32
    %c0_i32_1 = arith.constant 0 : i32
    return %c0_i32, %c0_i32_0 : i32, i32
  }
  func.func @transform_6(%arg0: i32) -> (i32, i32) {
    %c0_i32 = arith.constant 0 : i32
    %c0_i32_0 = arith.constant 0 : i32
    %c0_i32_1 = arith.constant 0 : i32
    return %c0_i32, %c0_i32_0 : i32, i32
  }
  func.func @transform_7(%arg0: i32) -> (i32, i32) {
    %c0_i32 = arith.constant 0 : i32
    %c0_i32_0 = arith.constant 0 : i32
    %c0_i32_1 = arith.constant 0 : i32
    return %c0_i32, %c0_i32_0 : i32, i32
  }
  func.func @transform_8(%arg0: i32) -> (i32, i32) {
    %c0_i32 = arith.constant 0 : i32
    %c0_i32_0 = arith.constant 0 : i32
    %c0_i32_1 = arith.constant 0 : i32
    return %c0_i32, %c0_i32_0 : i32, i32
  }
  func.func @transform_9(%arg0: i32) -> (i32, i32) {
    %c0_i32 = arith.constant 0 : i32
    %c0_i32_0 = arith.constant 0 : i32
    %c0_i32_1 = arith.constant 0 : i32
    return %c0_i32, %c0_i32_0 : i32, i32
  }
  func.func @transform_10(%arg0: i32) -> (i32, i32) {
    %c0_i32 = arith.constant 0 : i32
    %c0_i32_0 = arith.constant 0 : i32
    %c0_i32_1 = arith.constant 0 : i32
    return %c0_i32, %c0_i32_0 : i32, i32
  }
  func.func @transform_11(%arg0: i32) -> (i32, i32) {
    %c0_i32 = arith.constant 0 : i32
    %c0_i32_0 = arith.constant 0 : i32
    %c0_i32_1 = arith.constant 0 : i32
    return %c0_i32, %c0_i32_0 : i32, i32
  }
  func.func @transform_12(%arg0: i32) -> (i32, i32) {
    %c0_i32 = arith.constant 0 : i32
    %c0_i32_0 = arith.constant 0 : i32
    %c0_i32_1 = arith.constant 0 : i32
    return %c0_i32, %c0_i32_0 : i32, i32
  }
  func.func @transform_13(%arg0: i32) -> (i32, i32, i32) {
    %c0_i32 = arith.constant 0 : i32
    %c0_i32_0 = arith.constant 0 : i32
    %c0_i32_1 = arith.constant 0 : i32
    %c0_i32_2 = arith.constant 0 : i32
    return %c0_i32, %c0_i32_0, %c0_i32_1 : i32, i32, i32
  }
  func.func @transform_14(%arg0: i32) -> (i32, i32) {
    %c0_i32 = arith.constant 0 : i32
    %c0_i32_0 = arith.constant 0 : i32
    %c0_i32_1 = arith.constant 0 : i32
    return %c0_i32, %c0_i32_0 : i32, i32
  }
}

module attributes {stable_mosaic.version = 11 : i64} {
  func.func @_embed_block_kernel(%arg0: i32, %arg1: memref<128x48xf32, #tpu.memory_space<vmem>>, %arg2: memref<48x32xbf16, #tpu.memory_space<vmem>>, %arg3: memref<1x32xf32, #tpu.memory_space<vmem>>, %arg4: memref<1x32xf32, #tpu.memory_space<vmem>>, %arg5: memref<1x32xf32, #tpu.memory_space<vmem>>, %arg6: memref<1x32xf32, #tpu.memory_space<vmem>>, %arg7: memref<1x32xf32, #tpu.memory_space<vmem>>, %arg8: memref<32x96xbf16, #tpu.memory_space<vmem>>, %arg9: memref<1x96xf32, #tpu.memory_space<vmem>>, %arg10: memref<32x32xbf16, #tpu.memory_space<vmem>>, %arg11: memref<1x32xf32, #tpu.memory_space<vmem>>, %arg12: memref<1x32xf32, #tpu.memory_space<vmem>>, %arg13: memref<1x32xf32, #tpu.memory_space<vmem>>, %arg14: memref<32x128xbf16, #tpu.memory_space<vmem>>, %arg15: memref<1x128xf32, #tpu.memory_space<vmem>>, %arg16: memref<128x32xbf16, #tpu.memory_space<vmem>>, %arg17: memref<1x32xf32, #tpu.memory_space<vmem>>, %arg18: memref<2x128x128xf32, #tpu.memory_space<vmem>>, %arg19: memref<128x32xf32, #tpu.memory_space<vmem>>) attributes {dimension_semantics = [#tpu.dimension_semantics<arbitrary>], iteration_bounds = array<i64: 1>, scalar_prefetch = 0 : i64, scratch_operands = 0 : i64, tpu.core_type = #tpu.core_type<tc>, window_params = [{pipeline_mode = #tpu.pipeline_mode<synchronous>, transform_indices = @transform_0, window_bounds = array<i64: 128, 48>}, {pipeline_mode = #tpu.pipeline_mode<synchronous>, transform_indices = @transform_1, window_bounds = array<i64: 48, 32>}, {pipeline_mode = #tpu.pipeline_mode<synchronous>, transform_indices = @transform_2, window_bounds = array<i64: 1, 32>}, {pipeline_mode = #tpu.pipeline_mode<synchronous>, transform_indices = @transform_3, window_bounds = array<i64: 1, 32>}, {pipeline_mode = #tpu.pipeline_mode<synchronous>, transform_indices = @transform_4, window_bounds = array<i64: 1, 32>}, {pipeline_mode = #tpu.pipeline_mode<synchronous>, transform_indices = @transform_5, window_bounds = array<i64: 1, 32>}, {pipeline_mode = #tpu.pipeline_mode<synchronous>, transform_indices = @transform_6, window_bounds = array<i64: 1, 32>}, {pipeline_mode = #tpu.pipeline_mode<synchronous>, transform_indices = @transform_7, window_bounds = array<i64: 32, 96>}, {pipeline_mode = #tpu.pipeline_mode<synchronous>, transform_indices = @transform_8, window_bounds = array<i64: 1, 96>}, {pipeline_mode = #tpu.pipeline_mode<synchronous>, transform_indices = @transform_9, window_bounds = array<i64: 32, 32>}, {pipeline_mode = #tpu.pipeline_mode<synchronous>, transform_indices = @transform_10, window_bounds = array<i64: 1, 32>}, {pipeline_mode = #tpu.pipeline_mode<synchronous>, transform_indices = @transform_11, window_bounds = array<i64: 1, 32>}, {pipeline_mode = #tpu.pipeline_mode<synchronous>, transform_indices = @transform_12, window_bounds = array<i64: 1, 32>}, {pipeline_mode = #tpu.pipeline_mode<synchronous>, transform_indices = @transform_13, window_bounds = array<i64: 32, 128>}, {pipeline_mode = #tpu.pipeline_mode<synchronous>, transform_indices = @transform_14, window_bounds = array<i64: 1, 128>}, {pipeline_mode = #tpu.pipeline_mode<synchronous>, transform_indices = @transform_15, window_bounds = array<i64: 128, 32>}, {pipeline_mode = #tpu.pipeline_mode<synchronous>, transform_indices = @transform_16, window_bounds = array<i64: 1, 32>}, {pipeline_mode = #tpu.pipeline_mode<synchronous>, transform_indices = @transform_17, window_bounds = array<i64: 2, 128, 128>}, {pipeline_mode = #tpu.pipeline_mode<synchronous>, transform_indices = @transform_18, window_bounds = array<i64: 128, 32>}]} {
    %c0 = arith.constant 0 : index
    %c0_0 = arith.constant 0 : index
    %0 = vector.load %arg1[%c0, %c0_0] : memref<128x48xf32, #tpu.memory_space<vmem>>, vector<128x48xf32>
    %c0_1 = arith.constant 0 : index
    %c0_2 = arith.constant 0 : index
    %1 = vector.load %arg2[%c0_1, %c0_2] : memref<48x32xbf16, #tpu.memory_space<vmem>>, vector<48x32xbf16>
    %2 = arith.truncf %0 : vector<128x48xf32> to vector<128x48xbf16>
    %cst = arith.constant dense<0.000000e+00> : vector<128x32xf32>
    %3 = tpu.matmul %2, %1, %cst {dimension_numbers = #tpu.dot_dimension_numbers<[1], [0], [0], [1], [0, 0, 1, 1], [], []>} : vector<128x48xbf16>, vector<48x32xbf16>, vector<128x32xf32> -> vector<128x32xf32>
    %c0_3 = arith.constant 0 : index
    %c0_4 = arith.constant 0 : index
    %4 = vector.load %arg3[%c0_3, %c0_4] : memref<1x32xf32, #tpu.memory_space<vmem>>, vector<1x32xf32>
    %5 = vector.broadcast %4 : vector<1x32xf32> to vector<128x32xf32>
    %6 = arith.addf %3, %5 : vector<128x32xf32>
    %c0_5 = arith.constant 0 : index
    %c0_6 = arith.constant 0 : index
    %7 = vector.load %arg4[%c0_5, %c0_6] : memref<1x32xf32, #tpu.memory_space<vmem>>, vector<1x32xf32>
    %c0_7 = arith.constant 0 : index
    %c0_8 = arith.constant 0 : index
    %8 = vector.load %arg5[%c0_7, %c0_8] : memref<1x32xf32, #tpu.memory_space<vmem>>, vector<1x32xf32>
    %cst_9 = arith.constant dense<0.000000e+00> : vector<128xf32>
    %9 = vector.multi_reduction <add>, %6, %cst_9 [1] : vector<128x32xf32> to vector<128xf32>
    %10 = vector.shape_cast %9 : vector<128xf32> to vector<128x1xf32>
    %cst_10 = arith.constant 3.200000e+01 : f32
    %11 = vector.broadcast %cst_10 : f32 to vector<128x1xf32>
    %12 = arith.divf %10, %11 : vector<128x1xf32>
    %13 = vector.broadcast %12 : vector<128x1xf32> to vector<128x32xf32>
    %14 = arith.subf %6, %13 : vector<128x32xf32>
    %15 = arith.mulf %14, %14 : vector<128x32xf32>
    %cst_11 = arith.constant dense<0.000000e+00> : vector<128xf32>
    %16 = vector.multi_reduction <add>, %15, %cst_11 [1] : vector<128x32xf32> to vector<128xf32>
    %17 = vector.shape_cast %16 : vector<128xf32> to vector<128x1xf32>
    %cst_12 = arith.constant 3.200000e+01 : f32
    %18 = vector.broadcast %cst_12 : f32 to vector<128x1xf32>
    %19 = arith.divf %17, %18 : vector<128x1xf32>
    %20 = vector.broadcast %12 : vector<128x1xf32> to vector<128x32xf32>
    %21 = arith.subf %6, %20 : vector<128x32xf32>
    %cst_13 = arith.constant 9.99999974E-6 : f32
    %22 = vector.broadcast %cst_13 : f32 to vector<128x1xf32>
    %23 = arith.addf %19, %22 : vector<128x1xf32>
    %24 = math.rsqrt %23 : vector<128x1xf32>
    %25 = vector.broadcast %24 : vector<128x1xf32> to vector<128x32xf32>
    %26 = arith.mulf %21, %25 : vector<128x32xf32>
    %27 = vector.broadcast %7 : vector<1x32xf32> to vector<128x32xf32>
    %28 = arith.mulf %26, %27 : vector<128x32xf32>
    %29 = vector.broadcast %8 : vector<1x32xf32> to vector<128x32xf32>
    %30 = arith.addf %28, %29 : vector<128x32xf32>
    %c0_14 = arith.constant 0 : index
    %c0_15 = arith.constant 0 : index
    %31 = vector.load %arg6[%c0_14, %c0_15] : memref<1x32xf32, #tpu.memory_space<vmem>>, vector<1x32xf32>
    %c0_16 = arith.constant 0 : index
    %c0_17 = arith.constant 0 : index
    %32 = vector.load %arg7[%c0_16, %c0_17] : memref<1x32xf32, #tpu.memory_space<vmem>>, vector<1x32xf32>
    %c0_18 = arith.constant 0 : index
    %c0_19 = arith.constant 0 : index
    %33 = vector.load %arg8[%c0_18, %c0_19] : memref<32x96xbf16, #tpu.memory_space<vmem>>, vector<32x96xbf16>
    %c0_20 = arith.constant 0 : index
    %c0_21 = arith.constant 0 : index
    %34 = vector.load %arg9[%c0_20, %c0_21] : memref<1x96xf32, #tpu.memory_space<vmem>>, vector<1x96xf32>
    %c0_22 = arith.constant 0 : index
    %c0_23 = arith.constant 0 : index
    %35 = vector.load %arg10[%c0_22, %c0_23] : memref<32x32xbf16, #tpu.memory_space<vmem>>, vector<32x32xbf16>
    %c0_24 = arith.constant 0 : index
    %c0_25 = arith.constant 0 : index
    %36 = vector.load %arg11[%c0_24, %c0_25] : memref<1x32xf32, #tpu.memory_space<vmem>>, vector<1x32xf32>
    %c0_26 = arith.constant 0 : index
    %c0_27 = arith.constant 0 : index
    %37 = vector.load %arg12[%c0_26, %c0_27] : memref<1x32xf32, #tpu.memory_space<vmem>>, vector<1x32xf32>
    %c0_28 = arith.constant 0 : index
    %c0_29 = arith.constant 0 : index
    %38 = vector.load %arg13[%c0_28, %c0_29] : memref<1x32xf32, #tpu.memory_space<vmem>>, vector<1x32xf32>
    %c0_30 = arith.constant 0 : index
    %c0_31 = arith.constant 0 : index
    %39 = vector.load %arg14[%c0_30, %c0_31] : memref<32x128xbf16, #tpu.memory_space<vmem>>, vector<32x128xbf16>
    %c0_32 = arith.constant 0 : index
    %c0_33 = arith.constant 0 : index
    %40 = vector.load %arg15[%c0_32, %c0_33] : memref<1x128xf32, #tpu.memory_space<vmem>>, vector<1x128xf32>
    %c0_34 = arith.constant 0 : index
    %c0_35 = arith.constant 0 : index
    %41 = vector.load %arg16[%c0_34, %c0_35] : memref<128x32xbf16, #tpu.memory_space<vmem>>, vector<128x32xbf16>
    %c0_36 = arith.constant 0 : index
    %c0_37 = arith.constant 0 : index
    %42 = vector.load %arg17[%c0_36, %c0_37] : memref<1x32xf32, #tpu.memory_space<vmem>>, vector<1x32xf32>
    %cst_38 = arith.constant dense<0.000000e+00> : vector<128xf32>
    %43 = vector.multi_reduction <add>, %30, %cst_38 [1] : vector<128x32xf32> to vector<128xf32>
    %44 = vector.shape_cast %43 : vector<128xf32> to vector<128x1xf32>
    %cst_39 = arith.constant 3.200000e+01 : f32
    %45 = vector.broadcast %cst_39 : f32 to vector<128x1xf32>
    %46 = arith.divf %44, %45 : vector<128x1xf32>
    %47 = vector.broadcast %46 : vector<128x1xf32> to vector<128x32xf32>
    %48 = arith.subf %30, %47 : vector<128x32xf32>
    %49 = arith.mulf %48, %48 : vector<128x32xf32>
    %cst_40 = arith.constant dense<0.000000e+00> : vector<128xf32>
    %50 = vector.multi_reduction <add>, %49, %cst_40 [1] : vector<128x32xf32> to vector<128xf32>
    %51 = vector.shape_cast %50 : vector<128xf32> to vector<128x1xf32>
    %cst_41 = arith.constant 3.200000e+01 : f32
    %52 = vector.broadcast %cst_41 : f32 to vector<128x1xf32>
    %53 = arith.divf %51, %52 : vector<128x1xf32>
    %54 = vector.broadcast %46 : vector<128x1xf32> to vector<128x32xf32>
    %55 = arith.subf %30, %54 : vector<128x32xf32>
    %cst_42 = arith.constant 9.99999974E-6 : f32
    %56 = vector.broadcast %cst_42 : f32 to vector<128x1xf32>
    %57 = arith.addf %53, %56 : vector<128x1xf32>
    %58 = math.rsqrt %57 : vector<128x1xf32>
    %59 = vector.broadcast %58 : vector<128x1xf32> to vector<128x32xf32>
    %60 = arith.mulf %55, %59 : vector<128x32xf32>
    %61 = vector.broadcast %31 : vector<1x32xf32> to vector<128x32xf32>
    %62 = arith.mulf %60, %61 : vector<128x32xf32>
    %63 = vector.broadcast %32 : vector<1x32xf32> to vector<128x32xf32>
    %64 = arith.addf %62, %63 : vector<128x32xf32>
    %65 = arith.truncf %64 : vector<128x32xf32> to vector<128x32xbf16>
    %cst_43 = arith.constant dense<0.000000e+00> : vector<128x96xf32>
    %66 = tpu.matmul %65, %33, %cst_43 {dimension_numbers = #tpu.dot_dimension_numbers<[1], [0], [0], [1], [0, 0, 1, 1], [], []>} : vector<128x32xbf16>, vector<32x96xbf16>, vector<128x96xf32> -> vector<128x96xf32>
    %67 = vector.broadcast %34 : vector<1x96xf32> to vector<128x96xf32>
    %68 = arith.addf %66, %67 : vector<128x96xf32>
    %69 = vector.extract_strided_slice %68 {offsets = [0, 0], sizes = [128, 16], strides = [1, 1]} : vector<128x96xf32> to vector<128x16xf32>
    %70 = vector.extract_strided_slice %68 {offsets = [0, 32], sizes = [128, 16], strides = [1, 1]} : vector<128x96xf32> to vector<128x16xf32>
    %71 = vector.extract_strided_slice %68 {offsets = [0, 64], sizes = [128, 16], strides = [1, 1]} : vector<128x96xf32> to vector<128x16xf32>
    %72 = arith.truncf %69 : vector<128x16xf32> to vector<128x16xbf16>
    %73 = arith.truncf %70 : vector<128x16xf32> to vector<128x16xbf16>
    %cst_44 = arith.constant dense<0.000000e+00> : vector<128x128xf32>
    %74 = tpu.matmul %72, %73, %cst_44 {dimension_numbers = #tpu.dot_dimension_numbers<[1], [1], [0], [0], [0, 0, 1, 0], [], []>} : vector<128x16xbf16>, vector<128x16xbf16>, vector<128x128xf32> -> vector<128x128xf32>
    %cst_45 = arith.constant 2.500000e-01 : f32
    %75 = vector.broadcast %cst_45 : f32 to vector<128x128xf32>
    %76 = arith.mulf %74, %75 : vector<128x128xf32>
    %c0_46 = arith.constant 0 : index
    %c0_47 = arith.constant 0 : index
    %c0_48 = arith.constant 0 : index
    %77 = vector.load %arg18[%c0_46, %c0_47, %c0_48] : memref<2x128x128xf32, #tpu.memory_space<vmem>>, vector<1x128x128xf32>
    %78 = vector.shape_cast %77 : vector<1x128x128xf32> to vector<128x128xf32>
    %79 = arith.addf %76, %78 : vector<128x128xf32>
    %cst_49 = arith.constant dense<0xFF800000> : vector<128xf32>
    %80 = vector.multi_reduction <maximumf>, %79, %cst_49 [1] : vector<128x128xf32> to vector<128xf32>
    %81 = vector.shape_cast %80 : vector<128xf32> to vector<128x1xf32>
    %82 = vector.broadcast %81 : vector<128x1xf32> to vector<128x128xf32>
    %83 = arith.subf %79, %82 : vector<128x128xf32>
    %84 = math.exp %83 : vector<128x128xf32>
    %cst_50 = arith.constant dense<0.000000e+00> : vector<128xf32>
    %85 = vector.multi_reduction <add>, %84, %cst_50 [1] : vector<128x128xf32> to vector<128xf32>
    %86 = vector.shape_cast %85 : vector<128xf32> to vector<128x1xf32>
    %87 = tpu.reciprocal %86 {approx = true} : vector<128x1xf32> -> vector<128x1xf32>
    %88 = vector.broadcast %87 : vector<128x1xf32> to vector<128x128xf32>
    %89 = arith.mulf %84, %88 : vector<128x128xf32>
    %90 = arith.truncf %89 : vector<128x128xf32> to vector<128x128xbf16>
    %91 = arith.truncf %71 : vector<128x16xf32> to vector<128x16xbf16>
    %cst_51 = arith.constant dense<0.000000e+00> : vector<128x16xf32>
    %92 = tpu.matmul %90, %91, %cst_51 {dimension_numbers = #tpu.dot_dimension_numbers<[1], [0], [0], [1], [0, 0, 1, 1], [], []>} : vector<128x128xbf16>, vector<128x16xbf16>, vector<128x16xf32> -> vector<128x16xf32>
    %93 = vector.extract_strided_slice %68 {offsets = [0, 16], sizes = [128, 16], strides = [1, 1]} : vector<128x96xf32> to vector<128x16xf32>
    %94 = vector.extract_strided_slice %68 {offsets = [0, 48], sizes = [128, 16], strides = [1, 1]} : vector<128x96xf32> to vector<128x16xf32>
    %95 = vector.extract_strided_slice %68 {offsets = [0, 80], sizes = [128, 16], strides = [1, 1]} : vector<128x96xf32> to vector<128x16xf32>
    %96 = arith.truncf %93 : vector<128x16xf32> to vector<128x16xbf16>
    %97 = arith.truncf %94 : vector<128x16xf32> to vector<128x16xbf16>
    %cst_52 = arith.constant dense<0.000000e+00> : vector<128x128xf32>
    %98 = tpu.matmul %96, %97, %cst_52 {dimension_numbers = #tpu.dot_dimension_numbers<[1], [1], [0], [0], [0, 0, 1, 0], [], []>} : vector<128x16xbf16>, vector<128x16xbf16>, vector<128x128xf32> -> vector<128x128xf32>
    %cst_53 = arith.constant 2.500000e-01 : f32
    %99 = vector.broadcast %cst_53 : f32 to vector<128x128xf32>
    %100 = arith.mulf %98, %99 : vector<128x128xf32>
    %c1 = arith.constant 1 : index
    %c0_54 = arith.constant 0 : index
    %c0_55 = arith.constant 0 : index
    %101 = vector.load %arg18[%c1, %c0_54, %c0_55] : memref<2x128x128xf32, #tpu.memory_space<vmem>>, vector<1x128x128xf32>
    %102 = vector.shape_cast %101 : vector<1x128x128xf32> to vector<128x128xf32>
    %103 = arith.addf %100, %102 : vector<128x128xf32>
    %cst_56 = arith.constant dense<0xFF800000> : vector<128xf32>
    %104 = vector.multi_reduction <maximumf>, %103, %cst_56 [1] : vector<128x128xf32> to vector<128xf32>
    %105 = vector.shape_cast %104 : vector<128xf32> to vector<128x1xf32>
    %106 = vector.broadcast %105 : vector<128x1xf32> to vector<128x128xf32>
    %107 = arith.subf %103, %106 : vector<128x128xf32>
    %108 = math.exp %107 : vector<128x128xf32>
    %cst_57 = arith.constant dense<0.000000e+00> : vector<128xf32>
    %109 = vector.multi_reduction <add>, %108, %cst_57 [1] : vector<128x128xf32> to vector<128xf32>
    %110 = vector.shape_cast %109 : vector<128xf32> to vector<128x1xf32>
    %111 = tpu.reciprocal %110 {approx = true} : vector<128x1xf32> -> vector<128x1xf32>
    %112 = vector.broadcast %111 : vector<128x1xf32> to vector<128x128xf32>
    %113 = arith.mulf %108, %112 : vector<128x128xf32>
    %114 = arith.truncf %113 : vector<128x128xf32> to vector<128x128xbf16>
    %115 = arith.truncf %95 : vector<128x16xf32> to vector<128x16xbf16>
    %cst_58 = arith.constant dense<0.000000e+00> : vector<128x16xf32>
    %116 = tpu.matmul %114, %115, %cst_58 {dimension_numbers = #tpu.dot_dimension_numbers<[1], [0], [0], [1], [0, 0, 1, 1], [], []>} : vector<128x128xbf16>, vector<128x16xbf16>, vector<128x16xf32> -> vector<128x16xf32>
    %117 = tpu.concatenate %92, %116 in 1 : vector<128x16xf32>, vector<128x16xf32> -> vector<128x32xf32>
    %118 = arith.truncf %117 : vector<128x32xf32> to vector<128x32xbf16>
    %cst_59 = arith.constant dense<0.000000e+00> : vector<128x32xf32>
    %119 = tpu.matmul %118, %35, %cst_59 {dimension_numbers = #tpu.dot_dimension_numbers<[1], [0], [0], [1], [0, 0, 1, 1], [], []>} : vector<128x32xbf16>, vector<32x32xbf16>, vector<128x32xf32> -> vector<128x32xf32>
    %120 = vector.broadcast %36 : vector<1x32xf32> to vector<128x32xf32>
    %121 = arith.addf %119, %120 : vector<128x32xf32>
    %122 = arith.addf %30, %121 : vector<128x32xf32>
    %cst_60 = arith.constant dense<0.000000e+00> : vector<128xf32>
    %123 = vector.multi_reduction <add>, %122, %cst_60 [1] : vector<128x32xf32> to vector<128xf32>
    %124 = vector.shape_cast %123 : vector<128xf32> to vector<128x1xf32>
    %cst_61 = arith.constant 3.200000e+01 : f32
    %125 = vector.broadcast %cst_61 : f32 to vector<128x1xf32>
    %126 = arith.divf %124, %125 : vector<128x1xf32>
    %127 = vector.broadcast %126 : vector<128x1xf32> to vector<128x32xf32>
    %128 = arith.subf %122, %127 : vector<128x32xf32>
    %129 = arith.mulf %128, %128 : vector<128x32xf32>
    %cst_62 = arith.constant dense<0.000000e+00> : vector<128xf32>
    %130 = vector.multi_reduction <add>, %129, %cst_62 [1] : vector<128x32xf32> to vector<128xf32>
    %131 = vector.shape_cast %130 : vector<128xf32> to vector<128x1xf32>
    %cst_63 = arith.constant 3.200000e+01 : f32
    %132 = vector.broadcast %cst_63 : f32 to vector<128x1xf32>
    %133 = arith.divf %131, %132 : vector<128x1xf32>
    %134 = vector.broadcast %126 : vector<128x1xf32> to vector<128x32xf32>
    %135 = arith.subf %122, %134 : vector<128x32xf32>
    %cst_64 = arith.constant 9.99999974E-6 : f32
    %136 = vector.broadcast %cst_64 : f32 to vector<128x1xf32>
    %137 = arith.addf %133, %136 : vector<128x1xf32>
    %138 = math.rsqrt %137 : vector<128x1xf32>
    %139 = vector.broadcast %138 : vector<128x1xf32> to vector<128x32xf32>
    %140 = arith.mulf %135, %139 : vector<128x32xf32>
    %141 = vector.broadcast %37 : vector<1x32xf32> to vector<128x32xf32>
    %142 = arith.mulf %140, %141 : vector<128x32xf32>
    %143 = vector.broadcast %38 : vector<1x32xf32> to vector<128x32xf32>
    %144 = arith.addf %142, %143 : vector<128x32xf32>
    %145 = arith.truncf %144 : vector<128x32xf32> to vector<128x32xbf16>
    %cst_65 = arith.constant dense<0.000000e+00> : vector<128x128xf32>
    %146 = tpu.matmul %145, %39, %cst_65 {dimension_numbers = #tpu.dot_dimension_numbers<[1], [0], [0], [1], [0, 0, 1, 1], [], []>} : vector<128x32xbf16>, vector<32x128xbf16>, vector<128x128xf32> -> vector<128x128xf32>
    %147 = vector.broadcast %40 : vector<1x128xf32> to vector<128x128xf32>
    %148 = arith.addf %146, %147 : vector<128x128xf32>
    %149 = arith.mulf %148, %148 : vector<128x128xf32>
    %150 = arith.mulf %148, %149 : vector<128x128xf32>
    %cst_66 = arith.constant 4.471500e-02 : f32
    %151 = vector.broadcast %cst_66 : f32 to vector<128x128xf32>
    %152 = arith.mulf %151, %150 : vector<128x128xf32>
    %153 = arith.addf %148, %152 : vector<128x128xf32>
    %cst_67 = arith.constant 0.797884583 : f32
    %154 = vector.broadcast %cst_67 : f32 to vector<128x128xf32>
    %155 = arith.mulf %154, %153 : vector<128x128xf32>
    %156 = math.tanh %155 : vector<128x128xf32>
    %cst_68 = arith.constant 1.000000e+00 : f32
    %157 = vector.broadcast %cst_68 : f32 to vector<128x128xf32>
    %158 = arith.addf %157, %156 : vector<128x128xf32>
    %cst_69 = arith.constant 5.000000e-01 : f32
    %159 = vector.broadcast %cst_69 : f32 to vector<128x128xf32>
    %160 = arith.mulf %159, %158 : vector<128x128xf32>
    %161 = arith.mulf %148, %160 : vector<128x128xf32>
    %162 = arith.truncf %161 : vector<128x128xf32> to vector<128x128xbf16>
    %cst_70 = arith.constant dense<0.000000e+00> : vector<128x32xf32>
    %163 = tpu.matmul %162, %41, %cst_70 {dimension_numbers = #tpu.dot_dimension_numbers<[1], [0], [0], [1], [0, 0, 1, 1], [], []>} : vector<128x128xbf16>, vector<128x32xbf16>, vector<128x32xf32> -> vector<128x32xf32>
    %164 = arith.addf %122, %163 : vector<128x32xf32>
    %165 = vector.broadcast %42 : vector<1x32xf32> to vector<128x32xf32>
    %166 = arith.addf %164, %165 : vector<128x32xf32>
    %c0_71 = arith.constant 0 : index
    %c0_72 = arith.constant 0 : index
    %167 = vector.load %arg19[%c0_71, %c0_72] : memref<128x32xf32, #tpu.memory_space<vmem>>, vector<128x32xf32>
    tpu.vector_store %arg19[%c0_71, %c0_72], %166 {strides = array<i32>} : memref<128x32xf32, #tpu.memory_space<vmem>>, vector<128x32xf32>,
    return
  }
  func.func @transform_0(%arg0: i32) -> (i32, i32) {
    %c0_i32 = arith.constant 0 : i32
    %c0_i32_0 = arith.constant 0 : i32
    %c0_i32_1 = arith.constant 0 : i32
    return %c0_i32, %c0_i32_0 : i32, i32
  }
  func.func @transform_1(%arg0: i32) -> (i32, i32) {
    %c0_i32 = arith.constant 0 : i32
    %c0_i32_0 = arith.constant 0 : i32
    %c0_i32_1 = arith.constant 0 : i32
    return %c0_i32, %c0_i32_0 : i32, i32
  }
  func.func @transform_2(%arg0: i32) -> (i32, i32) {
    %c0_i32 = arith.constant 0 : i32
    %c0_i32_0 = arith.constant 0 : i32
    %c0_i32_1 = arith.constant 0 : i32
    return %c0_i32, %c0_i32_0 : i32, i32
  }
  func.func @transform_3(%arg0: i32) -> (i32, i32) {
    %c0_i32 = arith.constant 0 : i32
    %c0_i32_0 = arith.constant 0 : i32
    %c0_i32_1 = arith.constant 0 : i32
    return %c0_i32, %c0_i32_0 : i32, i32
  }
  func.func @transform_4(%arg0: i32) -> (i32, i32) {
    %c0_i32 = arith.constant 0 : i32
    %c0_i32_0 = arith.constant 0 : i32
    %c0_i32_1 = arith.constant 0 : i32
    return %c0_i32, %c0_i32_0 : i32, i32
  }
  func.func @transform_5(%arg0: i32) -> (i32, i32) {
    %c0_i32 = arith.constant 0 : i32
    %c0_i32_0 = arith.constant 0 : i32
    %c0_i32_1 = arith.constant 0 : i32
    return %c0_i32, %c0_i32_0 : i32, i32
  }
  func.func @transform_6(%arg0: i32) -> (i32, i32) {
    %c0_i32 = arith.constant 0 : i32
    %c0_i32_0 = arith.constant 0 : i32
    %c0_i32_1 = arith.constant 0 : i32
    return %c0_i32, %c0_i32_0 : i32, i32
  }
  func.func @transform_7(%arg0: i32) -> (i32, i32) {
    %c0_i32 = arith.constant 0 : i32
    %c0_i32_0 = arith.constant 0 : i32
    %c0_i32_1 = arith.constant 0 : i32
    return %c0_i32, %c0_i32_0 : i32, i32
  }
  func.func @transform_8(%arg0: i32) -> (i32, i32) {
    %c0_i32 = arith.constant 0 : i32
    %c0_i32_0 = arith.constant 0 : i32
    %c0_i32_1 = arith.constant 0 : i32
    return %c0_i32, %c0_i32_0 : i32, i32
  }
  func.func @transform_9(%arg0: i32) -> (i32, i32) {
    %c0_i32 = arith.constant 0 : i32
    %c0_i32_0 = arith.constant 0 : i32
    %c0_i32_1 = arith.constant 0 : i32
    return %c0_i32, %c0_i32_0 : i32, i32
  }
  func.func @transform_10(%arg0: i32) -> (i32, i32) {
    %c0_i32 = arith.constant 0 : i32
    %c0_i32_0 = arith.constant 0 : i32
    %c0_i32_1 = arith.constant 0 : i32
    return %c0_i32, %c0_i32_0 : i32, i32
  }
  func.func @transform_11(%arg0: i32) -> (i32, i32) {
    %c0_i32 = arith.constant 0 : i32
    %c0_i32_0 = arith.constant 0 : i32
    %c0_i32_1 = arith.constant 0 : i32
    return %c0_i32, %c0_i32_0 : i32, i32
  }
  func.func @transform_12(%arg0: i32) -> (i32, i32) {
    %c0_i32 = arith.constant 0 : i32
    %c0_i32_0 = arith.constant 0 : i32
    %c0_i32_1 = arith.constant 0 : i32
    return %c0_i32, %c0_i32_0 : i32, i32
  }
  func.func @transform_13(%arg0: i32) -> (i32, i32) {
    %c0_i32 = arith.constant 0 : i32
    %c0_i32_0 = arith.constant 0 : i32
    %c0_i32_1 = arith.constant 0 : i32
    return %c0_i32, %c0_i32_0 : i32, i32
  }
  func.func @transform_14(%arg0: i32) -> (i32, i32) {
    %c0_i32 = arith.constant 0 : i32
    %c0_i32_0 = arith.constant 0 : i32
    %c0_i32_1 = arith.constant 0 : i32
    return %c0_i32, %c0_i32_0 : i32, i32
  }
  func.func @transform_15(%arg0: i32) -> (i32, i32) {
    %c0_i32 = arith.constant 0 : i32
    %c0_i32_0 = arith.constant 0 : i32
    %c0_i32_1 = arith.constant 0 : i32
    return %c0_i32, %c0_i32_0 : i32, i32
  }
  func.func @transform_16(%arg0: i32) -> (i32, i32) {
    %c0_i32 = arith.constant 0 : i32
    %c0_i32_0 = arith.constant 0 : i32
    %c0_i32_1 = arith.constant 0 : i32
    return %c0_i32, %c0_i32_0 : i32, i32
  }
  func.func @transform_17(%arg0: i32) -> (i32, i32, i32) {
    %c0_i32 = arith.constant 0 : i32
    %c0_i32_0 = arith.constant 0 : i32
    %c0_i32_1 = arith.constant 0 : i32
    %c0_i32_2 = arith.constant 0 : i32
    return %c0_i32, %c0_i32_0, %c0_i32_1 : i32, i32, i32
  }
  func.func @transform_18(%arg0: i32) -> (i32, i32) {
    %c0_i32 = arith.constant 0 : i32
    %c0_i32_0 = arith.constant 0 : i32
    %c0_i32_1 = arith.constant 0 : i32
    return %c0_i32, %c0_i32_0 : i32, i32
  }
}

module attributes {stable_mosaic.version = 11 : i64} {
  func.func @_merge_block_kernel(%arg0: i32, %arg1: memref<32x128xf32, #tpu.memory_space<vmem>>, %arg2: memref<1x128xf32, #tpu.memory_space<vmem>>, %arg3: memref<1x128xf32, #tpu.memory_space<vmem>>, %arg4: memref<128x64xbf16, #tpu.memory_space<vmem>>, %arg5: memref<1x64xf32, #tpu.memory_space<vmem>>, %arg6: memref<1x64xf32, #tpu.memory_space<vmem>>, %arg7: memref<64x192xbf16, #tpu.memory_space<vmem>>, %arg8: memref<1x192xf32, #tpu.memory_space<vmem>>, %arg9: memref<64x64xbf16, #tpu.memory_space<vmem>>, %arg10: memref<1x64xf32, #tpu.memory_space<vmem>>, %arg11: memref<1x64xf32, #tpu.memory_space<vmem>>, %arg12: memref<1x64xf32, #tpu.memory_space<vmem>>, %arg13: memref<64x256xbf16, #tpu.memory_space<vmem>>, %arg14: memref<1x256xf32, #tpu.memory_space<vmem>>, %arg15: memref<256x64xbf16, #tpu.memory_space<vmem>>, %arg16: memref<1x64xf32, #tpu.memory_space<vmem>>, %arg17: memref<4x32x32xf32, #tpu.memory_space<vmem>>, %arg18: memref<32x64xf32, #tpu.memory_space<vmem>>) attributes {dimension_semantics = [#tpu.dimension_semantics<arbitrary>], iteration_bounds = array<i64: 1>, scalar_prefetch = 0 : i64, scratch_operands = 0 : i64, tpu.core_type = #tpu.core_type<tc>, window_params = [{pipeline_mode = #tpu.pipeline_mode<synchronous>, transform_indices = @transform_0, window_bounds = array<i64: 32, 128>}, {pipeline_mode = #tpu.pipeline_mode<synchronous>, transform_indices = @transform_1, window_bounds = array<i64: 1, 128>}, {pipeline_mode = #tpu.pipeline_mode<synchronous>, transform_indices = @transform_2, window_bounds = array<i64: 1, 128>}, {pipeline_mode = #tpu.pipeline_mode<synchronous>, transform_indices = @transform_3, window_bounds = array<i64: 128, 64>}, {pipeline_mode = #tpu.pipeline_mode<synchronous>, transform_indices = @transform_4, window_bounds = array<i64: 1, 64>}, {pipeline_mode = #tpu.pipeline_mode<synchronous>, transform_indices = @transform_5, window_bounds = array<i64: 1, 64>}, {pipeline_mode = #tpu.pipeline_mode<synchronous>, transform_indices = @transform_6, window_bounds = array<i64: 64, 192>}, {pipeline_mode = #tpu.pipeline_mode<synchronous>, transform_indices = @transform_7, window_bounds = array<i64: 1, 192>}, {pipeline_mode = #tpu.pipeline_mode<synchronous>, transform_indices = @transform_8, window_bounds = array<i64: 64, 64>}, {pipeline_mode = #tpu.pipeline_mode<synchronous>, transform_indices = @transform_9, window_bounds = array<i64: 1, 64>}, {pipeline_mode = #tpu.pipeline_mode<synchronous>, transform_indices = @transform_10, window_bounds = array<i64: 1, 64>}, {pipeline_mode = #tpu.pipeline_mode<synchronous>, transform_indices = @transform_11, window_bounds = array<i64: 1, 64>}, {pipeline_mode = #tpu.pipeline_mode<synchronous>, transform_indices = @transform_12, window_bounds = array<i64: 64, 256>}, {pipeline_mode = #tpu.pipeline_mode<synchronous>, transform_indices = @transform_13, window_bounds = array<i64: 1, 256>}, {pipeline_mode = #tpu.pipeline_mode<synchronous>, transform_indices = @transform_14, window_bounds = array<i64: 256, 64>}, {pipeline_mode = #tpu.pipeline_mode<synchronous>, transform_indices = @transform_15, window_bounds = array<i64: 1, 64>}, {pipeline_mode = #tpu.pipeline_mode<synchronous>, transform_indices = @transform_16, window_bounds = array<i64: 4, 32, 32>}, {pipeline_mode = #tpu.pipeline_mode<synchronous>, transform_indices = @transform_17, window_bounds = array<i64: 32, 64>}]} {
    %c0 = arith.constant 0 : index
    %c0_0 = arith.constant 0 : index
    %0 = vector.load %arg1[%c0, %c0_0] : memref<32x128xf32, #tpu.memory_space<vmem>>, vector<32x128xf32>
    %c0_1 = arith.constant 0 : index
    %c0_2 = arith.constant 0 : index
    %1 = vector.load %arg2[%c0_1, %c0_2] : memref<1x128xf32, #tpu.memory_space<vmem>>, vector<1x128xf32>
    %c0_3 = arith.constant 0 : index
    %c0_4 = arith.constant 0 : index
    %2 = vector.load %arg3[%c0_3, %c0_4] : memref<1x128xf32, #tpu.memory_space<vmem>>, vector<1x128xf32>
    %cst = arith.constant dense<0.000000e+00> : vector<32xf32>
    %3 = vector.multi_reduction <add>, %0, %cst [1] : vector<32x128xf32> to vector<32xf32>
    %4 = vector.shape_cast %3 : vector<32xf32> to vector<32x1xf32>
    %cst_5 = arith.constant 1.280000e+02 : f32
    %5 = vector.broadcast %cst_5 : f32 to vector<32x1xf32>
    %6 = arith.divf %4, %5 : vector<32x1xf32>
    %7 = vector.broadcast %6 : vector<32x1xf32> to vector<32x128xf32>
    %8 = arith.subf %0, %7 : vector<32x128xf32>
    %9 = arith.mulf %8, %8 : vector<32x128xf32>
    %cst_6 = arith.constant dense<0.000000e+00> : vector<32xf32>
    %10 = vector.multi_reduction <add>, %9, %cst_6 [1] : vector<32x128xf32> to vector<32xf32>
    %11 = vector.shape_cast %10 : vector<32xf32> to vector<32x1xf32>
    %cst_7 = arith.constant 1.280000e+02 : f32
    %12 = vector.broadcast %cst_7 : f32 to vector<32x1xf32>
    %13 = arith.divf %11, %12 : vector<32x1xf32>
    %14 = vector.broadcast %6 : vector<32x1xf32> to vector<32x128xf32>
    %15 = arith.subf %0, %14 : vector<32x128xf32>
    %cst_8 = arith.constant 9.99999974E-6 : f32
    %16 = vector.broadcast %cst_8 : f32 to vector<32x1xf32>
    %17 = arith.addf %13, %16 : vector<32x1xf32>
    %18 = math.rsqrt %17 : vector<32x1xf32>
    %19 = vector.broadcast %18 : vector<32x1xf32> to vector<32x128xf32>
    %20 = arith.mulf %15, %19 : vector<32x128xf32>
    %21 = vector.broadcast %1 : vector<1x128xf32> to vector<32x128xf32>
    %22 = arith.mulf %20, %21 : vector<32x128xf32>
    %23 = vector.broadcast %2 : vector<1x128xf32> to vector<32x128xf32>
    %24 = arith.addf %22, %23 : vector<32x128xf32>
    %c0_9 = arith.constant 0 : index
    %c0_10 = arith.constant 0 : index
    %25 = vector.load %arg4[%c0_9, %c0_10] : memref<128x64xbf16, #tpu.memory_space<vmem>>, vector<128x64xbf16>
    %26 = arith.truncf %24 : vector<32x128xf32> to vector<32x128xbf16>
    %cst_11 = arith.constant dense<0.000000e+00> : vector<32x64xf32>
    %27 = tpu.matmul %26, %25, %cst_11 {dimension_numbers = #tpu.dot_dimension_numbers<[1], [0], [0], [1], [0, 0, 1, 1], [], []>} : vector<32x128xbf16>, vector<128x64xbf16>, vector<32x64xf32> -> vector<32x64xf32>
    %c0_12 = arith.constant 0 : index
    %c0_13 = arith.constant 0 : index
    %28 = vector.load %arg5[%c0_12, %c0_13] : memref<1x64xf32, #tpu.memory_space<vmem>>, vector<1x64xf32>
    %c0_14 = arith.constant 0 : index
    %c0_15 = arith.constant 0 : index
    %29 = vector.load %arg6[%c0_14, %c0_15] : memref<1x64xf32, #tpu.memory_space<vmem>>, vector<1x64xf32>
    %c0_16 = arith.constant 0 : index
    %c0_17 = arith.constant 0 : index
    %30 = vector.load %arg7[%c0_16, %c0_17] : memref<64x192xbf16, #tpu.memory_space<vmem>>, vector<64x192xbf16>
    %c0_18 = arith.constant 0 : index
    %c0_19 = arith.constant 0 : index
    %31 = vector.load %arg8[%c0_18, %c0_19] : memref<1x192xf32, #tpu.memory_space<vmem>>, vector<1x192xf32>
    %c0_20 = arith.constant 0 : index
    %c0_21 = arith.constant 0 : index
    %32 = vector.load %arg9[%c0_20, %c0_21] : memref<64x64xbf16, #tpu.memory_space<vmem>>, vector<64x64xbf16>
    %c0_22 = arith.constant 0 : index
    %c0_23 = arith.constant 0 : index
    %33 = vector.load %arg10[%c0_22, %c0_23] : memref<1x64xf32, #tpu.memory_space<vmem>>, vector<1x64xf32>
    %c0_24 = arith.constant 0 : index
    %c0_25 = arith.constant 0 : index
    %34 = vector.load %arg11[%c0_24, %c0_25] : memref<1x64xf32, #tpu.memory_space<vmem>>, vector<1x64xf32>
    %c0_26 = arith.constant 0 : index
    %c0_27 = arith.constant 0 : index
    %35 = vector.load %arg12[%c0_26, %c0_27] : memref<1x64xf32, #tpu.memory_space<vmem>>, vector<1x64xf32>
    %c0_28 = arith.constant 0 : index
    %c0_29 = arith.constant 0 : index
    %36 = vector.load %arg13[%c0_28, %c0_29] : memref<64x256xbf16, #tpu.memory_space<vmem>>, vector<64x256xbf16>
    %c0_30 = arith.constant 0 : index
    %c0_31 = arith.constant 0 : index
    %37 = vector.load %arg14[%c0_30, %c0_31] : memref<1x256xf32, #tpu.memory_space<vmem>>, vector<1x256xf32>
    %c0_32 = arith.constant 0 : index
    %c0_33 = arith.constant 0 : index
    %38 = vector.load %arg15[%c0_32, %c0_33] : memref<256x64xbf16, #tpu.memory_space<vmem>>, vector<256x64xbf16>
    %c0_34 = arith.constant 0 : index
    %c0_35 = arith.constant 0 : index
    %39 = vector.load %arg16[%c0_34, %c0_35] : memref<1x64xf32, #tpu.memory_space<vmem>>, vector<1x64xf32>
    %cst_36 = arith.constant dense<0.000000e+00> : vector<32xf32>
    %40 = vector.multi_reduction <add>, %27, %cst_36 [1] : vector<32x64xf32> to vector<32xf32>
    %41 = vector.shape_cast %40 : vector<32xf32> to vector<32x1xf32>
    %cst_37 = arith.constant 6.400000e+01 : f32
    %42 = vector.broadcast %cst_37 : f32 to vector<32x1xf32>
    %43 = arith.divf %41, %42 : vector<32x1xf32>
    %44 = vector.broadcast %43 : vector<32x1xf32> to vector<32x64xf32>
    %45 = arith.subf %27, %44 : vector<32x64xf32>
    %46 = arith.mulf %45, %45 : vector<32x64xf32>
    %cst_38 = arith.constant dense<0.000000e+00> : vector<32xf32>
    %47 = vector.multi_reduction <add>, %46, %cst_38 [1] : vector<32x64xf32> to vector<32xf32>
    %48 = vector.shape_cast %47 : vector<32xf32> to vector<32x1xf32>
    %cst_39 = arith.constant 6.400000e+01 : f32
    %49 = vector.broadcast %cst_39 : f32 to vector<32x1xf32>
    %50 = arith.divf %48, %49 : vector<32x1xf32>
    %51 = vector.broadcast %43 : vector<32x1xf32> to vector<32x64xf32>
    %52 = arith.subf %27, %51 : vector<32x64xf32>
    %cst_40 = arith.constant 9.99999974E-6 : f32
    %53 = vector.broadcast %cst_40 : f32 to vector<32x1xf32>
    %54 = arith.addf %50, %53 : vector<32x1xf32>
    %55 = math.rsqrt %54 : vector<32x1xf32>
    %56 = vector.broadcast %55 : vector<32x1xf32> to vector<32x64xf32>
    %57 = arith.mulf %52, %56 : vector<32x64xf32>
    %58 = vector.broadcast %28 : vector<1x64xf32> to vector<32x64xf32>
    %59 = arith.mulf %57, %58 : vector<32x64xf32>
    %60 = vector.broadcast %29 : vector<1x64xf32> to vector<32x64xf32>
    %61 = arith.addf %59, %60 : vector<32x64xf32>
    %62 = arith.truncf %61 : vector<32x64xf32> to vector<32x64xbf16>
    %cst_41 = arith.constant dense<0.000000e+00> : vector<32x192xf32>
    %63 = tpu.matmul %62, %30, %cst_41 {dimension_numbers = #tpu.dot_dimension_numbers<[1], [0], [0], [1], [0, 0, 1, 1], [], []>} : vector<32x64xbf16>, vector<64x192xbf16>, vector<32x192xf32> -> vector<32x192xf32>
    %64 = vector.broadcast %31 : vector<1x192xf32> to vector<32x192xf32>
    %65 = arith.addf %63, %64 : vector<32x192xf32>
    %66 = vector.extract_strided_slice %65 {offsets = [0, 0], sizes = [32, 16], strides = [1, 1]} : vector<32x192xf32> to vector<32x16xf32>
    %67 = vector.extract_strided_slice %65 {offsets = [0, 64], sizes = [32, 16], strides = [1, 1]} : vector<32x192xf32> to vector<32x16xf32>
    %68 = vector.extract_strided_slice %65 {offsets = [0, 128], sizes = [32, 16], strides = [1, 1]} : vector<32x192xf32> to vector<32x16xf32>
    %69 = arith.truncf %66 : vector<32x16xf32> to vector<32x16xbf16>
    %70 = arith.truncf %67 : vector<32x16xf32> to vector<32x16xbf16>
    %cst_42 = arith.constant dense<0.000000e+00> : vector<32x32xf32>
    %71 = tpu.matmul %69, %70, %cst_42 {dimension_numbers = #tpu.dot_dimension_numbers<[1], [1], [0], [0], [0, 0, 1, 0], [], []>} : vector<32x16xbf16>, vector<32x16xbf16>, vector<32x32xf32> -> vector<32x32xf32>
    %cst_43 = arith.constant 2.500000e-01 : f32
    %72 = vector.broadcast %cst_43 : f32 to vector<32x32xf32>
    %73 = arith.mulf %71, %72 : vector<32x32xf32>
    %c0_44 = arith.constant 0 : index
    %c0_45 = arith.constant 0 : index
    %c0_46 = arith.constant 0 : index
    %74 = vector.load %arg17[%c0_44, %c0_45, %c0_46] : memref<4x32x32xf32, #tpu.memory_space<vmem>>, vector<1x32x32xf32>
    %75 = vector.shape_cast %74 : vector<1x32x32xf32> to vector<32x32xf32>
    %76 = arith.addf %73, %75 : vector<32x32xf32>
    %cst_47 = arith.constant dense<0xFF800000> : vector<32xf32>
    %77 = vector.multi_reduction <maximumf>, %76, %cst_47 [1] : vector<32x32xf32> to vector<32xf32>
    %78 = vector.shape_cast %77 : vector<32xf32> to vector<32x1xf32>
    %79 = vector.broadcast %78 : vector<32x1xf32> to vector<32x32xf32>
    %80 = arith.subf %76, %79 : vector<32x32xf32>
    %81 = math.exp %80 : vector<32x32xf32>
    %cst_48 = arith.constant dense<0.000000e+00> : vector<32xf32>
    %82 = vector.multi_reduction <add>, %81, %cst_48 [1] : vector<32x32xf32> to vector<32xf32>
    %83 = vector.shape_cast %82 : vector<32xf32> to vector<32x1xf32>
    %84 = tpu.reciprocal %83 {approx = true} : vector<32x1xf32> -> vector<32x1xf32>
    %85 = vector.broadcast %84 : vector<32x1xf32> to vector<32x32xf32>
    %86 = arith.mulf %81, %85 : vector<32x32xf32>
    %87 = arith.truncf %86 : vector<32x32xf32> to vector<32x32xbf16>
    %88 = arith.truncf %68 : vector<32x16xf32> to vector<32x16xbf16>
    %cst_49 = arith.constant dense<0.000000e+00> : vector<32x16xf32>
    %89 = tpu.matmul %87, %88, %cst_49 {dimension_numbers = #tpu.dot_dimension_numbers<[1], [0], [0], [1], [0, 0, 1, 1], [], []>} : vector<32x32xbf16>, vector<32x16xbf16>, vector<32x16xf32> -> vector<32x16xf32>
    %90 = vector.extract_strided_slice %65 {offsets = [0, 16], sizes = [32, 16], strides = [1, 1]} : vector<32x192xf32> to vector<32x16xf32>
    %91 = vector.extract_strided_slice %65 {offsets = [0, 80], sizes = [32, 16], strides = [1, 1]} : vector<32x192xf32> to vector<32x16xf32>
    %92 = vector.extract_strided_slice %65 {offsets = [0, 144], sizes = [32, 16], strides = [1, 1]} : vector<32x192xf32> to vector<32x16xf32>
    %93 = arith.truncf %90 : vector<32x16xf32> to vector<32x16xbf16>
    %94 = arith.truncf %91 : vector<32x16xf32> to vector<32x16xbf16>
    %cst_50 = arith.constant dense<0.000000e+00> : vector<32x32xf32>
    %95 = tpu.matmul %93, %94, %cst_50 {dimension_numbers = #tpu.dot_dimension_numbers<[1], [1], [0], [0], [0, 0, 1, 0], [], []>} : vector<32x16xbf16>, vector<32x16xbf16>, vector<32x32xf32> -> vector<32x32xf32>
    %cst_51 = arith.constant 2.500000e-01 : f32
    %96 = vector.broadcast %cst_51 : f32 to vector<32x32xf32>
    %97 = arith.mulf %95, %96 : vector<32x32xf32>
    %c1 = arith.constant 1 : index
    %c0_52 = arith.constant 0 : index
    %c0_53 = arith.constant 0 : index
    %98 = vector.load %arg17[%c1, %c0_52, %c0_53] : memref<4x32x32xf32, #tpu.memory_space<vmem>>, vector<1x32x32xf32>
    %99 = vector.shape_cast %98 : vector<1x32x32xf32> to vector<32x32xf32>
    %100 = arith.addf %97, %99 : vector<32x32xf32>
    %cst_54 = arith.constant dense<0xFF800000> : vector<32xf32>
    %101 = vector.multi_reduction <maximumf>, %100, %cst_54 [1] : vector<32x32xf32> to vector<32xf32>
    %102 = vector.shape_cast %101 : vector<32xf32> to vector<32x1xf32>
    %103 = vector.broadcast %102 : vector<32x1xf32> to vector<32x32xf32>
    %104 = arith.subf %100, %103 : vector<32x32xf32>
    %105 = math.exp %104 : vector<32x32xf32>
    %cst_55 = arith.constant dense<0.000000e+00> : vector<32xf32>
    %106 = vector.multi_reduction <add>, %105, %cst_55 [1] : vector<32x32xf32> to vector<32xf32>
    %107 = vector.shape_cast %106 : vector<32xf32> to vector<32x1xf32>
    %108 = tpu.reciprocal %107 {approx = true} : vector<32x1xf32> -> vector<32x1xf32>
    %109 = vector.broadcast %108 : vector<32x1xf32> to vector<32x32xf32>
    %110 = arith.mulf %105, %109 : vector<32x32xf32>
    %111 = arith.truncf %110 : vector<32x32xf32> to vector<32x32xbf16>
    %112 = arith.truncf %92 : vector<32x16xf32> to vector<32x16xbf16>
    %cst_56 = arith.constant dense<0.000000e+00> : vector<32x16xf32>
    %113 = tpu.matmul %111, %112, %cst_56 {dimension_numbers = #tpu.dot_dimension_numbers<[1], [0], [0], [1], [0, 0, 1, 1], [], []>} : vector<32x32xbf16>, vector<32x16xbf16>, vector<32x16xf32> -> vector<32x16xf32>
    %114 = vector.extract_strided_slice %65 {offsets = [0, 32], sizes = [32, 16], strides = [1, 1]} : vector<32x192xf32> to vector<32x16xf32>
    %115 = vector.extract_strided_slice %65 {offsets = [0, 96], sizes = [32, 16], strides = [1, 1]} : vector<32x192xf32> to vector<32x16xf32>
    %116 = vector.extract_strided_slice %65 {offsets = [0, 160], sizes = [32, 16], strides = [1, 1]} : vector<32x192xf32> to vector<32x16xf32>
    %117 = arith.truncf %114 : vector<32x16xf32> to vector<32x16xbf16>
    %118 = arith.truncf %115 : vector<32x16xf32> to vector<32x16xbf16>
    %cst_57 = arith.constant dense<0.000000e+00> : vector<32x32xf32>
    %119 = tpu.matmul %117, %118, %cst_57 {dimension_numbers = #tpu.dot_dimension_numbers<[1], [1], [0], [0], [0, 0, 1, 0], [], []>} : vector<32x16xbf16>, vector<32x16xbf16>, vector<32x32xf32> -> vector<32x32xf32>
    %cst_58 = arith.constant 2.500000e-01 : f32
    %120 = vector.broadcast %cst_58 : f32 to vector<32x32xf32>
    %121 = arith.mulf %119, %120 : vector<32x32xf32>
    %c2 = arith.constant 2 : index
    %c0_59 = arith.constant 0 : index
    %c0_60 = arith.constant 0 : index
    %122 = vector.load %arg17[%c2, %c0_59, %c0_60] : memref<4x32x32xf32, #tpu.memory_space<vmem>>, vector<1x32x32xf32>
    %123 = vector.shape_cast %122 : vector<1x32x32xf32> to vector<32x32xf32>
    %124 = arith.addf %121, %123 : vector<32x32xf32>
    %cst_61 = arith.constant dense<0xFF800000> : vector<32xf32>
    %125 = vector.multi_reduction <maximumf>, %124, %cst_61 [1] : vector<32x32xf32> to vector<32xf32>
    %126 = vector.shape_cast %125 : vector<32xf32> to vector<32x1xf32>
    %127 = vector.broadcast %126 : vector<32x1xf32> to vector<32x32xf32>
    %128 = arith.subf %124, %127 : vector<32x32xf32>
    %129 = math.exp %128 : vector<32x32xf32>
    %cst_62 = arith.constant dense<0.000000e+00> : vector<32xf32>
    %130 = vector.multi_reduction <add>, %129, %cst_62 [1] : vector<32x32xf32> to vector<32xf32>
    %131 = vector.shape_cast %130 : vector<32xf32> to vector<32x1xf32>
    %132 = tpu.reciprocal %131 {approx = true} : vector<32x1xf32> -> vector<32x1xf32>
    %133 = vector.broadcast %132 : vector<32x1xf32> to vector<32x32xf32>
    %134 = arith.mulf %129, %133 : vector<32x32xf32>
    %135 = arith.truncf %134 : vector<32x32xf32> to vector<32x32xbf16>
    %136 = arith.truncf %116 : vector<32x16xf32> to vector<32x16xbf16>
    %cst_63 = arith.constant dense<0.000000e+00> : vector<32x16xf32>
    %137 = tpu.matmul %135, %136, %cst_63 {dimension_numbers = #tpu.dot_dimension_numbers<[1], [0], [0], [1], [0, 0, 1, 1], [], []>} : vector<32x32xbf16>, vector<32x16xbf16>, vector<32x16xf32> -> vector<32x16xf32>
    %138 = vector.extract_strided_slice %65 {offsets = [0, 48], sizes = [32, 16], strides = [1, 1]} : vector<32x192xf32> to vector<32x16xf32>
    %139 = vector.extract_strided_slice %65 {offsets = [0, 112], sizes = [32, 16], strides = [1, 1]} : vector<32x192xf32> to vector<32x16xf32>
    %140 = vector.extract_strided_slice %65 {offsets = [0, 176], sizes = [32, 16], strides = [1, 1]} : vector<32x192xf32> to vector<32x16xf32>
    %141 = arith.truncf %138 : vector<32x16xf32> to vector<32x16xbf16>
    %142 = arith.truncf %139 : vector<32x16xf32> to vector<32x16xbf16>
    %cst_64 = arith.constant dense<0.000000e+00> : vector<32x32xf32>
    %143 = tpu.matmul %141, %142, %cst_64 {dimension_numbers = #tpu.dot_dimension_numbers<[1], [1], [0], [0], [0, 0, 1, 0], [], []>} : vector<32x16xbf16>, vector<32x16xbf16>, vector<32x32xf32> -> vector<32x32xf32>
    %cst_65 = arith.constant 2.500000e-01 : f32
    %144 = vector.broadcast %cst_65 : f32 to vector<32x32xf32>
    %145 = arith.mulf %143, %144 : vector<32x32xf32>
    %c3 = arith.constant 3 : index
    %c0_66 = arith.constant 0 : index
    %c0_67 = arith.constant 0 : index
    %146 = vector.load %arg17[%c3, %c0_66, %c0_67] : memref<4x32x32xf32, #tpu.memory_space<vmem>>, vector<1x32x32xf32>
    %147 = vector.shape_cast %146 : vector<1x32x32xf32> to vector<32x32xf32>
    %148 = arith.addf %145, %147 : vector<32x32xf32>
    %cst_68 = arith.constant dense<0xFF800000> : vector<32xf32>
    %149 = vector.multi_reduction <maximumf>, %148, %cst_68 [1] : vector<32x32xf32> to vector<32xf32>
    %150 = vector.shape_cast %149 : vector<32xf32> to vector<32x1xf32>
    %151 = vector.broadcast %150 : vector<32x1xf32> to vector<32x32xf32>
    %152 = arith.subf %148, %151 : vector<32x32xf32>
    %153 = math.exp %152 : vector<32x32xf32>
    %cst_69 = arith.constant dense<0.000000e+00> : vector<32xf32>
    %154 = vector.multi_reduction <add>, %153, %cst_69 [1] : vector<32x32xf32> to vector<32xf32>
    %155 = vector.shape_cast %154 : vector<32xf32> to vector<32x1xf32>
    %156 = tpu.reciprocal %155 {approx = true} : vector<32x1xf32> -> vector<32x1xf32>
    %157 = vector.broadcast %156 : vector<32x1xf32> to vector<32x32xf32>
    %158 = arith.mulf %153, %157 : vector<32x32xf32>
    %159 = arith.truncf %158 : vector<32x32xf32> to vector<32x32xbf16>
    %160 = arith.truncf %140 : vector<32x16xf32> to vector<32x16xbf16>
    %cst_70 = arith.constant dense<0.000000e+00> : vector<32x16xf32>
    %161 = tpu.matmul %159, %160, %cst_70 {dimension_numbers = #tpu.dot_dimension_numbers<[1], [0], [0], [1], [0, 0, 1, 1], [], []>} : vector<32x32xbf16>, vector<32x16xbf16>, vector<32x16xf32> -> vector<32x16xf32>
    %162 = tpu.concatenate %89, %113, %137, %161 in 1 : vector<32x16xf32>, vector<32x16xf32>, vector<32x16xf32>, vector<32x16xf32> -> vector<32x64xf32>
    %163 = arith.truncf %162 : vector<32x64xf32> to vector<32x64xbf16>
    %cst_71 = arith.constant dense<0.000000e+00> : vector<32x64xf32>
    %164 = tpu.matmul %163, %32, %cst_71 {dimension_numbers = #tpu.dot_dimension_numbers<[1], [0], [0], [1], [0, 0, 1, 1], [], []>} : vector<32x64xbf16>, vector<64x64xbf16>, vector<32x64xf32> -> vector<32x64xf32>
    %165 = vector.broadcast %33 : vector<1x64xf32> to vector<32x64xf32>
    %166 = arith.addf %164, %165 : vector<32x64xf32>
    %167 = arith.addf %27, %166 : vector<32x64xf32>
    %cst_72 = arith.constant dense<0.000000e+00> : vector<32xf32>
    %168 = vector.multi_reduction <add>, %167, %cst_72 [1] : vector<32x64xf32> to vector<32xf32>
    %169 = vector.shape_cast %168 : vector<32xf32> to vector<32x1xf32>
    %cst_73 = arith.constant 6.400000e+01 : f32
    %170 = vector.broadcast %cst_73 : f32 to vector<32x1xf32>
    %171 = arith.divf %169, %170 : vector<32x1xf32>
    %172 = vector.broadcast %171 : vector<32x1xf32> to vector<32x64xf32>
    %173 = arith.subf %167, %172 : vector<32x64xf32>
    %174 = arith.mulf %173, %173 : vector<32x64xf32>
    %cst_74 = arith.constant dense<0.000000e+00> : vector<32xf32>
    %175 = vector.multi_reduction <add>, %174, %cst_74 [1] : vector<32x64xf32> to vector<32xf32>
    %176 = vector.shape_cast %175 : vector<32xf32> to vector<32x1xf32>
    %cst_75 = arith.constant 6.400000e+01 : f32
    %177 = vector.broadcast %cst_75 : f32 to vector<32x1xf32>
    %178 = arith.divf %176, %177 : vector<32x1xf32>
    %179 = vector.broadcast %171 : vector<32x1xf32> to vector<32x64xf32>
    %180 = arith.subf %167, %179 : vector<32x64xf32>
    %cst_76 = arith.constant 9.99999974E-6 : f32
    %181 = vector.broadcast %cst_76 : f32 to vector<32x1xf32>
    %182 = arith.addf %178, %181 : vector<32x1xf32>
    %183 = math.rsqrt %182 : vector<32x1xf32>
    %184 = vector.broadcast %183 : vector<32x1xf32> to vector<32x64xf32>
    %185 = arith.mulf %180, %184 : vector<32x64xf32>
    %186 = vector.broadcast %34 : vector<1x64xf32> to vector<32x64xf32>
    %187 = arith.mulf %185, %186 : vector<32x64xf32>
    %188 = vector.broadcast %35 : vector<1x64xf32> to vector<32x64xf32>
    %189 = arith.addf %187, %188 : vector<32x64xf32>
    %190 = arith.truncf %189 : vector<32x64xf32> to vector<32x64xbf16>
    %cst_77 = arith.constant dense<0.000000e+00> : vector<32x256xf32>
    %191 = tpu.matmul %190, %36, %cst_77 {dimension_numbers = #tpu.dot_dimension_numbers<[1], [0], [0], [1], [0, 0, 1, 1], [], []>} : vector<32x64xbf16>, vector<64x256xbf16>, vector<32x256xf32> -> vector<32x256xf32>
    %192 = vector.broadcast %37 : vector<1x256xf32> to vector<32x256xf32>
    %193 = arith.addf %191, %192 : vector<32x256xf32>
    %194 = arith.mulf %193, %193 : vector<32x256xf32>
    %195 = arith.mulf %193, %194 : vector<32x256xf32>
    %cst_78 = arith.constant 4.471500e-02 : f32
    %196 = vector.broadcast %cst_78 : f32 to vector<32x256xf32>
    %197 = arith.mulf %196, %195 : vector<32x256xf32>
    %198 = arith.addf %193, %197 : vector<32x256xf32>
    %cst_79 = arith.constant 0.797884583 : f32
    %199 = vector.broadcast %cst_79 : f32 to vector<32x256xf32>
    %200 = arith.mulf %199, %198 : vector<32x256xf32>
    %201 = math.tanh %200 : vector<32x256xf32>
    %cst_80 = arith.constant 1.000000e+00 : f32
    %202 = vector.broadcast %cst_80 : f32 to vector<32x256xf32>
    %203 = arith.addf %202, %201 : vector<32x256xf32>
    %cst_81 = arith.constant 5.000000e-01 : f32
    %204 = vector.broadcast %cst_81 : f32 to vector<32x256xf32>
    %205 = arith.mulf %204, %203 : vector<32x256xf32>
    %206 = arith.mulf %193, %205 : vector<32x256xf32>
    %207 = arith.truncf %206 : vector<32x256xf32> to vector<32x256xbf16>
    %cst_82 = arith.constant dense<0.000000e+00> : vector<32x64xf32>
    %208 = tpu.matmul %207, %38, %cst_82 {dimension_numbers = #tpu.dot_dimension_numbers<[1], [0], [0], [1], [0, 0, 1, 1], [], []>} : vector<32x256xbf16>, vector<256x64xbf16>, vector<32x64xf32> -> vector<32x64xf32>
    %209 = arith.addf %167, %208 : vector<32x64xf32>
    %210 = vector.broadcast %39 : vector<1x64xf32> to vector<32x64xf32>
    %211 = arith.addf %209, %210 : vector<32x64xf32>
    %c0_83 = arith.constant 0 : index
    %c0_84 = arith.constant 0 : index
    %212 = vector.load %arg18[%c0_83, %c0_84] : memref<32x64xf32, #tpu.memory_space<vmem>>, vector<32x64xf32>
    tpu.vector_store %arg18[%c0_83, %c0_84], %211 {strides = array<i32>} : memref<32x64xf32, #tpu.memory_space<vmem>>, vector<32x64xf32>,
    return
  }
  func.func @transform_0(%arg0: i32) -> (i32, i32) {
    %c0_i32 = arith.constant 0 : i32
    %c0_i32_0 = arith.constant 0 : i32
    %c0_i32_1 = arith.constant 0 : i32
    return %c0_i32, %c0_i32_0 : i32, i32
  }
  func.func @transform_1(%arg0: i32) -> (i32, i32) {
    %c0_i32 = arith.constant 0 : i32
    %c0_i32_0 = arith.constant 0 : i32
    %c0_i32_1 = arith.constant 0 : i32
    return %c0_i32, %c0_i32_0 : i32, i32
  }
  func.func @transform_2(%arg0: i32) -> (i32, i32) {
    %c0_i32 = arith.constant 0 : i32
    %c0_i32_0 = arith.constant 0 : i32
    %c0_i32_1 = arith.constant 0 : i32
    return %c0_i32, %c0_i32_0 : i32, i32
  }
  func.func @transform_3(%arg0: i32) -> (i32, i32) {
    %c0_i32 = arith.constant 0 : i32
    %c0_i32_0 = arith.constant 0 : i32
    %c0_i32_1 = arith.constant 0 : i32
    return %c0_i32, %c0_i32_0 : i32, i32
  }
  func.func @transform_4(%arg0: i32) -> (i32, i32) {
    %c0_i32 = arith.constant 0 : i32
    %c0_i32_0 = arith.constant 0 : i32
    %c0_i32_1 = arith.constant 0 : i32
    return %c0_i32, %c0_i32_0 : i32, i32
  }
  func.func @transform_5(%arg0: i32) -> (i32, i32) {
    %c0_i32 = arith.constant 0 : i32
    %c0_i32_0 = arith.constant 0 : i32
    %c0_i32_1 = arith.constant 0 : i32
    return %c0_i32, %c0_i32_0 : i32, i32
  }
  func.func @transform_6(%arg0: i32) -> (i32, i32) {
    %c0_i32 = arith.constant 0 : i32
    %c0_i32_0 = arith.constant 0 : i32
    %c0_i32_1 = arith.constant 0 : i32
    return %c0_i32, %c0_i32_0 : i32, i32
  }
  func.func @transform_7(%arg0: i32) -> (i32, i32) {
    %c0_i32 = arith.constant 0 : i32
    %c0_i32_0 = arith.constant 0 : i32
    %c0_i32_1 = arith.constant 0 : i32
    return %c0_i32, %c0_i32_0 : i32, i32
  }
  func.func @transform_8(%arg0: i32) -> (i32, i32) {
    %c0_i32 = arith.constant 0 : i32
    %c0_i32_0 = arith.constant 0 : i32
    %c0_i32_1 = arith.constant 0 : i32
    return %c0_i32, %c0_i32_0 : i32, i32
  }
  func.func @transform_9(%arg0: i32) -> (i32, i32) {
    %c0_i32 = arith.constant 0 : i32
    %c0_i32_0 = arith.constant 0 : i32
    %c0_i32_1 = arith.constant 0 : i32
    return %c0_i32, %c0_i32_0 : i32, i32
  }
  func.func @transform_10(%arg0: i32) -> (i32, i32) {
    %c0_i32 = arith.constant 0 : i32
    %c0_i32_0 = arith.constant 0 : i32
    %c0_i32_1 = arith.constant 0 : i32
    return %c0_i32, %c0_i32_0 : i32, i32
  }
  func.func @transform_11(%arg0: i32) -> (i32, i32) {
    %c0_i32 = arith.constant 0 : i32
    %c0_i32_0 = arith.constant 0 : i32
    %c0_i32_1 = arith.constant 0 : i32
    return %c0_i32, %c0_i32_0 : i32, i32
  }
  func.func @transform_12(%arg0: i32) -> (i32, i32) {
    %c0_i32 = arith.constant 0 : i32
    %c0_i32_0 = arith.constant 0 : i32
    %c0_i32_1 = arith.constant 0 : i32
    return %c0_i32, %c0_i32_0 : i32, i32
  }
  func.func @transform_13(%arg0: i32) -> (i32, i32) {
    %c0_i32 = arith.constant 0 : i32
    %c0_i32_0 = arith.constant 0 : i32
    %c0_i32_1 = arith.constant 0 : i32
    return %c0_i32, %c0_i32_0 : i32, i32
  }
  func.func @transform_14(%arg0: i32) -> (i32, i32) {
    %c0_i32 = arith.constant 0 : i32
    %c0_i32_0 = arith.constant 0 : i32
    %c0_i32_1 = arith.constant 0 : i32
    return %c0_i32, %c0_i32_0 : i32, i32
  }
  func.func @transform_15(%arg0: i32) -> (i32, i32) {
    %c0_i32 = arith.constant 0 : i32
    %c0_i32_0 = arith.constant 0 : i32
    %c0_i32_1 = arith.constant 0 : i32
    return %c0_i32, %c0_i32_0 : i32, i32
  }
  func.func @transform_16(%arg0: i32) -> (i32, i32, i32) {
    %c0_i32 = arith.constant 0 : i32
    %c0_i32_0 = arith.constant 0 : i32
    %c0_i32_1 = arith.constant 0 : i32
    %c0_i32_2 = arith.constant 0 : i32
    return %c0_i32, %c0_i32_0, %c0_i32_1 : i32, i32, i32
  }
  func.func @transform_17(%arg0: i32) -> (i32, i32) {
    %c0_i32 = arith.constant 0 : i32
    %c0_i32_0 = arith.constant 0 : i32
    %c0_i32_1 = arith.constant 0 : i32
    return %c0_i32, %c0_i32_0 : i32, i32
  }
}

module attributes {stable_mosaic.version = 11 : i64} {
  func.func @_block_tail_kernel(%arg0: i32, %arg1: memref<32x64xf32, #tpu.memory_space<vmem>>, %arg2: memref<1x64xf32, #tpu.memory_space<vmem>>, %arg3: memref<1x64xf32, #tpu.memory_space<vmem>>, %arg4: memref<64x192xbf16, #tpu.memory_space<vmem>>, %arg5: memref<1x192xf32, #tpu.memory_space<vmem>>, %arg6: memref<64x64xbf16, #tpu.memory_space<vmem>>, %arg7: memref<1x64xf32, #tpu.memory_space<vmem>>, %arg8: memref<1x64xf32, #tpu.memory_space<vmem>>, %arg9: memref<1x64xf32, #tpu.memory_space<vmem>>, %arg10: memref<64x256xbf16, #tpu.memory_space<vmem>>, %arg11: memref<1x256xf32, #tpu.memory_space<vmem>>, %arg12: memref<256x64xbf16, #tpu.memory_space<vmem>>, %arg13: memref<1x64xf32, #tpu.memory_space<vmem>>, %arg14: memref<4x32x32xf32, #tpu.memory_space<vmem>>, %arg15: memref<2x32xf32, #tpu.memory_space<vmem>>, %arg16: memref<1x64xf32, #tpu.memory_space<vmem>>, %arg17: memref<1x64xf32, #tpu.memory_space<vmem>>, %arg18: memref<64x10xbf16, #tpu.memory_space<vmem>>, %arg19: memref<1x10xf32, #tpu.memory_space<vmem>>, %arg20: memref<2x10xf32, #tpu.memory_space<vmem>>) attributes {dimension_semantics = [#tpu.dimension_semantics<arbitrary>], iteration_bounds = array<i64: 1>, scalar_prefetch = 0 : i64, scratch_operands = 0 : i64, tpu.core_type = #tpu.core_type<tc>, window_params = [{pipeline_mode = #tpu.pipeline_mode<synchronous>, transform_indices = @transform_0, window_bounds = array<i64: 32, 64>}, {pipeline_mode = #tpu.pipeline_mode<synchronous>, transform_indices = @transform_1, window_bounds = array<i64: 1, 64>}, {pipeline_mode = #tpu.pipeline_mode<synchronous>, transform_indices = @transform_2, window_bounds = array<i64: 1, 64>}, {pipeline_mode = #tpu.pipeline_mode<synchronous>, transform_indices = @transform_3, window_bounds = array<i64: 64, 192>}, {pipeline_mode = #tpu.pipeline_mode<synchronous>, transform_indices = @transform_4, window_bounds = array<i64: 1, 192>}, {pipeline_mode = #tpu.pipeline_mode<synchronous>, transform_indices = @transform_5, window_bounds = array<i64: 64, 64>}, {pipeline_mode = #tpu.pipeline_mode<synchronous>, transform_indices = @transform_6, window_bounds = array<i64: 1, 64>}, {pipeline_mode = #tpu.pipeline_mode<synchronous>, transform_indices = @transform_7, window_bounds = array<i64: 1, 64>}, {pipeline_mode = #tpu.pipeline_mode<synchronous>, transform_indices = @transform_8, window_bounds = array<i64: 1, 64>}, {pipeline_mode = #tpu.pipeline_mode<synchronous>, transform_indices = @transform_9, window_bounds = array<i64: 64, 256>}, {pipeline_mode = #tpu.pipeline_mode<synchronous>, transform_indices = @transform_10, window_bounds = array<i64: 1, 256>}, {pipeline_mode = #tpu.pipeline_mode<synchronous>, transform_indices = @transform_11, window_bounds = array<i64: 256, 64>}, {pipeline_mode = #tpu.pipeline_mode<synchronous>, transform_indices = @transform_12, window_bounds = array<i64: 1, 64>}, {pipeline_mode = #tpu.pipeline_mode<synchronous>, transform_indices = @transform_13, window_bounds = array<i64: 4, 32, 32>}, {pipeline_mode = #tpu.pipeline_mode<synchronous>, transform_indices = @transform_14, window_bounds = array<i64: 2, 32>}, {pipeline_mode = #tpu.pipeline_mode<synchronous>, transform_indices = @transform_15, window_bounds = array<i64: 1, 64>}, {pipeline_mode = #tpu.pipeline_mode<synchronous>, transform_indices = @transform_16, window_bounds = array<i64: 1, 64>}, {pipeline_mode = #tpu.pipeline_mode<synchronous>, transform_indices = @transform_17, window_bounds = array<i64: 64, 10>}, {pipeline_mode = #tpu.pipeline_mode<synchronous>, transform_indices = @transform_18, window_bounds = array<i64: 1, 10>}, {pipeline_mode = #tpu.pipeline_mode<synchronous>, transform_indices = @transform_19, window_bounds = array<i64: 2, 10>}]} {
    %c0 = arith.constant 0 : index
    %c0_0 = arith.constant 0 : index
    %0 = vector.load %arg1[%c0, %c0_0] : memref<32x64xf32, #tpu.memory_space<vmem>>, vector<32x64xf32>
    %c0_1 = arith.constant 0 : index
    %c0_2 = arith.constant 0 : index
    %1 = vector.load %arg2[%c0_1, %c0_2] : memref<1x64xf32, #tpu.memory_space<vmem>>, vector<1x64xf32>
    %c0_3 = arith.constant 0 : index
    %c0_4 = arith.constant 0 : index
    %2 = vector.load %arg3[%c0_3, %c0_4] : memref<1x64xf32, #tpu.memory_space<vmem>>, vector<1x64xf32>
    %c0_5 = arith.constant 0 : index
    %c0_6 = arith.constant 0 : index
    %3 = vector.load %arg4[%c0_5, %c0_6] : memref<64x192xbf16, #tpu.memory_space<vmem>>, vector<64x192xbf16>
    %c0_7 = arith.constant 0 : index
    %c0_8 = arith.constant 0 : index
    %4 = vector.load %arg5[%c0_7, %c0_8] : memref<1x192xf32, #tpu.memory_space<vmem>>, vector<1x192xf32>
    %c0_9 = arith.constant 0 : index
    %c0_10 = arith.constant 0 : index
    %5 = vector.load %arg6[%c0_9, %c0_10] : memref<64x64xbf16, #tpu.memory_space<vmem>>, vector<64x64xbf16>
    %c0_11 = arith.constant 0 : index
    %c0_12 = arith.constant 0 : index
    %6 = vector.load %arg7[%c0_11, %c0_12] : memref<1x64xf32, #tpu.memory_space<vmem>>, vector<1x64xf32>
    %c0_13 = arith.constant 0 : index
    %c0_14 = arith.constant 0 : index
    %7 = vector.load %arg8[%c0_13, %c0_14] : memref<1x64xf32, #tpu.memory_space<vmem>>, vector<1x64xf32>
    %c0_15 = arith.constant 0 : index
    %c0_16 = arith.constant 0 : index
    %8 = vector.load %arg9[%c0_15, %c0_16] : memref<1x64xf32, #tpu.memory_space<vmem>>, vector<1x64xf32>
    %c0_17 = arith.constant 0 : index
    %c0_18 = arith.constant 0 : index
    %9 = vector.load %arg10[%c0_17, %c0_18] : memref<64x256xbf16, #tpu.memory_space<vmem>>, vector<64x256xbf16>
    %c0_19 = arith.constant 0 : index
    %c0_20 = arith.constant 0 : index
    %10 = vector.load %arg11[%c0_19, %c0_20] : memref<1x256xf32, #tpu.memory_space<vmem>>, vector<1x256xf32>
    %c0_21 = arith.constant 0 : index
    %c0_22 = arith.constant 0 : index
    %11 = vector.load %arg12[%c0_21, %c0_22] : memref<256x64xbf16, #tpu.memory_space<vmem>>, vector<256x64xbf16>
    %c0_23 = arith.constant 0 : index
    %c0_24 = arith.constant 0 : index
    %12 = vector.load %arg13[%c0_23, %c0_24] : memref<1x64xf32, #tpu.memory_space<vmem>>, vector<1x64xf32>
    %cst = arith.constant dense<0.000000e+00> : vector<32xf32>
    %13 = vector.multi_reduction <add>, %0, %cst [1] : vector<32x64xf32> to vector<32xf32>
    %14 = vector.shape_cast %13 : vector<32xf32> to vector<32x1xf32>
    %cst_25 = arith.constant 6.400000e+01 : f32
    %15 = vector.broadcast %cst_25 : f32 to vector<32x1xf32>
    %16 = arith.divf %14, %15 : vector<32x1xf32>
    %17 = vector.broadcast %16 : vector<32x1xf32> to vector<32x64xf32>
    %18 = arith.subf %0, %17 : vector<32x64xf32>
    %19 = arith.mulf %18, %18 : vector<32x64xf32>
    %cst_26 = arith.constant dense<0.000000e+00> : vector<32xf32>
    %20 = vector.multi_reduction <add>, %19, %cst_26 [1] : vector<32x64xf32> to vector<32xf32>
    %21 = vector.shape_cast %20 : vector<32xf32> to vector<32x1xf32>
    %cst_27 = arith.constant 6.400000e+01 : f32
    %22 = vector.broadcast %cst_27 : f32 to vector<32x1xf32>
    %23 = arith.divf %21, %22 : vector<32x1xf32>
    %24 = vector.broadcast %16 : vector<32x1xf32> to vector<32x64xf32>
    %25 = arith.subf %0, %24 : vector<32x64xf32>
    %cst_28 = arith.constant 9.99999974E-6 : f32
    %26 = vector.broadcast %cst_28 : f32 to vector<32x1xf32>
    %27 = arith.addf %23, %26 : vector<32x1xf32>
    %28 = math.rsqrt %27 : vector<32x1xf32>
    %29 = vector.broadcast %28 : vector<32x1xf32> to vector<32x64xf32>
    %30 = arith.mulf %25, %29 : vector<32x64xf32>
    %31 = vector.broadcast %1 : vector<1x64xf32> to vector<32x64xf32>
    %32 = arith.mulf %30, %31 : vector<32x64xf32>
    %33 = vector.broadcast %2 : vector<1x64xf32> to vector<32x64xf32>
    %34 = arith.addf %32, %33 : vector<32x64xf32>
    %35 = arith.truncf %34 : vector<32x64xf32> to vector<32x64xbf16>
    %cst_29 = arith.constant dense<0.000000e+00> : vector<32x192xf32>
    %36 = tpu.matmul %35, %3, %cst_29 {dimension_numbers = #tpu.dot_dimension_numbers<[1], [0], [0], [1], [0, 0, 1, 1], [], []>} : vector<32x64xbf16>, vector<64x192xbf16>, vector<32x192xf32> -> vector<32x192xf32>
    %37 = vector.broadcast %4 : vector<1x192xf32> to vector<32x192xf32>
    %38 = arith.addf %36, %37 : vector<32x192xf32>
    %39 = vector.extract_strided_slice %38 {offsets = [0, 0], sizes = [32, 16], strides = [1, 1]} : vector<32x192xf32> to vector<32x16xf32>
    %40 = vector.extract_strided_slice %38 {offsets = [0, 64], sizes = [32, 16], strides = [1, 1]} : vector<32x192xf32> to vector<32x16xf32>
    %41 = vector.extract_strided_slice %38 {offsets = [0, 128], sizes = [32, 16], strides = [1, 1]} : vector<32x192xf32> to vector<32x16xf32>
    %42 = arith.truncf %39 : vector<32x16xf32> to vector<32x16xbf16>
    %43 = arith.truncf %40 : vector<32x16xf32> to vector<32x16xbf16>
    %cst_30 = arith.constant dense<0.000000e+00> : vector<32x32xf32>
    %44 = tpu.matmul %42, %43, %cst_30 {dimension_numbers = #tpu.dot_dimension_numbers<[1], [1], [0], [0], [0, 0, 1, 0], [], []>} : vector<32x16xbf16>, vector<32x16xbf16>, vector<32x32xf32> -> vector<32x32xf32>
    %cst_31 = arith.constant 2.500000e-01 : f32
    %45 = vector.broadcast %cst_31 : f32 to vector<32x32xf32>
    %46 = arith.mulf %44, %45 : vector<32x32xf32>
    %c0_32 = arith.constant 0 : index
    %c0_33 = arith.constant 0 : index
    %c0_34 = arith.constant 0 : index
    %47 = vector.load %arg14[%c0_32, %c0_33, %c0_34] : memref<4x32x32xf32, #tpu.memory_space<vmem>>, vector<1x32x32xf32>
    %48 = vector.shape_cast %47 : vector<1x32x32xf32> to vector<32x32xf32>
    %49 = arith.addf %46, %48 : vector<32x32xf32>
    %cst_35 = arith.constant dense<0xFF800000> : vector<32xf32>
    %50 = vector.multi_reduction <maximumf>, %49, %cst_35 [1] : vector<32x32xf32> to vector<32xf32>
    %51 = vector.shape_cast %50 : vector<32xf32> to vector<32x1xf32>
    %52 = vector.broadcast %51 : vector<32x1xf32> to vector<32x32xf32>
    %53 = arith.subf %49, %52 : vector<32x32xf32>
    %54 = math.exp %53 : vector<32x32xf32>
    %cst_36 = arith.constant dense<0.000000e+00> : vector<32xf32>
    %55 = vector.multi_reduction <add>, %54, %cst_36 [1] : vector<32x32xf32> to vector<32xf32>
    %56 = vector.shape_cast %55 : vector<32xf32> to vector<32x1xf32>
    %57 = tpu.reciprocal %56 {approx = true} : vector<32x1xf32> -> vector<32x1xf32>
    %58 = vector.broadcast %57 : vector<32x1xf32> to vector<32x32xf32>
    %59 = arith.mulf %54, %58 : vector<32x32xf32>
    %60 = arith.truncf %59 : vector<32x32xf32> to vector<32x32xbf16>
    %61 = arith.truncf %41 : vector<32x16xf32> to vector<32x16xbf16>
    %cst_37 = arith.constant dense<0.000000e+00> : vector<32x16xf32>
    %62 = tpu.matmul %60, %61, %cst_37 {dimension_numbers = #tpu.dot_dimension_numbers<[1], [0], [0], [1], [0, 0, 1, 1], [], []>} : vector<32x32xbf16>, vector<32x16xbf16>, vector<32x16xf32> -> vector<32x16xf32>
    %63 = vector.extract_strided_slice %38 {offsets = [0, 16], sizes = [32, 16], strides = [1, 1]} : vector<32x192xf32> to vector<32x16xf32>
    %64 = vector.extract_strided_slice %38 {offsets = [0, 80], sizes = [32, 16], strides = [1, 1]} : vector<32x192xf32> to vector<32x16xf32>
    %65 = vector.extract_strided_slice %38 {offsets = [0, 144], sizes = [32, 16], strides = [1, 1]} : vector<32x192xf32> to vector<32x16xf32>
    %66 = arith.truncf %63 : vector<32x16xf32> to vector<32x16xbf16>
    %67 = arith.truncf %64 : vector<32x16xf32> to vector<32x16xbf16>
    %cst_38 = arith.constant dense<0.000000e+00> : vector<32x32xf32>
    %68 = tpu.matmul %66, %67, %cst_38 {dimension_numbers = #tpu.dot_dimension_numbers<[1], [1], [0], [0], [0, 0, 1, 0], [], []>} : vector<32x16xbf16>, vector<32x16xbf16>, vector<32x32xf32> -> vector<32x32xf32>
    %cst_39 = arith.constant 2.500000e-01 : f32
    %69 = vector.broadcast %cst_39 : f32 to vector<32x32xf32>
    %70 = arith.mulf %68, %69 : vector<32x32xf32>
    %c1 = arith.constant 1 : index
    %c0_40 = arith.constant 0 : index
    %c0_41 = arith.constant 0 : index
    %71 = vector.load %arg14[%c1, %c0_40, %c0_41] : memref<4x32x32xf32, #tpu.memory_space<vmem>>, vector<1x32x32xf32>
    %72 = vector.shape_cast %71 : vector<1x32x32xf32> to vector<32x32xf32>
    %73 = arith.addf %70, %72 : vector<32x32xf32>
    %cst_42 = arith.constant dense<0xFF800000> : vector<32xf32>
    %74 = vector.multi_reduction <maximumf>, %73, %cst_42 [1] : vector<32x32xf32> to vector<32xf32>
    %75 = vector.shape_cast %74 : vector<32xf32> to vector<32x1xf32>
    %76 = vector.broadcast %75 : vector<32x1xf32> to vector<32x32xf32>
    %77 = arith.subf %73, %76 : vector<32x32xf32>
    %78 = math.exp %77 : vector<32x32xf32>
    %cst_43 = arith.constant dense<0.000000e+00> : vector<32xf32>
    %79 = vector.multi_reduction <add>, %78, %cst_43 [1] : vector<32x32xf32> to vector<32xf32>
    %80 = vector.shape_cast %79 : vector<32xf32> to vector<32x1xf32>
    %81 = tpu.reciprocal %80 {approx = true} : vector<32x1xf32> -> vector<32x1xf32>
    %82 = vector.broadcast %81 : vector<32x1xf32> to vector<32x32xf32>
    %83 = arith.mulf %78, %82 : vector<32x32xf32>
    %84 = arith.truncf %83 : vector<32x32xf32> to vector<32x32xbf16>
    %85 = arith.truncf %65 : vector<32x16xf32> to vector<32x16xbf16>
    %cst_44 = arith.constant dense<0.000000e+00> : vector<32x16xf32>
    %86 = tpu.matmul %84, %85, %cst_44 {dimension_numbers = #tpu.dot_dimension_numbers<[1], [0], [0], [1], [0, 0, 1, 1], [], []>} : vector<32x32xbf16>, vector<32x16xbf16>, vector<32x16xf32> -> vector<32x16xf32>
    %87 = vector.extract_strided_slice %38 {offsets = [0, 32], sizes = [32, 16], strides = [1, 1]} : vector<32x192xf32> to vector<32x16xf32>
    %88 = vector.extract_strided_slice %38 {offsets = [0, 96], sizes = [32, 16], strides = [1, 1]} : vector<32x192xf32> to vector<32x16xf32>
    %89 = vector.extract_strided_slice %38 {offsets = [0, 160], sizes = [32, 16], strides = [1, 1]} : vector<32x192xf32> to vector<32x16xf32>
    %90 = arith.truncf %87 : vector<32x16xf32> to vector<32x16xbf16>
    %91 = arith.truncf %88 : vector<32x16xf32> to vector<32x16xbf16>
    %cst_45 = arith.constant dense<0.000000e+00> : vector<32x32xf32>
    %92 = tpu.matmul %90, %91, %cst_45 {dimension_numbers = #tpu.dot_dimension_numbers<[1], [1], [0], [0], [0, 0, 1, 0], [], []>} : vector<32x16xbf16>, vector<32x16xbf16>, vector<32x32xf32> -> vector<32x32xf32>
    %cst_46 = arith.constant 2.500000e-01 : f32
    %93 = vector.broadcast %cst_46 : f32 to vector<32x32xf32>
    %94 = arith.mulf %92, %93 : vector<32x32xf32>
    %c2 = arith.constant 2 : index
    %c0_47 = arith.constant 0 : index
    %c0_48 = arith.constant 0 : index
    %95 = vector.load %arg14[%c2, %c0_47, %c0_48] : memref<4x32x32xf32, #tpu.memory_space<vmem>>, vector<1x32x32xf32>
    %96 = vector.shape_cast %95 : vector<1x32x32xf32> to vector<32x32xf32>
    %97 = arith.addf %94, %96 : vector<32x32xf32>
    %cst_49 = arith.constant dense<0xFF800000> : vector<32xf32>
    %98 = vector.multi_reduction <maximumf>, %97, %cst_49 [1] : vector<32x32xf32> to vector<32xf32>
    %99 = vector.shape_cast %98 : vector<32xf32> to vector<32x1xf32>
    %100 = vector.broadcast %99 : vector<32x1xf32> to vector<32x32xf32>
    %101 = arith.subf %97, %100 : vector<32x32xf32>
    %102 = math.exp %101 : vector<32x32xf32>
    %cst_50 = arith.constant dense<0.000000e+00> : vector<32xf32>
    %103 = vector.multi_reduction <add>, %102, %cst_50 [1] : vector<32x32xf32> to vector<32xf32>
    %104 = vector.shape_cast %103 : vector<32xf32> to vector<32x1xf32>
    %105 = tpu.reciprocal %104 {approx = true} : vector<32x1xf32> -> vector<32x1xf32>
    %106 = vector.broadcast %105 : vector<32x1xf32> to vector<32x32xf32>
    %107 = arith.mulf %102, %106 : vector<32x32xf32>
    %108 = arith.truncf %107 : vector<32x32xf32> to vector<32x32xbf16>
    %109 = arith.truncf %89 : vector<32x16xf32> to vector<32x16xbf16>
    %cst_51 = arith.constant dense<0.000000e+00> : vector<32x16xf32>
    %110 = tpu.matmul %108, %109, %cst_51 {dimension_numbers = #tpu.dot_dimension_numbers<[1], [0], [0], [1], [0, 0, 1, 1], [], []>} : vector<32x32xbf16>, vector<32x16xbf16>, vector<32x16xf32> -> vector<32x16xf32>
    %111 = vector.extract_strided_slice %38 {offsets = [0, 48], sizes = [32, 16], strides = [1, 1]} : vector<32x192xf32> to vector<32x16xf32>
    %112 = vector.extract_strided_slice %38 {offsets = [0, 112], sizes = [32, 16], strides = [1, 1]} : vector<32x192xf32> to vector<32x16xf32>
    %113 = vector.extract_strided_slice %38 {offsets = [0, 176], sizes = [32, 16], strides = [1, 1]} : vector<32x192xf32> to vector<32x16xf32>
    %114 = arith.truncf %111 : vector<32x16xf32> to vector<32x16xbf16>
    %115 = arith.truncf %112 : vector<32x16xf32> to vector<32x16xbf16>
    %cst_52 = arith.constant dense<0.000000e+00> : vector<32x32xf32>
    %116 = tpu.matmul %114, %115, %cst_52 {dimension_numbers = #tpu.dot_dimension_numbers<[1], [1], [0], [0], [0, 0, 1, 0], [], []>} : vector<32x16xbf16>, vector<32x16xbf16>, vector<32x32xf32> -> vector<32x32xf32>
    %cst_53 = arith.constant 2.500000e-01 : f32
    %117 = vector.broadcast %cst_53 : f32 to vector<32x32xf32>
    %118 = arith.mulf %116, %117 : vector<32x32xf32>
    %c3 = arith.constant 3 : index
    %c0_54 = arith.constant 0 : index
    %c0_55 = arith.constant 0 : index
    %119 = vector.load %arg14[%c3, %c0_54, %c0_55] : memref<4x32x32xf32, #tpu.memory_space<vmem>>, vector<1x32x32xf32>
    %120 = vector.shape_cast %119 : vector<1x32x32xf32> to vector<32x32xf32>
    %121 = arith.addf %118, %120 : vector<32x32xf32>
    %cst_56 = arith.constant dense<0xFF800000> : vector<32xf32>
    %122 = vector.multi_reduction <maximumf>, %121, %cst_56 [1] : vector<32x32xf32> to vector<32xf32>
    %123 = vector.shape_cast %122 : vector<32xf32> to vector<32x1xf32>
    %124 = vector.broadcast %123 : vector<32x1xf32> to vector<32x32xf32>
    %125 = arith.subf %121, %124 : vector<32x32xf32>
    %126 = math.exp %125 : vector<32x32xf32>
    %cst_57 = arith.constant dense<0.000000e+00> : vector<32xf32>
    %127 = vector.multi_reduction <add>, %126, %cst_57 [1] : vector<32x32xf32> to vector<32xf32>
    %128 = vector.shape_cast %127 : vector<32xf32> to vector<32x1xf32>
    %129 = tpu.reciprocal %128 {approx = true} : vector<32x1xf32> -> vector<32x1xf32>
    %130 = vector.broadcast %129 : vector<32x1xf32> to vector<32x32xf32>
    %131 = arith.mulf %126, %130 : vector<32x32xf32>
    %132 = arith.truncf %131 : vector<32x32xf32> to vector<32x32xbf16>
    %133 = arith.truncf %113 : vector<32x16xf32> to vector<32x16xbf16>
    %cst_58 = arith.constant dense<0.000000e+00> : vector<32x16xf32>
    %134 = tpu.matmul %132, %133, %cst_58 {dimension_numbers = #tpu.dot_dimension_numbers<[1], [0], [0], [1], [0, 0, 1, 1], [], []>} : vector<32x32xbf16>, vector<32x16xbf16>, vector<32x16xf32> -> vector<32x16xf32>
    %135 = tpu.concatenate %62, %86, %110, %134 in 1 : vector<32x16xf32>, vector<32x16xf32>, vector<32x16xf32>, vector<32x16xf32> -> vector<32x64xf32>
    %136 = arith.truncf %135 : vector<32x64xf32> to vector<32x64xbf16>
    %cst_59 = arith.constant dense<0.000000e+00> : vector<32x64xf32>
    %137 = tpu.matmul %136, %5, %cst_59 {dimension_numbers = #tpu.dot_dimension_numbers<[1], [0], [0], [1], [0, 0, 1, 1], [], []>} : vector<32x64xbf16>, vector<64x64xbf16>, vector<32x64xf32> -> vector<32x64xf32>
    %138 = vector.broadcast %6 : vector<1x64xf32> to vector<32x64xf32>
    %139 = arith.addf %137, %138 : vector<32x64xf32>
    %140 = arith.addf %0, %139 : vector<32x64xf32>
    %cst_60 = arith.constant dense<0.000000e+00> : vector<32xf32>
    %141 = vector.multi_reduction <add>, %140, %cst_60 [1] : vector<32x64xf32> to vector<32xf32>
    %142 = vector.shape_cast %141 : vector<32xf32> to vector<32x1xf32>
    %cst_61 = arith.constant 6.400000e+01 : f32
    %143 = vector.broadcast %cst_61 : f32 to vector<32x1xf32>
    %144 = arith.divf %142, %143 : vector<32x1xf32>
    %145 = vector.broadcast %144 : vector<32x1xf32> to vector<32x64xf32>
    %146 = arith.subf %140, %145 : vector<32x64xf32>
    %147 = arith.mulf %146, %146 : vector<32x64xf32>
    %cst_62 = arith.constant dense<0.000000e+00> : vector<32xf32>
    %148 = vector.multi_reduction <add>, %147, %cst_62 [1] : vector<32x64xf32> to vector<32xf32>
    %149 = vector.shape_cast %148 : vector<32xf32> to vector<32x1xf32>
    %cst_63 = arith.constant 6.400000e+01 : f32
    %150 = vector.broadcast %cst_63 : f32 to vector<32x1xf32>
    %151 = arith.divf %149, %150 : vector<32x1xf32>
    %152 = vector.broadcast %144 : vector<32x1xf32> to vector<32x64xf32>
    %153 = arith.subf %140, %152 : vector<32x64xf32>
    %cst_64 = arith.constant 9.99999974E-6 : f32
    %154 = vector.broadcast %cst_64 : f32 to vector<32x1xf32>
    %155 = arith.addf %151, %154 : vector<32x1xf32>
    %156 = math.rsqrt %155 : vector<32x1xf32>
    %157 = vector.broadcast %156 : vector<32x1xf32> to vector<32x64xf32>
    %158 = arith.mulf %153, %157 : vector<32x64xf32>
    %159 = vector.broadcast %7 : vector<1x64xf32> to vector<32x64xf32>
    %160 = arith.mulf %158, %159 : vector<32x64xf32>
    %161 = vector.broadcast %8 : vector<1x64xf32> to vector<32x64xf32>
    %162 = arith.addf %160, %161 : vector<32x64xf32>
    %163 = arith.truncf %162 : vector<32x64xf32> to vector<32x64xbf16>
    %cst_65 = arith.constant dense<0.000000e+00> : vector<32x256xf32>
    %164 = tpu.matmul %163, %9, %cst_65 {dimension_numbers = #tpu.dot_dimension_numbers<[1], [0], [0], [1], [0, 0, 1, 1], [], []>} : vector<32x64xbf16>, vector<64x256xbf16>, vector<32x256xf32> -> vector<32x256xf32>
    %165 = vector.broadcast %10 : vector<1x256xf32> to vector<32x256xf32>
    %166 = arith.addf %164, %165 : vector<32x256xf32>
    %167 = arith.mulf %166, %166 : vector<32x256xf32>
    %168 = arith.mulf %166, %167 : vector<32x256xf32>
    %cst_66 = arith.constant 4.471500e-02 : f32
    %169 = vector.broadcast %cst_66 : f32 to vector<32x256xf32>
    %170 = arith.mulf %169, %168 : vector<32x256xf32>
    %171 = arith.addf %166, %170 : vector<32x256xf32>
    %cst_67 = arith.constant 0.797884583 : f32
    %172 = vector.broadcast %cst_67 : f32 to vector<32x256xf32>
    %173 = arith.mulf %172, %171 : vector<32x256xf32>
    %174 = math.tanh %173 : vector<32x256xf32>
    %cst_68 = arith.constant 1.000000e+00 : f32
    %175 = vector.broadcast %cst_68 : f32 to vector<32x256xf32>
    %176 = arith.addf %175, %174 : vector<32x256xf32>
    %cst_69 = arith.constant 5.000000e-01 : f32
    %177 = vector.broadcast %cst_69 : f32 to vector<32x256xf32>
    %178 = arith.mulf %177, %176 : vector<32x256xf32>
    %179 = arith.mulf %166, %178 : vector<32x256xf32>
    %180 = arith.truncf %179 : vector<32x256xf32> to vector<32x256xbf16>
    %cst_70 = arith.constant dense<0.000000e+00> : vector<32x64xf32>
    %181 = tpu.matmul %180, %11, %cst_70 {dimension_numbers = #tpu.dot_dimension_numbers<[1], [0], [0], [1], [0, 0, 1, 1], [], []>} : vector<32x256xbf16>, vector<256x64xbf16>, vector<32x64xf32> -> vector<32x64xf32>
    %182 = arith.addf %140, %181 : vector<32x64xf32>
    %183 = vector.broadcast %12 : vector<1x64xf32> to vector<32x64xf32>
    %184 = arith.addf %182, %183 : vector<32x64xf32>
    %c0_71 = arith.constant 0 : index
    %c0_72 = arith.constant 0 : index
    %185 = vector.load %arg16[%c0_71, %c0_72] : memref<1x64xf32, #tpu.memory_space<vmem>>, vector<1x64xf32>
    %c0_73 = arith.constant 0 : index
    %c0_74 = arith.constant 0 : index
    %186 = vector.load %arg17[%c0_73, %c0_74] : memref<1x64xf32, #tpu.memory_space<vmem>>, vector<1x64xf32>
    %cst_75 = arith.constant dense<0.000000e+00> : vector<32xf32>
    %187 = vector.multi_reduction <add>, %184, %cst_75 [1] : vector<32x64xf32> to vector<32xf32>
    %188 = vector.shape_cast %187 : vector<32xf32> to vector<32x1xf32>
    %cst_76 = arith.constant 6.400000e+01 : f32
    %189 = vector.broadcast %cst_76 : f32 to vector<32x1xf32>
    %190 = arith.divf %188, %189 : vector<32x1xf32>
    %191 = vector.broadcast %190 : vector<32x1xf32> to vector<32x64xf32>
    %192 = arith.subf %184, %191 : vector<32x64xf32>
    %193 = arith.mulf %192, %192 : vector<32x64xf32>
    %cst_77 = arith.constant dense<0.000000e+00> : vector<32xf32>
    %194 = vector.multi_reduction <add>, %193, %cst_77 [1] : vector<32x64xf32> to vector<32xf32>
    %195 = vector.shape_cast %194 : vector<32xf32> to vector<32x1xf32>
    %cst_78 = arith.constant 6.400000e+01 : f32
    %196 = vector.broadcast %cst_78 : f32 to vector<32x1xf32>
    %197 = arith.divf %195, %196 : vector<32x1xf32>
    %198 = vector.broadcast %190 : vector<32x1xf32> to vector<32x64xf32>
    %199 = arith.subf %184, %198 : vector<32x64xf32>
    %cst_79 = arith.constant 9.99999974E-6 : f32
    %200 = vector.broadcast %cst_79 : f32 to vector<32x1xf32>
    %201 = arith.addf %197, %200 : vector<32x1xf32>
    %202 = math.rsqrt %201 : vector<32x1xf32>
    %203 = vector.broadcast %202 : vector<32x1xf32> to vector<32x64xf32>
    %204 = arith.mulf %199, %203 : vector<32x64xf32>
    %205 = vector.broadcast %185 : vector<1x64xf32> to vector<32x64xf32>
    %206 = arith.mulf %204, %205 : vector<32x64xf32>
    %207 = vector.broadcast %186 : vector<1x64xf32> to vector<32x64xf32>
    %208 = arith.addf %206, %207 : vector<32x64xf32>
    %c0_80 = arith.constant 0 : index
    %c0_81 = arith.constant 0 : index
    %209 = vector.load %arg15[%c0_80, %c0_81] : memref<2x32xf32, #tpu.memory_space<vmem>>, vector<2x32xf32>
    %cst_82 = arith.constant dense<0.000000e+00> : vector<2x64xf32>
    %210 = tpu.matmul %209, %208, %cst_82 {dimension_numbers = #tpu.dot_dimension_numbers<[1], [0], [0], [1], [0, 0, 1, 1], [], []>} : vector<2x32xf32>, vector<32x64xf32>, vector<2x64xf32> -> vector<2x64xf32>
    %c0_83 = arith.constant 0 : index
    %c0_84 = arith.constant 0 : index
    %211 = vector.load %arg18[%c0_83, %c0_84] : memref<64x10xbf16, #tpu.memory_space<vmem>>, vector<64x10xbf16>
    %212 = arith.truncf %210 : vector<2x64xf32> to vector<2x64xbf16>
    %cst_85 = arith.constant dense<0.000000e+00> : vector<2x10xf32>
    %213 = tpu.matmul %212, %211, %cst_85 {dimension_numbers = #tpu.dot_dimension_numbers<[1], [0], [0], [1], [0, 0, 1, 1], [], []>} : vector<2x64xbf16>, vector<64x10xbf16>, vector<2x10xf32> -> vector<2x10xf32>
    %c0_86 = arith.constant 0 : index
    %c0_87 = arith.constant 0 : index
    %214 = vector.load %arg19[%c0_86, %c0_87] : memref<1x10xf32, #tpu.memory_space<vmem>>, vector<1x10xf32>
    %215 = vector.broadcast %214 : vector<1x10xf32> to vector<2x10xf32>
    %216 = arith.addf %213, %215 : vector<2x10xf32>
    %c0_88 = arith.constant 0 : index
    %c0_89 = arith.constant 0 : index
    %217 = vector.load %arg20[%c0_88, %c0_89] : memref<2x10xf32, #tpu.memory_space<vmem>>, vector<2x10xf32>
    tpu.vector_store %arg20[%c0_88, %c0_89], %216 {strides = array<i32>} : memref<2x10xf32, #tpu.memory_space<vmem>>, vector<2x10xf32>,
    return
  }
  func.func @transform_0(%arg0: i32) -> (i32, i32) {
    %c0_i32 = arith.constant 0 : i32
    %c0_i32_0 = arith.constant 0 : i32
    %c0_i32_1 = arith.constant 0 : i32
    return %c0_i32, %c0_i32_0 : i32, i32
  }
  func.func @transform_1(%arg0: i32) -> (i32, i32) {
    %c0_i32 = arith.constant 0 : i32
    %c0_i32_0 = arith.constant 0 : i32
    %c0_i32_1 = arith.constant 0 : i32
    return %c0_i32, %c0_i32_0 : i32, i32
  }
  func.func @transform_2(%arg0: i32) -> (i32, i32) {
    %c0_i32 = arith.constant 0 : i32
    %c0_i32_0 = arith.constant 0 : i32
    %c0_i32_1 = arith.constant 0 : i32
    return %c0_i32, %c0_i32_0 : i32, i32
  }
  func.func @transform_3(%arg0: i32) -> (i32, i32) {
    %c0_i32 = arith.constant 0 : i32
    %c0_i32_0 = arith.constant 0 : i32
    %c0_i32_1 = arith.constant 0 : i32
    return %c0_i32, %c0_i32_0 : i32, i32
  }
  func.func @transform_4(%arg0: i32) -> (i32, i32) {
    %c0_i32 = arith.constant 0 : i32
    %c0_i32_0 = arith.constant 0 : i32
    %c0_i32_1 = arith.constant 0 : i32
    return %c0_i32, %c0_i32_0 : i32, i32
  }
  func.func @transform_5(%arg0: i32) -> (i32, i32) {
    %c0_i32 = arith.constant 0 : i32
    %c0_i32_0 = arith.constant 0 : i32
    %c0_i32_1 = arith.constant 0 : i32
    return %c0_i32, %c0_i32_0 : i32, i32
  }
  func.func @transform_6(%arg0: i32) -> (i32, i32) {
    %c0_i32 = arith.constant 0 : i32
    %c0_i32_0 = arith.constant 0 : i32
    %c0_i32_1 = arith.constant 0 : i32
    return %c0_i32, %c0_i32_0 : i32, i32
  }
  func.func @transform_7(%arg0: i32) -> (i32, i32) {
    %c0_i32 = arith.constant 0 : i32
    %c0_i32_0 = arith.constant 0 : i32
    %c0_i32_1 = arith.constant 0 : i32
    return %c0_i32, %c0_i32_0 : i32, i32
  }
  func.func @transform_8(%arg0: i32) -> (i32, i32) {
    %c0_i32 = arith.constant 0 : i32
    %c0_i32_0 = arith.constant 0 : i32
    %c0_i32_1 = arith.constant 0 : i32
    return %c0_i32, %c0_i32_0 : i32, i32
  }
  func.func @transform_9(%arg0: i32) -> (i32, i32) {
    %c0_i32 = arith.constant 0 : i32
    %c0_i32_0 = arith.constant 0 : i32
    %c0_i32_1 = arith.constant 0 : i32
    return %c0_i32, %c0_i32_0 : i32, i32
  }
  func.func @transform_10(%arg0: i32) -> (i32, i32) {
    %c0_i32 = arith.constant 0 : i32
    %c0_i32_0 = arith.constant 0 : i32
    %c0_i32_1 = arith.constant 0 : i32
    return %c0_i32, %c0_i32_0 : i32, i32
  }
  func.func @transform_11(%arg0: i32) -> (i32, i32) {
    %c0_i32 = arith.constant 0 : i32
    %c0_i32_0 = arith.constant 0 : i32
    %c0_i32_1 = arith.constant 0 : i32
    return %c0_i32, %c0_i32_0 : i32, i32
  }
  func.func @transform_12(%arg0: i32) -> (i32, i32) {
    %c0_i32 = arith.constant 0 : i32
    %c0_i32_0 = arith.constant 0 : i32
    %c0_i32_1 = arith.constant 0 : i32
    return %c0_i32, %c0_i32_0 : i32, i32
  }
  func.func @transform_13(%arg0: i32) -> (i32, i32, i32) {
    %c0_i32 = arith.constant 0 : i32
    %c0_i32_0 = arith.constant 0 : i32
    %c0_i32_1 = arith.constant 0 : i32
    %c0_i32_2 = arith.constant 0 : i32
    return %c0_i32, %c0_i32_0, %c0_i32_1 : i32, i32, i32
  }
  func.func @transform_14(%arg0: i32) -> (i32, i32) {
    %c0_i32 = arith.constant 0 : i32
    %c0_i32_0 = arith.constant 0 : i32
    %c0_i32_1 = arith.constant 0 : i32
    return %c0_i32, %c0_i32_0 : i32, i32
  }
  func.func @transform_15(%arg0: i32) -> (i32, i32) {
    %c0_i32 = arith.constant 0 : i32
    %c0_i32_0 = arith.constant 0 : i32
    %c0_i32_1 = arith.constant 0 : i32
    return %c0_i32, %c0_i32_0 : i32, i32
  }
  func.func @transform_16(%arg0: i32) -> (i32, i32) {
    %c0_i32 = arith.constant 0 : i32
    %c0_i32_0 = arith.constant 0 : i32
    %c0_i32_1 = arith.constant 0 : i32
    return %c0_i32, %c0_i32_0 : i32, i32
  }
  func.func @transform_17(%arg0: i32) -> (i32, i32) {
    %c0_i32 = arith.constant 0 : i32
    %c0_i32_0 = arith.constant 0 : i32
    %c0_i32_1 = arith.constant 0 : i32
    return %c0_i32, %c0_i32_0 : i32, i32
  }
  func.func @transform_18(%arg0: i32) -> (i32, i32) {
    %c0_i32 = arith.constant 0 : i32
    %c0_i32_0 = arith.constant 0 : i32
    %c0_i32_1 = arith.constant 0 : i32
    return %c0_i32, %c0_i32_0 : i32, i32
  }
  func.func @transform_19(%arg0: i32) -> (i32, i32) {
    %c0_i32 = arith.constant 0 : i32
    %c0_i32_0 = arith.constant 0 : i32
    %c0_i32_1 = arith.constant 0 : i32
    return %c0_i32, %c0_i32_0 : i32, i32
  }
}

</mosaic_0001>

<bundles_post_ra>
// kernel: swin_forward.5
= control target key start
LH: loop header
LB: loop body
LE: loop exit
PB: predicated region body
PF: predicated region fallthrough
CT: control target
= control target key end

     0   :  { %vm100_vm0 = vcmask 261120   ;;  %vm533_vm1 = vcmask 130048   ;;  %s3236_s20 = smov 96   ;;  %s3238_s21 = smov 80   ;;  %s4685_s0 = inlined_call_operand.vmem [shape: f32[128,32], index: 0, kind: input, shape index: {}]   ;;  %s4686_s3 = inlined_call_operand.vmem [shape: bf16[32,96], index: 3, kind: input, shape index: {}]   ;;  %s4687_s1 = inlined_call_operand.vmem [shape: f32[1,32], index: 1, kind: input, shape index: {}]   ;;  %s4688_s2 = inlined_call_operand.vmem [shape: f32[1,32], index: 2, kind: input, shape index: {}]   ;;  %s4689_s4 = inlined_call_operand.vmem [shape: f32[1,96], index: 4, kind: input, shape index: {}]   ;;  %s4690_s13 = inlined_call_operand.vmem [shape: f32[2,128,128], index: 13, kind: input, shape index: {}]   ;;  %s4691_s5 = inlined_call_operand.vmem [shape: bf16[32,32], index: 5, kind: input, shape index: {}]   ;;  %s4692_s6 = inlined_call_operand.vmem [shape: f32[1,32], index: 6, kind: input, shape index: {}]   ;;  %s4693_s9 = inlined_call_operand.vmem [shape: bf16[32,128], index: 9, kind: input, shape index: {}]   ;;  %s4694_s7 = inlined_call_operand.vmem [shape: f32[1,32], index: 7, kind: input, shape index: {}]   ;;  %s4695_s8 = inlined_call_operand.vmem [shape: f32[1,32], index: 8, kind: input, shape index: {}]   ;;  %s4696_s11 = inlined_call_operand.vmem [shape: bf16[128,32], index: 11, kind: input, shape index: {}]   ;;  %s4697_s10 = inlined_call_operand.vmem [shape: f32[1,128], index: 10, kind: input, shape index: {}]   ;;  %s4698_s12 = inlined_call_operand.vmem [shape: f32[1,32], index: 12, kind: input, shape index: {}]   ;;  %s4699_s14 = inlined_call_operand.vmem [shape: f32[128,32], index: 14, kind: output, shape index: {}]  }
   0x1   :  { %v48_v0 = vld [vmem:[%s4685_s0] sm:$0xff]  ;;  %v50_v1 = vld [vmem:[%s4685_s0 + $0x10] sm:$0xff]  ;;  %v49_v2 = vld [vmem:[%s4685_s0 + $0x8] sm:$0xff]  ;;  %s3239_s18 = smov 112   ;;  %s3240_s19 = smov 48  }
   0x2   :  { %v101_v3 = vsel %vm100_vm0, %v48_v0, 0.0  ;;  %v107_v4 = vsel %vm100_vm0, %v50_v1, 0.0  ;;  %v51_v5 = vld [vmem:[%s4685_s0 + $0x18] sm:$0xff]  ;;  %v104_v6 = vsel %vm100_vm0, %v49_v2, 0.0  ;;  %v52_v8 = vld [vmem:[%s4685_s0 + $0x20] sm:$0xff]  ;;  %v53_v9 = vld [vmem:[%s4685_s0 + $0x28] sm:$0xff] }
   0x3   :  { %102 = vadd.xlane.f32.xlu0 %v101_v3  ;;  %108 = vadd.xlane.f32.xlu1 %v107_v4  ;;  %v110_v7 = vsel %vm100_vm0, %v51_v5, 0.0  ;;  %v113_v10 = vsel %vm100_vm0, %v52_v8, 0.0  ;;  %v116_v11 = vsel %vm100_vm0, %v53_v9, 0.0  ;;  %v3344_v12 = vld [vmem:[%s4685_s0 + $0x30] sm:$0xff]  ;;  %v3349_v13 = vld [vmem:[%s4685_s0 + $0x38] sm:$0xff]  ;;  %v3358_v16 = vld [vmem:[%s4685_s0 + $0x40] sm:$0xff] }
   0x4   :  { %v119_v14 = vsel %vm100_vm0, %v3344_v12, 0.0  ;;  %v122_v15 = vsel %vm100_vm0, %v3349_v13, 0.0  ;;  %v3363_v17 = vld [vmem:[%s4685_s0 + $0x48] sm:$0xff]  ;;  %v125_v18 = vsel %vm100_vm0, %v3358_v16, 0.0  ;;  %v3372_v20 = vld [vmem:[%s4685_s0 + $0x50] sm:$0xff]  ;;  %v3377_v21 = vld [vmem:[%s4685_s0 + $0x58] sm:$0xff] }
   0x5   :  { %v128_v19 = vsel %vm100_vm0, %v3363_v17, 0.0  ;;  %v131_v22 = vsel %vm100_vm0, %v3372_v20, 0.0  ;;  %v134_v23 = vsel %vm100_vm0, %v3377_v21, 0.0  ;;  %v3386_v24 = vld [vmem:[%s4685_s0 + $0x60] sm:$0xff]  ;;  %v3391_v25 = vld [vmem:[%s4685_s0 + $0x68] sm:$0xff]  ;;  %v3400_v28 = vld [vmem:[%s4685_s0 + $0x70] sm:$0xff] }
   0x6   :  { %v137_v26 = vsel %vm100_vm0, %v3386_v24, 0.0  ;;  %v140_v27 = vsel %vm100_vm0, %v3391_v25, 0.0  ;;  %v3405_v29 = vld [vmem:[%s4685_s0 + $0x78] sm:$0xff]  ;;  %v143_v30 = vsel %vm100_vm0, %v3400_v28, 0.0  ;;  %s3241_s16 = smov 16  }
   0x7   :  { %105 = vadd.xlane.f32.xlu0 %v104_v6  ;;  %111 = vadd.xlane.f32.xlu1 %v110_v7  ;;  %v146_v31 = vsel %vm100_vm0, %v3405_v29, 0.0 }
   0xb   :  { %114 = vadd.xlane.f32.xlu0 %v113_v10  ;;  %117 = vadd.xlane.f32.xlu1 %v116_v11 }
   0xf   :  { %120 = vadd.xlane.f32.xlu0 %v119_v14  ;;  %123 = vadd.xlane.f32.xlu1 %v122_v15 }
  0x13   :  { %126 = vadd.xlane.f32.xlu0 %v125_v18  ;;  %129 = vadd.xlane.f32.xlu1 %v128_v19 }
  0x17   :  { %132 = vadd.xlane.f32.xlu0 %v131_v22  ;;  %135 = vadd.xlane.f32.xlu1 %v134_v23 }
  0x1b   :  { %138 = vadd.xlane.f32.xlu0 %v137_v26  ;;  %141 = vadd.xlane.f32.xlu1 %v140_v27 }
  0x1f   :  { %144 = vadd.xlane.f32.xlu0 %v143_v30  ;;  %147 = vadd.xlane.f32.xlu1 %v146_v31 }
  0x90   :  { %v103_v32 = vpop.xlane.xlu0 %102  ;;  %v109_v33 = vpop.xlane.xlu1 %108 }
  0x91   :  { %v150_v34 = vmul.f32 0.03125, %v103_v32  ;;  %v152_v35 = vmul.f32 0.03125, %v109_v33 }
  0x93   :  { %v3411_v36 = vsub.f32 %v48_v0, %v150_v34  ;;  %v3413_v37 = vsub.f32 %v50_v1, %v152_v35 }
  0x94   :  { %v106_v38 = vpop.xlane.xlu0 %105  ;;  %v112_v39 = vpop.xlane.xlu1 %111 }
  0x95   :  { %v151_v40 = vmul.f32 0.03125, %v106_v38  ;;  %v153_v41 = vmul.f32 0.03125, %v112_v39  ;;  %v182_v42 = vmul.f32 %v3411_v36, %v3411_v36  ;;  %v184_v43 = vmul.f32 %v3413_v37, %v3413_v37 }
  0x97   :  { %v3419_v44 = vsub.f32 %v49_v2, %v151_v40  ;;  %v3421_v45 = vsub.f32 %v51_v5, %v153_v41  ;;  %v198_v46 = vsel %vm100_vm0, %v182_v42, 0.0  ;;  %v204_v49 = vsel %vm100_vm0, %v184_v43, 0.0 }
  0x98   :  { %199 = vadd.xlane.f32.xlu0 %v198_v46  ;;  %v115_v47 = vpop.xlane.xlu0 %114  ;;  %v118_v48 = vpop.xlane.xlu1 %117 }
  0x99   :  { %v154_v50 = vmul.f32 0.03125, %v115_v47  ;;  %v155_v51 = vmul.f32 0.03125, %v118_v48  ;;  %v183_v52 = vmul.f32 %v3419_v44, %v3419_v44  ;;  %v185_v53 = vmul.f32 %v3421_v45, %v3421_v45 }
  0x9b   :  { %v3429_v54 = vsub.f32 %v52_v8, %v154_v50  ;;  %v3431_v55 = vsub.f32 %v53_v9, %v155_v51  ;;  %v201_v56 = vsel %vm100_vm0, %v183_v52, 0.0  ;;  %v207_v59 = vsel %vm100_vm0, %v185_v53, 0.0  ;;  %v2983_v53 = vld [vmem:[%s4686_s3 + $0x8] sm:$0xff]  }
  0x9c   :  { %205 = vadd.xlane.f32.xlu0 %v204_v49  ;;  %202 = vadd.xlane.f32.xlu1 %v201_v56  ;;  %v121_v57 = vpop.xlane.xlu0 %120  ;;  %v124_v58 = vpop.xlane.xlu1 %123 }
  0x9d   :  { %v156_v60 = vmul.f32 0.03125, %v121_v57  ;;  %v157_v61 = vmul.f32 0.03125, %v124_v58  ;;  %v186_v62 = vmul.f32 %v3429_v54, %v3429_v54  ;;  %v187_v63 = vmul.f32 %v3431_v55, %v3431_v55 }
  0x9f   :  { %v3440_v0 = vsub.f32 %v3344_v12, %v156_v60  ;;  %v3443_v1 = vsub.f32 %v3349_v13, %v157_v61  ;;  %v210_v2 = vsel %vm100_vm0, %v186_v62, 0.0  ;;  %v213_v5 = vsel %vm100_vm0, %v187_v63, 0.0 }
  0xa0   :  { %208 = vadd.xlane.f32.xlu1 %v207_v59  ;;  %211 = vadd.xlane.f32.xlu0 %v210_v2  ;;  %v127_v3 = vpop.xlane.xlu0 %126  ;;  %v130_v4 = vpop.xlane.xlu1 %129 }
  0xa1   :  { %v158_v6 = vmul.f32 0.03125, %v127_v3  ;;  %v159_v7 = vmul.f32 0.03125, %v130_v4  ;;  %v188_v8 = vmul.f32 %v3440_v0, %v3440_v0  ;;  %v189_v9 = vmul.f32 %v3443_v1, %v3443_v1 }
  0xa3   :  { %v3452_v10 = vsub.f32 %v3358_v16, %v158_v6  ;;  %v3455_v11 = vsub.f32 %v3363_v17, %v159_v7  ;;  %v216_v12 = vsel %vm100_vm0, %v188_v8, 0.0  ;;  %v219_v15 = vsel %vm100_vm0, %v189_v9, 0.0 }
  0xa4   :  { %214 = vadd.xlane.f32.xlu1 %v213_v5  ;;  %217 = vadd.xlane.f32.xlu0 %v216_v12  ;;  %v133_v13 = vpop.xlane.xlu0 %132  ;;  %v136_v14 = vpop.xlane.xlu1 %135 }
  0xa5   :  { %v160_v18 = vmul.f32 0.03125, %v133_v13  ;;  %v161_v19 = vmul.f32 0.03125, %v136_v14  ;;  %v190_v22 = vmul.f32 %v3452_v10, %v3452_v10  ;;  %v191_v16 = vmul.f32 %v3455_v11, %v3455_v11 }
  0xa7   :  { %v3464_v23 = vsub.f32 %v3372_v20, %v160_v18  ;;  %v3467_v17 = vsub.f32 %v3377_v21, %v161_v19  ;;  %v222_v26 = vsel %vm100_vm0, %v190_v22, 0.0  ;;  %v225_v31 = vsel %vm100_vm0, %v191_v16, 0.0 }
  0xa8   :  { %220 = vadd.xlane.f32.xlu1 %v219_v15  ;;  %223 = vadd.xlane.f32.xlu0 %v222_v26  ;;  %v139_v27 = vpop.xlane.xlu0 %138  ;;  %v142_v30 = vpop.xlane.xlu1 %141 }
  0xa9   :  { %v162_v32 = vmul.f32 0.03125, %v139_v27  ;;  %v163_v33 = vmul.f32 0.03125, %v142_v30  ;;  %v192_v34 = vmul.f32 %v3464_v23, %v3464_v23  ;;  %v193_v20 = vmul.f32 %v3467_v17, %v3467_v17 }
  0xab   :  { %v3476_v35 = vsub.f32 %v3386_v24, %v162_v32  ;;  %v3479_v21 = vsub.f32 %v3391_v25, %v163_v33  ;;  %v228_v38 = vsel %vm100_vm0, %v192_v34, 0.0  ;;  %v231_v41 = vsel %vm100_vm0, %v193_v20, 0.0 }
  0xac   :  { %226 = vadd.xlane.f32.xlu1 %v225_v31  ;;  %229 = vadd.xlane.f32.xlu0 %v228_v38  ;;  %v145_v39 = vpop.xlane.xlu0 %144  ;;  %v148_v40 = vpop.xlane.xlu1 %147  ;;  %v3511_v31 = vld [vmem:[%s4687_s1] ss:$0 sm:$0xff] }
  0xad   :  { %v164_v42 = vmul.f32 0.03125, %v145_v39  ;;  %v165_v43 = vmul.f32 0.03125, %v148_v40  ;;  %v194_v46 = vmul.f32 %v3476_v35, %v3476_v35  ;;  %v195_v24 = vmul.f32 %v3479_v21, %v3479_v21 }
  0xaf   :  { %v3488_v47 = vsub.f32 %v3400_v28, %v164_v42  ;;  %v3491_v25 = vsub.f32 %v3405_v29, %v165_v43  ;;  %v234_v48 = vsel %vm100_vm0, %v194_v46, 0.0  ;;  %v237_v49 = vsel %vm100_vm0, %v195_v24, 0.0  ;;  %v2982_v29 = vld [vmem:[%s4686_s3] sm:$0xff]  }
  0xb0   :  { %232 = vadd.xlane.f32.xlu1 %v231_v41  ;;  %235 = vadd.xlane.f32.xlu0 %v234_v48  ;;  %v3518_v43 = vld [vmem:[%s4688_s2] ss:$0 sm:$0xff] }
  0xb1   :  { %v196_v50 = vmul.f32 %v3488_v47, %v3488_v47  ;;  %v197_v51 = vmul.f32 %v3491_v25, %v3491_v25  ;;  %2684 = vmatprep.subr.bf16.mxu0 %v2982_v29 }
  0xb2   :  { %2685 = vmatpush3.bf16.msra.mxu0 %v2982_v29 }
  0xb3   :  { %v240_v52 = vsel %vm100_vm0, %v196_v50, 0.0  ;;  %v243_v28 = vsel %vm100_vm0, %v197_v51, 0.0  ;;  %2686 = vmatprep.subr.bf16.mxu0 %v2983_v53 }
  0xb4   :  { %238 = vadd.xlane.f32.xlu1 %v237_v49  ;;  %241 = vadd.xlane.f32.xlu0 %v240_v52 }
  0xb6   :  { %2687 = vmatpush3.bf16.msra.mxu0 %v2983_v53 }
  0xb8   :  { %244 = vadd.xlane.f32.xlu1 %v243_v28 }
 0x125   :  { %v200_v56 = vpop.xlane.xlu0 %199 }
 0x126   :  { %v246_v57 = vmul.f32 0.03125, %v200_v56 }
 0x128   :  { %v262_v58 = vadd.f32 1e-05, %v246_v57 }
 0x129   :  { %v203_v59 = vpop.xlane.xlu1 %202  ;;  %v206_v60 = vpop.xlane.xlu0 %205 }
 0x12a   :  { %2996 = vrsqrt.f32 %v262_v58  ;;  %v247_v61 = vmul.f32 0.03125, %v203_v59  ;;  %v248_v62 = vmul.f32 0.03125, %v206_v60 }
 0x12c   :  { %v263_v63 = vadd.f32 1e-05, %v247_v61  ;;  %v264_v2 = vadd.f32 1e-05, %v248_v62 }
 0x12d   :  { %v209_v3 = vpop.xlane.xlu1 %208  ;;  %v212_v4 = vpop.xlane.xlu0 %211 }
 0x12e   :  { %2998 = vrsqrt.f32 %v263_v63  ;;  %v249_v5 = vmul.f32 0.03125, %v209_v3  ;;  %v250_v6 = vmul.f32 0.03125, %v212_v4 }
 0x12f   :  { %3000 = vrsqrt.f32 %v264_v2 }
 0x130   :  { %v265_v7 = vadd.f32 1e-05, %v249_v5  ;;  %v266_v8 = vadd.f32 1e-05, %v250_v6 }
 0x131   :  { %v215_v9 = vpop.xlane.xlu1 %214  ;;  %v218_v12 = vpop.xlane.xlu0 %217 }
 0x132   :  { %3002 = vrsqrt.f32 %v265_v7  ;;  %v251_v13 = vmul.f32 0.03125, %v215_v9  ;;  %v252_v14 = vmul.f32 0.03125, %v218_v12 }
 0x133   :  { %3004 = vrsqrt.f32 %v266_v8 }
 0x134   :  { %v2997_v15 = vpop.eup %2996  ;;  %v267_v18 = vadd.f32 1e-05, %v251_v13  ;;  %v268_v19 = vadd.f32 1e-05, %v252_v14 }
 0x135   :  { %v221_v22 = vpop.xlane.xlu1 %220  ;;  %v224_v16 = vpop.xlane.xlu0 %223  ;;  %v294_v26 = vmul.f32 %v2997_v15, %v3411_v36 }
 0x136   :  { %3006 = vrsqrt.f32 %v267_v18  ;;  %v253_v27 = vmul.f32 0.03125, %v221_v22  ;;  %v254_v30 = vmul.f32 0.03125, %v224_v16 }
 0x137   :  { %3008 = vrsqrt.f32 %v268_v19  ;;  %v316_v41 = vmul.f32 %v3511_v31, %v294_v26 }
 0x138   :  { %v2999_v32 = vpop.eup %2998  ;;  %v269_v33 = vadd.f32 1e-05, %v253_v27  ;;  %v270_v34 = vadd.f32 1e-05, %v254_v30 }
 0x139   :  { %v3001_v20 = vpop.eup %3000  ;;  %v227_v38 = vpop.xlane.xlu1 %226  ;;  %v295_v40 = vmul.f32 %v2999_v32, %v3419_v44  ;;  %v338_v28 = vadd.f32 %v3518_v43, %v316_v41 }
 0x13a   :  { %v230_v39 = vpop.xlane.xlu0 %229  ;;  %3010 = vrsqrt.f32 %v269_v33  ;;  %v255_v36 = vmul.f32 0.03125, %v227_v38  ;;  %v296_v46 = vmul.f32 %v3001_v20, %v3413_v37 }
 0x13b   :  { %v256_v42 = vmul.f32 0.03125, %v230_v39  ;;  %3012 = vrsqrt.f32 %v270_v34  ;;  %v317_v24 = vmul.f32 %v3511_v31, %v295_v40 }
 0x13c   :  { %v3003_v48 = vpop.eup %3002  ;;  %v271_v49 = vadd.f32 1e-05, %v255_v36  ;;  %v318_v56 = vmul.f32 %v3511_v31, %v296_v46 }
 0x13d   :  { %v272_v50 = vadd.f32 1e-05, %v256_v42  ;;  %v3005_v51 = vpop.eup %3004  ;;  %v233_v44 = vpop.xlane.xlu1 %232  ;;  %v339_v29 = vadd.f32 %v3518_v43, %v317_v24  ;;  %v297_v53 = vmul.f32 %v3003_v48, %v3421_v45 }
 0x13e   :  { %v236_v52 = vpop.xlane.xlu0 %235  ;;  %3014 = vrsqrt.f32 %v271_v49  ;;  %v257_v57 = vmul.f32 0.03125, %v233_v44  ;;  %v298_v60 = vmul.f32 %v3005_v51, %v3429_v54  ;;  %v340_v45 = vadd.f32 %v3518_v43, %v318_v56 }
 0x13f   :  { %v258_v37 = vmul.f32 0.03125, %v236_v52  ;;  %3016 = vrsqrt.f32 %v272_v50  ;;  %v354_v58 = vpack.c.bf16 %v339_v29, %v338_v28  ;;  %v319_v59 = vmul.f32 %v3511_v31, %v297_v53 }
 0x140   :  { %v3007_v61 = vpop.eup %3006  ;;  %v273_v62 = vadd.f32 1e-05, %v257_v57  ;;  %v320_v7 = vmul.f32 %v3511_v31, %v298_v60 }
 0x141   :  { %v274_v63 = vadd.f32 1e-05, %v258_v37  ;;  %v3009_v2 = vpop.eup %3008  ;;  %v239_v3 = vpop.xlane.xlu1 %238  ;;  %2688 = vmatprep.mubr.msk.bf16.mxu0 %vm100_vm0, %v354_v58  ;;  %v341_v5 = vadd.f32 %v3518_v43, %v319_v59  ;;  %v299_v6 = vmul.f32 %v3007_v61, %v3431_v55 }
 0x142   :  { %v242_v4 = vpop.xlane.xlu0 %241  ;;  %3018 = vrsqrt.f32 %v273_v62  ;;  %v259_v8 = vmul.f32 0.03125, %v239_v3  ;;  %v300_v54 = vmul.f32 %v3009_v2, %v3440_v0  ;;  %v342_v55 = vadd.f32 %v3518_v43, %v320_v7 }
 0x143   :  { %v260_v9 = vmul.f32 0.03125, %v242_v4  ;;  %3020 = vrsqrt.f32 %v274_v63  ;;  %v355_v12 = vpack.c.bf16 %v341_v5, %v340_v45  ;;  %v321_v13 = vmul.f32 %v3511_v31, %v299_v6  ;;  %v2498_v45 = vld [vmem:[%s4689_s4] ss:$0 sm:$0xff]  ;;  %s3237_s4 = smov 64  }
 0x144   :  { %v3011_v14 = vpop.eup %3010  ;;  %v275_v15 = vadd.f32 1e-05, %v259_v8  ;;  %v322_v27 = vmul.f32 %v3511_v31, %v300_v54 }
 0x145   :  { %v276_v18 = vadd.f32 1e-05, %v260_v9  ;;  %v3013_v19 = vpop.eup %3012  ;;  %v245_v22 = vpop.xlane.xlu1 %244  ;;  %2689 = vmatmul.mubr.msk.bf16.vlgmr.msra.gmra.mrb[0].mxu0 %vm100_vm0, %v355_v12  ;;  %v343_v16 = vadd.f32 %v3518_v43, %v321_v13  ;;  %v301_v26 = vmul.f32 %v3011_v14, %v3443_v1 }
 0x146   :  { %3022 = vrsqrt.f32 %v275_v15  ;;  %v261_v0 = vmul.f32 0.03125, %v245_v22  ;;  %v302_v30 = vmul.f32 %v3013_v19, %v3452_v10  ;;  %v344_v39 = vadd.f32 %v3518_v43, %v322_v27 }
 0x147   :  { %3024 = vrsqrt.f32 %v276_v18  ;;  %v356_v32 = vpack.c.bf16 %v343_v16, %v342_v55  ;;  %v323_v33 = vmul.f32 %v3511_v31, %v301_v26 }
 0x148   :  { %v3015_v34 = vpop.eup %3014  ;;  %v277_v20 = vadd.f32 1e-05, %v261_v0  ;;  %v324_v41 = vmul.f32 %v3511_v31, %v302_v30 }
 0x149   :  { %v3017_v38 = vpop.eup %3016  ;;  %2692 = vmatprep.mubr.msk.bf16.mxu0 %vm100_vm0, %v356_v32  ;;  %v345_v40 = vadd.f32 %v3518_v43, %v323_v33  ;;  %v303_v1 = vmul.f32 %v3015_v34, %v3455_v11 }
 0x14a   :  { %3026 = vrsqrt.f32 %v277_v20  ;;  %v304_v10 = vmul.f32 %v3017_v38, %v3464_v23  ;;  %v346_v48 = vadd.f32 %v3518_v43, %v324_v41 }
 0x14b   :  { %v357_v36 = vpack.c.bf16 %v345_v40, %v344_v39  ;;  %v325_v42 = vmul.f32 %v3511_v31, %v303_v1 }
 0x14c   :  { %v3019_v46 = vpop.eup %3018  ;;  %v326_v11 = vmul.f32 %v3511_v31, %v304_v10 }
 0x14d   :  { %v3021_v24 = vpop.eup %3020  ;;  %2693 = vmatmul.mubr.msk.bf16.gmra.mrb[4].mxu0 %vm100_vm0, %v357_v36  ;;  %v347_v49 = vadd.f32 %v3518_v43, %v325_v42  ;;  %v305_v50 = vmul.f32 %v3019_v46, %v3467_v17 }
 0x14e   :  { %v306_v51 = vmul.f32 %v3021_v24, %v3476_v35  ;;  %v348_v29 = vadd.f32 %v3518_v43, %v326_v11 }
 0x14f   :  { %v358_v44 = vpack.c.bf16 %v347_v49, %v346_v48  ;;  %v327_v23 = vmul.f32 %v3511_v31, %v305_v50 }
 0x150   :  { %v3023_v52 = vpop.eup %3022  ;;  %v328_v57 = vmul.f32 %v3511_v31, %v306_v51 }
 0x151   :  { %v3025_v28 = vpop.eup %3024  ;;  %2696 = vmatprep.mubr.msk.bf16.mxu0 %vm100_vm0, %v358_v44  ;;  %v349_v53 = vadd.f32 %v3518_v43, %v327_v23  ;;  %v307_v56 = vmul.f32 %v3023_v52, %v3479_v21 }
 0x152   :  { %v308_v17 = vmul.f32 %v3025_v28, %v3488_v47  ;;  %v350_v59 = vadd.f32 %v3518_v43, %v328_v57 }
 0x153   :  { %v359_v37 = vpack.c.bf16 %v349_v53, %v348_v29  ;;  %v329_v35 = vmul.f32 %v3511_v31, %v307_v56 }
 0x154   :  { %v3027_v58 = vpop.eup %3026  ;;  %v330_v62 = vmul.f32 %v3511_v31, %v308_v17 }
 0x155   :  { %2697 = vmatmul.mubr.msk.bf16.gmra.mrb[8].mxu0 %vm100_vm0, %v359_v37  ;;  %v351_v60 = vadd.f32 %v3518_v43, %v329_v35  ;;  %v309_v61 = vmul.f32 %v3027_v58, %v3491_v25 }
 0x156   :  { %v352_v47 = vadd.f32 %v3518_v43, %v330_v62 }
 0x157   :  { %v360_v63 = vpack.c.bf16 %v351_v60, %v350_v59  ;;  %v331_v21 = vmul.f32 %v3511_v31, %v309_v61 }
 0x159   :  { %2700 = vmatprep.mubr.msk.bf16.mxu0 %vm100_vm0, %v360_v63  ;;  %v353_v2 = vadd.f32 %v3518_v43, %v331_v21 }
 0x15b   :  { %v361_v3 = vpack.c.bf16 %v353_v2, %v352_v47 }
 0x15d   :  { %2701 = vmatmul.mubr.msk.bf16.gmra.mrb[12].mxu0 %vm100_vm0, %v361_v3 }
 0x218   :  { %v2690_v4 = vpop.f32.mrb[0].mxu0 }
 0x219   :  { %v438_v25 = vpop.f32.mrb[1].mxu0  ;;  %v447_v6 = vadd.f32 %v2690_v4, %v2498_v45 }
 0x21a   :  { %v2691_v5 = vpop.f32.mrb[2].mxu0  ;;  %v439_v31 = vadd.f32 %v2498_v45, %v438_v25 }
 0x21b   :  { %v450_v7 = vadd.f32 %v2691_v5, %v2498_v45  ;;  %v441_v8 = vpop.f32.mrb[3].mxu0  ;;  %v697_v5 = vld [vmem:[%s4690_s13 + $0x10] sm:$0xff] }
 0x21c   :  { %v442_v9 = vadd.f32 %v2498_v45, %v441_v8 }
 0x21d   :  { %v3576_v54 = vpack.c.bf16 %v450_v7, %v447_v6 }
 0x21e   :  { %v3578_v12 = vpack.c.bf16 %v442_v9, %v439_v31 }
 0x21f   :  { %519 = vrot.lane.b32.xlu1 %v3576_v54, %s3236_s20 }
 0x220   :  { %517 = vrot.lane.b32.xlu0 %v3578_v12, %s3236_s20  ;;  %v2694_v43 = vpop.f32.mrb[4].mxu0  ;;  %2720 = vmatprep.mubr.msk.bf16.mxu1 %vm533_vm1, %v3578_v12 }
 0x221   :  { %v454_v13 = vpop.f32.mrb[5].mxu0  ;;  %v463_v15 = vadd.f32 %v2694_v43, %v2498_v45 }
 0x222   :  { %v2695_v14 = vpop.f32.mrb[6].mxu0  ;;  %v455_v22 = vadd.f32 %v2498_v45, %v454_v13  ;;  %v696_v13 = vld [vmem:[%s4690_s13 + $0x8] sm:$0xff] }
 0x223   :  { %v466_v18 = vadd.f32 %v2695_v14, %v2498_v45  ;;  %v457_v19 = vpop.f32.mrb[7].mxu0 }
 0x224   :  { %v458_v55 = vadd.f32 %v2498_v45, %v457_v19 }
 0x225   :  { %v3586_v16 = vpack.c.bf16 %v466_v18, %v463_v15  ;;  %v695_v15 = vld [vmem:[%s4690_s13] sm:$0xff] }
 0x226   :  { %v3588_v26 = vpack.c.bf16 %v458_v55, %v455_v22 }
 0x228   :  { %521 = vrot.lane.b32.xlu1 %v3588_v26, %s3236_s20  ;;  %v2698_v27 = vpop.f32.mrb[8].mxu0 }
 0x229   :  { %v470_v0 = vpop.f32.mrb[9].mxu0  ;;  %v479_v32 = vadd.f32 %v2698_v27, %v2498_v45  ;;  %v698_v27 = vld [vmem:[%s4690_s13 + $0x18] sm:$0xff] }
 0x22a   :  { %v2699_v30 = vpop.f32.mrb[10].mxu0  ;;  %v471_v20 = vadd.f32 %v2498_v45, %v470_v0 }
 0x22b   :  { %v482_v33 = vadd.f32 %v2699_v30, %v2498_v45  ;;  %v473_v34 = vpop.f32.mrb[11].mxu0 }
 0x22c   :  { %v474_v38 = vadd.f32 %v2498_v45, %v473_v34  ;;  %523 = vrot.lane.b32.xlu1 %v3586_v16, %s3236_s20 }
 0x22d   :  { %v3594_v39 = vpack.c.bf16 %v482_v33, %v479_v32  ;;  %v702_v32 = vld [vmem:[%s4690_s13 + $0x38] sm:$0xff] }
 0x22e   :  { %v3596_v40 = vpack.c.bf16 %v474_v38, %v471_v20 }
 0x230   :  { %527 = vrot.lane.b32.xlu1 %v3594_v39, %s3236_s20  ;;  %525 = vrot.lane.b32.xlu0 %v3596_v40, %s3236_s20  ;;  %v2702_v1 = vpop.f32.mrb[12].mxu0 }
 0x231   :  { %v486_v41 = vpop.f32.mrb[13].mxu0  ;;  %v495_v36 = vadd.f32 %v2702_v1, %v2498_v45  ;;  %v701_v1 = vld [vmem:[%s4690_s13 + $0x30] sm:$0xff] }
 0x232   :  { %v2703_v10 = vpop.f32.mrb[14].mxu0  ;;  %v487_v24 = vadd.f32 %v2498_v45, %v486_v41 }
 0x233   :  { %v498_v42 = vadd.f32 %v2703_v10, %v2498_v45  ;;  %v489_v46 = vpop.f32.mrb[15].mxu0 }
 0x234   :  { %v490_v48 = vadd.f32 %v2498_v45, %v489_v46 }
 0x235   :  { %v3602_v49 = vpack.c.bf16 %v498_v42, %v495_v36  ;;  %v700_v36 = vld [vmem:[%s4690_s13 + $0x28] sm:$0xff] }
 0x236   :  { %v3604_v50 = vpack.c.bf16 %v490_v48, %v487_v24  ;;  %v699_v48 = vld [vmem:[%s4690_s13 + $0x20] sm:$0xff] }
 0x237   :  { %531 = vrot.lane.b32.xlu1 %v3602_v49, %s3236_s20 }
 0x238   :  { %529 = vrot.lane.b32.xlu0 %v3604_v50, %s3236_s20 }
 0x23b   :  { %881 = vrot.lane.b32.xlu1 %v3576_v54, %s3237_s4 }
 0x23c   :  { %879 = vrot.lane.b32.xlu0 %v3578_v12, %s3237_s4 }
 0x23f   :  { %885 = vrot.lane.b32.xlu1 %v3586_v16, %s3237_s4 }
 0x240   :  { %883 = vrot.lane.b32.xlu0 %v3588_v26, %s3237_s4 }
 0x243   :  { %889 = vrot.lane.b32.xlu1 %v3594_v39, %s3237_s4 }
 0x244   :  { %887 = vrot.lane.b32.xlu0 %v3596_v40, %s3237_s4 }
 0x247   :  { %893 = vrot.lane.b32.xlu1 %v3602_v49, %s3237_s4 }
 0x248   :  { %1016 = vrot.lane.b32.xlu0 %v3578_v12, %s3238_s21 }
 0x24b   :  { %1018 = vrot.lane.b32.xlu1 %v3576_v54, %s3238_s21 }
 0x24c   :  { %891 = vrot.lane.b32.xlu0 %v3604_v50, %s3237_s4 }
 0x291   :  { %v520_v44 = vpop.permute.xlu1 %519 }
 0x292   :  { %v518_v11 = vpop.permute.xlu0 %517  ;;  %v562_v52 = vsel %vm533_vm1, %v520_v44, 0 }
 0x293   :  { %2920 = vmatprep.subr.msk.bf16.mxu1 %vm533_vm1, %v518_v11  ;;  %v559_v51 = vsel %vm533_vm1, %v518_v11, 0 }
 0x294   :  { %2705 = vmatpush3.bf16.xpose.msra.mxu1 %v559_v51 }
 0x295   :  { %2921 = vmatprep.subr.msk.bf16.mxu1 %vm533_vm1, %v520_v44 }
 0x29a   :  { %v522_v23 = vpop.permute.xlu1 %521 }
 0x29b   :  { %v565_v29 = vsel %vm533_vm1, %v522_v23, 0 }
 0x29c   :  { %2707 = vmatpush3.bf16.xpose.msra.mxu1 %v562_v52 }
 0x29d   :  { %2922 = vmatprep.subr.msk.bf16.mxu1 %vm533_vm1, %v522_v23  ;;  %v706_v23 = vld [vmem:[%s4690_s13 + $0x58] sm:$0xff] }
 0x29e   :  { %v524_v28 = vpop.permute.xlu1 %523 }
 0x29f   :  { %v568_v37 = vsel %vm533_vm1, %v524_v28, 0 }
 0x2a2   :  { %v528_v53 = vpop.permute.xlu1 %527  ;;  %v526_v56 = vpop.permute.xlu0 %525 }
 0x2a3   :  { %v571_v60 = vsel %vm533_vm1, %v526_v56, 0  ;;  %v574_v63 = vsel %vm533_vm1, %v528_v53, 0 }
 0x2a4   :  { %2709 = vmatpush3.bf16.xpose.msra.mxu1 %v565_v29 }
 0x2a5   :  { %2923 = vmatprep.subr.msk.bf16.mxu1 %vm533_vm1, %v524_v28 }
 0x2a9   :  { %v532_v57 = vpop.permute.xlu1 %531 }
 0x2aa   :  { %v530_v17 = vpop.permute.xlu0 %529  ;;  %v580_v45 = vsel %vm533_vm1, %v532_v57, 0 }
 0x2ab   :  { %v577_v2 = vsel %vm533_vm1, %v530_v17, 0 }
 0x2ac   :  { %2711 = vmatpush3.bf16.xpose.msra.mxu1 %v568_v37  ;;  %v704_v37 = vld [vmem:[%s4690_s13 + $0x48] sm:$0xff] }
 0x2ad   :  { %2924 = vmatprep.subr.msk.bf16.mxu1 %vm533_vm1, %v526_v56  ;;  %v882_v58 = vpop.permute.xlu1 %881  ;;  %v705_v56 = vld [vmem:[%s4690_s13 + $0x50] sm:$0xff] }
 0x2ae   :  { %v880_v35 = vpop.permute.xlu0 %879 }
 0x2af   :  { %2736 = vmatprep.subr.bf16.mxu0 %v880_v35 }
 0x2b0   :  { %2737 = vmatpush3.bf16.msra.mxu0 %v880_v35 }
 0x2b1   :  { %2738 = vmatprep.subr.bf16.mxu0 %v882_v58  ;;  %v886_v61 = vpop.permute.xlu1 %885 }
 0x2b2   :  { %v884_v59 = vpop.permute.xlu0 %883 }
 0x2b4   :  { %2713 = vmatpush3.bf16.xpose.msra.mxu1 %v571_v60  ;;  %2739 = vmatpush3.bf16.msra.mxu0 %v882_v58  ;;  %v703_v60 = vld [vmem:[%s4690_s13 + $0x40] sm:$0xff] }
 0x2b5   :  { %2925 = vmatprep.subr.msk.bf16.mxu1 %vm533_vm1, %v528_v53  ;;  %2740 = vmatprep.subr.bf16.mxu0 %v884_v59  ;;  %v890_v47 = vpop.permute.xlu1 %889 }
 0x2b6   :  { %v888_v62 = vpop.permute.xlu0 %887 }
 0x2b8   :  { %2741 = vmatpush3.bf16.msra.mxu0 %v884_v59 }
 0x2b9   :  { %2742 = vmatprep.subr.bf16.mxu0 %v886_v61  ;;  %v894_v4 = vpop.permute.xlu1 %893 }
 0x2ba   :  { %v3635_v21 = vpop.permute.xlu0 %1016 }
 0x2bc   :  { %2715 = vmatpush3.bf16.xpose.msra.mxu1 %v574_v63  ;;  %2743 = vmatpush3.bf16.msra.mxu0 %v886_v61 }
 0x2bd   :  { %2926 = vmatprep.subr.msk.bf16.mxu1 %vm533_vm1, %v530_v17  ;;  %2744 = vmatprep.subr.bf16.mxu0 %v888_v62 }
 0x2be   :  { %v892_v3 = vpop.permute.xlu0 %891 }
 0x2c0   :  { %2745 = vmatpush3.bf16.msra.mxu0 %v888_v62 }
 0x2c1   :  { %2746 = vmatprep.subr.bf16.mxu0 %v890_v47 }
 0x2c4   :  { %2717 = vmatpush3.bf16.xpose.msra.mxu1 %v577_v2  ;;  %2747 = vmatpush3.bf16.msra.mxu0 %v890_v47 }
 0x2c5   :  { %2927 = vmatprep.subr.msk.bf16.mxu1 %vm533_vm1, %v532_v57  ;;  %2748 = vmatprep.subr.bf16.mxu0 %v892_v3 }
 0x2c8   :  { %2749 = vmatpush3.bf16.msra.mxu0 %v892_v3 }
 0x2c9   :  { %2750 = vmatprep.subr.bf16.mxu0 %v894_v4 }
 0x2cc   :  { %2719 = vmatpush3.bf16.xpose.msra.mxu1 %v580_v45  ;;  %2751 = vmatpush3.bf16.msra.mxu0 %v894_v4  ;;  %v709_v4 = vld [vmem:[%s4690_s13 + $0x70] sm:$0xff] }
 0x2cd   :  { %2928 = vmatprep.subr.msk.bf16.mxu0 %vm533_vm1, %v3635_v21 }
 0x2d3   :  { %2721 = vmatmul.mubr.msk.bf16.vlgmr.msra.gmra.mrb[0].mxu1 %vm533_vm1, %v3576_v54 }
 0x2d4   :  { %2724 = vmatprep.mubr.msk.bf16.mxu1 %vm533_vm1, %v3588_v26 }
 0x2db   :  { %2725 = vmatmul.mubr.msk.bf16.gmra.mrb[4].mxu1 %vm533_vm1, %v3586_v16 }
 0x2dc   :  { %2728 = vmatprep.mubr.msk.bf16.mxu1 %vm533_vm1, %v3596_v40 }
 0x2e3   :  { %2729 = vmatmul.mubr.msk.bf16.gmra.mrb[8].mxu1 %vm533_vm1, %v3594_v39 }
 0x2e4   :  { %2732 = vmatprep.mubr.msk.bf16.mxu1 %vm533_vm1, %v3604_v50 }
 0x2eb   :  { %2733 = vmatmul.mubr.msk.bf16.gmra.mrb[12].mxu1 %vm533_vm1, %v3602_v49 }
 0x3a6   :  { %v2722_v25 = vpop.f32.mrb[0].mxu1 }
 0x3a7   :  { %v681_v6 = vmul.f32 0.25, %v2722_v25  ;;  %v616_v7 = vpop.f32.mrb[1].mxu1 }
 0x3a8   :  { %v2723_v8 = vpop.f32.mrb[2].mxu1  ;;  %v679_v31 = vmul.f32 0.25, %v616_v7 }
 0x3a9   :  { %v619_v9 = vpop.f32.mrb[3].mxu1  ;;  %v3659_v43 = vadd.f32 %v697_v5, %v681_v6  ;;  %v682_v19 = vmul.f32 0.25, %v2723_v8  ;;  %v707_v5 = vld [vmem:[%s4690_s13 + $0x60] sm:$0xff]  ;;  %v710_v8 = vld [vmem:[%s4690_s13 + $0x78] sm:$0xff] }
 0x3aa   :  { %v680_v14 = vmul.f32 0.25, %v619_v9  ;;  %v3670_v22 = vadd.f32 %v695_v15, %v679_v31  ;;  %v3756_v15 = vpop.permute.xlu1 %1018 }
 0x3ab   :  { %731 = vmax.xlane.f32.xlu0 %v3659_v43  ;;  %v3680_v38 = vadd.f32 %v698_v27, %v682_v19 }
 0x3ac   :  { %v3668_v18 = vadd.f32 %v696_v13, %v680_v14  ;;  %v708_v13 = vld [vmem:[%s4690_s13 + $0x68] sm:$0xff] }
 0x3ae   :  { %729 = vmax.xlane.f32.xlu1 %v3668_v18  ;;  %v2726_v55 = vpop.f32.mrb[4].mxu1 }
 0x3af   :  { %727 = vmax.xlane.f32.xlu0 %v3670_v22  ;;  %v632_v0 = vpop.f32.mrb[5].mxu1  ;;  %v685_v33 = vmul.f32 0.25, %v2726_v55 }
 0x3b0   :  { %v2727_v30 = vpop.f32.mrb[6].mxu1  ;;  %v683_v42 = vmul.f32 0.25, %v632_v0 }
 0x3b1   :  { %v686_v34 = vmul.f32 0.25, %v2727_v30  ;;  %v635_v20 = vpop.f32.mrb[7].mxu1  ;;  %v3692_v46 = vadd.f32 %v701_v1, %v685_v33 }
 0x3b2   :  { %v684_v41 = vmul.f32 0.25, %v635_v20  ;;  %v3704_v53 = vadd.f32 %v699_v48, %v683_v42 }
 0x3b3   :  { %733 = vmax.xlane.f32.xlu0 %v3680_v38  ;;  %v3686_v10 = vadd.f32 %v702_v32, %v686_v34 }
 0x3b4   :  { %v3698_v51 = vadd.f32 %v700_v36, %v684_v41 }
 0x3b5   :  { %741 = vmax.xlane.f32.xlu1 %v3686_v10 }
 0x3b6   :  { %v2730_v24 = vpop.f32.mrb[8].mxu1 }
 0x3b7   :  { %739 = vmax.xlane.f32.xlu0 %v3692_v46  ;;  %v648_v11 = vpop.f32.mrb[9].mxu1  ;;  %v689_v52 = vmul.f32 0.25, %v2730_v24 }
 0x3b8   :  { %v2731_v44 = vpop.f32.mrb[10].mxu1  ;;  %v687_v35 = vmul.f32 0.25, %v648_v11 }
 0x3b9   :  { %v690_v28 = vmul.f32 0.25, %v2731_v44  ;;  %737 = vmax.xlane.f32.xlu1 %v3698_v51  ;;  %v651_v29 = vpop.f32.mrb[11].mxu1  ;;  %v3716_v58 = vadd.f32 %v705_v56, %v689_v52 }
 0x3ba   :  { %v688_v57 = vmul.f32 0.25, %v651_v29  ;;  %v3725_v3 = vadd.f32 %v703_v60, %v687_v35 }
 0x3bb   :  { %735 = vmax.xlane.f32.xlu0 %v3704_v53  ;;  %v3710_v17 = vadd.f32 %v706_v23, %v690_v28 }
 0x3bc   :  { %v3722_v62 = vadd.f32 %v704_v37, %v688_v57 }
 0x3bd   :  { %749 = vmax.xlane.f32.xlu1 %v3710_v17 }
 0x3be   :  { %v2734_v59 = vpop.f32.mrb[12].mxu1 }
 0x3bf   :  { %747 = vmax.xlane.f32.xlu0 %v3716_v58  ;;  %v664_v61 = vpop.f32.mrb[13].mxu1  ;;  %v693_v47 = vmul.f32 0.25, %v2734_v59 }
 0x3c0   :  { %v2735_v63 = vpop.f32.mrb[14].mxu1  ;;  %v691_v45 = vmul.f32 0.25, %v664_v61 }
 0x3c1   :  { %745 = vmax.xlane.f32.xlu1 %v3722_v62  ;;  %v667_v2 = vpop.f32.mrb[15].mxu1  ;;  %v3731_v25 = vadd.f32 %v709_v4, %v693_v47  ;;  %v694_v7 = vmul.f32 0.25, %v2735_v63 }
 0x3c2   :  { %v3737_v6 = vadd.f32 %v707_v5, %v691_v45  ;;  %v692_v31 = vmul.f32 0.25, %v667_v2 }
 0x3c3   :  { %743 = vmax.xlane.f32.xlu0 %v3725_v3  ;;  %v3747_v9 = vadd.f32 %v710_v8, %v694_v7 }
 0x3c4   :  { %v3753_v14 = vadd.f32 %v708_v13, %v692_v31 }
 0x3c7   :  { %755 = vmax.xlane.f32.xlu0 %v3731_v25 }
 0x3cb   :  { %751 = vmax.xlane.f32.xlu0 %v3737_v6 }
 0x3d2   :  { %1022 = vrot.lane.b32.xlu1 %v3586_v16, %s3238_s21 }
 0x3e1   :  { %1020 = vrot.lane.b32.xlu0 %v3588_v26, %s3238_s21 }
 0x3f6   :  { %757 = vmax.xlane.f32.xlu1 %v3747_v9 }
 0x3fa   :  { %753 = vmax.xlane.f32.xlu1 %v3753_v14 }
 0x438   :  { %v732_v19 = vpop.xlane.xlu0 %731 }
 0x439   :  { %v761_v55 = vsub.f32 %v3659_v43, %v732_v19 }
 0x43b   :  { %v779_v27 = vmul.f32 1.442695, %v761_v55  ;;  %v730_v0 = vpop.xlane.xlu1 %729 }
 0x43c   :  { %v760_v30 = vsub.f32 %v3668_v18, %v730_v0  ;;  %v728_v32 = vpop.xlane.xlu0 %727 }
 0x43d   :  { %3028 = vpow2.f32 %v779_v27  ;;  %v759_v33 = vsub.f32 %v3670_v22, %v728_v32 }
 0x43e   :  { %v777_v34 = vmul.f32 1.442695, %v760_v30 }
 0x43f   :  { %v775_v20 = vmul.f32 1.442695, %v759_v33 }
 0x440   :  { %3030 = vpow2.f32 %v777_v34  ;;  %v734_v1 = vpop.xlane.xlu0 %733 }
 0x441   :  { %3032 = vpow2.f32 %v775_v20  ;;  %v762_v41 = vsub.f32 %v3680_v38, %v734_v1 }
 0x442   :  { %v742_v48 = vpop.xlane.xlu1 %741 }
 0x443   :  { %v781_v36 = vmul.f32 1.442695, %v762_v41  ;;  %v766_v35 = vsub.f32 %v3686_v10, %v742_v48 }
 0x444   :  { %v740_v24 = vpop.xlane.xlu0 %739 }
 0x445   :  { %3034 = vpow2.f32 %v781_v36  ;;  %v765_v44 = vsub.f32 %v3692_v46, %v740_v24  ;;  %v789_v63 = vmul.f32 1.442695, %v766_v35 }
 0x446   :  { %v738_v23 = vpop.xlane.xlu1 %737 }
 0x447   :  { %v3762_v42 = vpop.eup %3028  ;;  %v787_v28 = vmul.f32 1.442695, %v765_v44  ;;  %v764_v56 = vsub.f32 %v3698_v51, %v738_v23 }
 0x448   :  { %811 = vadd.xlane.f32.xlu1 %v3762_v42  ;;  %v736_v38 = vpop.xlane.xlu0 %735 }
 0x449   :  { %v763_v29 = vsub.f32 %v3704_v53, %v736_v38  ;;  %3036 = vpow2.f32 %v787_v28  ;;  %v785_v60 = vmul.f32 1.442695, %v764_v56 }
 0x44a   :  { %v3765_v43 = vpop.eup %3030  ;;  %v750_v57 = vpop.xlane.xlu1 %749 }
 0x44b   :  { %v3767_v18 = vpop.eup %3032  ;;  %809 = vadd.xlane.f32.xlu0 %v3765_v43  ;;  %v783_v59 = vmul.f32 1.442695, %v763_v29  ;;  %v770_v10 = vsub.f32 %v3710_v17, %v750_v57 }
 0x44c   :  { %807 = vadd.xlane.f32.xlu1 %v3767_v18  ;;  %v748_v11 = vpop.xlane.xlu0 %747 }
 0x44d   :  { %v769_v61 = vsub.f32 %v3716_v58, %v748_v11  ;;  %3038 = vpow2.f32 %v783_v59  ;;  %v797_v8 = vmul.f32 1.442695, %v770_v10 }
 0x44e   :  { %v746_v47 = vpop.xlane.xlu1 %745  ;;  %3040 = vpow2.f32 %v785_v60 }
 0x44f   :  { %v3771_v22 = vpop.eup %3034  ;;  %v795_v2 = vmul.f32 1.442695, %v769_v61  ;;  %3042 = vpow2.f32 %v789_v63 }
 0x450   :  { %813 = vadd.xlane.f32.xlu1 %v3771_v22  ;;  %v744_v52 = vpop.xlane.xlu0 %743 }
 0x451   :  { %v767_v53 = vsub.f32 %v3725_v3, %v744_v52  ;;  %3044 = vpow2.f32 %v795_v2  ;;  %v768_v3 = vsub.f32 %v3722_v62, %v746_v47 }
 0x452   :  { %v3789_v58 = vpop.permute.xlu1 %1022 }
 0x453   :  { %v791_v5 = vmul.f32 1.442695, %v767_v53  ;;  %v3787_v7 = vpop.eup %3036  ;;  %v793_v19 = vmul.f32 1.442695, %v768_v3 }
 0x454   :  { %v756_v37 = vpop.xlane.xlu0 %755 }
 0x455   :  { %v773_v46 = vsub.f32 %v3731_v25, %v756_v37  ;;  %v1057_v37 = vsel %vm533_vm1, %v3635_v21, 0 }
 0x457   :  { %v803_v51 = vmul.f32 1.442695, %v773_v46  ;;  %v3793_v31 = vpop.eup %3038 }
 0x458   :  { %v752_v4 = vpop.xlane.xlu0 %751 }
 0x459   :  { %v771_v45 = vsub.f32 %v3737_v6, %v752_v4  ;;  %3046 = vpow2.f32 %v803_v51  ;;  %v3795_v6 = vpop.eup %3040 }
 0x45a   :  { %3048 = vpow2.f32 %v791_v5  ;;  %v3800_v27 = vpop.eup %3042 }
 0x45b   :  { %v799_v25 = vmul.f32 1.442695, %v771_v45  ;;  %v3802_v62 = vpop.eup %3044 }
 0x45c   :  { %v1021_v36 = vpop.permute.xlu0 %1020 }
 0x45d   :  { %3050 = vpow2.f32 %v799_v25 }
 0x45e   :  { %3052 = vpow2.f32 %v797_v8 }
 0x461   :  { %1024 = vrot.lane.b32.xlu0 %v3596_v40, %s3238_s21  ;;  %1026 = vrot.lane.b32.xlu1 %v3594_v39, %s3238_s21 }
 0x463   :  { %v3807_v32 = vpop.eup %3046 }
 0x464   :  { %v3809_v33 = vpop.eup %3048 }
 0x467   :  { %v3813_v34 = vpop.eup %3050 }
 0x468   :  { %v3815_v20 = vpop.eup %3052 }
 0x480   :  { %819 = vadd.xlane.f32.xlu0 %v3787_v7 }
 0x483   :  { %v758_v13 = vpop.xlane.xlu1 %757 }
 0x484   :  { %v774_v17 = vsub.f32 %v3747_v9, %v758_v13  ;;  %815 = vadd.xlane.f32.xlu0 %v3793_v31 }
 0x485   :  { %817 = vadd.xlane.f32.xlu1 %v3795_v6 }
 0x486   :  { %v805_v55 = vmul.f32 1.442695, %v774_v17 }
 0x487   :  { %v754_v0 = vpop.xlane.xlu1 %753 }
 0x488   :  { %3054 = vpow2.f32 %v805_v55  ;;  %v772_v30 = vsub.f32 %v3753_v14, %v754_v0  ;;  %821 = vadd.xlane.f32.xlu0 %v3800_v27 }
 0x489   :  { %827 = vadd.xlane.f32.xlu1 %v3802_v62  ;;  %3056 = vpow2.f32 %v793_v19 }
 0x48a   :  { %v801_v9 = vmul.f32 1.442695, %v772_v30 }
 0x48c   :  { %835 = vadd.xlane.f32.xlu0 %v3807_v32  ;;  %3058 = vpow2.f32 %v801_v9 }
 0x48d   :  { %823 = vadd.xlane.f32.xlu1 %v3809_v33 }
 0x490   :  { %831 = vadd.xlane.f32.xlu0 %v3813_v34 }
 0x491   :  { %829 = vadd.xlane.f32.xlu1 %v3815_v20 }
 0x492   :  { %v3819_v14 = vpop.eup %3054 }
 0x493   :  { %v3821_v1 = vpop.eup %3056 }
 0x494   :  { %837 = vadd.xlane.f32.xlu0 %v3819_v14 }
 0x495   :  { %825 = vadd.xlane.f32.xlu1 %v3821_v1 }
 0x496   :  { %v3825_v41 = vpop.eup %3058 }
 0x499   :  { %833 = vadd.xlane.f32.xlu1 %v3825_v41 }
 0x4aa   :  { %1030 = vrot.lane.b32.xlu1 %v3602_v49, %s3238_s21  ;;  %1028 = vrot.lane.b32.xlu0 %v3604_v50, %s3238_s21 }
 0x4ae   :  { %1002 = vrot.lane.b32.xlu1 %v3576_v54, %s3239_s18  ;;  %1000 = vrot.lane.b32.xlu0 %v3578_v12, %s3239_s18 }
 0x4b2   :  { %1006 = vrot.lane.b32.xlu1 %v3586_v16, %s3239_s18  ;;  %1004 = vrot.lane.b32.xlu0 %v3588_v26, %s3239_s18 }
 0x4b6   :  { %1010 = vrot.lane.b32.xlu1 %v3594_v39, %s3239_s18  ;;  %1008 = vrot.lane.b32.xlu0 %v3596_v40, %s3239_s18 }
 0x4ba   :  { %1014 = vrot.lane.b32.xlu1 %v3602_v49, %s3239_s18  ;;  %1012 = vrot.lane.b32.xlu0 %v3604_v50, %s3239_s18 }
 0x4be   :  { %1380 = vrot.lane.b32.xlu1 %v3576_v54, %s3240_s19  ;;  %1378 = vrot.lane.b32.xlu0 %v3578_v12, %s3240_s19 }
 0x4c2   :  { %1382 = vrot.lane.b32.xlu0 %v3588_v26, %s3240_s19 }
 0x4d5   :  { %v812_v24 = vpop.xlane.xlu1 %811 }
 0x4d8   :  { %v810_v38 = vpop.xlane.xlu0 %809 }
 0x4d9   :  { %3060 = vrcp.f32 %v810_v38  ;;  %v808_v48 = vpop.xlane.xlu1 %807 }
 0x4da   :  { %3062 = vrcp.f32 %v808_v48 }
 0x4db   :  { %3064 = vrcp.f32 %v812_v24 }
 0x4dc   :  { %v1025_v21 = vpop.permute.xlu0 %1024 }
 0x4dd   :  { %v814_v11 = vpop.xlane.xlu1 %813 }
 0x4de   :  { %3066 = vrcp.f32 %v814_v11 }
 0x4e3   :  { %v3061_v44 = vpop.eup %3060 }
 0x4e4   :  { %v3063_v23 = vpop.eup %3062  ;;  %v856_v52 = vmul.f32 %v3061_v44, %v3765_v43  ;;  %v1060_v43 = vsel %vm533_vm1, %v3756_v15, 0 }
 0x4e5   :  { %v855_v54 = vmul.f32 %v3063_v23, %v3767_v18  ;;  %v3065_v28 = vpop.eup %3064  ;;  %v1066_v18 = vsel %vm533_vm1, %v3789_v58, 0 }
 0x4e6   :  { %v857_v26 = vmul.f32 %v3065_v28, %v3762_v42  ;;  %v1063_v42 = vsel %vm533_vm1, %v1021_v36, 0 }
 0x4e7   :  { %v871_v12 = vpack.c.bf16 %v856_v52, %v855_v54 }
 0x4e8   :  { %v3067_v29 = vpop.eup %3066 }
 0x4e9   :  { %v858_v56 = vmul.f32 %v3067_v29, %v3771_v22  ;;  %2752 = vmatprep.mubr.bf16.mxu0 %v871_v12  ;;  %v1069_v22 = vsel %vm533_vm1, %v1025_v21, 0 }
 0x4eb   :  { %v872_v57 = vpack.c.bf16 %v858_v56, %v857_v26 }
 0x4ed   :  { %2753 = vmatmul.mubr.bf16.vlgmr.msra.gmra.mrb[16].mxu0 %v872_v57 }
 0x4ee   :  { %2769 = vmatpush3.bf16.xpose.msra.mxu0 %v1057_v37 }
 0x4ef   :  { %2929 = vmatprep.subr.msk.bf16.mxu0 %vm533_vm1, %v3756_v15  ;;  %v1027_v15 = vpop.permute.xlu1 %1026 }
 0x4f0   :  { %v1072_v61 = vsel %vm533_vm1, %v1027_v15, 0 }
 0x4f6   :  { %2771 = vmatpush3.bf16.xpose.msra.mxu0 %v1060_v43 }
 0x4f7   :  { %2930 = vmatprep.subr.msk.bf16.mxu0 %vm533_vm1, %v1021_v36 }
 0x4fe   :  { %2773 = vmatpush3.bf16.xpose.msra.mxu0 %v1063_v42 }
 0x4ff   :  { %2931 = vmatprep.subr.msk.bf16.mxu0 %vm533_vm1, %v3789_v58 }
 0x506   :  { %2775 = vmatpush3.bf16.xpose.msra.mxu0 %v1066_v18 }
 0x507   :  { %2932 = vmatprep.subr.msk.bf16.mxu0 %vm533_vm1, %v1025_v21 }
 0x50d   :  { %v820_v35 = vpop.xlane.xlu0 %819 }
 0x50e   :  { %2777 = vmatpush3.bf16.xpose.msra.mxu0 %v1069_v22 }
 0x50f   :  { %2933 = vmatprep.subr.msk.bf16.mxu0 %vm533_vm1, %v1027_v15 }
 0x511   :  { %v816_v59 = vpop.xlane.xlu0 %815 }
 0x512   :  { %3068 = vrcp.f32 %v816_v59  ;;  %v818_v60 = vpop.xlane.xlu1 %817 }
 0x513   :  { %3070 = vrcp.f32 %v818_v60 }
 0x514   :  { %3072 = vrcp.f32 %v820_v35 }
 0x515   :  { %v822_v63 = vpop.xlane.xlu0 %821 }
 0x516   :  { %2779 = vmatpush3.bf16.xpose.msra.mxu0 %v1072_v61  ;;  %3074 = vrcp.f32 %v822_v63  ;;  %v828_v47 = vpop.xlane.xlu1 %827 }
 0x519   :  { %v836_v46 = vpop.xlane.xlu0 %835 }
 0x51a   :  { %v824_v2 = vpop.xlane.xlu1 %823 }
 0x51c   :  { %v3069_v53 = vpop.eup %3068 }
 0x51d   :  { %v3071_v4 = vpop.eup %3070  ;;  %v832_v51 = vpop.xlane.xlu0 %831  ;;  %v859_v45 = vmul.f32 %v3069_v53, %v3793_v31 }
 0x51e   :  { %v3073_v10 = vpop.eup %3072  ;;  %v830_v5 = vpop.xlane.xlu1 %829  ;;  %v860_v58 = vmul.f32 %v3071_v4, %v3795_v6 }
 0x51f   :  { %3076 = vrcp.f32 %v830_v5  ;;  %v861_v13 = vmul.f32 %v3073_v10, %v3787_v7 }
 0x520   :  { %v3075_v25 = vpop.eup %3074  ;;  %v873_v8 = vpack.c.bf16 %v860_v58, %v859_v45  ;;  %3078 = vrcp.f32 %v824_v2 }
 0x521   :  { %v838_v3 = vpop.xlane.xlu0 %837  ;;  %v862_v17 = vmul.f32 %v3075_v25, %v3800_v27  ;;  %3080 = vrcp.f32 %v828_v47 }
 0x522   :  { %v826_v19 = vpop.xlane.xlu1 %825  ;;  %2756 = vmatprep.mubr.bf16.mxu0 %v873_v8  ;;  %v2527_v8 = vld [vmem:[%s4690_s13 + $0x90] sm:$0xff] }
 0x523   :  { %3082 = vrcp.f32 %v826_v19  ;;  %v874_v55 = vpack.c.bf16 %v862_v17, %v861_v13 }
 0x524   :  { %3084 = vrcp.f32 %v832_v51 }
 0x525   :  { %2757 = vmatmul.mubr.bf16.gmra.mrb[20].mxu0 %v874_v55  ;;  %v1029_v31 = vpop.permute.xlu0 %1028 }
 0x526   :  { %v1075_v0 = vsel %vm533_vm1, %v1029_v31, 0  ;;  %v834_v6 = vpop.xlane.xlu1 %833  ;;  %2934 = vmatprep.subr.msk.bf16.mxu0 %vm533_vm1, %v1029_v31 }
 0x527   :  { %3086 = vrcp.f32 %v834_v6  ;;  %2781 = vmatpush3.bf16.xpose.msra.mxu0 %v1075_v0  ;;  %v2526_v0 = vld [vmem:[%s4690_s13 + $0x88] sm:$0xff]  ;;  %v2525_v6 = vld [vmem:[%s4690_s13 + $0x80] sm:$0xff] }
 0x528   :  { %3088 = vrcp.f32 %v838_v3 }
 0x529   :  { %v1001_v30 = vpop.permute.xlu0 %1000  ;;  %v3077_v7 = vpop.eup %3076  ;;  %3090 = vrcp.f32 %v836_v46 }
 0x52a   :  { %v1031_v27 = vpop.permute.xlu1 %1030  ;;  %v3079_v9 = vpop.eup %3078  ;;  %v866_v48 = vmul.f32 %v3077_v7, %v3815_v20 }
 0x52b   :  { %2935 = vmatprep.subr.msk.bf16.mxu0 %vm533_vm1, %v1031_v27  ;;  %v3081_v36 = vpop.eup %3080  ;;  %v1078_v11 = vsel %vm533_vm1, %v1031_v27, 0  ;;  %v863_v23 = vmul.f32 %v3079_v9, %v3809_v33 }
 0x52c   :  { %v865_v28 = vmul.f32 %v3081_v36, %v3802_v62  ;;  %v2528_v36 = vld [vmem:[%s4690_s13 + $0x98] sm:$0xff] }
 0x52d   :  { %v3083_v24 = vpop.eup %3082  ;;  %v1005_v38 = vpop.permute.xlu0 %1004 }
 0x52e   :  { %v1003_v44 = vpop.permute.xlu1 %1002  ;;  %v864_v52 = vmul.f32 %v3083_v24, %v3821_v1  ;;  %v3085_v54 = vpop.eup %3084  ;;  %v876_v56 = vpack.c.bf16 %v866_v48, %v865_v28  ;;  %v2531_v28 = vld [vmem:[%s4690_s13 + $0xb0] sm:$0xff] }
 0x52f   :  { %2783 = vmatpush3.bf16.xpose.msra.mxu0 %v1078_v11  ;;  %v867_v20 = vmul.f32 %v3085_v54, %v3813_v34  ;;  %v2532_v11 = vld [vmem:[%s4690_s13 + $0xb8] sm:$0xff] }
 0x530   :  { %v875_v12 = vpack.c.bf16 %v864_v52, %v863_v23 }
 0x531   :  { %v3087_v29 = vpop.eup %3086  ;;  %v1009_v26 = vpop.permute.xlu0 %1008 }
 0x532   :  { %v3089_v57 = vpop.eup %3088  ;;  %v1007_v37 = vpop.permute.xlu1 %1006  ;;  %2760 = vmatprep.mubr.bf16.mxu0 %v875_v12  ;;  %v868_v43 = vmul.f32 %v3087_v29, %v3825_v41 }
 0x533   :  { %2761 = vmatmul.mubr.bf16.gmra.mrb[24].mxu0 %v876_v56  ;;  %v3091_v42 = vpop.eup %3090  ;;  %v870_v1 = vmul.f32 %v3089_v57, %v3819_v14 }
 0x534   :  { %v877_v33 = vpack.c.bf16 %v868_v43, %v867_v20  ;;  %v869_v62 = vmul.f32 %v3091_v42, %v3807_v32 }
 0x535   :  { %v1013_v18 = vpop.permute.xlu0 %1012 }
 0x536   :  { %v1011_v21 = vpop.permute.xlu1 %1010  ;;  %2764 = vmatprep.mubr.bf16.mxu0 %v877_v33  ;;  %v878_v35 = vpack.c.bf16 %v870_v1, %v869_v62 }
 0x539   :  { %v1379_v22 = vpop.permute.xlu0 %1378 }
 0x53a   :  { %v1015_v15 = vpop.permute.xlu1 %1014  ;;  %2800 = vmatprep.subr.bf16.mxu0 %v1379_v22  ;;  %2904 = vmatprep.subr.bf16.mxu1 %v1379_v22 }
 0x53b   :  { %2765 = vmatmul.mubr.bf16.gmra.mrb[28].mxu0 %v878_v35  ;;  %2912 = vmatpush3.bf16.msra.mxu1 %v1379_v22  ;;  %v2535_v35 = vld [vmem:[%s4690_s13 + $0xd0] sm:$0xff] }
 0x53c   :  { %2784 = vmatprep.mubr.msk.bf16.mxu0 %vm533_vm1, %v1001_v30 }
 0x53d   :  { %v1383_v41 = vpop.permute.xlu0 %1382 }
 0x53e   :  { %v1381_v34 = vpop.permute.xlu1 %1380 }
 0x53f   :  { %2905 = vmatprep.subr.bf16.mxu1 %v1381_v34 }
 0x540   :  { %2913 = vmatpush3.bf16.msra.mxu1 %v1381_v34 }
 0x541   :  { %2906 = vmatprep.subr.bf16.mxu1 %v1383_v41 }
 0x543   :  { %2785 = vmatmul.mubr.msk.bf16.vlgmr.msra.gmra.mrb[32].mxu0 %vm533_vm1, %v1003_v44 }
 0x544   :  { %2801 = vmatpush3.bf16.msra.mxu0 %v1379_v22  ;;  %2788 = vmatprep.mubr.msk.bf16.mxu0 %vm533_vm1, %v1005_v38 }
 0x545   :  { %2802 = vmatprep.subr.bf16.mxu0 %v1381_v34  ;;  %2914 = vmatpush3.bf16.msra.mxu1 %v1383_v41 }
 0x548   :  { %2803 = vmatpush3.bf16.msra.mxu0 %v1381_v34 }
 0x549   :  { %2804 = vmatprep.subr.bf16.mxu0 %v1383_v41 }
 0x54b   :  { %2789 = vmatmul.mubr.msk.bf16.gmra.mrb[36].mxu0 %vm533_vm1, %v1007_v37  ;;  %v2529_v37 = vld [vmem:[%s4690_s13 + $0xa0] sm:$0xff] }
 0x54c   :  { %2805 = vmatpush3.bf16.msra.mxu0 %v1383_v41  ;;  %2792 = vmatprep.mubr.msk.bf16.mxu0 %vm533_vm1, %v1009_v26  ;;  %v2530_v26 = vld [vmem:[%s4690_s13 + $0xa8] sm:$0xff] }
 0x54d   :  { %v2534_v41 = vld [vmem:[%s4690_s13 + $0xc8] sm:$0xff] }
 0x553   :  { %2793 = vmatmul.mubr.msk.bf16.gmra.mrb[40].mxu0 %vm533_vm1, %v1011_v21 }
 0x554   :  { %2796 = vmatprep.mubr.msk.bf16.mxu0 %vm533_vm1, %v1013_v18  ;;  %v2536_v18 = vld [vmem:[%s4690_s13 + $0xd8] sm:$0xff] }
 0x55b   :  { %2797 = vmatmul.mubr.msk.bf16.gmra.mrb[44].mxu0 %vm533_vm1, %v1015_v15 }
 0x5c0   :  { %v3890_v32 = vpop.f32.mrb[16].mxu0 }
 0x5c1   :  { %v3892_v14 = vpop.f32.mrb[17].mxu0 }
 0x5c2   :  { %v3894_v59 = vpop.f32.mrb[18].mxu0 }
 0x5c3   :  { %v3896_v60 = vpop.f32.mrb[19].mxu0 }
 0x5f8   :  { %v3898_v61 = vpop.f32.mrb[20].mxu0 }
 0x5f9   :  { %v3900_v63 = vpop.f32.mrb[21].mxu0 }
 0x5fa   :  { %v3902_v47 = vpop.f32.mrb[22].mxu0 }
 0x5fb   :  { %v3904_v46 = vpop.f32.mrb[23].mxu0 }
 0x606   :  { %v3906_v2 = vpop.f32.mrb[24].mxu0 }
 0x607   :  { %v3908_v53 = vpop.f32.mrb[25].mxu0 }
 0x608   :  { %v3910_v4 = vpop.f32.mrb[26].mxu0 }
 0x609   :  { %v3912_v51 = vpop.f32.mrb[27].mxu0 }
 0x60e   :  { %v3914_v45 = vpop.f32.mrb[28].mxu0 }
 0x60f   :  { %v3916_v10 = vpop.f32.mrb[29].mxu0 }
 0x610   :  { %v3918_v5 = vpop.f32.mrb[30].mxu0 }
 0x611   :  { %v3920_v58 = vpop.f32.mrb[31].mxu0 }
 0x616   :  { %v2786_v25 = vpop.f32.mrb[32].mxu0 }
 0x617   :  { %v1179_v3 = vmul.f32 0.25, %v2786_v25  ;;  %v1114_v13 = vpop.f32.mrb[33].mxu0 }
 0x618   :  { %v2787_v17 = vpop.f32.mrb[34].mxu0  ;;  %v1177_v55 = vmul.f32 0.25, %v1114_v13 }
 0x619   :  { %v3925_v19 = vadd.f32 %v2527_v8, %v1179_v3  ;;  %v1117_v31 = vpop.f32.mrb[35].mxu0  ;;  %v1180_v9 = vmul.f32 0.25, %v2787_v17  ;;  %v2533_v3 = vld [vmem:[%s4690_s13 + $0xc0] sm:$0xff] }
 0x61a   :  { %v1178_v30 = vmul.f32 0.25, %v1117_v31  ;;  %v3936_v27 = vadd.f32 %v2525_v6, %v1177_v55 }
 0x61b   :  { %1230 = vmax.xlane.f32.xlu0 %v3925_v19  ;;  %v3946_v44 = vadd.f32 %v2528_v36, %v1180_v9  ;;  %v2539_v9 = vld [vmem:[%s4690_s13 + $0xf0] sm:$0xff] }
 0x61c   :  { %v3934_v7 = vadd.f32 %v2526_v0, %v1178_v30 }
 0x61e   :  { %1228 = vmax.xlane.f32.xlu1 %v3934_v7  ;;  %v2790_v24 = vpop.f32.mrb[36].mxu0 }
 0x61f   :  { %1226 = vmax.xlane.f32.xlu0 %v3936_v27  ;;  %v1130_v38 = vpop.f32.mrb[37].mxu0  ;;  %v1183_v23 = vmul.f32 0.25, %v2790_v24 }
 0x620   :  { %v2791_v48 = vpop.f32.mrb[38].mxu0  ;;  %v1181_v57 = vmul.f32 0.25, %v1130_v38  ;;  %v2537_v38 = vld [vmem:[%s4690_s13 + $0xe0] sm:$0xff] }
 0x621   :  { %v1184_v52 = vmul.f32 0.25, %v2791_v48  ;;  %v1133_v54 = vpop.f32.mrb[39].mxu0  ;;  %v3957_v56 = vadd.f32 %v2531_v28, %v1183_v23  ;;  %v2540_v23 = vld [vmem:[%s4690_s13 + $0xf8] sm:$0xff]  ;;  %v2538_v28 = vld [vmem:[%s4690_s13 + $0xe8] sm:$0xff] }
 0x622   :  { %v1182_v29 = vmul.f32 0.25, %v1133_v54  ;;  %v3969_v1 = vadd.f32 %v2529_v37, %v1181_v57 }
 0x623   :  { %v3951_v12 = vadd.f32 %v2532_v11, %v1184_v52  ;;  %1232 = vmax.xlane.f32.xlu0 %v3946_v44 }
 0x624   :  { %v3963_v43 = vadd.f32 %v2530_v26, %v1182_v29 }
 0x625   :  { %1240 = vmax.xlane.f32.xlu1 %v3951_v12 }
 0x626   :  { %v2794_v20 = vpop.f32.mrb[40].mxu0 }
 0x627   :  { %1238 = vmax.xlane.f32.xlu0 %v3957_v56  ;;  %v1146_v42 = vpop.f32.mrb[41].mxu0  ;;  %v1187_v21 = vmul.f32 0.25, %v2794_v20 }
 0x628   :  { %v2795_v33 = vpop.f32.mrb[42].mxu0  ;;  %v1185_v8 = vmul.f32 0.25, %v1146_v42 }
 0x629   :  { %v1188_v62 = vmul.f32 0.25, %v2795_v33  ;;  %1236 = vmax.xlane.f32.xlu1 %v3963_v43  ;;  %v1149_v22 = vpop.f32.mrb[43].mxu0  ;;  %v3981_v25 = vadd.f32 %v2535_v35, %v1187_v21 }
 0x62a   :  { %v1186_v34 = vmul.f32 0.25, %v1149_v22  ;;  %v3990_v0 = vadd.f32 %v2533_v3, %v1185_v8 }
 0x62b   :  { %v3975_v15 = vadd.f32 %v2536_v18, %v1188_v62  ;;  %1234 = vmax.xlane.f32.xlu0 %v3969_v1 }
 0x62c   :  { %v3987_v17 = vadd.f32 %v2534_v41, %v1186_v34 }
 0x62d   :  { %1248 = vmax.xlane.f32.xlu1 %v3975_v15 }
 0x62e   :  { %v2798_v13 = vpop.f32.mrb[44].mxu0 }
 0x62f   :  { %1246 = vmax.xlane.f32.xlu0 %v3981_v25  ;;  %v1162_v55 = vpop.f32.mrb[45].mxu0  ;;  %v1191_v6 = vmul.f32 0.25, %v2798_v13 }
 0x630   :  { %v2799_v31 = vpop.f32.mrb[46].mxu0  ;;  %v1189_v24 = vmul.f32 0.25, %v1162_v55 }
 0x631   :  { %1244 = vmax.xlane.f32.xlu1 %v3987_v17  ;;  %v1165_v30 = vpop.f32.mrb[47].mxu0  ;;  %v3997_v36 = vadd.f32 %v2539_v9, %v1191_v6  ;;  %v1192_v11 = vmul.f32 0.25, %v2799_v31 }
 0x632   :  { %v4003_v48 = vadd.f32 %v2537_v38, %v1189_v24  ;;  %v1190_v54 = vmul.f32 0.25, %v1165_v30 }
 0x633   :  { %1242 = vmax.xlane.f32.xlu0 %v3990_v0  ;;  %v4013_v52 = vadd.f32 %v2540_v23, %v1192_v11 }
 0x634   :  { %v4019_v29 = vadd.f32 %v2538_v28, %v1190_v54 }
 0x637   :  { %1254 = vmax.xlane.f32.xlu0 %v3997_v36 }
 0x63b   :  { %1250 = vmax.xlane.f32.xlu0 %v4003_v48 }
 0x642   :  { %1386 = vrot.lane.b32.xlu1 %v3596_v40, %s3240_s19 }
 0x651   :  { %1384 = vrot.lane.b32.xlu0 %v3586_v16, %s3240_s19 }
 0x666   :  { %1256 = vmax.xlane.f32.xlu1 %v4013_v52 }
 0x66a   :  { %1252 = vmax.xlane.f32.xlu1 %v4019_v29 }
 0x67b   :  { %1388 = vrot.lane.b32.xlu1 %v3594_v39, %s3240_s19 }
 0x6a8   :  { %v1231_v16 = vpop.xlane.xlu0 %1230 }
 0x6a9   :  { %v1260_v40 = vsub.f32 %v3925_v19, %v1231_v16 }
 0x6ab   :  { %v1278_v26 = vmul.f32 1.442695, %v1260_v40  ;;  %v1229_v37 = vpop.xlane.xlu1 %1228 }
 0x6ac   :  { %v1227_v57 = vpop.xlane.xlu0 %1226  ;;  %v1259_v33 = vsub.f32 %v3934_v7, %v1229_v37 }
 0x6ad   :  { %3092 = vpow2.f32 %v1278_v26  ;;  %v1258_v20 = vsub.f32 %v3936_v27, %v1227_v57 }
 0x6ae   :  { %v1276_v35 = vmul.f32 1.442695, %v1259_v33 }
 0x6af   :  { %v1274_v42 = vmul.f32 1.442695, %v1258_v20 }
 0x6b0   :  { %v1233_v18 = vpop.xlane.xlu0 %1232 }
 0x6b1   :  { %3094 = vpow2.f32 %v1274_v42  ;;  %v1261_v21 = vsub.f32 %v3946_v44, %v1233_v18 }
 0x6b2   :  { %v1241_v62 = vpop.xlane.xlu1 %1240 }
 0x6b3   :  { %v1280_v22 = vmul.f32 1.442695, %v1261_v21  ;;  %v1265_v3 = vsub.f32 %v3951_v12, %v1241_v62 }
 0x6b4   :  { %v1239_v39 = vpop.xlane.xlu0 %1238 }
 0x6b5   :  { %3096 = vpow2.f32 %v1280_v22  ;;  %v1264_v19 = vsub.f32 %v3957_v56, %v1239_v39  ;;  %v1288_v30 = vmul.f32 1.442695, %v1265_v3 }
 0x6b6   :  { %v1237_v34 = vpop.xlane.xlu1 %1236  ;;  %3098 = vpow2.f32 %v1276_v35 }
 0x6b7   :  { %v4029_v41 = vpop.eup %3092  ;;  %v1286_v8 = vmul.f32 1.442695, %v1264_v19  ;;  %v1263_v27 = vsub.f32 %v3963_v43, %v1237_v34 }
 0x6b8   :  { %1310 = vadd.xlane.f32.xlu1 %v4029_v41  ;;  %v1235_v7 = vpop.xlane.xlu0 %1234 }
 0x6b9   :  { %3100 = vpow2.f32 %v1286_v8  ;;  %v1284_v44 = vmul.f32 1.442695, %v1263_v27  ;;  %v1262_v13 = vsub.f32 %v3969_v1, %v1235_v7 }
 0x6ba   :  { %v1249_v56 = vpop.xlane.xlu1 %1248 }
 0x6bb   :  { %v4035_v55 = vpop.eup %3094  ;;  %v1282_v31 = vmul.f32 1.442695, %v1262_v13  ;;  %3102 = vpow2.f32 %v1284_v44  ;;  %v1269_v12 = vsub.f32 %v3975_v15, %v1249_v56 }
 0x6bc   :  { %1306 = vadd.xlane.f32.xlu1 %v4035_v55  ;;  %v1247_v6 = vpop.xlane.xlu0 %1246 }
 0x6bd   :  { %3104 = vpow2.f32 %v1282_v31  ;;  %v1268_v43 = vsub.f32 %v3981_v25, %v1247_v6  ;;  %v1296_v16 = vmul.f32 1.442695, %v1269_v12 }
 0x6be   :  { %3106 = vpow2.f32 %v1288_v30  ;;  %v1245_v38 = vpop.xlane.xlu1 %1244 }
 0x6bf   :  { %v4039_v9 = vpop.eup %3096  ;;  %v1294_v24 = vmul.f32 1.442695, %v1268_v43  ;;  %v1267_v25 = vsub.f32 %v3987_v17, %v1245_v38 }
 0x6c0   :  { %1312 = vadd.xlane.f32.xlu1 %v4039_v9  ;;  %v1243_v1 = vpop.xlane.xlu0 %1242  ;;  %v4044_v23 = vpop.eup %3098 }
 0x6c1   :  { %v1266_v11 = vsub.f32 %v3990_v0, %v1243_v1  ;;  %3108 = vpow2.f32 %v1294_v24  ;;  %v1292_v37 = vmul.f32 1.442695, %v1267_v25 }
 0x6c2   :  { %v1387_v21 = vpop.permute.xlu1 %1386 }
 0x6c3   :  { %v4046_v54 = vpop.eup %3100  ;;  %v1290_v28 = vmul.f32 1.442695, %v1266_v11 }
 0x6c4   :  { %1308 = vadd.xlane.f32.xlu1 %v4044_v23  ;;  %1318 = vadd.xlane.f32.xlu0 %v4046_v54  ;;  %v1255_v15 = vpop.xlane.xlu0 %1254 }
 0x6c5   :  { %3110 = vpow2.f32 %v1290_v28  ;;  %v1272_v40 = vsub.f32 %v3997_v36, %v1255_v15  ;;  %v4052_v26 = vpop.eup %3102 }
 0x6c6   :  { %3112 = vpow2.f32 %v1296_v16 }
 0x6c7   :  { %v4054_v0 = vpop.eup %3104  ;;  %v1302_v57 = vmul.f32 1.442695, %v1272_v40 }
 0x6c8   :  { %1316 = vadd.xlane.f32.xlu1 %v4052_v26  ;;  %1314 = vadd.xlane.f32.xlu0 %v4054_v0  ;;  %v1251_v17 = vpop.xlane.xlu0 %1250  ;;  %v4059_v42 = vpop.eup %3106 }
 0x6c9   :  { %3114 = vpow2.f32 %v1302_v57  ;;  %v1270_v20 = vsub.f32 %v4003_v48, %v1251_v17 }
 0x6ca   :  { %3116 = vpow2.f32 %v1292_v37 }
 0x6cb   :  { %v1298_v33 = vmul.f32 1.442695, %v1270_v20  ;;  %v4062_v18 = vpop.eup %3108 }
 0x6cc   :  { %1320 = vadd.xlane.f32.xlu0 %v4059_v42  ;;  %v1385_v36 = vpop.permute.xlu0 %1384 }
 0x6cd   :  { %3118 = vpow2.f32 %v1298_v33  ;;  %2806 = vmatprep.subr.bf16.mxu0 %v1385_v36  ;;  %2907 = vmatprep.subr.bf16.mxu1 %v1385_v36 }
 0x6ce   :  { %2807 = vmatpush3.bf16.msra.mxu0 %v1385_v36  ;;  %2915 = vmatpush3.bf16.msra.mxu1 %v1385_v36 }
 0x6cf   :  { %v4064_v62 = vpop.eup %3110  ;;  %2808 = vmatprep.subr.bf16.mxu0 %v1387_v21  ;;  %2908 = vmatprep.subr.bf16.mxu1 %v1387_v21 }
 0x6d0   :  { %1326 = vadd.xlane.f32.xlu0 %v4062_v18  ;;  %1322 = vadd.xlane.f32.xlu1 %v4064_v62  ;;  %v4068_v48 = vpop.eup %3112 }
 0x6d2   :  { %2809 = vmatpush3.bf16.msra.mxu0 %v1387_v21  ;;  %2916 = vmatpush3.bf16.msra.mxu1 %v1387_v21 }
 0x6d3   :  { %v4070_v22 = vpop.eup %3114 }
 0x6d4   :  { %1328 = vadd.xlane.f32.xlu0 %v4068_v48  ;;  %1334 = vadd.xlane.f32.xlu1 %v4070_v22  ;;  %v4074_v35 = vpop.eup %3116 }
 0x6d7   :  { %v4076_v39 = vpop.eup %3118 }
 0x6d8   :  { %1324 = vadd.xlane.f32.xlu0 %v4074_v35  ;;  %1330 = vadd.xlane.f32.xlu1 %v4076_v39 }
 0x6e9   :  { %1392 = vrot.lane.b32.xlu1 %v3602_v49, %s3240_s19 }
 0x6ee   :  { %1390 = vrot.lane.b32.xlu0 %v3604_v50, %s3240_s19 }
 0x6f3   :  { %v1257_v19 = vpop.xlane.xlu1 %1256 }
 0x6f4   :  { %v1273_v7 = vsub.f32 %v4013_v52, %v1257_v19 }
 0x6f6   :  { %v1304_v44 = vmul.f32 1.442695, %v1273_v7 }
 0x6f7   :  { %v1253_v34 = vpop.xlane.xlu1 %1252 }
 0x6f8   :  { %v1271_v8 = vsub.f32 %v4019_v29, %v1253_v34 }
 0x6fa   :  { %v1300_v3 = vmul.f32 1.442695, %v1271_v8 }
 0x6fb   :  { %v1389_v27 = vpop.permute.xlu1 %1388 }
 0x6fc   :  { %2810 = vmatprep.subr.bf16.mxu0 %v1389_v27  ;;  %2909 = vmatprep.subr.bf16.mxu1 %v1389_v27  ;;  %3120 = vpow2.f32 %v1300_v3 }
 0x6fd   :  { %2811 = vmatpush3.bf16.msra.mxu0 %v1389_v27  ;;  %2917 = vmatpush3.bf16.msra.mxu1 %v1389_v27  ;;  %3122 = vpow2.f32 %v1304_v44 }
 0x706   :  { %v4086_v13 = vpop.eup %3120 }
 0x707   :  { %v4089_v49 = vpop.eup %3122 }
 0x70d   :  { %1332 = vadd.xlane.f32.xlu0 %v4086_v13 }
 0x711   :  { %1336 = vadd.xlane.f32.xlu0 %v4089_v49 }
 0x745   :  { %v1311_v50 = vpop.xlane.xlu1 %1310 }
 0x749   :  { %v1307_v29 = vpop.xlane.xlu1 %1306 }
 0x74a   :  { %3124 = vrcp.f32 %v1307_v29 }
 0x74d   :  { %v1313_v31 = vpop.xlane.xlu1 %1312 }
 0x751   :  { %v1309_v56 = vpop.xlane.xlu1 %1308  ;;  %v1319_v6 = vpop.xlane.xlu0 %1318 }
 0x752   :  { %3126 = vrcp.f32 %v1309_v56 }
 0x754   :  { %v3125_v12 = vpop.eup %3124 }
 0x755   :  { %v1317_v52 = vpop.xlane.xlu1 %1316  ;;  %v1315_v30 = vpop.xlane.xlu0 %1314  ;;  %v1354_v11 = vmul.f32 %v3125_v12, %v4035_v55 }
 0x756   :  { %3128 = vrcp.f32 %v1317_v52 }
 0x757   :  { %3130 = vrcp.f32 %v1315_v30 }
 0x758   :  { %3132 = vrcp.f32 %v1313_v31 }
 0x759   :  { %v1321_v43 = vpop.xlane.xlu0 %1320 }
 0x75a   :  { %3134 = vrcp.f32 %v1321_v43 }
 0x75b   :  { %3136 = vrcp.f32 %v1311_v50 }
 0x75c   :  { %v3127_v24 = vpop.eup %3126  ;;  %3138 = vrcp.f32 %v1319_v6 }
 0x75d   :  { %v1323_v1 = vpop.xlane.xlu1 %1322  ;;  %v1327_v38 = vpop.xlane.xlu0 %1326  ;;  %v1355_v28 = vmul.f32 %v3127_v24, %v4044_v23 }
 0x75e   :  { %3140 = vrcp.f32 %v1323_v1 }
 0x75f   :  { %v1370_v16 = vpack.c.bf16 %v1355_v28, %v1354_v11 }
 0x760   :  { %v3129_v25 = vpop.eup %3128 }
 0x761   :  { %v3131_v15 = vpop.eup %3130  ;;  %2816 = vmatprep.mubr.bf16.mxu0 %v1370_v16  ;;  %v1335_v40 = vpop.xlane.xlu1 %1334  ;;  %v1359_v37 = vmul.f32 %v3129_v25, %v4052_v26  ;;  %v2984_v16 = vld [vmem:[%s4691_s5] sm:$0xff]  }
 0x762   :  { %v1329_v57 = vpop.xlane.xlu0 %1328  ;;  %v1358_v17 = vmul.f32 %v3131_v15, %v4054_v0  ;;  %v3133_v23 = vpop.eup %3132 }
 0x763   :  { %3142 = vrcp.f32 %v1329_v57  ;;  %v1357_v26 = vmul.f32 %v3133_v23, %v4039_v9 }
 0x764   :  { %v1372_v20 = vpack.c.bf16 %v1359_v37, %v1358_v17  ;;  %v3135_v36 = vpop.eup %3134 }
 0x765   :  { %v1331_v33 = vpop.xlane.xlu1 %1330  ;;  %v3137_v19 = vpop.eup %3136  ;;  %v1361_v0 = vmul.f32 %v3135_v36, %v4059_v42 }
 0x766   :  { %v1325_v55 = vpop.xlane.xlu0 %1324  ;;  %2820 = vmatprep.mubr.bf16.mxu1 %v1372_v20  ;;  %v3139_v34 = vpop.eup %3138  ;;  %v1356_v27 = vmul.f32 %v3137_v19, %v4029_v41 }
 0x767   :  { %3144 = vrcp.f32 %v1325_v55  ;;  %v1360_v7 = vmul.f32 %v3139_v34, %v4046_v54 }
 0x768   :  { %3146 = vrcp.f32 %v1327_v38  ;;  %v3141_v3 = vpop.eup %3140  ;;  %v1371_v50 = vpack.c.bf16 %v1357_v26, %v1356_v27 }
 0x769   :  { %v1393_v8 = vpop.permute.xlu1 %1392  ;;  %v1373_v29 = vpack.c.bf16 %v1361_v0, %v1360_v7  ;;  %v1362_v56 = vmul.f32 %v3141_v3, %v4064_v62  ;;  %3148 = vrcp.f32 %v1331_v33 }
 0x76a   :  { %v1391_v21 = vpop.permute.xlu0 %1390 }
 0x76b   :  { %2812 = vmatprep.subr.bf16.mxu0 %v1391_v21  ;;  %2910 = vmatprep.subr.bf16.mxu1 %v1391_v21 }
 0x76c   :  { %2813 = vmatpush3.bf16.msra.mxu0 %v1391_v21  ;;  %2918 = vmatpush3.bf16.msra.mxu1 %v1391_v21 }
 0x76d   :  { %2814 = vmatprep.subr.bf16.mxu0 %v1393_v8  ;;  %2911 = vmatprep.subr.bf16.mxu1 %v1393_v8  ;;  %v3143_v44 = vpop.eup %3142 }
 0x76e   :  { %v1365_v52 = vmul.f32 %v3143_v44, %v4068_v48 }
 0x770   :  { %2815 = vmatpush3.bf16.msra.mxu0 %v1393_v8  ;;  %2919 = vmatpush3.bf16.msra.mxu1 %v1393_v8 }
 0x771   :  { %v3145_v31 = vpop.eup %3144  ;;  %2832 = vmatprep.subr.bf16.mxu1 %v2984_v16 }
 0x772   :  { %v1363_v9 = vmul.f32 %v3145_v31, %v4074_v35  ;;  %v3147_v42 = vpop.eup %3146 }
 0x773   :  { %2817 = vmatmul.mubr.bf16.vlgmr.msra.gmra.mrb[48].mxu0 %v1371_v50  ;;  %2821 = vmatmul.mubr.bf16.vlgmr.msra.gmra.mrb[16].mxu1 %v1373_v29  ;;  %v1364_v41 = vmul.f32 %v3147_v42, %v4062_v18  ;;  %v3149_v12 = vpop.eup %3148 }
 0x774   :  { %v1374_v6 = vpack.c.bf16 %v1363_v9, %v1362_v56  ;;  %v1366_v62 = vmul.f32 %v3149_v12, %v4076_v39  ;;  %2833 = vmatpush3.bf16.msra.mxu1 %v2984_v16  ;;  %v2985_v39 = vld [vmem:[%s4691_s5 + $0x8] sm:$0xff]  }
 0x775   :  { %v1375_v54 = vpack.c.bf16 %v1365_v52, %v1364_v41  ;;  %2834 = vmatprep.subr.bf16.mxu1 %v2985_v39 }
 0x776   :  { %2824 = vmatprep.mubr.bf16.mxu1 %v1374_v6 }
 0x778   :  { %2835 = vmatpush3.bf16.msra.mxu1 %v2985_v39 }
 0x77b   :  { %2825 = vmatmul.mubr.bf16.gmra.mrb[20].mxu1 %v1375_v54 }
 0x79a   :  { %v1333_v30 = vpop.xlane.xlu0 %1332 }
 0x79b   :  { %3150 = vrcp.f32 %v1333_v30 }
 0x79c   :  { %3152 = vrcp.f32 %v1335_v40 }
 0x79e   :  { %v1337_v43 = vpop.xlane.xlu0 %1336 }
 0x79f   :  { %3154 = vrcp.f32 %v1337_v43 }
 0x7a5   :  { %v3151_v24 = vpop.eup %3150 }
 0x7a6   :  { %v1367_v35 = vmul.f32 %v3151_v24, %v4086_v13  ;;  %v3153_v1 = vpop.eup %3152 }
 0x7a7   :  { %v1368_v18 = vmul.f32 %v3153_v1, %v4070_v22 }
 0x7a8   :  { %v1376_v38 = vpack.c.bf16 %v1367_v35, %v1366_v62 }
 0x7a9   :  { %v3155_v48 = vpop.eup %3154 }
 0x7aa   :  { %2828 = vmatprep.mubr.bf16.mxu1 %v1376_v38  ;;  %v1369_v11 = vmul.f32 %v3155_v48, %v4089_v49 }
 0x7ac   :  { %v1377_v28 = vpack.c.bf16 %v1369_v11, %v1368_v18 }
 0x7ae   :  { %2829 = vmatmul.mubr.bf16.gmra.mrb[24].mxu1 %v1377_v28 }
 0x846   :  { %v2818_v13 = vpop.f32.mrb[48].mxu0  ;;  %v2822_v25 = vpop.f32.mrb[16].mxu1 }
 0x847   :  { %v1436_v15 = vpop.f32.mrb[49].mxu0  ;;  %v1452_v22 = vpop.f32.mrb[17].mxu1 }
 0x848   :  { %v2819_v40 = vpop.f32.mrb[50].mxu0  ;;  %v2823_v49 = vpop.f32.mrb[18].mxu1 }
 0x849   :  { %v2947_v57 = vpack.i.bf16 %v2819_v40, %v2818_v13  ;;  %v2957_v37 = vpack.i.bf16 %v2823_v49, %v2822_v25  ;;  %v1439_v17 = vpop.f32.mrb[51].mxu0  ;;  %v1455_v20 = vpop.f32.mrb[19].mxu1 }
 0x84a   :  { %v2942_v33 = vpack.i.bf16 %v1439_v17, %v1436_v15  ;;  %v2952_v55 = vpack.i.bf16 %v1455_v20, %v1452_v22 }
 0x84b   :  { %2948 = vrot.lane.b32.xlu1 %v2947_v57, %s3241_s16 }
 0x84c   :  { %2943 = vrot.lane.b32.xlu0 %v2942_v33, %s3241_s16 }
 0x84e   :  { %v2826_v23 = vpop.f32.mrb[20].mxu1 }
 0x84f   :  { %v1468_v36 = vpop.f32.mrb[21].mxu1  ;;  %2953 = vrot.lane.b32.xlu1 %v2952_v55, %s3241_s16 }
 0x850   :  { %v2827_v21 = vpop.f32.mrb[22].mxu1 }
 0x851   :  { %v2967_v19 = vpack.i.bf16 %v2827_v21, %v2826_v23  ;;  %v1471_v34 = vpop.f32.mrb[23].mxu1  ;;  %v4157_v23 = vld [vmem:[%s4692_s6] ss:$0 sm:$0xff] }
 0x852   :  { %v2962_v8 = vpack.i.bf16 %v1471_v34, %v1468_v36 }
 0x853   :  { %2958 = vrot.lane.b32.xlu1 %v2957_v37, %s3241_s16 }
 0x854   :  { %2963 = vrot.lane.b32.xlu0 %v2962_v8, %s3241_s16 }
 0x857   :  { %2968 = vrot.lane.b32.xlu1 %v2967_v19, %s3241_s16 }
 0x881   :  { %v2830_v26 = vpop.f32.mrb[24].mxu1 }
 0x882   :  { %v1484_v0 = vpop.f32.mrb[25].mxu1 }
 0x883   :  { %v2831_v27 = vpop.f32.mrb[26].mxu1 }
 0x884   :  { %v2977_v7 = vpack.i.bf16 %v2831_v27, %v2830_v26  ;;  %v1487_v3 = vpop.f32.mrb[27].mxu1  ;;  %v3221_v26 = vld [vmem:[%s4685_s0 + $0x10] sm:$0xff] }
 0x885   :  { %v2972_v44 = vpack.i.bf16 %v1487_v3, %v1484_v0 }
 0x886   :  { %2978 = vrot.lane.b32.xlu1 %v2977_v7, %s3241_s16  ;;  %v3222_v7 = vld [vmem:[%s4685_s0 + $0x8] sm:$0xff] }
 0x887   :  { %2973 = vrot.lane.b32.xlu0 %v2972_v44, %s3241_s16 }
 0x8bd   :  { %v2949_v50 = vpop.permute.xlu1 %2948 }
 0x8be   :  { %v2951_v29 = vunpack.i.h.bf16 %v2949_v50  ;;  %v2950_v31 = vunpack.i.l.bf16 %v2949_v50  ;;  %v2944_v56 = vpop.permute.xlu0 %2943 }
 0x8bf   :  { %v2946_v9 = vunpack.i.h.bf16 %v2944_v56  ;;  %v2945_v42 = vunpack.i.l.bf16 %v2944_v56  ;;  %v3223_v56 = vld [vmem:[%s4685_s0 + $0x18] sm:$0xff] }
 0x8c0   :  { %v1566_v6 = vsel %vm533_vm1, %v3894_v59, %v2951_v29  ;;  %v1565_v52 = vsel %vm533_vm1, %v3890_v32, %v2950_v31 }
 0x8c1   :  { %v1580_v41 = vpack.c.bf16 %v1566_v6, %v1565_v52  ;;  %v1564_v54 = vsel %vm533_vm1, %v3896_v60, %v2946_v9  ;;  %v1563_v30 = vsel %vm533_vm1, %v3892_v14, %v2945_v42  ;;  %v2954_v43 = vpop.permute.xlu1 %2953 }
 0x8c2   :  { %v1579_v12 = vpack.c.bf16 %v1564_v54, %v1563_v30  ;;  %v2956_v24 = vunpack.i.h.bf16 %v2954_v43  ;;  %v2955_v62 = vunpack.i.l.bf16 %v2954_v43 }
 0x8c4   :  { %v1568_v35 = vsel %vm533_vm1, %v3904_v46, %v2956_v24  ;;  %v1567_v59 = vsel %vm533_vm1, %v3900_v63, %v2955_v62  ;;  %2836 = vmatprep.mubr.msk.bf16.mxu1 %vm100_vm0, %v1579_v12  ;;  %v3224_v12 = vld [vmem:[%s4685_s0 + $0x20] sm:$0xff]  ;;  %v3225_v62 = vld [vmem:[%s4685_s0 + $0x28] sm:$0xff] }
 0x8c5   :  { %v1581_v32 = vpack.c.bf16 %v1568_v35, %v1567_v59  ;;  %v2959_v1 = vpop.permute.xlu1 %2958  ;;  %2837 = vmatmul.mubr.msk.bf16.vlgmr.msra.gmra.mrb[28].mxu1 %vm100_vm0, %v1580_v41 }
 0x8c6   :  { %v2961_v60 = vunpack.i.h.bf16 %v2959_v1  ;;  %v2960_v38 = vunpack.i.l.bf16 %v2959_v1  ;;  %v2964_v48 = vpop.permute.xlu0 %2963 }
 0x8c7   :  { %v2966_v14 = vunpack.i.h.bf16 %v2964_v48  ;;  %v2965_v18 = vunpack.i.l.bf16 %v2964_v48  ;;  %2840 = vmatprep.mubr.msk.bf16.mxu1 %vm100_vm0, %v1581_v32  ;;  %v3226_v32 = vld [vmem:[%s4685_s0 + $0x38] sm:$0xff] }
 0x8c8   :  { %v1570_v11 = vsel %vm533_vm1, %v3902_v47, %v2961_v60  ;;  %v1569_v46 = vsel %vm533_vm1, %v3898_v61, %v2960_v38 }
 0x8c9   :  { %v1582_v63 = vpack.c.bf16 %v1570_v11, %v1569_v46  ;;  %v1572_v28 = vsel %vm533_vm1, %v3912_v51, %v2966_v14  ;;  %v1571_v16 = vsel %vm533_vm1, %v3908_v53, %v2965_v18  ;;  %v2969_v39 = vpop.permute.xlu1 %2968  ;;  %v3227_v14 = vld [vmem:[%s4685_s0 + $0x30] sm:$0xff] }
 0x8ca   :  { %v1583_v13 = vpack.c.bf16 %v1572_v28, %v1571_v16  ;;  %v2971_v25 = vunpack.i.h.bf16 %v2969_v39  ;;  %v2970_v15 = vunpack.i.l.bf16 %v2969_v39 }
 0x8cc   :  { %v1574_v22 = vsel %vm533_vm1, %v3910_v4, %v2971_v25  ;;  %v1573_v47 = vsel %vm533_vm1, %v3906_v2, %v2970_v15  ;;  %v3228_v15 = vld [vmem:[%s4685_s0 + $0x40] sm:$0xff] }
 0x8cd   :  { %v1584_v40 = vpack.c.bf16 %v1574_v22, %v1573_v47  ;;  %2841 = vmatmul.mubr.msk.bf16.gmra.mrb[32].mxu1 %vm100_vm0, %v1582_v63  ;;  %v3229_v47 = vld [vmem:[%s4685_s0 + $0x48] sm:$0xff] }
 0x8ce   :  { %2844 = vmatprep.mubr.msk.bf16.mxu1 %vm100_vm0, %v1583_v13 }
 0x8d5   :  { %2845 = vmatmul.mubr.msk.bf16.gmra.mrb[36].mxu1 %vm100_vm0, %v1584_v40 }
 0x8f8   :  { %v2979_v61 = vpop.permute.xlu1 %2978 }
 0x8f9   :  { %v2981_v51 = vunpack.i.h.bf16 %v2979_v61  ;;  %v2980_v53 = vunpack.i.l.bf16 %v2979_v61  ;;  %v2974_v49 = vpop.permute.xlu0 %2973 }
 0x8fa   :  { %v2976_v57 = vunpack.i.h.bf16 %v2974_v49  ;;  %v2975_v37 = vunpack.i.l.bf16 %v2974_v49 }
 0x8fb   :  { %v1578_v17 = vsel %vm533_vm1, %v3918_v5, %v2981_v51  ;;  %v1577_v4 = vsel %vm533_vm1, %v3914_v45, %v2980_v53  ;;  %v3230_v51 = vld [vmem:[%s4685_s0 + $0x58] sm:$0xff] }
 0x8fc   :  { %v1586_v2 = vpack.c.bf16 %v1578_v17, %v1577_v4  ;;  %v1576_v20 = vsel %vm533_vm1, %v3920_v58, %v2976_v57  ;;  %v1575_v33 = vsel %vm533_vm1, %v3916_v10, %v2975_v37  ;;  %v3220_v10 = vld [vmem:[%s4685_s0] sm:$0xff]  ;;  %v3231_v57 = vld [vmem:[%s4685_s0 + $0x50] sm:$0xff] }
 0x8fd   :  { %v1585_v55 = vpack.c.bf16 %v1576_v20, %v1575_v33 }
 0x8ff   :  { %2848 = vmatprep.mubr.msk.bf16.mxu1 %vm100_vm0, %v1585_v55 }
 0x900   :  { %2849 = vmatmul.mubr.msk.bf16.gmra.mrb[40].mxu1 %vm100_vm0, %v1586_v2 }
 0x998   :  { %v2838_v5 = vpop.f32.mrb[28].mxu1 }
 0x999   :  { %v1663_v36 = vpop.f32.mrb[29].mxu1  ;;  %v1672_v45 = vadd.f32 %v2838_v5, %v4157_v23 }
 0x99a   :  { %v1664_v21 = vadd.f32 %v4157_v23, %v1663_v36  ;;  %v2839_v58 = vpop.f32.mrb[30].mxu1 }
 0x99b   :  { %v1666_v19 = vpop.f32.mrb[31].mxu1  ;;  %v4170_v0 = vadd.f32 %v3221_v26, %v1672_v45  ;;  %v1675_v27 = vadd.f32 %v2839_v58, %v4157_v23  ;;  %v3232_v58 = vld [vmem:[%s4685_s0 + $0x60] sm:$0xff] }
 0x99c   :  { %v4164_v34 = vadd.f32 %v3220_v10, %v1664_v21  ;;  %v1667_v8 = vadd.f32 %v4157_v23, %v1666_v19 }
 0x99d   :  { %v4185_v9 = vadd.f32 %v3223_v56, %v1675_v27  ;;  %v1748_v52 = vsel %vm100_vm0, %v4170_v0, 0.0  ;;  %v3234_v27 = vld [vmem:[%s4685_s0 + $0x68] sm:$0xff] }
 0x99e   :  { %v4176_v3 = vadd.f32 %v3222_v7, %v1667_v8  ;;  %v1742_v44 = vsel %vm100_vm0, %v4164_v34, 0.0  ;;  %v3233_v8 = vld [vmem:[%s4685_s0 + $0x70] sm:$0xff] }
 0x99f   :  { %1743 = vadd.xlane.f32.xlu0 %v1742_v44  ;;  %v1751_v59 = vsel %vm100_vm0, %v4185_v9, 0.0 }
 0x9a0   :  { %v2842_v50 = vpop.f32.mrb[32].mxu1  ;;  %v1745_v29 = vsel %vm100_vm0, %v4176_v3, 0.0 }
 0x9a1   :  { %v1679_v31 = vpop.f32.mrb[33].mxu1  ;;  %1746 = vadd.xlane.f32.xlu1 %v1745_v29  ;;  %v1688_v43 = vadd.f32 %v2842_v50, %v4157_v23 }
 0x9a2   :  { %v1680_v42 = vadd.f32 %v4157_v23, %v1679_v31  ;;  %v2843_v6 = vpop.f32.mrb[34].mxu1 }
 0x9a3   :  { %v1682_v41 = vpop.f32.mrb[35].mxu1  ;;  %1749 = vadd.xlane.f32.xlu0 %v1748_v52  ;;  %v1691_v54 = vadd.f32 %v2843_v6, %v4157_v23  ;;  %v4215_v18 = vadd.f32 %v3227_v14, %v1688_v43 }
 0x9a4   :  { %v1683_v30 = vadd.f32 %v4157_v23, %v1682_v41  ;;  %v4196_v24 = vadd.f32 %v3224_v12, %v1680_v42 }
 0x9a5   :  { %v4208_v1 = vadd.f32 %v3226_v32, %v1691_v54  ;;  %v1760_v61 = vsel %vm100_vm0, %v4215_v18, 0.0 }
 0x9a6   :  { %v4201_v35 = vadd.f32 %v3225_v62, %v1683_v30  ;;  %v1754_v63 = vsel %vm100_vm0, %v4196_v24, 0.0 }
 0x9a7   :  { %1752 = vadd.xlane.f32.xlu0 %v1751_v59  ;;  %v1763_v13 = vsel %vm100_vm0, %v4208_v1, 0.0 }
 0x9a8   :  { %v2846_v60 = vpop.f32.mrb[36].mxu1  ;;  %v1757_v38 = vsel %vm100_vm0, %v4201_v35, 0.0 }
 0x9a9   :  { %v1695_v48 = vpop.f32.mrb[37].mxu1  ;;  %1758 = vadd.xlane.f32.xlu1 %v1757_v38  ;;  %v1704_v25 = vadd.f32 %v2846_v60, %v4157_v23 }
 0x9aa   :  { %v1696_v11 = vadd.f32 %v4157_v23, %v1695_v48  ;;  %v2847_v46 = vpop.f32.mrb[38].mxu1 }
 0x9ab   :  { %v1698_v28 = vpop.f32.mrb[39].mxu1  ;;  %1755 = vadd.xlane.f32.xlu0 %v1754_v63  ;;  %v1707_v16 = vadd.f32 %v2847_v46, %v4157_v23  ;;  %v4247_v37 = vadd.f32 %v3231_v57, %v1704_v25 }
 0x9ac   :  { %v1699_v39 = vadd.f32 %v4157_v23, %v1698_v28  ;;  %v4228_v22 = vadd.f32 %v3228_v15, %v1696_v11 }
 0x9ad   :  { %1764 = vadd.xlane.f32.xlu1 %v1763_v13  ;;  %v4240_v53 = vadd.f32 %v3230_v51, %v1707_v16  ;;  %v1772_v2 = vsel %vm100_vm0, %v4247_v37, 0.0 }
 0x9ae   :  { %v4233_v40 = vadd.f32 %v3229_v47, %v1699_v39  ;;  %v1766_v17 = vsel %vm100_vm0, %v4228_v22, 0.0 }
 0x9af   :  { %1761 = vadd.xlane.f32.xlu0 %v1760_v61  ;;  %v1775_v4 = vsel %vm100_vm0, %v4240_v53, 0.0 }
 0x9b0   :  { %v1769_v49 = vsel %vm100_vm0, %v4233_v40, 0.0 }
 0x9b1   :  { %1770 = vadd.xlane.f32.xlu1 %v1769_v49 }
 0x9b3   :  { %1767 = vadd.xlane.f32.xlu0 %v1766_v17 }
 0x9b5   :  { %1776 = vadd.xlane.f32.xlu1 %v1775_v4 }
 0x9b7   :  { %1773 = vadd.xlane.f32.xlu0 %v1772_v2 }
 0x9d3   :  { %v2850_v20 = vpop.f32.mrb[40].mxu1 }
 0x9d4   :  { %v1720_v33 = vadd.f32 %v2850_v20, %v4157_v23  ;;  %v1711_v55 = vpop.f32.mrb[41].mxu1 }
 0x9d5   :  { %v1712_v5 = vadd.f32 %v4157_v23, %v1711_v55  ;;  %v2851_v36 = vpop.f32.mrb[42].mxu1 }
 0x9d6   :  { %v1723_v45 = vadd.f32 %v2851_v36, %v4157_v23  ;;  %v1714_v21 = vpop.f32.mrb[43].mxu1  ;;  %v4267_v26 = vadd.f32 %v3233_v8, %v1720_v33 }
 0x9d7   :  { %v4261_v19 = vadd.f32 %v3232_v58, %v1712_v5  ;;  %v1715_v10 = vadd.f32 %v4157_v23, %v1714_v21  ;;  %v3235_v23 = vld [vmem:[%s4685_s0 + $0x78] sm:$0xff] }
 0x9d8   :  { %v4279_v50 = vadd.f32 %v3235_v23, %v1723_v45  ;;  %v1784_v31 = vsel %vm100_vm0, %v4267_v26, 0.0 }
 0x9d9   :  { %v4272_v7 = vadd.f32 %v3234_v27, %v1715_v10  ;;  %v1778_v44 = vsel %vm100_vm0, %v4261_v19, 0.0 }
 0x9da   :  { %1779 = vadd.xlane.f32.xlu0 %v1778_v44  ;;  %v1787_v56 = vsel %vm100_vm0, %v4279_v50, 0.0 }
 0x9db   :  { %v1781_v29 = vsel %vm100_vm0, %v4272_v7, 0.0 }
 0x9dc   :  { %1782 = vadd.xlane.f32.xlu1 %v1781_v29 }
 0x9de   :  { %1785 = vadd.xlane.f32.xlu0 %v1784_v31 }
 0x9e0   :  { %1788 = vadd.xlane.f32.xlu1 %v1787_v56 }
 0xa2c   :  { %v1744_v42 = vpop.xlane.xlu0 %1743 }
 0xa2d   :  { %v1790_v6 = vmul.f32 0.03125, %v1744_v42 }
 0xa2e   :  { %v1747_v52 = vpop.xlane.xlu1 %1746 }
 0xa2f   :  { %v4288_v41 = vsub.f32 %v4164_v34, %v1790_v6  ;;  %v1791_v54 = vmul.f32 0.03125, %v1747_v52 }
 0xa30   :  { %v1750_v30 = vpop.xlane.xlu0 %1749 }
 0xa31   :  { %v4291_v43 = vsub.f32 %v4176_v3, %v1791_v54  ;;  %v1792_v12 = vmul.f32 0.03125, %v1750_v30  ;;  %v1822_v62 = vmul.f32 %v4288_v41, %v4288_v41 }
 0xa33   :  { %v4296_v59 = vsub.f32 %v4170_v0, %v1792_v12  ;;  %v1838_v32 = vsel %vm100_vm0, %v1822_v62, 0.0  ;;  %v1823_v60 = vmul.f32 %v4291_v43, %v4291_v43 }
 0xa34   :  { %1839 = vadd.xlane.f32.xlu0 %v1838_v32  ;;  %v1753_v38 = vpop.xlane.xlu0 %1752 }
 0xa35   :  { %v1793_v48 = vmul.f32 0.03125, %v1753_v38  ;;  %v1841_v14 = vsel %vm100_vm0, %v1823_v60, 0.0  ;;  %v1824_v11 = vmul.f32 %v4296_v59, %v4296_v59 }
 0xa36   :  { %1842 = vadd.xlane.f32.xlu1 %v1841_v14  ;;  %v1759_v46 = vpop.xlane.xlu1 %1758 }
 0xa37   :  { %v4305_v63 = vsub.f32 %v4185_v9, %v1793_v48  ;;  %v1795_v28 = vmul.f32 0.03125, %v1759_v46  ;;  %v1844_v16 = vsel %vm100_vm0, %v1824_v11, 0.0  ;;  %v2986_v11 = vld [vmem:[%s4693_s9] sm:$0xff]   ;;  %v2987_v46 = vld [vmem:[%s4693_s9 + $0x8] sm:$0xff]  }
 0xa38   :  { %1845 = vadd.xlane.f32.xlu0 %v1844_v16  ;;  %v1756_v39 = vpop.xlane.xlu0 %1755  ;;  %2852 = vmatprep.subr.bf16.mxu0 %v2986_v11 }
 0xa39   :  { %v4309_v13 = vsub.f32 %v4201_v35, %v1795_v28  ;;  %v1794_v25 = vmul.f32 0.03125, %v1756_v39  ;;  %v1825_v15 = vmul.f32 %v4305_v63, %v4305_v63  ;;  %2853 = vmatpush3.bf16.msra.mxu0 %v2986_v11 }
 0xa3a   :  { %v1765_v47 = vpop.xlane.xlu1 %1764  ;;  %2854 = vmatprep.subr.bf16.mxu0 %v2987_v46 }
 0xa3b   :  { %v4314_v61 = vsub.f32 %v4196_v24, %v1794_v25  ;;  %v1797_v51 = vmul.f32 0.03125, %v1765_v47  ;;  %v1847_v49 = vsel %vm100_vm0, %v1825_v15, 0.0  ;;  %v1827_v57 = vmul.f32 %v4309_v13, %v4309_v13 }
 0xa3c   :  { %1848 = vadd.xlane.f32.xlu1 %v1847_v49  ;;  %v1762_v17 = vpop.xlane.xlu0 %1761 }
 0xa3d   :  { %v4320_v4 = vsub.f32 %v4208_v1, %v1797_v51  ;;  %v1796_v2 = vmul.f32 0.03125, %v1762_v17  ;;  %v1826_v20 = vmul.f32 %v4314_v61, %v4314_v61  ;;  %v1853_v55 = vsel %vm100_vm0, %v1827_v57, 0.0  ;;  %2855 = vmatpush3.bf16.msra.mxu0 %v2987_v46 }
 0xa3e   :  { %v1771_v33 = vpop.xlane.xlu1 %1770 }
 0xa3f   :  { %v4326_v5 = vsub.f32 %v4215_v18, %v1796_v2  ;;  %v1799_v36 = vmul.f32 0.03125, %v1771_v33  ;;  %v1850_v45 = vsel %vm100_vm0, %v1826_v20, 0.0  ;;  %v1829_v21 = vmul.f32 %v4320_v4, %v4320_v4 }
 0xa40   :  { %1854 = vadd.xlane.f32.xlu1 %v1853_v55  ;;  %1851 = vadd.xlane.f32.xlu0 %v1850_v45  ;;  %v1768_v58 = vpop.xlane.xlu0 %1767 }
 0xa41   :  { %v4332_v10 = vsub.f32 %v4233_v40, %v1799_v36  ;;  %v1798_v8 = vmul.f32 0.03125, %v1768_v58  ;;  %v1828_v27 = vmul.f32 %v4326_v5, %v4326_v5  ;;  %v1859_v23 = vsel %vm100_vm0, %v1829_v21, 0.0 }
 0xa42   :  { %v1777_v44 = vpop.xlane.xlu1 %1776 }
 0xa43   :  { %v4338_v29 = vsub.f32 %v4228_v22, %v1798_v8  ;;  %v1801_v31 = vmul.f32 0.03125, %v1777_v44  ;;  %v1856_v56 = vsel %vm100_vm0, %v1828_v27, 0.0  ;;  %v1831_v42 = vmul.f32 %v4332_v10, %v4332_v10 }
 0xa44   :  { %1860 = vadd.xlane.f32.xlu1 %v1859_v23  ;;  %1857 = vadd.xlane.f32.xlu0 %v1856_v56  ;;  %v1774_v6 = vpop.xlane.xlu0 %1773 }
 0xa45   :  { %v4344_v52 = vsub.f32 %v4240_v53, %v1801_v31  ;;  %v1800_v54 = vmul.f32 0.03125, %v1774_v6  ;;  %v1830_v30 = vmul.f32 %v4338_v29, %v4338_v29  ;;  %v1865_v62 = vsel %vm100_vm0, %v1831_v42, 0.0 }
 0xa47   :  { %v4349_v12 = vsub.f32 %v4247_v37, %v1800_v54  ;;  %v1862_v32 = vsel %vm100_vm0, %v1830_v30, 0.0  ;;  %v1833_v60 = vmul.f32 %v4344_v52, %v4344_v52 }
 0xa48   :  { %1866 = vadd.xlane.f32.xlu1 %v1865_v62  ;;  %1863 = vadd.xlane.f32.xlu0 %v1862_v32 }
 0xa49   :  { %v1832_v38 = vmul.f32 %v4349_v12, %v4349_v12  ;;  %v1871_v48 = vsel %vm100_vm0, %v1833_v60, 0.0 }
 0xa4b   :  { %v1868_v14 = vsel %vm100_vm0, %v1832_v38, 0.0 }
 0xa4c   :  { %1872 = vadd.xlane.f32.xlu1 %v1871_v48  ;;  %1869 = vadd.xlane.f32.xlu0 %v1868_v14 }
 0xa67   :  { %v1780_v28 = vpop.xlane.xlu0 %1779 }
 0xa68   :  { %v1802_v16 = vmul.f32 0.03125, %v1780_v28 }
 0xa69   :  { %v1783_v39 = vpop.xlane.xlu1 %1782 }
 0xa6a   :  { %v4366_v25 = vsub.f32 %v4261_v19, %v1802_v16  ;;  %v1803_v15 = vmul.f32 0.03125, %v1783_v39  ;;  %v4392_v16 = vld [vmem:[%s4694_s7] ss:$0 sm:$0xff] }
 0xa6b   :  { %v1786_v47 = vpop.xlane.xlu0 %1785 }
 0xa6c   :  { %v4369_v51 = vsub.f32 %v4272_v7, %v1803_v15  ;;  %v1804_v49 = vmul.f32 0.03125, %v1786_v47  ;;  %v1834_v57 = vmul.f32 %v4366_v25, %v4366_v25 }
 0xa6d   :  { %v1789_v17 = vpop.xlane.xlu1 %1788 }
 0xa6e   :  { %v4374_v2 = vsub.f32 %v4267_v26, %v1804_v49  ;;  %v1805_v20 = vmul.f32 0.03125, %v1789_v17  ;;  %v1874_v33 = vsel %vm100_vm0, %v1834_v57, 0.0  ;;  %v1835_v55 = vmul.f32 %v4369_v51, %v4369_v51 }
 0xa6f   :  { %1875 = vadd.xlane.f32.xlu0 %v1874_v33 }
 0xa70   :  { %v4380_v36 = vsub.f32 %v4279_v50, %v1805_v20  ;;  %v1877_v45 = vsel %vm100_vm0, %v1835_v55, 0.0  ;;  %v1836_v21 = vmul.f32 %v4374_v2, %v4374_v2 }
 0xa71   :  { %1878 = vadd.xlane.f32.xlu1 %v1877_v45 }
 0xa72   :  { %v1880_v58 = vsel %vm100_vm0, %v1836_v21, 0.0  ;;  %v1837_v8 = vmul.f32 %v4380_v36, %v4380_v36 }
 0xa73   :  { %1881 = vadd.xlane.f32.xlu0 %v1880_v58 }
 0xa74   :  { %v1883_v27 = vsel %vm100_vm0, %v1837_v8, 0.0 }
 0xa75   :  { %1884 = vadd.xlane.f32.xlu1 %v1883_v27  ;;  %v4400_v27 = vld [vmem:[%s4695_s8] ss:$0 sm:$0xff] }
 0xac1   :  { %v1840_v44 = vpop.xlane.xlu0 %1839 }
 0xac2   :  { %v1886_v23 = vmul.f32 0.03125, %v1840_v44 }
 0xac3   :  { %v1843_v31 = vpop.xlane.xlu1 %1842 }
 0xac4   :  { %v1902_v56 = vadd.f32 1e-05, %v1886_v23  ;;  %v1887_v42 = vmul.f32 0.03125, %v1843_v31 }
 0xac5   :  { %v1846_v6 = vpop.xlane.xlu0 %1845 }
 0xac6   :  { %3156 = vrsqrt.f32 %v1902_v56  ;;  %v1903_v54 = vadd.f32 1e-05, %v1887_v42  ;;  %v1888_v30 = vmul.f32 0.03125, %v1846_v6 }
 0xac8   :  { %3158 = vrsqrt.f32 %v1903_v54  ;;  %v1904_v62 = vadd.f32 1e-05, %v1888_v30 }
 0xac9   :  { %v1849_v32 = vpop.xlane.xlu1 %1848 }
 0xaca   :  { %3160 = vrsqrt.f32 %v1904_v62  ;;  %v1889_v60 = vmul.f32 0.03125, %v1849_v32 }
 0xacc   :  { %v1905_v38 = vadd.f32 1e-05, %v1889_v60 }
 0xacd   :  { %v1855_v48 = vpop.xlane.xlu1 %1854  ;;  %v1852_v14 = vpop.xlane.xlu0 %1851 }
 0xace   :  { %3162 = vrsqrt.f32 %v1905_v38  ;;  %v1891_v11 = vmul.f32 0.03125, %v1855_v48  ;;  %v1890_v46 = vmul.f32 0.03125, %v1852_v14 }
 0xad0   :  { %v3157_v28 = vpop.eup %3156  ;;  %v1907_v39 = vadd.f32 1e-05, %v1891_v11  ;;  %v1906_v15 = vadd.f32 1e-05, %v1890_v46 }
 0xad1   :  { %v1934_v47 = vmul.f32 %v3157_v28, %v4288_v41  ;;  %v1861_v49 = vpop.xlane.xlu1 %1860  ;;  %v1858_v57 = vpop.xlane.xlu0 %1857 }
 0xad2   :  { %v3159_v17 = vpop.eup %3158  ;;  %3164 = vrsqrt.f32 %v1907_v39  ;;  %v1893_v20 = vmul.f32 0.03125, %v1861_v49  ;;  %v1892_v33 = vmul.f32 0.03125, %v1858_v57 }
 0xad3   :  { %v1935_v55 = vmul.f32 %v3159_v17, %v4291_v43  ;;  %3166 = vrsqrt.f32 %v1906_v15  ;;  %v1956_v45 = vmul.f32 %v4392_v16, %v1934_v47 }
 0xad4   :  { %v3161_v21 = vpop.eup %3160  ;;  %v1909_v58 = vadd.f32 1e-05, %v1893_v20  ;;  %v1908_v8 = vadd.f32 1e-05, %v1892_v33 }
 0xad5   :  { %v1936_v41 = vmul.f32 %v3161_v21, %v4296_v59  ;;  %v1867_v44 = vpop.xlane.xlu1 %1866  ;;  %v1864_v23 = vpop.xlane.xlu0 %1863  ;;  %v1957_v31 = vmul.f32 %v4392_v16, %v1935_v55  ;;  %v1978_v42 = vadd.f32 %v4400_v27, %v1956_v45 }
 0xad6   :  { %3168 = vrsqrt.f32 %v1909_v58  ;;  %v1895_v56 = vmul.f32 0.03125, %v1867_v44  ;;  %v1894_v43 = vmul.f32 0.03125, %v1864_v23 }
 0xad7   :  { %3170 = vrsqrt.f32 %v1908_v8  ;;  %v1979_v6 = vadd.f32 %v4400_v27, %v1957_v31  ;;  %v1958_v32 = vmul.f32 %v4392_v16, %v1936_v41 }
 0xad8   :  { %v3163_v54 = vpop.eup %3162  ;;  %v1911_v30 = vadd.f32 1e-05, %v1895_v56  ;;  %v1910_v62 = vadd.f32 1e-05, %v1894_v43 }
 0xad9   :  { %v1937_v60 = vmul.f32 %v3163_v54, %v4305_v63  ;;  %v1873_v59 = vpop.xlane.xlu1 %1872  ;;  %v1870_v38 = vpop.xlane.xlu0 %1869  ;;  %v1994_v48 = vpack.c.bf16 %v1979_v6, %v1978_v42  ;;  %v1980_v57 = vadd.f32 %v4400_v27, %v1958_v32 }
 0xada   :  { %3172 = vrsqrt.f32 %v1911_v30  ;;  %v1897_v14 = vmul.f32 0.03125, %v1873_v59  ;;  %v1896_v11 = vmul.f32 0.03125, %v1870_v38 }
 0xadb   :  { %v1959_v46 = vmul.f32 %v4392_v16, %v1937_v60  ;;  %3174 = vrsqrt.f32 %v1910_v62  ;;  %2856 = vmatprep.mubr.msk.bf16.mxu0 %vm100_vm0, %v1994_v48 }
 0xadc   :  { %v3165_v28 = vpop.eup %3164  ;;  %v1913_v39 = vadd.f32 1e-05, %v1897_v14  ;;  %v1912_v15 = vadd.f32 1e-05, %v1896_v11 }
 0xadd   :  { %v3167_v47 = vpop.eup %3166  ;;  %v1939_v49 = vmul.f32 %v3165_v28, %v4309_v13  ;;  %v1981_v63 = vadd.f32 %v4400_v27, %v1959_v46 }
 0xade   :  { %v1938_v17 = vmul.f32 %v3167_v47, %v4314_v61  ;;  %3176 = vrsqrt.f32 %v1913_v39 }
 0xadf   :  { %3178 = vrsqrt.f32 %v1912_v15  ;;  %v1995_v20 = vpack.c.bf16 %v1981_v63, %v1980_v57  ;;  %v1961_v33 = vmul.f32 %v4392_v16, %v1939_v49 }
 0xae0   :  { %v3169_v55 = vpop.eup %3168  ;;  %v1960_v45 = vmul.f32 %v4392_v16, %v1938_v17 }
 0xae1   :  { %v3171_v21 = vpop.eup %3170  ;;  %v1941_v58 = vmul.f32 %v3169_v55, %v4320_v4  ;;  %2857 = vmatmul.mubr.msk.bf16.vlgmr.msra.gmra.mrb[52].mxu0 %vm100_vm0, %v1995_v20  ;;  %v1983_v13 = vadd.f32 %v4400_v27, %v1961_v33 }
 0xae2   :  { %v1940_v8 = vmul.f32 %v3171_v21, %v4326_v5  ;;  %v1982_v41 = vadd.f32 %v4400_v27, %v1960_v45 }
 0xae3   :  { %v1963_v61 = vmul.f32 %v4392_v16, %v1941_v58 }
 0xae4   :  { %v3173_v44 = vpop.eup %3172  ;;  %v1996_v23 = vpack.c.bf16 %v1983_v13, %v1982_v41  ;;  %v1962_v31 = vmul.f32 %v4392_v16, %v1940_v8 }
 0xae5   :  { %v3175_v56 = vpop.eup %3174  ;;  %v1943_v43 = vmul.f32 %v3173_v44, %v4332_v10  ;;  %v1985_v42 = vadd.f32 %v4400_v27, %v1963_v61 }
 0xae6   :  { %v1942_v4 = vmul.f32 %v3175_v56, %v4338_v29  ;;  %2860 = vmatprep.mubr.msk.bf16.mxu0 %vm100_vm0, %v1996_v23  ;;  %v1984_v6 = vadd.f32 %v4400_v27, %v1962_v31 }
 0xae7   :  { %v1965_v5 = vmul.f32 %v4392_v16, %v1943_v43 }
 0xae8   :  { %v3177_v54 = vpop.eup %3176  ;;  %v1997_v30 = vpack.c.bf16 %v1985_v42, %v1984_v6  ;;  %v1964_v62 = vmul.f32 %v4392_v16, %v1942_v4 }
 0xae9   :  { %v3179_v32 = vpop.eup %3178  ;;  %v1945_v60 = vmul.f32 %v3177_v54, %v4344_v52  ;;  %v1987_v59 = vadd.f32 %v4400_v27, %v1965_v5  ;;  %v2989_v5 = vld [vmem:[%s4696_s11 + $0x8] sm:$0xff]   ;;  %v2992_v54 = vld [vmem:[%s4696_s11 + $0x20] sm:$0xff]  }
 0xaea   :  { %v1944_v10 = vmul.f32 %v3179_v32, %v4349_v12  ;;  %2861 = vmatmul.mubr.msk.bf16.gmra.mrb[56].mxu0 %vm100_vm0, %v1997_v30  ;;  %v1986_v29 = vadd.f32 %v4400_v27, %v1964_v62  ;;  %v2993_v30 = vld [vmem:[%s4696_s11 + $0x28] sm:$0xff]   ;;  %v2994_v62 = vld [vmem:[%s4696_s11 + $0x30] sm:$0xff]   ;;  %v2995_v32 = vld [vmem:[%s4696_s11 + $0x38] sm:$0xff]  }
 0xaeb   :  { %v1967_v38 = vmul.f32 %v4392_v16, %v1945_v60  ;;  %v4482_v60 = vld [vmem:[%s4697_s10] ss:$0 sm:$0xff] }
 0xaec   :  { %v1998_v48 = vpack.c.bf16 %v1987_v59, %v1986_v29  ;;  %v1966_v14 = vmul.f32 %v4392_v16, %v1944_v10 }
 0xaed   :  { %v1989_v11 = vadd.f32 %v4400_v27, %v1967_v38 }
 0xaee   :  { %2864 = vmatprep.mubr.msk.bf16.mxu0 %vm100_vm0, %v1998_v48  ;;  %v1988_v46 = vadd.f32 %v4400_v27, %v1966_v14 }
 0xaf0   :  { %v1999_v52 = vpack.c.bf16 %v1989_v11, %v1988_v46 }
 0xaf2   :  { %2865 = vmatmul.mubr.msk.bf16.gmra.mrb[60].mxu0 %vm100_vm0, %v1999_v52 }
 0xafc   :  { %v1876_v28 = vpop.xlane.xlu0 %1875 }
 0xafd   :  { %v1898_v12 = vmul.f32 0.03125, %v1876_v28 }
 0xafe   :  { %v1879_v39 = vpop.xlane.xlu1 %1878 }
 0xaff   :  { %v1914_v15 = vadd.f32 1e-05, %v1898_v12  ;;  %v1899_v47 = vmul.f32 0.03125, %v1879_v39 }
 0xb00   :  { %v1882_v49 = vpop.xlane.xlu0 %1881 }
 0xb01   :  { %3180 = vrsqrt.f32 %v1914_v15  ;;  %v1915_v57 = vadd.f32 1e-05, %v1899_v47  ;;  %v1900_v63 = vmul.f32 0.03125, %v1882_v49 }
 0xb02   :  { %v1885_v17 = vpop.xlane.xlu1 %1884 }
 0xb03   :  { %3182 = vrsqrt.f32 %v1915_v57  ;;  %v1916_v20 = vadd.f32 1e-05, %v1900_v63  ;;  %v1901_v33 = vmul.f32 0.03125, %v1885_v17 }
 0xb05   :  { %3184 = vrsqrt.f32 %v1916_v20  ;;  %v1917_v55 = vadd.f32 1e-05, %v1901_v33 }
 0xb07   :  { %3186 = vrsqrt.f32 %v1917_v55 }
 0xb0b   :  { %v3181_v45 = vpop.eup %3180 }
 0xb0c   :  { %v1946_v21 = vmul.f32 %v3181_v45, %v4366_v25 }
 0xb0d   :  { %v3183_v58 = vpop.eup %3182 }
 0xb0e   :  { %v1947_v13 = vmul.f32 %v3183_v58, %v4369_v51  ;;  %v1968_v8 = vmul.f32 %v4392_v16, %v1946_v21 }
 0xb0f   :  { %v3185_v41 = vpop.eup %3184 }
 0xb10   :  { %v1948_v61 = vmul.f32 %v3185_v41, %v4374_v2  ;;  %v1969_v44 = vmul.f32 %v4392_v16, %v1947_v13  ;;  %v1990_v56 = vadd.f32 %v4400_v27, %v1968_v8 }
 0xb11   :  { %v3187_v23 = vpop.eup %3186 }
 0xb12   :  { %v1949_v31 = vmul.f32 %v3187_v23, %v4380_v36  ;;  %v1991_v43 = vadd.f32 %v4400_v27, %v1969_v44  ;;  %v1970_v42 = vmul.f32 %v4392_v16, %v1948_v61  ;;  %v2988_v36 = vld [vmem:[%s4696_s11] sm:$0xff]  }
 0xb13   :  { %2872 = vmatprep.subr.bf16.mxu1 %v2988_v36 }
 0xb14   :  { %v2000_v25 = vpack.c.bf16 %v1991_v43, %v1990_v56  ;;  %v1971_v4 = vmul.f32 %v4392_v16, %v1949_v31  ;;  %v1992_v51 = vadd.f32 %v4400_v27, %v1970_v42  ;;  %2873 = vmatpush3.bf16.msra.mxu1 %v2988_v36  ;;  %v2990_v16 = vld [vmem:[%s4696_s11 + $0x10] sm:$0xff]  }
 0xb15   :  { %2874 = vmatprep.subr.bf16.mxu1 %v2989_v5 }
 0xb16   :  { %2868 = vmatprep.mubr.msk.bf16.mxu0 %vm100_vm0, %v2000_v25  ;;  %v1993_v2 = vadd.f32 %v4400_v27, %v1971_v4  ;;  %v2991_v27 = vld [vmem:[%s4696_s11 + $0x18] sm:$0xff]  }
 0xb18   :  { %v2001_v6 = vpack.c.bf16 %v1993_v2, %v1992_v51  ;;  %2875 = vmatpush3.bf16.msra.mxu1 %v2989_v5 }
 0xb19   :  { %2876 = vmatprep.subr.bf16.mxu1 %v2990_v16 }
 0xb1a   :  { %2869 = vmatmul.mubr.msk.bf16.gmra.mrb[64].mxu0 %vm100_vm0, %v2001_v6 }
 0xb1c   :  { %2877 = vmatpush3.bf16.msra.mxu1 %v2990_v16 }
 0xb1d   :  { %2878 = vmatprep.subr.bf16.mxu1 %v2991_v27 }
 0xb20   :  { %2879 = vmatpush3.bf16.msra.mxu1 %v2991_v27 }
 0xb21   :  { %2880 = vmatprep.subr.bf16.mxu1 %v2992_v54 }
 0xb24   :  { %2881 = vmatpush3.bf16.msra.mxu1 %v2992_v54 }
 0xb25   :  { %2882 = vmatprep.subr.bf16.mxu1 %v2993_v30 }
 0xb28   :  { %2883 = vmatpush3.bf16.msra.mxu1 %v2993_v30 }
 0xb29   :  { %2884 = vmatprep.subr.bf16.mxu1 %v2994_v62 }
 0xb2c   :  { %2885 = vmatpush3.bf16.msra.mxu1 %v2994_v62 }
 0xb2d   :  { %2886 = vmatprep.subr.bf16.mxu1 %v2995_v32 }
 0xb30   :  { %2887 = vmatpush3.bf16.msra.mxu1 %v2995_v32 }
 0xbb4   :  { %v2858_v59 = vpop.f32.mrb[52].mxu0 }
 0xbb5   :  { %v4485_v10 = vadd.f32 %v2858_v59, %v4482_v60  ;;  %v2078_v29 = vpop.f32.mrb[53].mxu0 }
 0xbb6   :  { %v4488_v38 = vadd.f32 %v4482_v60, %v2078_v29  ;;  %v2859_v48 = vpop.f32.mrb[54].mxu0 }
 0xbb7   :  { %v2143_v14 = vmul.f32 %v4485_v10, %v4485_v10  ;;  %v4493_v11 = vadd.f32 %v2859_v48, %v4482_v60  ;;  %v2081_v46 = vpop.f32.mrb[55].mxu0 }
 0xbb8   :  { %v2141_v52 = vmul.f32 %v4488_v38, %v4488_v38  ;;  %v4498_v28 = vadd.f32 %v4482_v60, %v2081_v46 }
 0xbb9   :  { %v2159_v12 = vmul.f32 %v2143_v14, %v4485_v10  ;;  %v2144_v39 = vmul.f32 %v4493_v11, %v4493_v11 }
 0xbba   :  { %v2157_v15 = vmul.f32 %v2141_v52, %v4488_v38  ;;  %v2142_v47 = vmul.f32 %v4498_v28, %v4498_v28 }
 0xbbb   :  { %v2175_v49 = vmul.f32 0.044715, %v2159_v12  ;;  %v2160_v57 = vmul.f32 %v2144_v39, %v4493_v11 }
 0xbbc   :  { %v2173_v63 = vmul.f32 0.044715, %v2157_v15  ;;  %v2158_v17 = vmul.f32 %v2142_v47, %v4498_v28 }
 0xbbd   :  { %v2191_v20 = vadd.f32 %v2175_v49, %v4485_v10  ;;  %v2176_v33 = vmul.f32 0.044715, %v2160_v57  ;;  %v2862_v55 = vpop.f32.mrb[56].mxu0 }
 0xbbe   :  { %v2189_v45 = vadd.f32 %v2173_v63, %v4488_v38  ;;  %v2174_v21 = vmul.f32 0.044715, %v2158_v17  ;;  %v4511_v58 = vadd.f32 %v2862_v55, %v4482_v60  ;;  %v2094_v13 = vpop.f32.mrb[57].mxu0 }
 0xbbf   :  { %v2207_v8 = vmul.f32 0.7978846, %v2191_v20  ;;  %v2192_v41 = vadd.f32 %v2176_v33, %v4493_v11  ;;  %v4515_v61 = vadd.f32 %v4482_v60, %v2094_v13  ;;  %v2863_v44 = vpop.f32.mrb[58].mxu0 }
 0xbc0   :  { %v2205_v23 = vmul.f32 0.7978846, %v2189_v45  ;;  %v2190_v31 = vadd.f32 %v2174_v21, %v4498_v28  ;;  %v2147_v56 = vmul.f32 %v4511_v58, %v4511_v58  ;;  %v4521_v43 = vadd.f32 %v2863_v44, %v4482_v60  ;;  %v2097_v42 = vpop.f32.mrb[59].mxu0 }
 0xbc1   :  { %3188 = vtanh.f32 %v2207_v8  ;;  %v2208_v25 = vmul.f32 0.7978846, %v2192_v41  ;;  %v2145_v4 = vmul.f32 %v4515_v61, %v4515_v61  ;;  %v4526_v51 = vadd.f32 %v4482_v60, %v2097_v42 }
 0xbc2   :  { %3190 = vtanh.f32 %v2205_v23  ;;  %v2206_v2 = vmul.f32 0.7978846, %v2190_v31  ;;  %v2163_v6 = vmul.f32 %v2147_v56, %v4511_v58  ;;  %v2148_v36 = vmul.f32 %v4521_v43, %v4521_v43 }
 0xbc3   :  { %3192 = vtanh.f32 %v2208_v25  ;;  %v2161_v5 = vmul.f32 %v2145_v4, %v4515_v61  ;;  %v2146_v16 = vmul.f32 %v4526_v51, %v4526_v51 }
 0xbc4   :  { %3194 = vtanh.f32 %v2206_v2  ;;  %v2179_v27 = vmul.f32 0.044715, %v2163_v6  ;;  %v2164_v54 = vmul.f32 %v2148_v36, %v4521_v43 }
 0xbc5   :  { %v2177_v30 = vmul.f32 0.044715, %v2161_v5  ;;  %v2162_v62 = vmul.f32 %v2146_v16, %v4526_v51  ;;  %v2866_v32 = vpop.f32.mrb[60].mxu0 }
 0xbc6   :  { %v2195_v59 = vadd.f32 %v2179_v27, %v4511_v58  ;;  %v2180_v29 = vmul.f32 0.044715, %v2164_v54  ;;  %v4538_v48 = vadd.f32 %v2866_v32, %v4482_v60  ;;  %v2110_v14 = vpop.f32.mrb[61].mxu0 }
 0xbc7   :  { %v2193_v46 = vadd.f32 %v2177_v30, %v4515_v61  ;;  %v2178_v52 = vmul.f32 0.044715, %v2162_v62  ;;  %v4542_v12 = vadd.f32 %v4482_v60, %v2110_v14  ;;  %v2867_v39 = vpop.f32.mrb[62].mxu0 }
 0xbc8   :  { %v2211_v15 = vmul.f32 0.7978846, %v2195_v59  ;;  %v2196_v47 = vadd.f32 %v2180_v29, %v4521_v43  ;;  %v2151_v49 = vmul.f32 %v4538_v48, %v4538_v48  ;;  %v4548_v57 = vadd.f32 %v2867_v39, %v4482_v60  ;;  %v2113_v63 = vpop.f32.mrb[63].mxu0 }
 0xbc9   :  { %v2209_v17 = vmul.f32 0.7978846, %v2193_v46  ;;  %v2194_v20 = vadd.f32 %v2178_v52, %v4526_v51  ;;  %v2149_v33 = vmul.f32 %v4542_v12, %v4542_v12  ;;  %v4554_v55 = vadd.f32 %v4482_v60, %v2113_v63 }
 0xbca   :  { %3196 = vtanh.f32 %v2211_v15  ;;  %v2212_v45 = vmul.f32 0.7978846, %v2196_v47  ;;  %v2167_v21 = vmul.f32 %v2151_v49, %v4538_v48  ;;  %v2152_v13 = vmul.f32 %v4548_v57, %v4548_v57 }
 0xbcb   :  { %v3189_v8 = vpop.eup %3188  ;;  %3198 = vtanh.f32 %v2209_v17  ;;  %v2210_v41 = vmul.f32 0.7978846, %v2194_v20  ;;  %v2165_v44 = vmul.f32 %v2149_v33, %v4542_v12  ;;  %v2150_v23 = vmul.f32 %v4554_v55, %v4554_v55 }
 0xbcc   :  { %v3191_v31 = vpop.eup %3190  ;;  %v2239_v56 = vadd.f32 1.0, %v3189_v8  ;;  %3200 = vtanh.f32 %v2212_v45  ;;  %v2183_v42 = vmul.f32 0.044715, %v2167_v21  ;;  %v2168_v25 = vmul.f32 %v2152_v13, %v4548_v57 }
 0xbcd   :  { %v3193_v4 = vpop.eup %3192  ;;  %3202 = vtanh.f32 %v2210_v41  ;;  %v2181_v2 = vmul.f32 0.044715, %v2165_v44  ;;  %v2166_v6 = vmul.f32 %v2150_v23, %v4554_v55  ;;  %v2237_v36 = vadd.f32 1.0, %v3191_v31 }
 0xbce   :  { %v3195_v5 = vpop.eup %3194  ;;  %v2255_v16 = vmul.f32 0.5, %v2239_v56  ;;  %v2240_v27 = vadd.f32 1.0, %v3193_v4  ;;  %v2199_v54 = vadd.f32 %v2183_v42, %v4538_v48  ;;  %v2184_v30 = vmul.f32 0.044715, %v2168_v25 }
 0xbcf   :  { %v2197_v62 = vadd.f32 %v2181_v2, %v4542_v12  ;;  %v2182_v32 = vmul.f32 0.044715, %v2166_v6  ;;  %v2238_v59 = vadd.f32 1.0, %v3195_v5  ;;  %v2253_v29 = vmul.f32 0.5, %v2237_v36 }
 0xbd0   :  { %v2256_v14 = vmul.f32 0.5, %v2240_v27  ;;  %v2215_v46 = vmul.f32 0.7978846, %v2199_v54  ;;  %v2200_v52 = vadd.f32 %v2184_v30, %v4548_v57  ;;  %v2271_v49 = vmul.f32 %v2255_v16, %v4485_v10 }
 0xbd1   :  { %v2213_v39 = vmul.f32 0.7978846, %v2197_v62  ;;  %v2198_v15 = vadd.f32 %v2182_v32, %v4554_v55  ;;  %v2254_v47 = vmul.f32 0.5, %v2238_v59  ;;  %v2269_v33 = vmul.f32 %v2253_v29, %v4488_v38 }
 0xbd2   :  { %v2272_v63 = vmul.f32 %v2256_v14, %v4493_v11  ;;  %3204 = vtanh.f32 %v2215_v46  ;;  %v2216_v17 = vmul.f32 0.7978846, %v2200_v52 }
 0xbd3   :  { %3206 = vtanh.f32 %v2213_v39  ;;  %v2214_v20 = vmul.f32 0.7978846, %v2198_v15  ;;  %v2270_v45 = vmul.f32 %v2254_v47, %v4498_v28 }
 0xbd4   :  { %v3197_v21 = vpop.eup %3196  ;;  %v2286_v13 = vpack.c.bf16 %v2272_v63, %v2271_v49  ;;  %3208 = vtanh.f32 %v2216_v17 }
 0xbd5   :  { %v3199_v8 = vpop.eup %3198  ;;  %3210 = vtanh.f32 %v2214_v20  ;;  %v2285_v41 = vpack.c.bf16 %v2270_v45, %v2269_v33  ;;  %v2243_v44 = vadd.f32 1.0, %v3197_v21 }
 0xbd6   :  { %v3201_v23 = vpop.eup %3200  ;;  %v2241_v31 = vadd.f32 1.0, %v3199_v8 }
 0xbd7   :  { %v3203_v10 = vpop.eup %3202  ;;  %2888 = vmatprep.mubr.bf16.mxu1 %v2285_v41  ;;  %v2244_v11 = vadd.f32 1.0, %v3201_v23  ;;  %v2259_v56 = vmul.f32 0.5, %v2243_v44 }
 0xbd8   :  { %2889 = vmatmul.mubr.bf16.vlgmr.msra.gmra.mrb[44].mxu1 %v2286_v13  ;;  %v2242_v42 = vadd.f32 1.0, %v3203_v10  ;;  %v2257_v25 = vmul.f32 0.5, %v2241_v31 }
 0xbd9   :  { %v2260_v4 = vmul.f32 0.5, %v2244_v11  ;;  %v2275_v28 = vmul.f32 %v2259_v56, %v4511_v58 }
 0xbda   :  { %v2258_v38 = vmul.f32 0.5, %v2242_v42  ;;  %v2273_v36 = vmul.f32 %v2257_v25, %v4515_v61 }
 0xbdb   :  { %v2276_v2 = vmul.f32 %v2260_v4, %v4521_v43 }
 0xbdc   :  { %v3205_v6 = vpop.eup %3204  ;;  %v2274_v5 = vmul.f32 %v2258_v38, %v4526_v51 }
 0xbdd   :  { %v3207_v16 = vpop.eup %3206  ;;  %v2288_v27 = vpack.c.bf16 %v2276_v2, %v2275_v28  ;;  %v2247_v54 = vadd.f32 1.0, %v3205_v6 }
 0xbde   :  { %v3209_v30 = vpop.eup %3208  ;;  %v2287_v62 = vpack.c.bf16 %v2274_v5, %v2273_v36  ;;  %v2245_v32 = vadd.f32 1.0, %v3207_v16 }
 0xbdf   :  { %v3211_v59 = vpop.eup %3210  ;;  %v2248_v29 = vadd.f32 1.0, %v3209_v30  ;;  %v2263_v14 = vmul.f32 0.5, %v2247_v54 }
 0xbe0   :  { %2892 = vmatprep.mubr.bf16.mxu1 %v2287_v62  ;;  %v2246_v46 = vadd.f32 1.0, %v3211_v59  ;;  %v2261_v52 = vmul.f32 0.5, %v2245_v32 }
 0xbe1   :  { %2893 = vmatmul.mubr.bf16.gmra.mrb[48].mxu1 %v2288_v27  ;;  %v2264_v58 = vmul.f32 0.5, %v2248_v29  ;;  %v2279_v39 = vmul.f32 %v2263_v14, %v4538_v48 }
 0xbe2   :  { %v2262_v43 = vmul.f32 0.5, %v2246_v46  ;;  %v2277_v51 = vmul.f32 %v2261_v52, %v4542_v12 }
 0xbe3   :  { %v2280_v61 = vmul.f32 %v2264_v58, %v4548_v57 }
 0xbe4   :  { %v2278_v15 = vmul.f32 %v2262_v43, %v4554_v55 }
 0xbe5   :  { %v2290_v47 = vpack.c.bf16 %v2280_v61, %v2279_v39 }
 0xbe6   :  { %v2289_v49 = vpack.c.bf16 %v2278_v15, %v2277_v51 }
 0xbe8   :  { %2896 = vmatprep.mubr.bf16.mxu1 %v2289_v49 }
 0xbe9   :  { %2897 = vmatmul.mubr.bf16.gmra.mrb[52].mxu1 %v2290_v47  ;;  %v4587_v47 = vld [vmem:[%s4698_s12] ss:$0 sm:$0xff] }
 0xbed   :  { %v2870_v63 = vpop.f32.mrb[64].mxu0 }
 0xbee   :  { %v2135_v17 = vadd.f32 %v2870_v63, %v4482_v60  ;;  %v2126_v20 = vpop.f32.mrb[65].mxu0 }
 0xbef   :  { %v2127_v33 = vadd.f32 %v4482_v60, %v2126_v20  ;;  %v2871_v45 = vpop.f32.mrb[66].mxu0 }
 0xbf0   :  { %v2155_v21 = vmul.f32 %v2135_v17, %v2135_v17  ;;  %v2138_v48 = vadd.f32 %v2871_v45, %v4482_v60  ;;  %v2129_v13 = vpop.f32.mrb[67].mxu0 }
 0xbf1   :  { %v2153_v57 = vmul.f32 %v2127_v33, %v2127_v33  ;;  %v2130_v12 = vadd.f32 %v4482_v60, %v2129_v13 }
 0xbf2   :  { %v2171_v8 = vmul.f32 %v2155_v21, %v2135_v17  ;;  %v2156_v55 = vmul.f32 %v2138_v48, %v2138_v48 }
 0xbf3   :  { %v2169_v41 = vmul.f32 %v2153_v57, %v2127_v33  ;;  %v2154_v44 = vmul.f32 %v2130_v12, %v2130_v12 }
 0xbf4   :  { %v2187_v23 = vmul.f32 0.044715, %v2171_v8  ;;  %v2172_v31 = vmul.f32 %v2156_v55, %v2138_v48 }
 0xbf5   :  { %v2185_v10 = vmul.f32 0.044715, %v2169_v41  ;;  %v2170_v11 = vmul.f32 %v2154_v44, %v2130_v12 }
 0xbf6   :  { %v2203_v56 = vadd.f32 %v2187_v23, %v2135_v17  ;;  %v2188_v42 = vmul.f32 0.044715, %v2172_v31 }
 0xbf7   :  { %v2201_v25 = vadd.f32 %v2185_v10, %v2127_v33  ;;  %v2186_v4 = vmul.f32 0.044715, %v2170_v11 }
 0xbf8   :  { %v2219_v38 = vmul.f32 0.7978846, %v2203_v56  ;;  %v2204_v28 = vadd.f32 %v2188_v42, %v2138_v48 }
 0xbf9   :  { %v2217_v2 = vmul.f32 0.7978846, %v2201_v25  ;;  %v2202_v6 = vadd.f32 %v2186_v4, %v2130_v12 }
 0xbfa   :  { %3212 = vtanh.f32 %v2219_v38  ;;  %v2220_v36 = vmul.f32 0.7978846, %v2204_v28 }
 0xbfb   :  { %3214 = vtanh.f32 %v2217_v2  ;;  %v2218_v60 = vmul.f32 0.7978846, %v2202_v6 }
 0xbfc   :  { %3216 = vtanh.f32 %v2220_v36 }
 0xbfd   :  { %3218 = vtanh.f32 %v2218_v60 }
 0xc04   :  { %v3213_v5 = vpop.eup %3212 }
 0xc05   :  { %v3215_v16 = vpop.eup %3214  ;;  %v2251_v27 = vadd.f32 1.0, %v3213_v5 }
 0xc06   :  { %v3217_v54 = vpop.eup %3216  ;;  %v2249_v30 = vadd.f32 1.0, %v3215_v16 }
 0xc07   :  { %v3219_v62 = vpop.eup %3218  ;;  %v2252_v32 = vadd.f32 1.0, %v3217_v54  ;;  %v2267_v59 = vmul.f32 0.5, %v2251_v27 }
 0xc08   :  { %v2250_v29 = vadd.f32 1.0, %v3219_v62  ;;  %v2265_v14 = vmul.f32 0.5, %v2249_v30 }
 0xc09   :  { %v2268_v46 = vmul.f32 0.5, %v2252_v32  ;;  %v2283_v58 = vmul.f32 %v2267_v59, %v2135_v17 }
 0xc0a   :  { %v2266_v52 = vmul.f32 0.5, %v2250_v29  ;;  %v2281_v39 = vmul.f32 %v2265_v14, %v2127_v33 }
 0xc0b   :  { %v2284_v43 = vmul.f32 %v2268_v46, %v2138_v48 }
 0xc0c   :  { %v2282_v61 = vmul.f32 %v2266_v52, %v2130_v12 }
 0xc0d   :  { %v2292_v51 = vpack.c.bf16 %v2284_v43, %v2283_v58 }
 0xc0e   :  { %v2291_v15 = vpack.c.bf16 %v2282_v61, %v2281_v39 }
 0xc10   :  { %2900 = vmatprep.mubr.bf16.mxu1 %v2291_v15 }
 0xc11   :  { %2901 = vmatmul.mubr.bf16.gmra.mrb[56].mxu1 %v2292_v51 }
 0xcab   :  { %v2890_v49 = vpop.f32.mrb[44].mxu1 }
 0xcac   :  { %v2440_v63 = vadd.f32 %v2890_v49, %v4170_v0  ;;  %v2375_v20 = vpop.f32.mrb[45].mxu1 }
 0xcad   :  { %v2438_v45 = vadd.f32 %v2375_v20, %v4164_v34  ;;  %v2891_v21 = vpop.f32.mrb[46].mxu1 }
 0xcae   :  { %v2462_v17 = vadd.f32 %v4587_v47, %v2440_v63  ;;  %v2441_v33 = vadd.f32 %v2891_v21, %v4185_v9  ;;  %v2378_v48 = vpop.f32.mrb[47].mxu1 }
 0xcaf   :  { %v2460_v13 = vadd.f32 %v4587_v47, %v2438_v45  ;;  %v2439_v57 = vadd.f32 %v2378_v48, %v4176_v3 }
 0xcb0   :  { %2478 = vst.msk [vmem:[%s4699_s14 + $0x10] sm:$0xff] %vm100_vm0, %v2462_v17  ;;  %v2463_v0 = vadd.f32 %v4587_v47, %v2441_v33 }
 0xcb1   :  { %2476 = vst.msk [vmem:[%s4699_s14] sm:$0xff] %vm100_vm0, %v2460_v13  ;;  %v2461_v34 = vadd.f32 %v4587_v47, %v2439_v57 }
 0xcb2   :  { %2479 = vst.msk [vmem:[%s4699_s14 + $0x18] sm:$0xff] %vm100_vm0, %v2463_v0 }
 0xcb3   :  { %2477 = vst.msk [vmem:[%s4699_s14 + $0x8] sm:$0xff] %vm100_vm0, %v2461_v34 }
 0xcb4   :  { %v2894_v3 = vpop.f32.mrb[48].mxu1 }
 0xcb5   :  { %v2444_v9 = vadd.f32 %v2894_v3, %v4215_v18  ;;  %v2391_v12 = vpop.f32.mrb[49].mxu1 }
 0xcb6   :  { %v2442_v8 = vadd.f32 %v2391_v12, %v4196_v24  ;;  %v2895_v55 = vpop.f32.mrb[50].mxu1 }
 0xcb7   :  { %v2466_v41 = vadd.f32 %v4587_v47, %v2444_v9  ;;  %v2445_v44 = vadd.f32 %v2895_v55, %v4208_v1  ;;  %v2394_v23 = vpop.f32.mrb[51].mxu1 }
 0xcb8   :  { %v2464_v31 = vadd.f32 %v4587_v47, %v2442_v8  ;;  %v2443_v10 = vadd.f32 %v2394_v23, %v4201_v35 }
 0xcb9   :  { %2482 = vst.msk [vmem:[%s4699_s14 + $0x30] sm:$0xff] %vm100_vm0, %v2466_v41  ;;  %v2467_v18 = vadd.f32 %v4587_v47, %v2445_v44 }
 0xcba   :  { %2480 = vst.msk [vmem:[%s4699_s14 + $0x20] sm:$0xff] %vm100_vm0, %v2464_v31  ;;  %v2465_v24 = vadd.f32 %v4587_v47, %v2443_v10 }
 0xcbb   :  { %2483 = vst.msk [vmem:[%s4699_s14 + $0x38] sm:$0xff] %vm100_vm0, %v2467_v18 }
 0xcbc   :  { %2481 = vst.msk [vmem:[%s4699_s14 + $0x28] sm:$0xff] %vm100_vm0, %v2465_v24  ;;  %v2898_v35 = vpop.f32.mrb[52].mxu1 }
 0xcbd   :  { %v2448_v1 = vadd.f32 %v2898_v35, %v4247_v37  ;;  %v2407_v11 = vpop.f32.mrb[53].mxu1 }
 0xcbe   :  { %v2446_v56 = vadd.f32 %v2407_v11, %v4228_v22  ;;  %v2899_v42 = vpop.f32.mrb[54].mxu1 }
 0xcbf   :  { %v2470_v25 = vadd.f32 %v4587_v47, %v2448_v1  ;;  %v2449_v4 = vadd.f32 %v2899_v42, %v4240_v53  ;;  %v2410_v38 = vpop.f32.mrb[55].mxu1 }
 0xcc0   :  { %v2468_v28 = vadd.f32 %v4587_v47, %v2446_v56  ;;  %v2447_v2 = vadd.f32 %v2410_v38, %v4233_v40 }
 0xcc1   :  { %2486 = vst.msk [vmem:[%s4699_s14 + $0x50] sm:$0xff] %vm100_vm0, %v2470_v25  ;;  %v2471_v37 = vadd.f32 %v4587_v47, %v2449_v4 }
 0xcc2   :  { %2484 = vst.msk [vmem:[%s4699_s14 + $0x40] sm:$0xff] %vm100_vm0, %v2468_v28  ;;  %v2469_v22 = vadd.f32 %v4587_v47, %v2447_v2 }
 0xcc3   :  { %2487 = vst.msk [vmem:[%s4699_s14 + $0x58] sm:$0xff] %vm100_vm0, %v2471_v37 }
 0xcc4   :  { %2485 = vst.msk [vmem:[%s4699_s14 + $0x48] sm:$0xff] %vm100_vm0, %v2469_v22 }
 0xce4   :  { %v2902_v40 = vpop.f32.mrb[56].mxu1 }
 0xce5   :  { %v2452_v53 = vadd.f32 %v2902_v40, %v4267_v26  ;;  %v2423_v6 = vpop.f32.mrb[57].mxu1 }
 0xce6   :  { %v2450_v36 = vadd.f32 %v2423_v6, %v4261_v19  ;;  %v2903_v60 = vpop.f32.mrb[58].mxu1 }
 0xce7   :  { %v2474_v5 = vadd.f32 %v4587_v47, %v2452_v53  ;;  %v2453_v16 = vadd.f32 %v2903_v60, %v4279_v50  ;;  %v2426_v27 = vpop.f32.mrb[59].mxu1 }
 0xce8   :  { %v2472_v54 = vadd.f32 %v4587_v47, %v2450_v36  ;;  %v2451_v30 = vadd.f32 %v2426_v27, %v4272_v7 }
 0xce9   :  { %2490 = vst.msk [vmem:[%s4699_s14 + $0x70] sm:$0xff] %vm100_vm0, %v2474_v5  ;;  %v2475_v26 = vadd.f32 %v4587_v47, %v2453_v16 }
 0xcea   :  { %2488 = vst.msk [vmem:[%s4699_s14 + $0x60] sm:$0xff] %vm100_vm0, %v2472_v54  ;;  %v2473_v19 = vadd.f32 %v4587_v47, %v2451_v30 }
 0xceb   :  { %2491 = vst.msk [vmem:[%s4699_s14 + $0x78] sm:$0xff] %vm100_vm0, %v2475_v26 }
 0xcec   :  { %2489 = vst.msk [vmem:[%s4699_s14 + $0x68] sm:$0xff] %vm100_vm0, %v2473_v19 }

// kernel: swin_forward.4
= control target key start
LH: loop header
LB: loop body
LE: loop exit
PB: predicated region body
PF: predicated region fallthrough
CT: control target
= control target key end

     0   :  { %vm115_vm0 = vcmask 392192   ;;  %vm239_vm1 = vcmask 261120   ;;  %vm960_vm2 = vcmask 130048   ;;  %s3729_s22 = smov 96   ;;  %s3734_s30 = smov 16   ;;  %s5428_s1 = inlined_call_operand.vmem [shape: bf16[48,32], index: 1, kind: input, shape index: {}]   ;;  %s5429_s0 = inlined_call_operand.vmem [shape: f32[128,48], index: 0, kind: input, shape index: {}]   ;;  %s5430_s2 = inlined_call_operand.vmem [shape: f32[1,32], index: 2, kind: input, shape index: {}]   ;;  %s5431_s3 = inlined_call_operand.vmem [shape: f32[1,32], index: 3, kind: input, shape index: {}]   ;;  %s5432_s4 = inlined_call_operand.vmem [shape: f32[1,32], index: 4, kind: input, shape index: {}]   ;;  %s5433_s7 = inlined_call_operand.vmem [shape: bf16[32,96], index: 7, kind: input, shape index: {}]   ;;  %s5434_s5 = inlined_call_operand.vmem [shape: f32[1,32], index: 5, kind: input, shape index: {}]   ;;  %s5435_s6 = inlined_call_operand.vmem [shape: f32[1,32], index: 6, kind: input, shape index: {}]   ;;  %s5436_s8 = inlined_call_operand.vmem [shape: f32[1,96], index: 8, kind: input, shape index: {}]   ;;  %s5437_s17 = inlined_call_operand.vmem [shape: f32[2,128,128], index: 17, kind: input, shape index: {}]   ;;  %s5438_s9 = inlined_call_operand.vmem [shape: bf16[32,32], index: 9, kind: input, shape index: {}]   ;;  %s5439_s10 = inlined_call_operand.vmem [shape: f32[1,32], index: 10, kind: input, shape index: {}]   ;;  %s5440_s13 = inlined_call_operand.vmem [shape: bf16[32,128], index: 13, kind: input, shape index: {}]   ;;  %s5441_s11 = inlined_call_operand.vmem [shape: f32[1,32], index: 11, kind: input, shape index: {}]   ;;  %s5442_s12 = inlined_call_operand.vmem [shape: f32[1,32], index: 12, kind: input, shape index: {}]   ;;  %s5443_s15 = inlined_call_operand.vmem [shape: bf16[128,32], index: 15, kind: input, shape index: {}]   ;;  %s5444_s14 = inlined_call_operand.vmem [shape: f32[1,128], index: 14, kind: input, shape index: {}]   ;;  %s5445_s16 = inlined_call_operand.vmem [shape: f32[1,32], index: 16, kind: input, shape index: {}]   ;;  %s5446_s18 = inlined_call_operand.vmem [shape: f32[128,32], index: 18, kind: output, shape index: {}]  }
   0x1   :  { %5452 = sst [smem:[#allocation5_spill]] %s5428_s1 }
   0x2   :  { %5453 = sst [smem:[#allocation6_spill]] %s5429_s0  ;;  %s5455_s29 = sld [smem:[#allocation5_spill]] }
   0x3   :  { %5454 = sst [smem:[#allocation7_spill]] %s5430_s2  ;;  %s5456_s20 = sld [smem:[#allocation6_spill]] }
   0x4   :  { %s5457_s26 = sld [smem:[#allocation7_spill]]  ;;  %s3731_s2 = smov 80  }
   0x8   :  { %v3456_v0 = vld [vmem:[%s5455_s29] sm:$0xff]   ;;  %v3457_v1 = vld [vmem:[%s5455_s29 + $0x8] sm:$0xff]   ;;  %v3458_v4 = vld [vmem:[%s5455_s29 + $0x10] sm:$0xff]   ;;  %s3733_s29 = smov 48  }
   0x9   :  { %3136 = vmatprep.subr.bf16.mxu0 %v3456_v0  ;;  %v60_v2 = vld [vmem:[%s5456_s20] sm:$0xff]  ;;  %v61_v3 = vld [vmem:[%s5456_s20 + $0x8] sm:$0xff]  ;;  %v62_v6 = vld [vmem:[%s5456_s20 + $0x10] sm:$0xff] }
   0xa   :  { %3137 = vmatpush3.bf16.msra.mxu0 %v3456_v0  ;;  %v82_v5 = vpack.c.bf16 %v61_v3, %v60_v2  ;;  %v63_v7 = vld [vmem:[%s5456_s20 + $0x18] sm:$0xff]  ;;  %v64_v8 = vld [vmem:[%s5456_s20 + $0x20] sm:$0xff]  ;;  %v65_v9 = vld [vmem:[%s5456_s20 + $0x28] sm:$0xff] }
   0xb   :  { %3138 = vmatprep.subr.bf16.mxu0 %v3457_v1  ;;  %v83_v10 = vpack.c.bf16 %v63_v7, %v62_v6  ;;  %v84_v11 = vpack.c.bf16 %v65_v9, %v64_v8  ;;  %v66_v12 = vld [vmem:[%s5456_s20 + $0x30] sm:$0xff]  ;;  %v67_v13 = vld [vmem:[%s5456_s20 + $0x38] sm:$0xff]  ;;  %v68_v14 = vld [vmem:[%s5456_s20 + $0x40] sm:$0xff] }
   0xc   :  { %3142 = vmatprep.mubr.msk.bf16.mxu0 %vm115_vm0, %v82_v5  ;;  %v69_v15 = vld [vmem:[%s5456_s20 + $0x48] sm:$0xff]  ;;  %v85_v16 = vpack.c.bf16 %v67_v13, %v66_v12  ;;  %v70_v18 = vld [vmem:[%s5456_s20 + $0x50] sm:$0xff]  ;;  %v71_v19 = vld [vmem:[%s5456_s20 + $0x58] sm:$0xff] }
   0xd   :  { %v86_v17 = vpack.c.bf16 %v69_v15, %v68_v14  ;;  %v72_v20 = vld [vmem:[%s5456_s20 + $0x60] sm:$0xff]  ;;  %v73_v21 = vld [vmem:[%s5456_s20 + $0x68] sm:$0xff]  ;;  %v87_v22 = vpack.c.bf16 %v71_v19, %v70_v18  ;;  %v74_v24 = vld [vmem:[%s5456_s20 + $0x70] sm:$0xff] }
   0xe   :  { %3139 = vmatpush3.bf16.msra.mxu0 %v3457_v1  ;;  %v88_v23 = vpack.c.bf16 %v73_v21, %v72_v20  ;;  %v75_v25 = vld [vmem:[%s5456_s20 + $0x78] sm:$0xff]  ;;  %v2923_v27 = vld [vmem:[%s5457_s26] ss:$0 sm:$0xff] }
   0xf   :  { %3140 = vmatprep.subr.bf16.mxu0 %v3458_v4  ;;  %v89_v26 = vpack.c.bf16 %v75_v25, %v74_v24 }
  0x12   :  { %3141 = vmatpush3.bf16.msra.mxu0 %v3458_v4 }
  0x15   :  { %3143 = vmatmul.mubr.msk.bf16.vlgmr.msra.gmra.mrb[0].mxu0 %vm115_vm0, %v83_v10 }
  0x16   :  { %3146 = vmatprep.mubr.msk.bf16.mxu0 %vm115_vm0, %v84_v11 }
  0x1d   :  { %3147 = vmatmul.mubr.msk.bf16.gmra.mrb[4].mxu0 %vm115_vm0, %v85_v16 }
  0x1e   :  { %3150 = vmatprep.mubr.msk.bf16.mxu0 %vm115_vm0, %v86_v17 }
  0x25   :  { %3151 = vmatmul.mubr.msk.bf16.gmra.mrb[8].mxu0 %vm115_vm0, %v87_v22 }
  0x26   :  { %3154 = vmatprep.mubr.msk.bf16.mxu0 %vm115_vm0, %v88_v23 }
  0x2d   :  { %3155 = vmatmul.mubr.msk.bf16.gmra.mrb[12].mxu0 %vm115_vm0, %v89_v26 }
  0xe8   :  { %v3144_v28 = vpop.f32.mrb[0].mxu0 }
  0xe9   :  { %v3898_v29 = vadd.f32 %v3144_v28, %v2923_v27  ;;  %v174_v30 = vpop.f32.mrb[1].mxu0 }
  0xea   :  { %v3900_v31 = vadd.f32 %v2923_v27, %v174_v30  ;;  %v3145_v32 = vpop.f32.mrb[2].mxu0 }
  0xeb   :  { %v3902_v33 = vadd.f32 %v3145_v32, %v2923_v27  ;;  %v177_v34 = vpop.f32.mrb[3].mxu0  ;;  %v246_v35 = vsel %vm239_vm1, %v3898_v29, 0.0 }
  0xec   :  { %v3906_v36 = vadd.f32 %v2923_v27, %v177_v34  ;;  %247 = vadd.xlane.f32.xlu1 %v246_v35  ;;  %v240_v37 = vsel %vm239_vm1, %v3900_v31, 0.0 }
  0xed   :  { %241 = vadd.xlane.f32.xlu0 %v240_v37  ;;  %v249_v38 = vsel %vm239_vm1, %v3902_v33, 0.0 }
  0xee   :  { %v243_v40 = vsel %vm239_vm1, %v3906_v36, 0.0 }
  0xf0   :  { %250 = vadd.xlane.f32.xlu1 %v249_v38  ;;  %v3148_v39 = vpop.f32.mrb[4].mxu0 }
  0xf1   :  { %v190_v41 = vpop.f32.mrb[5].mxu0  ;;  %244 = vadd.xlane.f32.xlu0 %v243_v40  ;;  %v3914_v42 = vadd.f32 %v3148_v39, %v2923_v27 }
  0xf2   :  { %v3916_v43 = vadd.f32 %v2923_v27, %v190_v41  ;;  %v3149_v44 = vpop.f32.mrb[6].mxu0 }
  0xf3   :  { %v193_v45 = vpop.f32.mrb[7].mxu0  ;;  %v3918_v46 = vadd.f32 %v3149_v44, %v2923_v27  ;;  %v258_v50 = vsel %vm239_vm1, %v3914_v42, 0.0 }
  0xf4   :  { %v3920_v47 = vadd.f32 %v2923_v27, %v193_v45  ;;  %v252_v48 = vsel %vm239_vm1, %v3916_v43, 0.0 }
  0xf5   :  { %253 = vadd.xlane.f32.xlu0 %v252_v48  ;;  %v261_v52 = vsel %vm239_vm1, %v3918_v46, 0.0 }
  0xf6   :  { %v255_v49 = vsel %vm239_vm1, %v3920_v47, 0.0 }
  0xf7   :  { %256 = vadd.xlane.f32.xlu1 %v255_v49 }
  0xf8   :  { %v3152_v51 = vpop.f32.mrb[8].mxu0 }
  0xf9   :  { %v206_v53 = vpop.f32.mrb[9].mxu0  ;;  %259 = vadd.xlane.f32.xlu0 %v258_v50  ;;  %v3930_v54 = vadd.f32 %v3152_v51, %v2923_v27 }
  0xfa   :  { %v3932_v55 = vadd.f32 %v2923_v27, %v206_v53  ;;  %v3153_v56 = vpop.f32.mrb[10].mxu0 }
  0xfb   :  { %v209_v57 = vpop.f32.mrb[11].mxu0  ;;  %262 = vadd.xlane.f32.xlu1 %v261_v52  ;;  %v3934_v58 = vadd.f32 %v3153_v56, %v2923_v27  ;;  %v270_v62 = vsel %vm239_vm1, %v3930_v54, 0.0 }
  0xfc   :  { %v3936_v59 = vadd.f32 %v2923_v27, %v209_v57  ;;  %v264_v60 = vsel %vm239_vm1, %v3932_v55, 0.0 }
  0xfd   :  { %265 = vadd.xlane.f32.xlu0 %v264_v60  ;;  %v273_v0 = vsel %vm239_vm1, %v3934_v58, 0.0 }
  0xfe   :  { %v267_v61 = vsel %vm239_vm1, %v3936_v59, 0.0 }
  0xff   :  { %268 = vadd.xlane.f32.xlu1 %v267_v61 }
 0x100   :  { %v3156_v63 = vpop.f32.mrb[12].mxu0 }
 0x101   :  { %v222_v1 = vpop.f32.mrb[13].mxu0  ;;  %271 = vadd.xlane.f32.xlu0 %v270_v62  ;;  %v3946_v2 = vadd.f32 %v3156_v63, %v2923_v27 }
 0x102   :  { %v3948_v3 = vadd.f32 %v2923_v27, %v222_v1  ;;  %v3157_v4 = vpop.f32.mrb[14].mxu0 }
 0x103   :  { %v225_v5 = vpop.f32.mrb[15].mxu0  ;;  %274 = vadd.xlane.f32.xlu1 %v273_v0  ;;  %v3950_v6 = vadd.f32 %v3157_v4, %v2923_v27  ;;  %v282_v10 = vsel %vm239_vm1, %v3946_v2, 0.0 }
 0x104   :  { %v3952_v7 = vadd.f32 %v2923_v27, %v225_v5  ;;  %v276_v8 = vsel %vm239_vm1, %v3948_v3, 0.0 }
 0x105   :  { %277 = vadd.xlane.f32.xlu0 %v276_v8  ;;  %v285_v11 = vsel %vm239_vm1, %v3950_v6, 0.0 }
 0x106   :  { %v279_v9 = vsel %vm239_vm1, %v3952_v7, 0.0 }
 0x107   :  { %280 = vadd.xlane.f32.xlu1 %v279_v9 }
 0x109   :  { %283 = vadd.xlane.f32.xlu0 %v282_v10 }
 0x10b   :  { %286 = vadd.xlane.f32.xlu1 %v285_v11 }
 0x179   :  { %v248_v12 = vpop.xlane.xlu1 %247 }
 0x17a   :  { %v291_v13 = vmul.f32 0.03125, %v248_v12  ;;  %v242_v14 = vpop.xlane.xlu0 %241 }
 0x17b   :  { %v289_v15 = vmul.f32 0.03125, %v242_v14 }
 0x17c   :  { %v3963_v16 = vsub.f32 %v3898_v29, %v291_v13 }
 0x17d   :  { %v3966_v17 = vsub.f32 %v3900_v31, %v289_v15  ;;  %v251_v18 = vpop.xlane.xlu1 %250 }
 0x17e   :  { %v292_v19 = vmul.f32 0.03125, %v251_v18  ;;  %v245_v20 = vpop.xlane.xlu0 %244  ;;  %v323_v26 = vmul.f32 %v3963_v16, %v3963_v16 }
 0x17f   :  { %v290_v21 = vmul.f32 0.03125, %v245_v20  ;;  %v321_v22 = vmul.f32 %v3966_v17, %v3966_v17 }
 0x180   :  { %v3971_v23 = vsub.f32 %v3902_v33, %v292_v19  ;;  %v343_v34 = vsel %vm239_vm1, %v323_v26, 0.0 }
 0x181   :  { %v3974_v24 = vsub.f32 %v3906_v36, %v290_v21  ;;  %v337_v25 = vsel %vm239_vm1, %v321_v22, 0.0 }
 0x182   :  { %338 = vadd.xlane.f32.xlu0 %v337_v25  ;;  %v254_v27 = vpop.xlane.xlu0 %253  ;;  %v324_v31 = vmul.f32 %v3971_v23, %v3971_v23 }
 0x183   :  { %v293_v28 = vmul.f32 0.03125, %v254_v27  ;;  %v322_v29 = vmul.f32 %v3974_v24, %v3974_v24 }
 0x184   :  { %v257_v30 = vpop.xlane.xlu1 %256  ;;  %v346_v41 = vsel %vm239_vm1, %v324_v31, 0.0 }
 0x185   :  { %v3984_v32 = vsub.f32 %v3916_v43, %v293_v28  ;;  %v294_v33 = vmul.f32 0.03125, %v257_v30  ;;  %v340_v35 = vsel %vm239_vm1, %v322_v29, 0.0 }
 0x186   :  { %344 = vadd.xlane.f32.xlu0 %v343_v34  ;;  %341 = vadd.xlane.f32.xlu1 %v340_v35  ;;  %v260_v36 = vpop.xlane.xlu0 %259 }
 0x187   :  { %v3989_v37 = vsub.f32 %v3920_v47, %v294_v33  ;;  %v295_v38 = vmul.f32 0.03125, %v260_v36  ;;  %v325_v39 = vmul.f32 %v3984_v32, %v3984_v32 }
 0x188   :  { %v263_v40 = vpop.xlane.xlu1 %262 }
 0x189   :  { %v3995_v43 = vsub.f32 %v3914_v42, %v295_v38  ;;  %v296_v44 = vmul.f32 0.03125, %v263_v40  ;;  %v349_v45 = vsel %vm239_vm1, %v325_v39, 0.0  ;;  %v326_v48 = vmul.f32 %v3989_v37, %v3989_v37 }
 0x18a   :  { %347 = vadd.xlane.f32.xlu1 %v346_v41  ;;  %350 = vadd.xlane.f32.xlu0 %v349_v45  ;;  %v266_v47 = vpop.xlane.xlu0 %265 }
 0x18b   :  { %v4001_v49 = vsub.f32 %v3918_v46, %v296_v44  ;;  %v297_v50 = vmul.f32 0.03125, %v266_v47  ;;  %v327_v51 = vmul.f32 %v3995_v43, %v3995_v43  ;;  %v352_v42 = vsel %vm239_vm1, %v326_v48, 0.0 }
 0x18c   :  { %v269_v52 = vpop.xlane.xlu1 %268 }
 0x18d   :  { %v4007_v53 = vsub.f32 %v3932_v55, %v297_v50  ;;  %v298_v56 = vmul.f32 0.03125, %v269_v52  ;;  %v355_v57 = vsel %vm239_vm1, %v327_v51, 0.0  ;;  %v328_v60 = vmul.f32 %v4001_v49, %v4001_v49 }
 0x18e   :  { %353 = vadd.xlane.f32.xlu1 %v352_v42  ;;  %356 = vadd.xlane.f32.xlu0 %v355_v57  ;;  %v272_v46 = vpop.xlane.xlu0 %271 }
 0x18f   :  { %v4013_v61 = vsub.f32 %v3936_v59, %v298_v56  ;;  %v299_v62 = vmul.f32 0.03125, %v272_v46  ;;  %v329_v63 = vmul.f32 %v4007_v53, %v4007_v53  ;;  %v358_v55 = vsel %vm239_vm1, %v328_v60, 0.0 }
 0x190   :  { %v275_v0 = vpop.xlane.xlu1 %274 }
 0x191   :  { %v4019_v1 = vsub.f32 %v3930_v54, %v299_v62  ;;  %v300_v4 = vmul.f32 0.03125, %v275_v0  ;;  %v361_v5 = vsel %vm239_vm1, %v329_v63, 0.0  ;;  %v330_v8 = vmul.f32 %v4013_v61, %v4013_v61  ;;  %v4061_v0 = vld [vmem:[%s5431_s3] ss:$0 sm:$0xff] }
 0x192   :  { %359 = vadd.xlane.f32.xlu1 %v358_v55  ;;  %362 = vadd.xlane.f32.xlu0 %v361_v5  ;;  %v278_v59 = vpop.xlane.xlu0 %277 }
 0x193   :  { %v4025_v9 = vsub.f32 %v3934_v58, %v300_v4  ;;  %v301_v10 = vmul.f32 0.03125, %v278_v59  ;;  %v331_v11 = vmul.f32 %v4019_v1, %v4019_v1  ;;  %v364_v54 = vsel %vm239_vm1, %v330_v8, 0.0 }
 0x194   :  { %v281_v12 = vpop.xlane.xlu1 %280 }
 0x195   :  { %v4031_v13 = vsub.f32 %v3948_v3, %v301_v10  ;;  %v302_v14 = vmul.f32 0.03125, %v281_v12  ;;  %v367_v15 = vsel %vm239_vm1, %v331_v11, 0.0  ;;  %v332_v18 = vmul.f32 %v4025_v9, %v4025_v9  ;;  %v4067_v10 = vld [vmem:[%s5432_s4] ss:$0 sm:$0xff] }
 0x196   :  { %365 = vadd.xlane.f32.xlu1 %v364_v54  ;;  %368 = vadd.xlane.f32.xlu0 %v367_v15  ;;  %v284_v58 = vpop.xlane.xlu0 %283 }
 0x197   :  { %v4037_v19 = vsub.f32 %v3952_v7, %v302_v14  ;;  %v303_v20 = vmul.f32 0.03125, %v284_v58  ;;  %v333_v21 = vmul.f32 %v4031_v13, %v4031_v13  ;;  %v370_v3 = vsel %vm239_vm1, %v332_v18, 0.0 }
 0x198   :  { %v287_v22 = vpop.xlane.xlu1 %286 }
 0x199   :  { %v4043_v25 = vsub.f32 %v3946_v2, %v303_v20  ;;  %v304_v26 = vmul.f32 0.03125, %v287_v22  ;;  %v373_v27 = vsel %vm239_vm1, %v333_v21, 0.0  ;;  %v334_v28 = vmul.f32 %v4037_v19, %v4037_v19 }
 0x19a   :  { %371 = vadd.xlane.f32.xlu1 %v370_v3  ;;  %374 = vadd.xlane.f32.xlu0 %v373_v27 }
 0x19b   :  { %v4049_v7 = vsub.f32 %v3950_v6, %v304_v26  ;;  %v335_v29 = vmul.f32 %v4043_v25, %v4043_v25  ;;  %v376_v30 = vsel %vm239_vm1, %v334_v28, 0.0 }
 0x19d   :  { %v379_v31 = vsel %vm239_vm1, %v335_v29, 0.0  ;;  %v336_v2 = vmul.f32 %v4049_v7, %v4049_v7 }
 0x19e   :  { %377 = vadd.xlane.f32.xlu1 %v376_v30  ;;  %380 = vadd.xlane.f32.xlu0 %v379_v31 }
 0x19f   :  { %v382_v33 = vsel %vm239_vm1, %v336_v2, 0.0 }
 0x1a2   :  { %383 = vadd.xlane.f32.xlu1 %v382_v33 }
 0x20f   :  { %v339_v34 = vpop.xlane.xlu0 %338 }
 0x210   :  { %v385_v35 = vmul.f32 0.03125, %v339_v34 }
 0x212   :  { %v401_v36 = vadd.f32 1e-05, %v385_v35 }
 0x213   :  { %v342_v6 = vpop.xlane.xlu1 %341  ;;  %v345_v38 = vpop.xlane.xlu0 %344 }
 0x214   :  { %3473 = vrsqrt.f32 %v401_v36  ;;  %v386_v39 = vmul.f32 0.03125, %v342_v6  ;;  %v387_v40 = vmul.f32 0.03125, %v345_v38 }
 0x216   :  { %v402_v41 = vadd.f32 1e-05, %v386_v39  ;;  %v403_v44 = vadd.f32 1e-05, %v387_v40 }
 0x217   :  { %v348_v45 = vpop.xlane.xlu1 %347  ;;  %v351_v48 = vpop.xlane.xlu0 %350 }
 0x218   :  { %3475 = vrsqrt.f32 %v402_v41  ;;  %v388_v47 = vmul.f32 0.03125, %v348_v45  ;;  %v389_v50 = vmul.f32 0.03125, %v351_v48 }
 0x219   :  { %3477 = vrsqrt.f32 %v403_v44 }
 0x21a   :  { %v404_v51 = vadd.f32 1e-05, %v388_v47  ;;  %v405_v52 = vadd.f32 1e-05, %v389_v50 }
 0x21b   :  { %v354_v42 = vpop.xlane.xlu1 %353  ;;  %v357_v56 = vpop.xlane.xlu0 %356 }
 0x21c   :  { %3479 = vrsqrt.f32 %v404_v51  ;;  %v390_v57 = vmul.f32 0.03125, %v354_v42  ;;  %v391_v60 = vmul.f32 0.03125, %v357_v56 }
 0x21d   :  { %3481 = vrsqrt.f32 %v405_v52 }
 0x21e   :  { %v3474_v46 = vpop.eup %3473  ;;  %v406_v62 = vadd.f32 1e-05, %v390_v57  ;;  %v407_v63 = vadd.f32 1e-05, %v391_v60 }
 0x21f   :  { %v360_v55 = vpop.xlane.xlu1 %359  ;;  %v363_v4 = vpop.xlane.xlu0 %362  ;;  %v433_v5 = vmul.f32 %v3474_v46, %v3966_v17 }
 0x220   :  { %3483 = vrsqrt.f32 %v406_v62  ;;  %v392_v8 = vmul.f32 0.03125, %v360_v55  ;;  %v393_v59 = vmul.f32 0.03125, %v363_v4 }
 0x221   :  { %3485 = vrsqrt.f32 %v407_v63  ;;  %v455_v11 = vmul.f32 %v4061_v0, %v433_v5 }
 0x222   :  { %v3476_v12 = vpop.eup %3475  ;;  %v408_v54 = vadd.f32 1e-05, %v392_v8  ;;  %v409_v14 = vadd.f32 1e-05, %v393_v59 }
 0x223   :  { %v3478_v15 = vpop.eup %3477  ;;  %v366_v18 = vpop.xlane.xlu1 %365  ;;  %v4071_v20 = vadd.f32 %v4067_v10, %v455_v11  ;;  %v434_v17 = vmul.f32 %v3476_v12, %v3974_v24 }
 0x224   :  { %v369_v58 = vpop.xlane.xlu0 %368  ;;  %3487 = vrsqrt.f32 %v408_v54  ;;  %v394_v21 = vmul.f32 0.03125, %v366_v18  ;;  %v435_v3 = vmul.f32 %v3478_v15, %v3963_v16 }
 0x225   :  { %v395_v22 = vmul.f32 0.03125, %v369_v58  ;;  %3489 = vrsqrt.f32 %v409_v14  ;;  %v529_v26 = vsel %vm239_vm1, %v4071_v20, 0.0  ;;  %v456_v27 = vmul.f32 %v4061_v0, %v434_v17 }
 0x226   :  { %v3480_v28 = vpop.eup %3479  ;;  %v410_v29 = vadd.f32 1e-05, %v394_v21  ;;  %530 = vadd.xlane.f32.xlu0 %v529_v26  ;;  %v457_v31 = vmul.f32 %v4061_v0, %v435_v3 }
 0x227   :  { %v411_v30 = vadd.f32 1e-05, %v395_v22  ;;  %v3482_v2 = vpop.eup %3481  ;;  %v372_v33 = vpop.xlane.xlu1 %371  ;;  %v4080_v34 = vadd.f32 %v4067_v10, %v456_v27  ;;  %v436_v16 = vmul.f32 %v3480_v28, %v3971_v23 }
 0x228   :  { %v375_v24 = vpop.xlane.xlu0 %374  ;;  %3491 = vrsqrt.f32 %v410_v29  ;;  %v396_v35 = vmul.f32 0.03125, %v372_v33  ;;  %v4084_v6 = vadd.f32 %v4067_v10, %v457_v31  ;;  %v437_v40 = vmul.f32 %v3482_v2, %v3984_v32 }
 0x229   :  { %v397_v36 = vmul.f32 0.03125, %v375_v24  ;;  %3493 = vrsqrt.f32 %v411_v30  ;;  %v532_v38 = vsel %vm239_vm1, %v4080_v34, 0.0  ;;  %v458_v39 = vmul.f32 %v4061_v0, %v436_v16 }
 0x22a   :  { %v3484_v41 = vpop.eup %3483  ;;  %v412_v44 = vadd.f32 1e-05, %v396_v35  ;;  %533 = vadd.xlane.f32.xlu1 %v532_v38  ;;  %v535_v23 = vsel %vm239_vm1, %v4084_v6, 0.0  ;;  %v459_v52 = vmul.f32 %v4061_v0, %v437_v40 }
 0x22b   :  { %v413_v45 = vadd.f32 1e-05, %v397_v36  ;;  %v3486_v48 = vpop.eup %3485  ;;  %536 = vadd.xlane.f32.xlu0 %v535_v23  ;;  %v378_v47 = vpop.xlane.xlu1 %377  ;;  %v4093_v51 = vadd.f32 %v4067_v10, %v458_v39  ;;  %v438_v42 = vmul.f32 %v3484_v41, %v3989_v37 }
 0x22c   :  { %v381_v50 = vpop.xlane.xlu0 %380  ;;  %3495 = vrsqrt.f32 %v412_v44  ;;  %v398_v32 = vmul.f32 0.03125, %v378_v47  ;;  %v439_v57 = vmul.f32 %v3486_v48, %v3995_v43  ;;  %v4101_v46 = vadd.f32 %v4067_v10, %v459_v52 }
 0x22d   :  { %v399_v56 = vmul.f32 0.03125, %v381_v50  ;;  %3497 = vrsqrt.f32 %v413_v45  ;;  %v538_v60 = vsel %vm239_vm1, %v4093_v51, 0.0  ;;  %v460_v62 = vmul.f32 %v4061_v0, %v438_v42 }
 0x22e   :  { %v3488_v63 = vpop.eup %3487  ;;  %v414_v55 = vadd.f32 1e-05, %v398_v32  ;;  %539 = vadd.xlane.f32.xlu1 %v538_v60  ;;  %v461_v37 = vmul.f32 %v4061_v0, %v439_v57  ;;  %v541_v8 = vsel %vm239_vm1, %v4101_v46, 0.0 }
 0x22f   :  { %v415_v4 = vadd.f32 1e-05, %v399_v56  ;;  %v3490_v5 = vpop.eup %3489  ;;  %v384_v43 = vpop.xlane.xlu1 %383  ;;  %v4108_v59 = vadd.f32 %v4067_v10, %v460_v62  ;;  %v440_v11 = vmul.f32 %v3488_v63, %v4001_v49  ;;  %542 = vadd.xlane.f32.xlu0 %v541_v8 }
 0x230   :  { %3499 = vrsqrt.f32 %v414_v55  ;;  %v400_v12 = vmul.f32 0.03125, %v384_v43  ;;  %v4112_v54 = vadd.f32 %v4067_v10, %v461_v37  ;;  %v441_v14 = vmul.f32 %v3490_v5, %v4007_v53 }
 0x231   :  { %3501 = vrsqrt.f32 %v415_v4  ;;  %v544_v15 = vsel %vm239_vm1, %v4108_v59, 0.0  ;;  %v462_v18 = vmul.f32 %v4061_v0, %v440_v11 }
 0x232   :  { %v3492_v58 = vpop.eup %3491  ;;  %v416_v17 = vadd.f32 1e-05, %v400_v12  ;;  %545 = vadd.xlane.f32.xlu1 %v544_v15  ;;  %v547_v49 = vsel %vm239_vm1, %v4112_v54, 0.0  ;;  %v463_v21 = vmul.f32 %v4061_v0, %v441_v14 }
 0x233   :  { %v3494_v22 = vpop.eup %3493  ;;  %v4122_v3 = vadd.f32 %v4067_v10, %v462_v18  ;;  %v442_v53 = vmul.f32 %v3492_v58, %v4013_v61  ;;  %548 = vadd.xlane.f32.xlu0 %v547_v49 }
 0x234   :  { %3503 = vrsqrt.f32 %v416_v17  ;;  %v4126_v26 = vadd.f32 %v4067_v10, %v463_v21  ;;  %v443_v27 = vmul.f32 %v3494_v22, %v4019_v1 }
 0x235   :  { %v550_v28 = vsel %vm239_vm1, %v4122_v3, 0.0  ;;  %v464_v29 = vmul.f32 %v4061_v0, %v442_v53 }
 0x236   :  { %v3496_v30 = vpop.eup %3495  ;;  %551 = vadd.xlane.f32.xlu1 %v550_v28  ;;  %v553_v31 = vsel %vm239_vm1, %v4126_v26, 0.0  ;;  %v465_v2 = vmul.f32 %v4061_v0, %v443_v27 }
 0x237   :  { %v3498_v61 = vpop.eup %3497  ;;  %v4136_v33 = vadd.f32 %v4067_v10, %v464_v29  ;;  %v444_v24 = vmul.f32 %v3496_v30, %v4025_v9  ;;  %554 = vadd.xlane.f32.xlu0 %v553_v31 }
 0x238   :  { %v4140_v1 = vadd.f32 %v4067_v10, %v465_v2  ;;  %v445_v16 = vmul.f32 %v3498_v61, %v4031_v13 }
 0x239   :  { %v556_v35 = vsel %vm239_vm1, %v4136_v33, 0.0  ;;  %v466_v36 = vmul.f32 %v4061_v0, %v444_v24 }
 0x23a   :  { %v3500_v38 = vpop.eup %3499  ;;  %557 = vadd.xlane.f32.xlu1 %v556_v35  ;;  %v559_v39 = vsel %vm239_vm1, %v4140_v1, 0.0  ;;  %v467_v40 = vmul.f32 %v4061_v0, %v445_v16 }
 0x23b   :  { %v3502_v41 = vpop.eup %3501  ;;  %v4150_v9 = vadd.f32 %v4067_v10, %v466_v36  ;;  %v446_v44 = vmul.f32 %v3500_v38, %v4037_v19  ;;  %560 = vadd.xlane.f32.xlu0 %v559_v39 }
 0x23c   :  { %v4154_v13 = vadd.f32 %v4067_v10, %v467_v40  ;;  %v447_v45 = vmul.f32 %v3502_v41, %v4043_v25 }
 0x23d   :  { %v562_v23 = vsel %vm239_vm1, %v4150_v9, 0.0  ;;  %v468_v48 = vmul.f32 %v4061_v0, %v446_v44 }
 0x23e   :  { %v3504_v47 = vpop.eup %3503  ;;  %563 = vadd.xlane.f32.xlu1 %v562_v23  ;;  %v565_v50 = vsel %vm239_vm1, %v4154_v13, 0.0  ;;  %v469_v52 = vmul.f32 %v4061_v0, %v447_v45 }
 0x23f   :  { %v4164_v19 = vadd.f32 %v4067_v10, %v468_v48  ;;  %v448_v42 = vmul.f32 %v3504_v47, %v4049_v7  ;;  %566 = vadd.xlane.f32.xlu0 %v565_v50 }
 0x240   :  { %v4168_v25 = vadd.f32 %v4067_v10, %v469_v52 }
 0x241   :  { %5458 = vst [vmem:[#allocation2_spill] sm:$0xff] %v4164_v19  ;;  %v568_v32 = vsel %vm239_vm1, %v4164_v19, 0.0  ;;  %v470_v56 = vmul.f32 %v4061_v0, %v448_v42 }
 0x242   :  { %5459 = vst [vmem:[#allocation3_spill] sm:$0xff] %v4168_v25  ;;  %569 = vadd.xlane.f32.xlu1 %v568_v32  ;;  %v571_v57 = vsel %vm239_vm1, %v4168_v25, 0.0 }
 0x243   :  { %v4176_v60 = vadd.f32 %v4067_v10, %v470_v56  ;;  %572 = vadd.xlane.f32.xlu0 %v571_v57 }
 0x245   :  { %5460 = vst [vmem:[#allocation4_spill] sm:$0xff] %v4176_v60  ;;  %v574_v7 = vsel %vm239_vm1, %v4176_v60, 0.0 }
 0x246   :  { %575 = vadd.xlane.f32.xlu1 %v574_v7 }
 0x2b3   :  { %v531_v62 = vpop.xlane.xlu0 %530 }
 0x2b4   :  { %v577_v63 = vmul.f32 0.03125, %v531_v62 }
 0x2b6   :  { %v4181_v55 = vsub.f32 %v4071_v20, %v577_v63 }
 0x2b7   :  { %v534_v4 = vpop.xlane.xlu1 %533 }
 0x2b8   :  { %v578_v37 = vmul.f32 0.03125, %v534_v4  ;;  %v537_v0 = vpop.xlane.xlu0 %536  ;;  %v609_v5 = vmul.f32 %v4181_v55, %v4181_v55 }
 0x2b9   :  { %v579_v8 = vmul.f32 0.03125, %v537_v0 }
 0x2ba   :  { %v4186_v10 = vsub.f32 %v4080_v34, %v578_v37  ;;  %v625_v43 = vsel %vm239_vm1, %v609_v5, 0.0 }
 0x2bb   :  { %v4190_v11 = vsub.f32 %v4084_v6, %v579_v8  ;;  %v540_v12 = vpop.xlane.xlu1 %539  ;;  %626 = vadd.xlane.f32.xlu0 %v625_v43 }
 0x2bc   :  { %v580_v14 = vmul.f32 0.03125, %v540_v12  ;;  %v610_v15 = vmul.f32 %v4186_v10, %v4186_v10  ;;  %v543_v18 = vpop.xlane.xlu0 %542 }
 0x2bd   :  { %v611_v58 = vmul.f32 %v4190_v11, %v4190_v11  ;;  %v581_v49 = vmul.f32 0.03125, %v543_v18 }
 0x2be   :  { %v4197_v17 = vsub.f32 %v4093_v51, %v580_v14  ;;  %v628_v21 = vsel %vm239_vm1, %v610_v15, 0.0 }
 0x2bf   :  { %629 = vadd.xlane.f32.xlu1 %v628_v21  ;;  %v546_v22 = vpop.xlane.xlu1 %545  ;;  %v631_v53 = vsel %vm239_vm1, %v611_v58, 0.0  ;;  %v4202_v27 = vsub.f32 %v4101_v46, %v581_v49 }
 0x2c0   :  { %v582_v28 = vmul.f32 0.03125, %v546_v22  ;;  %632 = vadd.xlane.f32.xlu0 %v631_v53  ;;  %v612_v29 = vmul.f32 %v4197_v17, %v4197_v17  ;;  %v549_v30 = vpop.xlane.xlu0 %548 }
 0x2c1   :  { %v583_v2 = vmul.f32 0.03125, %v549_v30  ;;  %v613_v24 = vmul.f32 %v4202_v27, %v4202_v27 }
 0x2c2   :  { %v4207_v31 = vsub.f32 %v4108_v59, %v582_v28  ;;  %v634_v61 = vsel %vm239_vm1, %v612_v29, 0.0 }
 0x2c3   :  { %635 = vadd.xlane.f32.xlu1 %v634_v61  ;;  %v552_v16 = vpop.xlane.xlu1 %551  ;;  %v4213_v35 = vsub.f32 %v4112_v54, %v583_v2  ;;  %v637_v38 = vsel %vm239_vm1, %v613_v24, 0.0 }
 0x2c4   :  { %v584_v36 = vmul.f32 0.03125, %v552_v16  ;;  %v614_v39 = vmul.f32 %v4207_v31, %v4207_v31  ;;  %638 = vadd.xlane.f32.xlu0 %v637_v38  ;;  %v555_v40 = vpop.xlane.xlu0 %554 }
 0x2c5   :  { %v585_v44 = vmul.f32 0.03125, %v555_v40  ;;  %v615_v23 = vmul.f32 %v4213_v35, %v4213_v35 }
 0x2c6   :  { %v4219_v41 = vsub.f32 %v4122_v3, %v584_v36  ;;  %v640_v45 = vsel %vm239_vm1, %v614_v39, 0.0 }
 0x2c7   :  { %641 = vadd.xlane.f32.xlu1 %v640_v45  ;;  %v558_v48 = vpop.xlane.xlu1 %557  ;;  %v4225_v47 = vsub.f32 %v4126_v26, %v585_v44  ;;  %v643_v52 = vsel %vm239_vm1, %v615_v23, 0.0 }
 0x2c8   :  { %v586_v50 = vmul.f32 0.03125, %v558_v48  ;;  %v616_v42 = vmul.f32 %v4219_v41, %v4219_v41  ;;  %644 = vadd.xlane.f32.xlu0 %v643_v52  ;;  %v561_v32 = vpop.xlane.xlu0 %560  ;;  %v3460_v52 = vld [vmem:[%s5433_s7 + $0x8] sm:$0xff]  }
 0x2c9   :  { %v587_v57 = vmul.f32 0.03125, %v561_v32  ;;  %v617_v62 = vmul.f32 %v4225_v47, %v4225_v47 }
 0x2ca   :  { %v4231_v56 = vsub.f32 %v4136_v33, %v586_v50  ;;  %v646_v7 = vsel %vm239_vm1, %v616_v42, 0.0  ;;  %v3459_v50 = vld [vmem:[%s5433_s7] sm:$0xff]   ;;  %s3732_s7 = smov 112  }
 0x2cb   :  { %647 = vadd.xlane.f32.xlu1 %v646_v7  ;;  %v564_v63 = vpop.xlane.xlu1 %563  ;;  %v4237_v4 = vsub.f32 %v4140_v1, %v587_v57  ;;  %v649_v0 = vsel %vm239_vm1, %v617_v62, 0.0  ;;  %3158 = vmatprep.subr.bf16.mxu1 %v3459_v50 }
 0x2cc   :  { %v588_v37 = vmul.f32 0.03125, %v564_v63  ;;  %v618_v5 = vmul.f32 %v4231_v56, %v4231_v56  ;;  %650 = vadd.xlane.f32.xlu0 %v649_v0  ;;  %v567_v8 = vpop.xlane.xlu0 %566  ;;  %3159 = vmatpush3.bf16.msra.mxu1 %v3459_v50 }
 0x2cd   :  { %v589_v12 = vmul.f32 0.03125, %v567_v8  ;;  %v619_v15 = vmul.f32 %v4237_v4, %v4237_v4  ;;  %3160 = vmatprep.subr.bf16.mxu1 %v3460_v52 }
 0x2ce   :  { %v4243_v43 = vsub.f32 %v4150_v9, %v588_v37  ;;  %v652_v14 = vsel %vm239_vm1, %v618_v5, 0.0 }
 0x2cf   :  { %653 = vadd.xlane.f32.xlu1 %v652_v14  ;;  %v570_v18 = vpop.xlane.xlu1 %569  ;;  %v4249_v58 = vsub.f32 %v4154_v13, %v589_v12  ;;  %v655_v21 = vsel %vm239_vm1, %v619_v15, 0.0 }
 0x2d0   :  { %v590_v49 = vmul.f32 0.03125, %v570_v18  ;;  %v620_v22 = vmul.f32 %v4243_v43, %v4243_v43  ;;  %656 = vadd.xlane.f32.xlu0 %v655_v21  ;;  %v573_v53 = vpop.xlane.xlu0 %572  ;;  %3161 = vmatpush3.bf16.msra.mxu1 %v3460_v52 }
 0x2d1   :  { %v591_v29 = vmul.f32 0.03125, %v573_v53  ;;  %v621_v2 = vmul.f32 %v4249_v58, %v4249_v58 }
 0x2d2   :  { %v4255_v28 = vsub.f32 %v4164_v19, %v590_v49  ;;  %v658_v30 = vsel %vm239_vm1, %v620_v22, 0.0 }
 0x2d3   :  { %659 = vadd.xlane.f32.xlu1 %v658_v30  ;;  %v576_v61 = vpop.xlane.xlu1 %575  ;;  %v4261_v24 = vsub.f32 %v4168_v25, %v591_v29  ;;  %v661_v36 = vsel %vm239_vm1, %v621_v2, 0.0 }
 0x2d4   :  { %v592_v16 = vmul.f32 0.03125, %v576_v61  ;;  %v622_v38 = vmul.f32 %v4255_v28, %v4255_v28  ;;  %662 = vadd.xlane.f32.xlu0 %v661_v36 }
 0x2d5   :  { %v623_v44 = vmul.f32 %v4261_v24, %v4261_v24 }
 0x2d6   :  { %v4267_v39 = vsub.f32 %v4176_v60, %v592_v16  ;;  %v664_v40 = vsel %vm239_vm1, %v622_v38, 0.0 }
 0x2d7   :  { %665 = vadd.xlane.f32.xlu1 %v664_v40  ;;  %v667_v45 = vsel %vm239_vm1, %v623_v44, 0.0  ;;  %v4286_v40 = vld [vmem:[%s5434_s5] ss:$0 sm:$0xff] }
 0x2d8   :  { %v624_v23 = vmul.f32 %v4267_v39, %v4267_v39  ;;  %668 = vadd.xlane.f32.xlu0 %v667_v45 }
 0x2da   :  { %v670_v48 = vsel %vm239_vm1, %v624_v23, 0.0 }
 0x2db   :  { %671 = vadd.xlane.f32.xlu1 %v670_v48 }
 0x348   :  { %v627_v42 = vpop.xlane.xlu0 %626 }
 0x349   :  { %v673_v32 = vmul.f32 0.03125, %v627_v42 }
 0x34b   :  { %v689_v57 = vadd.f32 1e-05, %v673_v32 }
 0x34c   :  { %v630_v7 = vpop.xlane.xlu1 %629 }
 0x34d   :  { %3505 = vrsqrt.f32 %v689_v57  ;;  %v674_v62 = vmul.f32 0.03125, %v630_v7  ;;  %v633_v63 = vpop.xlane.xlu0 %632  ;;  %v4293_v7 = vld [vmem:[%s5435_s6] ss:$0 sm:$0xff] }
 0x34e   :  { %v675_v37 = vmul.f32 0.03125, %v633_v63 }
 0x34f   :  { %v690_v0 = vadd.f32 1e-05, %v674_v62 }
 0x350   :  { %v691_v5 = vadd.f32 1e-05, %v675_v37  ;;  %v636_v8 = vpop.xlane.xlu1 %635 }
 0x351   :  { %3507 = vrsqrt.f32 %v690_v0  ;;  %v676_v12 = vmul.f32 0.03125, %v636_v8  ;;  %v639_v14 = vpop.xlane.xlu0 %638 }
 0x352   :  { %3509 = vrsqrt.f32 %v691_v5  ;;  %v677_v18 = vmul.f32 0.03125, %v639_v14 }
 0x353   :  { %v692_v15 = vadd.f32 1e-05, %v676_v12 }
 0x354   :  { %v642_v49 = vpop.xlane.xlu1 %641  ;;  %v693_v21 = vadd.f32 1e-05, %v677_v18 }
 0x355   :  { %3511 = vrsqrt.f32 %v692_v15  ;;  %v678_v22 = vmul.f32 0.03125, %v642_v49  ;;  %v645_v53 = vpop.xlane.xlu0 %644 }
 0x356   :  { %3513 = vrsqrt.f32 %v693_v21  ;;  %v679_v2 = vmul.f32 0.03125, %v645_v53 }
 0x357   :  { %v3506_v29 = vpop.eup %3505  ;;  %v694_v30 = vadd.f32 1e-05, %v678_v22 }
 0x358   :  { %v648_v61 = vpop.xlane.xlu1 %647  ;;  %v721_v16 = vmul.f32 %v3506_v29, %v4181_v55  ;;  %v695_v36 = vadd.f32 1e-05, %v679_v2 }
 0x359   :  { %3515 = vrsqrt.f32 %v694_v30  ;;  %v680_v38 = vmul.f32 0.03125, %v648_v61  ;;  %v651_v44 = vpop.xlane.xlu0 %650 }
 0x35a   :  { %3517 = vrsqrt.f32 %v695_v36  ;;  %v681_v48 = vmul.f32 0.03125, %v651_v44  ;;  %v743_v32 = vmul.f32 %v4286_v40, %v721_v16 }
 0x35b   :  { %v3508_v45 = vpop.eup %3507  ;;  %v696_v23 = vadd.f32 1e-05, %v680_v38 }
 0x35c   :  { %v3510_v50 = vpop.eup %3509  ;;  %v654_v52 = vpop.xlane.xlu1 %653  ;;  %v722_v42 = vmul.f32 %v3508_v45, %v4186_v10  ;;  %v697_v55 = vadd.f32 1e-05, %v681_v48  ;;  %v765_v12 = vadd.f32 %v4293_v7, %v743_v32 }
 0x35d   :  { %3519 = vrsqrt.f32 %v696_v23  ;;  %v682_v57 = vmul.f32 0.03125, %v654_v52  ;;  %v723_v62 = vmul.f32 %v3510_v50, %v4190_v11  ;;  %v657_v63 = vpop.xlane.xlu0 %656 }
 0x35e   :  { %v744_v37 = vmul.f32 %v4286_v40, %v722_v42  ;;  %3521 = vrsqrt.f32 %v697_v55  ;;  %v683_v8 = vmul.f32 0.03125, %v657_v63 }
 0x35f   :  { %v3512_v0 = vpop.eup %3511  ;;  %v698_v5 = vadd.f32 1e-05, %v682_v57  ;;  %v745_v18 = vmul.f32 %v4286_v40, %v723_v62 }
 0x360   :  { %v660_v10 = vpop.xlane.xlu1 %659  ;;  %v766_v14 = vadd.f32 %v4293_v7, %v744_v37  ;;  %v724_v15 = vmul.f32 %v3512_v0, %v4197_v17  ;;  %v3514_v49 = vpop.eup %3513  ;;  %v699_v21 = vadd.f32 1e-05, %v683_v8 }
 0x361   :  { %3523 = vrsqrt.f32 %v698_v5  ;;  %v684_v11 = vmul.f32 0.03125, %v660_v10  ;;  %v663_v22 = vpop.xlane.xlu0 %662  ;;  %v725_v30 = vmul.f32 %v3514_v49, %v4202_v27  ;;  %v767_v17 = vadd.f32 %v4293_v7, %v745_v18 }
 0x362   :  { %v781_v53 = vpack.c.bf16 %v766_v14, %v765_v12  ;;  %v746_v29 = vmul.f32 %v4286_v40, %v724_v15  ;;  %3525 = vrsqrt.f32 %v699_v21  ;;  %v685_v16 = vmul.f32 0.03125, %v663_v22 }
 0x363   :  { %v3516_v2 = vpop.eup %3515  ;;  %v700_v61 = vadd.f32 1e-05, %v684_v11  ;;  %v747_v45 = vmul.f32 %v4286_v40, %v725_v30 }
 0x364   :  { %v666_v36 = vpop.xlane.xlu1 %665  ;;  %3162 = vmatprep.mubr.msk.bf16.mxu1 %vm239_vm1, %v781_v53  ;;  %v768_v38 = vadd.f32 %v4293_v7, %v746_v29  ;;  %v726_v44 = vmul.f32 %v3516_v2, %v4207_v31  ;;  %v3518_v23 = vpop.eup %3517  ;;  %v701_v48 = vadd.f32 1e-05, %v685_v16 }
 0x365   :  { %3527 = vrsqrt.f32 %v700_v61  ;;  %v686_v50 = vmul.f32 0.03125, %v666_v36  ;;  %v669_v27 = vpop.xlane.xlu0 %668  ;;  %v727_v32 = vmul.f32 %v3518_v23, %v4213_v35  ;;  %v769_v31 = vadd.f32 %v4293_v7, %v747_v45 }
 0x366   :  { %v782_v52 = vpack.c.bf16 %v768_v38, %v767_v17  ;;  %v748_v42 = vmul.f32 %v4286_v40, %v726_v44  ;;  %3529 = vrsqrt.f32 %v701_v48  ;;  %v687_v62 = vmul.f32 0.03125, %v669_v27 }
 0x367   :  { %v3520_v55 = vpop.eup %3519  ;;  %v702_v57 = vadd.f32 1e-05, %v686_v50  ;;  %v749_v5 = vmul.f32 %v4286_v40, %v727_v32 }
 0x368   :  { %v672_v63 = vpop.xlane.xlu1 %671  ;;  %3163 = vmatmul.mubr.msk.bf16.vlgmr.msra.gmra.mrb[0].mxu1 %vm239_vm1, %v782_v52  ;;  %v770_v37 = vadd.f32 %v4293_v7, %v748_v42  ;;  %v728_v0 = vmul.f32 %v3520_v55, %v4219_v41  ;;  %v3522_v8 = vpop.eup %3521  ;;  %v703_v10 = vadd.f32 1e-05, %v687_v62 }
 0x369   :  { %3531 = vrsqrt.f32 %v702_v57  ;;  %v688_v12 = vmul.f32 0.03125, %v672_v63  ;;  %v729_v15 = vmul.f32 %v3522_v8, %v4225_v47  ;;  %v771_v21 = vadd.f32 %v4293_v7, %v749_v5  ;;  %v2939_v8 = vld [vmem:[%s5436_s8] ss:$0 sm:$0xff]  ;;  %s3730_s8 = smov 64  }
 0x36a   :  { %v783_v35 = vpack.c.bf16 %v770_v37, %v769_v31  ;;  %v750_v14 = vmul.f32 %v4286_v40, %v728_v0  ;;  %3533 = vrsqrt.f32 %v703_v10 }
 0x36b   :  { %v3524_v18 = vpop.eup %3523  ;;  %v704_v49 = vadd.f32 1e-05, %v688_v12  ;;  %v751_v22 = vmul.f32 %v4286_v40, %v729_v15 }
 0x36c   :  { %3166 = vmatprep.mubr.msk.bf16.mxu1 %vm239_vm1, %v783_v35  ;;  %v772_v41 = vadd.f32 %v4293_v7, %v750_v14  ;;  %v730_v11 = vmul.f32 %v3524_v18, %v4231_v56  ;;  %v3526_v53 = vpop.eup %3525 }
 0x36d   :  { %3535 = vrsqrt.f32 %v704_v49  ;;  %v731_v47 = vmul.f32 %v3526_v53, %v4237_v4  ;;  %v773_v61 = vadd.f32 %v4293_v7, %v751_v22 }
 0x36e   :  { %v784_v29 = vpack.c.bf16 %v772_v41, %v771_v21  ;;  %v752_v30 = vmul.f32 %v4286_v40, %v730_v11 }
 0x36f   :  { %v3528_v2 = vpop.eup %3527  ;;  %v753_v56 = vmul.f32 %v4286_v40, %v731_v47 }
 0x370   :  { %3167 = vmatmul.mubr.msk.bf16.gmra.mrb[4].mxu1 %vm239_vm1, %v784_v29  ;;  %v774_v16 = vadd.f32 %v4293_v7, %v752_v30  ;;  %v732_v36 = vmul.f32 %v3528_v2, %v4243_v43  ;;  %v3530_v17 = vpop.eup %3529 }
 0x371   :  { %v733_v45 = vmul.f32 %v3530_v17, %v4249_v58  ;;  %v775_v4 = vadd.f32 %v4293_v7, %v753_v56 }
 0x372   :  { %v785_v38 = vpack.c.bf16 %v774_v16, %v773_v61  ;;  %v754_v44 = vmul.f32 %v4286_v40, %v732_v36 }
 0x373   :  { %v3532_v23 = vpop.eup %3531  ;;  %v755_v27 = vmul.f32 %v4286_v40, %v733_v45 }
 0x374   :  { %3170 = vmatprep.mubr.msk.bf16.mxu1 %vm239_vm1, %v785_v38  ;;  %v776_v48 = vadd.f32 %v4293_v7, %v754_v44  ;;  %v734_v50 = vmul.f32 %v3532_v23, %v4255_v28  ;;  %v3534_v43 = vpop.eup %3533 }
 0x375   :  { %v735_v32 = vmul.f32 %v3534_v43, %v4261_v24  ;;  %v777_v58 = vadd.f32 %v4293_v7, %v755_v27 }
 0x376   :  { %v786_v52 = vpack.c.bf16 %v776_v48, %v775_v4  ;;  %v756_v42 = vmul.f32 %v4286_v40, %v734_v50 }
 0x377   :  { %v3536_v55 = vpop.eup %3535  ;;  %v757_v63 = vmul.f32 %v4286_v40, %v735_v32 }
 0x378   :  { %3171 = vmatmul.mubr.msk.bf16.gmra.mrb[8].mxu1 %vm239_vm1, %v786_v52  ;;  %v778_v57 = vadd.f32 %v4293_v7, %v756_v42  ;;  %v736_v62 = vmul.f32 %v3536_v55, %v4267_v39 }
 0x379   :  { %v779_v37 = vadd.f32 %v4293_v7, %v757_v63 }
 0x37a   :  { %v787_v28 = vpack.c.bf16 %v778_v57, %v777_v58  ;;  %v758_v31 = vmul.f32 %v4286_v40, %v736_v62 }
 0x37c   :  { %3174 = vmatprep.mubr.msk.bf16.mxu1 %vm239_vm1, %v787_v28  ;;  %v780_v24 = vadd.f32 %v4293_v7, %v758_v31 }
 0x37e   :  { %v788_v0 = vpack.c.bf16 %v780_v24, %v779_v37 }
 0x380   :  { %3175 = vmatmul.mubr.msk.bf16.gmra.mrb[12].mxu1 %vm239_vm1, %v788_v0 }
 0x43b   :  { %v3164_v5 = vpop.f32.mrb[0].mxu1 }
 0x43c   :  { %v865_v39 = vpop.f32.mrb[1].mxu1  ;;  %v874_v12 = vadd.f32 %v3164_v5, %v2939_v8 }
 0x43d   :  { %v3165_v10 = vpop.f32.mrb[2].mxu1  ;;  %v866_v40 = vadd.f32 %v2939_v8, %v865_v39 }
 0x43e   :  { %v877_v35 = vadd.f32 %v3165_v10, %v2939_v8  ;;  %v868_v14 = vpop.f32.mrb[3].mxu1 }
 0x43f   :  { %v869_v15 = vadd.f32 %v2939_v8, %v868_v14 }
 0x440   :  { %v4351_v18 = vpack.c.bf16 %v877_v35, %v874_v12 }
 0x441   :  { %v4353_v49 = vpack.c.bf16 %v869_v15, %v866_v40 }
 0x442   :  { %946 = vrot.lane.b32.xlu1 %v4351_v18, %s3729_s22 }
 0x443   :  { %944 = vrot.lane.b32.xlu0 %v4353_v49, %s3729_s22  ;;  %v3168_v7 = vpop.f32.mrb[4].mxu1  ;;  %3194 = vmatprep.mubr.msk.bf16.mxu1 %vm960_vm2, %v4353_v49 }
 0x444   :  { %v881_v21 = vpop.f32.mrb[5].mxu1  ;;  %v890_v11 = vadd.f32 %v3168_v7, %v2939_v8 }
 0x445   :  { %v3169_v41 = vpop.f32.mrb[6].mxu1  ;;  %v882_v29 = vadd.f32 %v2939_v8, %v881_v21 }
 0x446   :  { %v893_v22 = vadd.f32 %v3169_v41, %v2939_v8  ;;  %v884_v53 = vpop.f32.mrb[7].mxu1 }
 0x447   :  { %v885_v30 = vadd.f32 %v2939_v8, %v884_v53 }
 0x448   :  { %v4361_v47 = vpack.c.bf16 %v893_v22, %v890_v11 }
 0x449   :  { %v4363_v2 = vpack.c.bf16 %v885_v30, %v882_v29 }
 0x44b   :  { %948 = vrot.lane.b32.xlu1 %v4363_v2, %s3729_s22  ;;  %v3172_v61 = vpop.f32.mrb[8].mxu1 }
 0x44c   :  { %v897_v16 = vpop.f32.mrb[9].mxu1  ;;  %v906_v56 = vadd.f32 %v3172_v61, %v2939_v8 }
 0x44d   :  { %v3173_v36 = vpop.f32.mrb[10].mxu1  ;;  %v898_v44 = vadd.f32 %v2939_v8, %v897_v16 }
 0x44e   :  { %v909_v17 = vadd.f32 %v3173_v36, %v2939_v8  ;;  %v900_v38 = vpop.f32.mrb[11].mxu1  ;;  %v1124_v36 = vld [vmem:[%s5437_s17 + $0x10] sm:$0xff] }
 0x44f   :  { %v901_v45 = vadd.f32 %v2939_v8, %v900_v38  ;;  %950 = vrot.lane.b32.xlu1 %v4361_v47, %s3729_s22 }
 0x450   :  { %v4369_v23 = vpack.c.bf16 %v909_v17, %v906_v56 }
 0x451   :  { %v4371_v4 = vpack.c.bf16 %v901_v45, %v898_v44 }
 0x453   :  { %954 = vrot.lane.b32.xlu1 %v4369_v23, %s3729_s22  ;;  %952 = vrot.lane.b32.xlu0 %v4371_v4, %s3729_s22  ;;  %v3176_v48 = vpop.f32.mrb[12].mxu1 }
 0x454   :  { %v913_v50 = vpop.f32.mrb[13].mxu1  ;;  %v922_v43 = vadd.f32 %v3176_v48, %v2939_v8 }
 0x455   :  { %v3177_v27 = vpop.f32.mrb[14].mxu1  ;;  %v914_v32 = vadd.f32 %v2939_v8, %v913_v50  ;;  %v1123_v50 = vld [vmem:[%s5437_s17 + $0x8] sm:$0xff] }
 0x456   :  { %v925_v52 = vadd.f32 %v3177_v27, %v2939_v8  ;;  %v916_v42 = vpop.f32.mrb[15].mxu1 }
 0x457   :  { %v917_v55 = vadd.f32 %v2939_v8, %v916_v42 }
 0x458   :  { %v4377_v58 = vpack.c.bf16 %v925_v52, %v922_v43  ;;  %v1122_v43 = vld [vmem:[%s5437_s17] sm:$0xff] }
 0x459   :  { %v4379_v57 = vpack.c.bf16 %v917_v55, %v914_v32 }
 0x45a   :  { %958 = vrot.lane.b32.xlu1 %v4377_v58, %s3729_s22 }
 0x45b   :  { %956 = vrot.lane.b32.xlu0 %v4379_v57, %s3729_s22 }
 0x45e   :  { %1308 = vrot.lane.b32.xlu1 %v4351_v18, %s3730_s8 }
 0x45f   :  { %1306 = vrot.lane.b32.xlu0 %v4353_v49, %s3730_s8 }
 0x462   :  { %1312 = vrot.lane.b32.xlu1 %v4361_v47, %s3730_s8 }
 0x463   :  { %1310 = vrot.lane.b32.xlu0 %v4363_v2, %s3730_s8 }
 0x466   :  { %1316 = vrot.lane.b32.xlu1 %v4369_v23, %s3730_s8 }
 0x467   :  { %1314 = vrot.lane.b32.xlu0 %v4371_v4, %s3730_s8 }
 0x46a   :  { %1320 = vrot.lane.b32.xlu1 %v4377_v58, %s3730_s8 }
 0x46b   :  { %1443 = vrot.lane.b32.xlu0 %v4353_v49, %s3731_s2 }
 0x46e   :  { %1445 = vrot.lane.b32.xlu1 %v4351_v18, %s3731_s2 }
 0x46f   :  { %1318 = vrot.lane.b32.xlu0 %v4379_v57, %s3730_s8 }
 0x4b4   :  { %v947_v28 = vpop.permute.xlu1 %946 }
 0x4b5   :  { %v945_v62 = vpop.permute.xlu0 %944  ;;  %v989_v37 = vsel %vm960_vm2, %v947_v28, 0 }
 0x4b6   :  { %3394 = vmatprep.subr.msk.bf16.mxu1 %vm960_vm2, %v945_v62  ;;  %v986_v63 = vsel %vm960_vm2, %v945_v62, 0  ;;  %v1125_v62 = vld [vmem:[%s5437_s17 + $0x18] sm:$0xff] }
 0x4b7   :  { %3179 = vmatpush3.bf16.xpose.msra.mxu1 %v986_v63 }
 0x4b8   :  { %3395 = vmatprep.subr.msk.bf16.mxu1 %vm960_vm2, %v947_v28 }
 0x4bd   :  { %v949_v31 = vpop.permute.xlu1 %948 }
 0x4be   :  { %v992_v0 = vsel %vm960_vm2, %v949_v31, 0 }
 0x4bf   :  { %3181 = vmatpush3.bf16.xpose.msra.mxu1 %v989_v37 }
 0x4c0   :  { %3396 = vmatprep.subr.msk.bf16.mxu1 %vm960_vm2, %v949_v31  ;;  %v1129_v31 = vld [vmem:[%s5437_s17 + $0x38] sm:$0xff] }
 0x4c1   :  { %v951_v24 = vpop.permute.xlu1 %950 }
 0x4c2   :  { %v995_v12 = vsel %vm960_vm2, %v951_v24, 0 }
 0x4c5   :  { %v955_v5 = vpop.permute.xlu1 %954  ;;  %v953_v8 = vpop.permute.xlu0 %952 }
 0x4c6   :  { %v998_v15 = vsel %vm960_vm2, %v953_v8, 0  ;;  %v1001_v41 = vsel %vm960_vm2, %v955_v5, 0 }
 0x4c7   :  { %3183 = vmatpush3.bf16.xpose.msra.mxu1 %v992_v0 }
 0x4c8   :  { %3397 = vmatprep.subr.msk.bf16.mxu1 %vm960_vm2, %v951_v24 }
 0x4cc   :  { %v959_v39 = vpop.permute.xlu1 %958 }
 0x4cd   :  { %v957_v10 = vpop.permute.xlu0 %956  ;;  %v1007_v61 = vsel %vm960_vm2, %v959_v39, 0 }
 0x4ce   :  { %v1004_v53 = vsel %vm960_vm2, %v957_v10, 0 }
 0x4cf   :  { %3185 = vmatpush3.bf16.xpose.msra.mxu1 %v995_v12  ;;  %v1127_v12 = vld [vmem:[%s5437_s17 + $0x28] sm:$0xff] }
 0x4d0   :  { %3398 = vmatprep.subr.msk.bf16.mxu1 %vm960_vm2, %v953_v8  ;;  %v1309_v14 = vpop.permute.xlu1 %1308  ;;  %v1128_v8 = vld [vmem:[%s5437_s17 + $0x30] sm:$0xff] }
 0x4d1   :  { %v1307_v35 = vpop.permute.xlu0 %1306 }
 0x4d2   :  { %3210 = vmatprep.subr.bf16.mxu0 %v1307_v35 }
 0x4d3   :  { %3211 = vmatpush3.bf16.msra.mxu0 %v1307_v35 }
 0x4d4   :  { %3212 = vmatprep.subr.bf16.mxu0 %v1309_v14  ;;  %v1313_v7 = vpop.permute.xlu1 %1312 }
 0x4d5   :  { %v1311_v40 = vpop.permute.xlu0 %1310 }
 0x4d7   :  { %3187 = vmatpush3.bf16.xpose.msra.mxu1 %v998_v15  ;;  %3213 = vmatpush3.bf16.msra.mxu0 %v1309_v14  ;;  %v1126_v15 = vld [vmem:[%s5437_s17 + $0x20] sm:$0xff] }
 0x4d8   :  { %3399 = vmatprep.subr.msk.bf16.mxu1 %vm960_vm2, %v955_v5  ;;  %3214 = vmatprep.subr.bf16.mxu0 %v1311_v40  ;;  %v1317_v22 = vpop.permute.xlu1 %1316 }
 0x4d9   :  { %v1315_v21 = vpop.permute.xlu0 %1314 }
 0x4db   :  { %3215 = vmatpush3.bf16.msra.mxu0 %v1311_v40 }
 0x4dc   :  { %3216 = vmatprep.subr.bf16.mxu0 %v1313_v7  ;;  %v1321_v30 = vpop.permute.xlu1 %1320 }
 0x4dd   :  { %v4410_v11 = vpop.permute.xlu0 %1443 }
 0x4df   :  { %3189 = vmatpush3.bf16.xpose.msra.mxu1 %v1001_v41  ;;  %3217 = vmatpush3.bf16.msra.mxu0 %v1313_v7 }
 0x4e0   :  { %3400 = vmatprep.subr.msk.bf16.mxu1 %vm960_vm2, %v957_v10  ;;  %3218 = vmatprep.subr.bf16.mxu0 %v1315_v21 }
 0x4e1   :  { %v1319_v29 = vpop.permute.xlu0 %1318 }
 0x4e3   :  { %3219 = vmatpush3.bf16.msra.mxu0 %v1315_v21 }
 0x4e4   :  { %3220 = vmatprep.subr.bf16.mxu0 %v1317_v22 }
 0x4e7   :  { %3191 = vmatpush3.bf16.xpose.msra.mxu1 %v1004_v53  ;;  %3221 = vmatpush3.bf16.msra.mxu0 %v1317_v22  ;;  %v1133_v22 = vld [vmem:[%s5437_s17 + $0x58] sm:$0xff] }
 0x4e8   :  { %3401 = vmatprep.subr.msk.bf16.mxu1 %vm960_vm2, %v959_v39  ;;  %3222 = vmatprep.subr.bf16.mxu0 %v1319_v29 }
 0x4eb   :  { %3223 = vmatpush3.bf16.msra.mxu0 %v1319_v29 }
 0x4ec   :  { %3224 = vmatprep.subr.bf16.mxu0 %v1321_v30 }
 0x4ef   :  { %3193 = vmatpush3.bf16.xpose.msra.mxu1 %v1007_v61  ;;  %3225 = vmatpush3.bf16.msra.mxu0 %v1321_v30 }
 0x4f0   :  { %3402 = vmatprep.subr.msk.bf16.mxu0 %vm960_vm2, %v4410_v11 }
 0x4f6   :  { %3195 = vmatmul.mubr.msk.bf16.vlgmr.msra.gmra.mrb[16].mxu1 %vm960_vm2, %v4351_v18 }
 0x4f7   :  { %3198 = vmatprep.mubr.msk.bf16.mxu1 %vm960_vm2, %v4363_v2 }
 0x4fe   :  { %3199 = vmatmul.mubr.msk.bf16.gmra.mrb[20].mxu1 %vm960_vm2, %v4361_v47 }
 0x4ff   :  { %3202 = vmatprep.mubr.msk.bf16.mxu1 %vm960_vm2, %v4371_v4 }
 0x506   :  { %3203 = vmatmul.mubr.msk.bf16.gmra.mrb[24].mxu1 %vm960_vm2, %v4369_v23 }
 0x507   :  { %3206 = vmatprep.mubr.msk.bf16.mxu1 %vm960_vm2, %v4379_v57 }
 0x50e   :  { %3207 = vmatmul.mubr.msk.bf16.gmra.mrb[28].mxu1 %vm960_vm2, %v4377_v58 }
 0x5c9   :  { %v3196_v16 = vpop.f32.mrb[16].mxu1 }
 0x5ca   :  { %v1108_v56 = vmul.f32 0.25, %v3196_v16  ;;  %v1043_v17 = vpop.f32.mrb[17].mxu1  ;;  %v1132_v16 = vld [vmem:[%s5437_s17 + $0x50] sm:$0xff] }
 0x5cb   :  { %v3197_v38 = vpop.f32.mrb[18].mxu1  ;;  %v1106_v44 = vmul.f32 0.25, %v1043_v17  ;;  %v1131_v17 = vld [vmem:[%s5437_s17 + $0x48] sm:$0xff] }
 0x5cc   :  { %v1046_v45 = vpop.f32.mrb[19].mxu1  ;;  %v4434_v48 = vadd.f32 %v1124_v36, %v1108_v56  ;;  %v1109_v42 = vmul.f32 0.25, %v3197_v38 }
 0x5cd   :  { %v1107_v27 = vmul.f32 0.25, %v1046_v45  ;;  %v4445_v32 = vadd.f32 %v1122_v43, %v1106_v44 }
 0x5ce   :  { %1158 = vmax.xlane.f32.xlu0 %v4434_v48  ;;  %v4455_v5 = vadd.f32 %v1125_v62, %v1109_v42 }
 0x5cf   :  { %v4443_v52 = vadd.f32 %v1123_v50, %v1107_v27  ;;  %v1130_v50 = vld [vmem:[%s5437_s17 + $0x40] sm:$0xff] }
 0x5d1   :  { %1156 = vmax.xlane.f32.xlu1 %v4443_v52  ;;  %v3200_v55 = vpop.f32.mrb[20].mxu1 }
 0x5d2   :  { %1154 = vmax.xlane.f32.xlu0 %v4445_v32  ;;  %v1059_v63 = vpop.f32.mrb[21].mxu1  ;;  %v1112_v37 = vmul.f32 0.25, %v3200_v55 }
 0x5d3   :  { %v3201_v28 = vpop.f32.mrb[22].mxu1  ;;  %v1110_v35 = vmul.f32 0.25, %v1059_v63 }
 0x5d4   :  { %v1113_v24 = vmul.f32 0.25, %v3201_v28  ;;  %v1062_v0 = vpop.f32.mrb[23].mxu1  ;;  %v4467_v14 = vadd.f32 %v1128_v8, %v1112_v37  ;;  %v1136_v28 = vld [vmem:[%s5437_s17 + $0x70] sm:$0xff] }
 0x5d5   :  { %v1111_v39 = vmul.f32 0.25, %v1062_v0  ;;  %v4479_v61 = vadd.f32 %v1126_v15, %v1110_v35 }
 0x5d6   :  { %1160 = vmax.xlane.f32.xlu0 %v4455_v5  ;;  %v4461_v10 = vadd.f32 %v1129_v31, %v1113_v24  ;;  %v1134_v24 = vld [vmem:[%s5437_s17 + $0x60] sm:$0xff] }
 0x5d7   :  { %v4473_v21 = vadd.f32 %v1127_v12, %v1111_v39  ;;  %v1137_v39 = vld [vmem:[%s5437_s17 + $0x78] sm:$0xff] }
 0x5d8   :  { %1168 = vmax.xlane.f32.xlu1 %v4461_v10 }
 0x5d9   :  { %v3204_v40 = vpop.f32.mrb[24].mxu1 }
 0x5da   :  { %1166 = vmax.xlane.f32.xlu0 %v4467_v14  ;;  %v1075_v7 = vpop.f32.mrb[25].mxu1  ;;  %v1116_v53 = vmul.f32 0.25, %v3204_v40  ;;  %v1135_v40 = vld [vmem:[%s5437_s17 + $0x68] sm:$0xff] }
 0x5db   :  { %v3205_v41 = vpop.f32.mrb[26].mxu1  ;;  %v1114_v38 = vmul.f32 0.25, %v1075_v7  ;;  %v4531_v7 = vpop.permute.xlu1 %1445 }
 0x5dc   :  { %v1117_v29 = vmul.f32 0.25, %v3205_v41  ;;  %1164 = vmax.xlane.f32.xlu1 %v4473_v21  ;;  %v1078_v30 = vpop.f32.mrb[27].mxu1  ;;  %v4491_v44 = vadd.f32 %v1132_v16, %v1116_v53 }
 0x5dd   :  { %v1115_v36 = vmul.f32 0.25, %v1078_v30  ;;  %v4500_v63 = vadd.f32 %v1130_v50, %v1114_v38 }
 0x5de   :  { %1162 = vmax.xlane.f32.xlu0 %v4479_v61  ;;  %v4485_v56 = vadd.f32 %v1133_v22, %v1117_v29 }
 0x5df   :  { %v4497_v43 = vadd.f32 %v1131_v17, %v1115_v36 }
 0x5e0   :  { %1176 = vmax.xlane.f32.xlu1 %v4485_v56 }
 0x5e1   :  { %v3208_v45 = vpop.f32.mrb[28].mxu1 }
 0x5e2   :  { %1174 = vmax.xlane.f32.xlu0 %v4491_v44  ;;  %v1091_v27 = vpop.f32.mrb[29].mxu1  ;;  %v1120_v55 = vmul.f32 0.25, %v3208_v45 }
 0x5e3   :  { %v3209_v42 = vpop.f32.mrb[30].mxu1  ;;  %v1118_v31 = vmul.f32 0.25, %v1091_v27 }
 0x5e4   :  { %1172 = vmax.xlane.f32.xlu1 %v4497_v43  ;;  %v1094_v62 = vpop.f32.mrb[31].mxu1  ;;  %v4506_v37 = vadd.f32 %v1136_v28, %v1120_v55  ;;  %v1121_v8 = vmul.f32 0.25, %v3209_v42 }
 0x5e5   :  { %v4512_v0 = vadd.f32 %v1134_v24, %v1118_v31  ;;  %v1119_v12 = vmul.f32 0.25, %v1094_v62 }
 0x5e6   :  { %1170 = vmax.xlane.f32.xlu0 %v4500_v63  ;;  %v4522_v35 = vadd.f32 %v1137_v39, %v1121_v8 }
 0x5e7   :  { %v4528_v15 = vadd.f32 %v1135_v40, %v1119_v12 }
 0x5ea   :  { %1182 = vmax.xlane.f32.xlu0 %v4506_v37 }
 0x5ee   :  { %1178 = vmax.xlane.f32.xlu0 %v4512_v0 }
 0x5f5   :  { %1449 = vrot.lane.b32.xlu1 %v4361_v47, %s3731_s2 }
 0x604   :  { %1447 = vrot.lane.b32.xlu0 %v4363_v2, %s3731_s2 }
 0x619   :  { %1184 = vmax.xlane.f32.xlu1 %v4522_v35 }
 0x61d   :  { %1180 = vmax.xlane.f32.xlu1 %v4528_v15 }
 0x65b   :  { %v1159_v41 = vpop.xlane.xlu0 %1158 }
 0x65c   :  { %v1188_v22 = vsub.f32 %v4434_v48, %v1159_v41 }
 0x65e   :  { %v1206_v53 = vmul.f32 1.442695, %v1188_v22  ;;  %v1157_v29 = vpop.xlane.xlu1 %1156 }
 0x65f   :  { %v1187_v30 = vsub.f32 %v4443_v52, %v1157_v29  ;;  %v1155_v16 = vpop.xlane.xlu0 %1154 }
 0x660   :  { %3537 = vpow2.f32 %v1206_v53  ;;  %v1186_v36 = vsub.f32 %v4445_v32, %v1155_v16 }
 0x661   :  { %v1204_v17 = vmul.f32 1.442695, %v1187_v30 }
 0x662   :  { %v1202_v38 = vmul.f32 1.442695, %v1186_v36 }
 0x663   :  { %3539 = vpow2.f32 %v1204_v17  ;;  %v1161_v45 = vpop.xlane.xlu0 %1160 }
 0x664   :  { %3541 = vpow2.f32 %v1202_v38  ;;  %v1189_v50 = vsub.f32 %v4455_v5, %v1161_v45 }
 0x665   :  { %v1169_v62 = vpop.xlane.xlu1 %1168 }
 0x666   :  { %v1208_v27 = vmul.f32 1.442695, %v1189_v50  ;;  %v1193_v53 = vsub.f32 %v4461_v10, %v1169_v62 }
 0x667   :  { %v1167_v55 = vpop.xlane.xlu0 %1166 }
 0x668   :  { %3543 = vpow2.f32 %v1208_v27  ;;  %v1192_v31 = vsub.f32 %v4467_v14, %v1167_v55  ;;  %v1216_v36 = vmul.f32 1.442695, %v1193_v53 }
 0x669   :  { %v1165_v24 = vpop.xlane.xlu1 %1164 }
 0x66a   :  { %v4537_v42 = vpop.eup %3537  ;;  %v1214_v39 = vmul.f32 1.442695, %v1192_v31  ;;  %v1191_v40 = vsub.f32 %v4473_v21, %v1165_v24 }
 0x66b   :  { %1238 = vadd.xlane.f32.xlu1 %v4537_v42  ;;  %v1163_v5 = vpop.xlane.xlu0 %1162 }
 0x66c   :  { %v1190_v12 = vsub.f32 %v4479_v61, %v1163_v5  ;;  %3545 = vpow2.f32 %v1214_v39  ;;  %v1212_v30 = vmul.f32 1.442695, %v1191_v40 }
 0x66d   :  { %v4540_v48 = vpop.eup %3539  ;;  %v1177_v41 = vpop.xlane.xlu1 %1176 }
 0x66e   :  { %v4542_v52 = vpop.eup %3541  ;;  %1236 = vadd.xlane.f32.xlu0 %v4540_v48  ;;  %v1210_v29 = vmul.f32 1.442695, %v1190_v12  ;;  %v1197_v10 = vsub.f32 %v4485_v56, %v1177_v41 }
 0x66f   :  { %1234 = vadd.xlane.f32.xlu1 %v4542_v52  ;;  %v1175_v28 = vpop.xlane.xlu0 %1174 }
 0x670   :  { %v1196_v16 = vsub.f32 %v4491_v44, %v1175_v28  ;;  %3547 = vpow2.f32 %v1210_v29  ;;  %v1224_v5 = vmul.f32 1.442695, %v1197_v10 }
 0x671   :  { %v1173_v17 = vpop.xlane.xlu1 %1172  ;;  %3549 = vpow2.f32 %v1212_v30 }
 0x672   :  { %v4546_v32 = vpop.eup %3543  ;;  %v1222_v38 = vmul.f32 1.442695, %v1196_v16  ;;  %3551 = vpow2.f32 %v1216_v36 }
 0x673   :  { %1240 = vadd.xlane.f32.xlu1 %v4546_v32  ;;  %v1171_v8 = vpop.xlane.xlu0 %1170 }
 0x674   :  { %v1194_v61 = vsub.f32 %v4500_v63, %v1171_v8  ;;  %3553 = vpow2.f32 %v1222_v38  ;;  %v1195_v63 = vsub.f32 %v4497_v43, %v1173_v17 }
 0x675   :  { %v4564_v44 = vpop.permute.xlu1 %1449 }
 0x676   :  { %v1218_v27 = vmul.f32 1.442695, %v1194_v61  ;;  %v4562_v55 = vpop.eup %3545  ;;  %v1220_v31 = vmul.f32 1.442695, %v1195_v63 }
 0x677   :  { %v1183_v22 = vpop.xlane.xlu0 %1182 }
 0x678   :  { %v1200_v14 = vsub.f32 %v4506_v37, %v1183_v22 }
 0x67a   :  { %v1230_v21 = vmul.f32 1.442695, %v1200_v14  ;;  %v4568_v62 = vpop.eup %3547 }
 0x67b   :  { %v1179_v45 = vpop.xlane.xlu0 %1178 }
 0x67c   :  { %v1198_v50 = vsub.f32 %v4512_v0, %v1179_v45  ;;  %3555 = vpow2.f32 %v1230_v21  ;;  %v4570_v0 = vpop.eup %3549 }
 0x67d   :  { %3557 = vpow2.f32 %v1218_v27  ;;  %v4575_v8 = vpop.eup %3551 }
 0x67e   :  { %v1226_v37 = vmul.f32 1.442695, %v1198_v50  ;;  %v4577_v43 = vpop.eup %3553 }
 0x67f   :  { %v1448_v16 = vpop.permute.xlu0 %1447 }
 0x680   :  { %3559 = vpow2.f32 %v1226_v37 }
 0x681   :  { %3561 = vpow2.f32 %v1224_v5  ;;  %v1484_v5 = vsel %vm960_vm2, %v4410_v11, 0 }
 0x684   :  { %1451 = vrot.lane.b32.xlu0 %v4371_v4, %s3731_s2  ;;  %1453 = vrot.lane.b32.xlu1 %v4369_v23, %s3731_s2 }
 0x686   :  { %v4582_v40 = vpop.eup %3555 }
 0x687   :  { %v4584_v41 = vpop.eup %3557 }
 0x68a   :  { %v4588_v22 = vpop.eup %3559 }
 0x68b   :  { %v4590_v53 = vpop.eup %3561 }
 0x6a3   :  { %1246 = vadd.xlane.f32.xlu0 %v4562_v55 }
 0x6a6   :  { %v1185_v28 = vpop.xlane.xlu1 %1184 }
 0x6a7   :  { %v1201_v56 = vsub.f32 %v4522_v35, %v1185_v28  ;;  %1242 = vadd.xlane.f32.xlu0 %v4568_v62 }
 0x6a8   :  { %1244 = vadd.xlane.f32.xlu1 %v4570_v0 }
 0x6a9   :  { %v1232_v24 = vmul.f32 1.442695, %v1201_v56 }
 0x6aa   :  { %v1181_v39 = vpop.xlane.xlu1 %1180 }
 0x6ab   :  { %3563 = vpow2.f32 %v1232_v24  ;;  %v1199_v12 = vsub.f32 %v4528_v15, %v1181_v39  ;;  %1248 = vadd.xlane.f32.xlu0 %v4575_v8 }
 0x6ac   :  { %1254 = vadd.xlane.f32.xlu1 %v4577_v43  ;;  %3565 = vpow2.f32 %v1220_v31 }
 0x6ad   :  { %v1228_v35 = vmul.f32 1.442695, %v1199_v12 }
 0x6af   :  { %1262 = vadd.xlane.f32.xlu0 %v4582_v40  ;;  %3567 = vpow2.f32 %v1228_v35 }
 0x6b0   :  { %1250 = vadd.xlane.f32.xlu1 %v4584_v41 }
 0x6b3   :  { %1258 = vadd.xlane.f32.xlu0 %v4588_v22 }
 0x6b4   :  { %1256 = vadd.xlane.f32.xlu1 %v4590_v53 }
 0x6b5   :  { %v4594_v15 = vpop.eup %3563 }
 0x6b6   :  { %v4596_v29 = vpop.eup %3565 }
 0x6b7   :  { %1264 = vadd.xlane.f32.xlu0 %v4594_v15 }
 0x6b8   :  { %1252 = vadd.xlane.f32.xlu1 %v4596_v29 }
 0x6b9   :  { %v4600_v30 = vpop.eup %3567 }
 0x6bc   :  { %1260 = vadd.xlane.f32.xlu1 %v4600_v30 }
 0x6cd   :  { %1457 = vrot.lane.b32.xlu1 %v4377_v58, %s3731_s2  ;;  %1455 = vrot.lane.b32.xlu0 %v4379_v57, %s3731_s2 }
 0x6d1   :  { %1429 = vrot.lane.b32.xlu1 %v4351_v18, %s3732_s7  ;;  %1427 = vrot.lane.b32.xlu0 %v4353_v49, %s3732_s7 }
 0x6d5   :  { %1433 = vrot.lane.b32.xlu1 %v4361_v47, %s3732_s7  ;;  %1431 = vrot.lane.b32.xlu0 %v4363_v2, %s3732_s7 }
 0x6d9   :  { %1437 = vrot.lane.b32.xlu1 %v4369_v23, %s3732_s7  ;;  %1435 = vrot.lane.b32.xlu0 %v4371_v4, %s3732_s7 }
 0x6dd   :  { %1441 = vrot.lane.b32.xlu1 %v4377_v58, %s3732_s7  ;;  %1439 = vrot.lane.b32.xlu0 %v4379_v57, %s3732_s7 }
 0x6e1   :  { %1807 = vrot.lane.b32.xlu1 %v4351_v18, %s3733_s29  ;;  %1805 = vrot.lane.b32.xlu0 %v4353_v49, %s3733_s29 }
 0x6e5   :  { %1809 = vrot.lane.b32.xlu0 %v4363_v2, %s3733_s29 }
 0x6f8   :  { %v1239_v36 = vpop.xlane.xlu1 %1238 }
 0x6fb   :  { %v1237_v17 = vpop.xlane.xlu0 %1236 }
 0x6fc   :  { %3569 = vrcp.f32 %v1237_v17  ;;  %v1235_v14 = vpop.xlane.xlu1 %1234 }
 0x6fd   :  { %3571 = vrcp.f32 %v1235_v14 }
 0x6fe   :  { %3573 = vrcp.f32 %v1239_v36 }
 0x6ff   :  { %v1452_v11 = vpop.permute.xlu0 %1451 }
 0x700   :  { %v1241_v38 = vpop.xlane.xlu1 %1240 }
 0x701   :  { %3575 = vrcp.f32 %v1241_v38 }
 0x706   :  { %v3570_v61 = vpop.eup %3569 }
 0x707   :  { %v3572_v45 = vpop.eup %3571  ;;  %v1283_v21 = vmul.f32 %v3570_v61, %v4540_v48  ;;  %v1487_v48 = vsel %vm960_vm2, %v4531_v7, 0 }
 0x708   :  { %v1282_v18 = vmul.f32 %v3572_v45, %v4542_v52  ;;  %v3574_v50 = vpop.eup %3573  ;;  %v1493_v52 = vsel %vm960_vm2, %v4564_v44, 0 }
 0x709   :  { %v1284_v2 = vmul.f32 %v3574_v50, %v4537_v42  ;;  %v1490_v42 = vsel %vm960_vm2, %v1448_v16, 0 }
 0x70a   :  { %v1298_v49 = vpack.c.bf16 %v1283_v21, %v1282_v18 }
 0x70b   :  { %v3576_v10 = vpop.eup %3575 }
 0x70c   :  { %v1285_v27 = vmul.f32 %v3576_v10, %v4546_v32  ;;  %3226 = vmatprep.mubr.bf16.mxu0 %v1298_v49  ;;  %v1496_v32 = vsel %vm960_vm2, %v1452_v11, 0 }
 0x70e   :  { %v1299_v37 = vpack.c.bf16 %v1285_v27, %v1284_v2 }
 0x710   :  { %3227 = vmatmul.mubr.bf16.vlgmr.msra.gmra.mrb[16].mxu0 %v1299_v37 }
 0x711   :  { %3243 = vmatpush3.bf16.xpose.msra.mxu0 %v1484_v5 }
 0x712   :  { %3403 = vmatprep.subr.msk.bf16.mxu0 %vm960_vm2, %v4531_v7  ;;  %v1454_v7 = vpop.permute.xlu1 %1453 }
 0x713   :  { %v1499_v31 = vsel %vm960_vm2, %v1454_v7, 0 }
 0x719   :  { %3245 = vmatpush3.bf16.xpose.msra.mxu0 %v1487_v48 }
 0x71a   :  { %3404 = vmatprep.subr.msk.bf16.mxu0 %vm960_vm2, %v1448_v16 }
 0x721   :  { %3247 = vmatpush3.bf16.xpose.msra.mxu0 %v1490_v42 }
 0x722   :  { %3405 = vmatprep.subr.msk.bf16.mxu0 %vm960_vm2, %v4564_v44 }
 0x729   :  { %3249 = vmatpush3.bf16.xpose.msra.mxu0 %v1493_v52 }
 0x72a   :  { %3406 = vmatprep.subr.msk.bf16.mxu0 %vm960_vm2, %v1452_v11 }
 0x730   :  { %v1247_v63 = vpop.xlane.xlu0 %1246 }
 0x731   :  { %3251 = vmatpush3.bf16.xpose.msra.mxu0 %v1496_v32 }
 0x732   :  { %3407 = vmatprep.subr.msk.bf16.mxu0 %vm960_vm2, %v1454_v7 }
 0x734   :  { %v1243_v28 = vpop.xlane.xlu0 %1242 }
 0x735   :  { %3577 = vrcp.f32 %v1243_v28  ;;  %v1245_v56 = vpop.xlane.xlu1 %1244 }
 0x736   :  { %3579 = vrcp.f32 %v1245_v56 }
 0x737   :  { %3581 = vrcp.f32 %v1247_v63 }
 0x738   :  { %v1249_v24 = vpop.xlane.xlu0 %1248 }
 0x739   :  { %3253 = vmatpush3.bf16.xpose.msra.mxu0 %v1499_v31  ;;  %3583 = vrcp.f32 %v1249_v24  ;;  %v1255_v44 = vpop.xlane.xlu1 %1254 }
 0x73c   :  { %v1263_v39 = vpop.xlane.xlu0 %1262 }
 0x73d   :  { %v1251_v12 = vpop.xlane.xlu1 %1250 }
 0x73f   :  { %v3578_v35 = vpop.eup %3577 }
 0x740   :  { %v3580_v16 = vpop.eup %3579  ;;  %v1259_v36 = vpop.xlane.xlu0 %1258  ;;  %v1286_v17 = vmul.f32 %v3578_v35, %v4568_v62 }
 0x741   :  { %v3582_v14 = vpop.eup %3581  ;;  %v1257_v38 = vpop.xlane.xlu1 %1256  ;;  %v1287_v61 = vmul.f32 %v3580_v16, %v4570_v0 }
 0x742   :  { %3585 = vrcp.f32 %v1257_v38  ;;  %v1288_v50 = vmul.f32 %v3582_v14, %v4562_v55 }
 0x743   :  { %v3584_v45 = vpop.eup %3583  ;;  %v1300_v21 = vpack.c.bf16 %v1287_v61, %v1286_v17  ;;  %3587 = vrcp.f32 %v1251_v12 }
 0x744   :  { %v1265_v18 = vpop.xlane.xlu0 %1264  ;;  %v1289_v49 = vmul.f32 %v3584_v45, %v4575_v8  ;;  %3589 = vrcp.f32 %v1255_v44 }
 0x745   :  { %v1253_v10 = vpop.xlane.xlu1 %1252  ;;  %3230 = vmatprep.mubr.bf16.mxu0 %v1300_v21 }
 0x746   :  { %3591 = vrcp.f32 %v1253_v10  ;;  %v1301_v2 = vpack.c.bf16 %v1289_v49, %v1288_v50 }
 0x747   :  { %3593 = vrcp.f32 %v1259_v36 }
 0x748   :  { %3231 = vmatmul.mubr.bf16.gmra.mrb[20].mxu0 %v1301_v2  ;;  %v1456_v62 = vpop.permute.xlu0 %1455 }
 0x749   :  { %v1502_v27 = vsel %vm960_vm2, %v1456_v62, 0  ;;  %v1261_v0 = vpop.xlane.xlu1 %1260  ;;  %3408 = vmatprep.subr.msk.bf16.mxu0 %vm960_vm2, %v1456_v62 }
 0x74a   :  { %3595 = vrcp.f32 %v1261_v0  ;;  %3255 = vmatpush3.bf16.xpose.msra.mxu0 %v1502_v27 }
 0x74b   :  { %3597 = vrcp.f32 %v1265_v18 }
 0x74c   :  { %v1428_v37 = vpop.permute.xlu0 %1427  ;;  %v3586_v55 = vpop.eup %3585  ;;  %3599 = vrcp.f32 %v1263_v39 }
 0x74d   :  { %v1458_v8 = vpop.permute.xlu1 %1457  ;;  %v3588_v5 = vpop.eup %3587  ;;  %v1293_v11 = vmul.f32 %v3586_v55, %v4590_v53 }
 0x74e   :  { %3409 = vmatprep.subr.msk.bf16.mxu0 %vm960_vm2, %v1458_v8  ;;  %v3590_v48 = vpop.eup %3589  ;;  %v1505_v32 = vsel %vm960_vm2, %v1458_v8, 0  ;;  %v1290_v7 = vmul.f32 %v3588_v5, %v4584_v41 }
 0x74f   :  { %v1292_v31 = vmul.f32 %v3590_v48, %v4577_v43 }
 0x750   :  { %v3592_v42 = vpop.eup %3591  ;;  %v1432_v52 = vpop.permute.xlu0 %1431 }
 0x751   :  { %v1430_v63 = vpop.permute.xlu1 %1429  ;;  %v1291_v28 = vmul.f32 %v3592_v42, %v4596_v29  ;;  %v3594_v56 = vpop.eup %3593  ;;  %v1303_v12 = vpack.c.bf16 %v1293_v11, %v1292_v31  ;;  %v2968_v11 = vld [vmem:[%s5437_s17 + $0x90] sm:$0xff] }
 0x752   :  { %3257 = vmatpush3.bf16.xpose.msra.mxu0 %v1505_v32  ;;  %v1294_v53 = vmul.f32 %v3594_v56, %v4588_v22 }
 0x753   :  { %v1302_v24 = vpack.c.bf16 %v1291_v28, %v1290_v7 }
 0x754   :  { %v3596_v44 = vpop.eup %3595  ;;  %v1436_v39 = vpop.permute.xlu0 %1435 }
 0x755   :  { %v3598_v35 = vpop.eup %3597  ;;  %v1434_v16 = vpop.permute.xlu1 %1433  ;;  %3234 = vmatprep.mubr.bf16.mxu0 %v1302_v24  ;;  %v1295_v36 = vmul.f32 %v3596_v44, %v4600_v30  ;;  %v2967_v24 = vld [vmem:[%s5437_s17 + $0x88] sm:$0xff]  ;;  %v2966_v44 = vld [vmem:[%s5437_s17 + $0x80] sm:$0xff] }
 0x756   :  { %3235 = vmatmul.mubr.bf16.gmra.mrb[24].mxu0 %v1303_v12  ;;  %v3600_v17 = vpop.eup %3599  ;;  %v1297_v29 = vmul.f32 %v3598_v35, %v4594_v15 }
 0x757   :  { %v1304_v41 = vpack.c.bf16 %v1295_v36, %v1294_v53  ;;  %v1296_v43 = vmul.f32 %v3600_v17, %v4582_v40  ;;  %v2969_v53 = vld [vmem:[%s5437_s17 + $0x98] sm:$0xff] }
 0x758   :  { %v1440_v14 = vpop.permute.xlu0 %1439 }
 0x759   :  { %v1438_v38 = vpop.permute.xlu1 %1437  ;;  %3238 = vmatprep.mubr.bf16.mxu0 %v1304_v41  ;;  %v1305_v45 = vpack.c.bf16 %v1297_v29, %v1296_v43 }
 0x75c   :  { %v1806_v61 = vpop.permute.xlu0 %1805 }
 0x75d   :  { %v1442_v21 = vpop.permute.xlu1 %1441  ;;  %3274 = vmatprep.subr.bf16.mxu0 %v1806_v61  ;;  %3378 = vmatprep.subr.bf16.mxu1 %v1806_v61 }
 0x75e   :  { %3239 = vmatmul.mubr.bf16.gmra.mrb[28].mxu0 %v1305_v45  ;;  %3386 = vmatpush3.bf16.msra.mxu1 %v1806_v61  ;;  %v2972_v45 = vld [vmem:[%s5437_s17 + $0xb0] sm:$0xff] }
 0x75f   :  { %3258 = vmatprep.mubr.msk.bf16.mxu0 %vm960_vm2, %v1428_v37 }
 0x760   :  { %v1810_v30 = vpop.permute.xlu0 %1809 }
 0x761   :  { %v1808_v22 = vpop.permute.xlu1 %1807 }
 0x762   :  { %3379 = vmatprep.subr.bf16.mxu1 %v1808_v22 }
 0x763   :  { %3387 = vmatpush3.bf16.msra.mxu1 %v1808_v22 }
 0x764   :  { %3380 = vmatprep.subr.bf16.mxu1 %v1810_v30 }
 0x766   :  { %3259 = vmatmul.mubr.msk.bf16.vlgmr.msra.gmra.mrb[32].mxu0 %vm960_vm2, %v1430_v63 }
 0x767   :  { %3275 = vmatpush3.bf16.msra.mxu0 %v1806_v61  ;;  %3262 = vmatprep.mubr.msk.bf16.mxu0 %vm960_vm2, %v1432_v52 }
 0x768   :  { %3276 = vmatprep.subr.bf16.mxu0 %v1808_v22  ;;  %3388 = vmatpush3.bf16.msra.mxu1 %v1810_v30 }
 0x76b   :  { %3277 = vmatpush3.bf16.msra.mxu0 %v1808_v22 }
 0x76c   :  { %3278 = vmatprep.subr.bf16.mxu0 %v1810_v30 }
 0x76e   :  { %3263 = vmatmul.mubr.msk.bf16.gmra.mrb[36].mxu0 %vm960_vm2, %v1434_v16 }
 0x76f   :  { %3279 = vmatpush3.bf16.msra.mxu0 %v1810_v30  ;;  %3266 = vmatprep.mubr.msk.bf16.mxu0 %vm960_vm2, %v1436_v39  ;;  %v2971_v30 = vld [vmem:[%s5437_s17 + $0xa8] sm:$0xff] }
 0x776   :  { %3267 = vmatmul.mubr.msk.bf16.gmra.mrb[40].mxu0 %vm960_vm2, %v1438_v38 }
 0x777   :  { %3270 = vmatprep.mubr.msk.bf16.mxu0 %vm960_vm2, %v1440_v14  ;;  %v2973_v14 = vld [vmem:[%s5437_s17 + $0xb8] sm:$0xff] }
 0x77e   :  { %3271 = vmatmul.mubr.msk.bf16.gmra.mrb[44].mxu0 %vm960_vm2, %v1442_v21 }
 0x7e3   :  { %v4665_v40 = vpop.f32.mrb[16].mxu0 }
 0x7e4   :  { %v4667_v15 = vpop.f32.mrb[17].mxu0 }
 0x7e5   :  { %v4669_v18 = vpop.f32.mrb[18].mxu0 }
 0x7e6   :  { %v4671_v50 = vpop.f32.mrb[19].mxu0 }
 0x81b   :  { %v4673_v49 = vpop.f32.mrb[20].mxu0 }
 0x81c   :  { %v4675_v10 = vpop.f32.mrb[21].mxu0 }
 0x81d   :  { %v4677_v2 = vpop.f32.mrb[22].mxu0 }
 0x81e   :  { %v4679_v62 = vpop.f32.mrb[23].mxu0 }
 0x829   :  { %v4681_v27 = vpop.f32.mrb[24].mxu0 }
 0x82a   :  { %v4683_v0 = vpop.f32.mrb[25].mxu0 }
 0x82b   :  { %v4685_v37 = vpop.f32.mrb[26].mxu0 }
 0x82c   :  { %v4687_v55 = vpop.f32.mrb[27].mxu0 }
 0x831   :  { %v4689_v8 = vpop.f32.mrb[28].mxu0 }
 0x832   :  { %v4691_v5 = vpop.f32.mrb[29].mxu0 }
 0x833   :  { %v4693_v48 = vpop.f32.mrb[30].mxu0 }
 0x834   :  { %v4695_v42 = vpop.f32.mrb[31].mxu0 }
 0x839   :  { %v3260_v52 = vpop.f32.mrb[32].mxu0 }
 0x83a   :  { %v1606_v32 = vmul.f32 0.25, %v3260_v52  ;;  %v1541_v63 = vpop.f32.mrb[33].mxu0 }
 0x83b   :  { %v3261_v7 = vpop.f32.mrb[34].mxu0  ;;  %v1604_v56 = vmul.f32 0.25, %v1541_v63 }
 0x83c   :  { %v4700_v28 = vadd.f32 %v2968_v11, %v1606_v32  ;;  %v1544_v31 = vpop.f32.mrb[35].mxu0  ;;  %v1607_v16 = vmul.f32 0.25, %v3261_v7  ;;  %v2970_v32 = vld [vmem:[%s5437_s17 + $0xa0] sm:$0xff] }
 0x83d   :  { %v1605_v39 = vmul.f32 0.25, %v1544_v31  ;;  %v4711_v35 = vadd.f32 %v2966_v44, %v1604_v56 }
 0x83e   :  { %1657 = vmax.xlane.f32.xlu0 %v4700_v28  ;;  %v4721_v29 = vadd.f32 %v2969_v53, %v1607_v16 }
 0x83f   :  { %v4709_v12 = vadd.f32 %v2967_v24, %v1605_v39  ;;  %v2977_v24 = vld [vmem:[%s5437_s17 + $0xd8] sm:$0xff] }
 0x841   :  { %1655 = vmax.xlane.f32.xlu1 %v4709_v12  ;;  %v3264_v36 = vpop.f32.mrb[36].mxu0 }
 0x842   :  { %1653 = vmax.xlane.f32.xlu0 %v4711_v35  ;;  %v1557_v17 = vpop.f32.mrb[37].mxu0  ;;  %v1610_v38 = vmul.f32 0.25, %v3264_v36  ;;  %v2976_v36 = vld [vmem:[%s5437_s17 + $0xd0] sm:$0xff] }
 0x843   :  { %v3265_v41 = vpop.f32.mrb[38].mxu0  ;;  %v1608_v11 = vmul.f32 0.25, %v1557_v17 }
 0x844   :  { %v1611_v43 = vmul.f32 0.25, %v3265_v41  ;;  %v1560_v61 = vpop.f32.mrb[39].mxu0  ;;  %v4732_v52 = vadd.f32 %v2972_v45, %v1610_v38 }
 0x845   :  { %v1609_v22 = vmul.f32 0.25, %v1560_v61  ;;  %v4744_v44 = vadd.f32 %v2970_v32, %v1608_v11  ;;  %v2974_v61 = vld [vmem:[%s5437_s17 + $0xc0] sm:$0xff] }
 0x846   :  { %v4726_v21 = vadd.f32 %v2973_v14, %v1611_v43  ;;  %1659 = vmax.xlane.f32.xlu0 %v4721_v29  ;;  %v2975_v14 = vld [vmem:[%s5437_s17 + $0xc8] sm:$0xff] }
 0x847   :  { %v4738_v7 = vadd.f32 %v2971_v30, %v1609_v22 }
 0x848   :  { %1667 = vmax.xlane.f32.xlu1 %v4726_v21 }
 0x849   :  { %v3268_v63 = vpop.f32.mrb[40].mxu0 }
 0x84a   :  { %1665 = vmax.xlane.f32.xlu0 %v4732_v52  ;;  %v1573_v56 = vpop.f32.mrb[41].mxu0  ;;  %v1614_v39 = vmul.f32 0.25, %v3268_v63 }
 0x84b   :  { %v3269_v31 = vpop.f32.mrb[42].mxu0  ;;  %v1612_v43 = vmul.f32 0.25, %v1573_v56  ;;  %v2980_v56 = vld [vmem:[%s5437_s17 + $0xf0] sm:$0xff] }
 0x84c   :  { %v1615_v16 = vmul.f32 0.25, %v3269_v31  ;;  %1663 = vmax.xlane.f32.xlu1 %v4738_v7  ;;  %v1576_v53 = vpop.f32.mrb[43].mxu0  ;;  %v4756_v38 = vadd.f32 %v2976_v36, %v1614_v39 }
 0x84d   :  { %v1613_v41 = vmul.f32 0.25, %v1576_v53  ;;  %v4765_v32 = vadd.f32 %v2974_v61, %v1612_v43  ;;  %v2979_v61 = vld [vmem:[%s5437_s17 + $0xe8] sm:$0xff] }
 0x84e   :  { %v4750_v17 = vadd.f32 %v2977_v24, %v1615_v16  ;;  %1661 = vmax.xlane.f32.xlu0 %v4744_v44  ;;  %v2978_v16 = vld [vmem:[%s5437_s17 + $0xe0] sm:$0xff] }
 0x84f   :  { %v4762_v22 = vadd.f32 %v2975_v14, %v1613_v41  ;;  %v2981_v41 = vld [vmem:[%s5437_s17 + $0xf8] sm:$0xff] }
 0x850   :  { %1675 = vmax.xlane.f32.xlu1 %v4750_v17 }
 0x851   :  { %v3272_v45 = vpop.f32.mrb[44].mxu0 }
 0x852   :  { %1673 = vmax.xlane.f32.xlu0 %v4756_v38  ;;  %v1589_v30 = vpop.f32.mrb[45].mxu0  ;;  %v1618_v63 = vmul.f32 0.25, %v3272_v45 }
 0x853   :  { %v3273_v11 = vpop.f32.mrb[46].mxu0  ;;  %v1616_v39 = vmul.f32 0.25, %v1589_v30 }
 0x854   :  { %1671 = vmax.xlane.f32.xlu1 %v4762_v22  ;;  %v1592_v31 = vpop.f32.mrb[47].mxu0  ;;  %v4772_v24 = vadd.f32 %v2980_v56, %v1618_v63  ;;  %v1619_v36 = vmul.f32 0.25, %v3273_v11 }
 0x855   :  { %v4778_v53 = vadd.f32 %v2978_v16, %v1616_v39  ;;  %v1617_v43 = vmul.f32 0.25, %v1592_v31 }
 0x856   :  { %1669 = vmax.xlane.f32.xlu0 %v4765_v32  ;;  %v4788_v14 = vadd.f32 %v2981_v41, %v1619_v36 }
 0x857   :  { %v4794_v45 = vadd.f32 %v2979_v61, %v1617_v43 }
 0x85a   :  { %1681 = vmax.xlane.f32.xlu0 %v4772_v24 }
 0x85e   :  { %1677 = vmax.xlane.f32.xlu0 %v4778_v53 }
 0x865   :  { %1813 = vrot.lane.b32.xlu1 %v4371_v4, %s3733_s29 }
 0x874   :  { %1811 = vrot.lane.b32.xlu0 %v4361_v47, %s3733_s29 }
 0x889   :  { %1683 = vmax.xlane.f32.xlu1 %v4788_v14 }
 0x88d   :  { %1679 = vmax.xlane.f32.xlu1 %v4794_v45 }
 0x89e   :  { %1815 = vrot.lane.b32.xlu1 %v4369_v23, %s3733_s29 }
 0x8cb   :  { %v1658_v47 = vpop.xlane.xlu0 %1657 }
 0x8cc   :  { %v1687_v4 = vsub.f32 %v4700_v28, %v1658_v47 }
 0x8ce   :  { %v1705_v30 = vmul.f32 1.442695, %v1687_v4  ;;  %v1656_v63 = vpop.xlane.xlu1 %1655 }
 0x8cf   :  { %v1654_v11 = vpop.xlane.xlu0 %1653  ;;  %v1686_v39 = vsub.f32 %v4709_v12, %v1656_v63 }
 0x8d0   :  { %3601 = vpow2.f32 %v1705_v30  ;;  %v1685_v31 = vsub.f32 %v4711_v35, %v1654_v11 }
 0x8d1   :  { %v1703_v61 = vmul.f32 1.442695, %v1686_v39 }
 0x8d2   :  { %v1701_v56 = vmul.f32 1.442695, %v1685_v31 }
 0x8d3   :  { %v1660_v16 = vpop.xlane.xlu0 %1659 }
 0x8d4   :  { %3603 = vpow2.f32 %v1701_v56  ;;  %v1688_v36 = vsub.f32 %v4721_v29, %v1660_v16 }
 0x8d5   :  { %v1668_v41 = vpop.xlane.xlu1 %1667 }
 0x8d6   :  { %v1707_v43 = vmul.f32 1.442695, %v1688_v36  ;;  %v1692_v11 = vsub.f32 %v4726_v21, %v1668_v41 }
 0x8d7   :  { %v1666_v23 = vpop.xlane.xlu0 %1665 }
 0x8d8   :  { %3605 = vpow2.f32 %v1707_v43  ;;  %v1691_v28 = vsub.f32 %v4732_v52, %v1666_v23  ;;  %v1715_v16 = vmul.f32 1.442695, %v1692_v11 }
 0x8d9   :  { %v1664_v47 = vpop.xlane.xlu1 %1663  ;;  %3607 = vpow2.f32 %v1703_v61 }
 0x8da   :  { %v4804_v4 = vpop.eup %3601  ;;  %v1713_v30 = vmul.f32 1.442695, %v1691_v28  ;;  %v1690_v35 = vsub.f32 %v4738_v7, %v1664_v47 }
 0x8db   :  { %1737 = vadd.xlane.f32.xlu1 %v4804_v4  ;;  %v1662_v12 = vpop.xlane.xlu0 %1661 }
 0x8dc   :  { %3609 = vpow2.f32 %v1713_v30  ;;  %v1711_v29 = vmul.f32 1.442695, %v1690_v35  ;;  %v1689_v63 = vsub.f32 %v4744_v44, %v1662_v12 }
 0x8dd   :  { %v1676_v52 = vpop.xlane.xlu1 %1675 }
 0x8de   :  { %v4810_v31 = vpop.eup %3603  ;;  %v1709_v56 = vmul.f32 1.442695, %v1689_v63  ;;  %3611 = vpow2.f32 %v1711_v29  ;;  %v1696_v21 = vsub.f32 %v4750_v17, %v1676_v52 }
 0x8df   :  { %1733 = vadd.xlane.f32.xlu1 %v4810_v31  ;;  %v1674_v39 = vpop.xlane.xlu0 %1673 }
 0x8e0   :  { %3613 = vpow2.f32 %v1709_v56  ;;  %v1695_v7 = vsub.f32 %v4756_v38, %v1674_v39  ;;  %v1723_v30 = vmul.f32 1.442695, %v1696_v21 }
 0x8e1   :  { %3615 = vpow2.f32 %v1715_v16  ;;  %v1672_v43 = vpop.xlane.xlu1 %1671 }
 0x8e2   :  { %v4814_v36 = vpop.eup %3605  ;;  %v1721_v41 = vmul.f32 1.442695, %v1695_v7  ;;  %v1694_v38 = vsub.f32 %v4762_v22, %v1672_v43 }
 0x8e3   :  { %1739 = vadd.xlane.f32.xlu1 %v4814_v36  ;;  %v1670_v44 = vpop.xlane.xlu0 %1669  ;;  %v4819_v23 = vpop.eup %3607 }
 0x8e4   :  { %v1693_v61 = vsub.f32 %v4765_v32, %v1670_v44  ;;  %3617 = vpow2.f32 %v1721_v41  ;;  %v1719_v29 = vmul.f32 1.442695, %v1694_v38 }
 0x8e5   :  { %v1814_v16 = vpop.permute.xlu1 %1813 }
 0x8e6   :  { %v4821_v28 = vpop.eup %3609  ;;  %v1717_v47 = vmul.f32 1.442695, %v1693_v61 }
 0x8e7   :  { %1735 = vadd.xlane.f32.xlu1 %v4819_v23  ;;  %1745 = vadd.xlane.f32.xlu0 %v4821_v28  ;;  %v1682_v17 = vpop.xlane.xlu0 %1681 }
 0x8e8   :  { %3619 = vpow2.f32 %v1717_v47  ;;  %v1699_v35 = vsub.f32 %v4772_v24, %v1682_v17  ;;  %v4827_v12 = vpop.eup %3611 }
 0x8e9   :  { %3621 = vpow2.f32 %v1723_v30 }
 0x8ea   :  { %v4829_v32 = vpop.eup %3613  ;;  %v1729_v11 = vmul.f32 1.442695, %v1699_v35 }
 0x8eb   :  { %1743 = vadd.xlane.f32.xlu1 %v4827_v12  ;;  %1741 = vadd.xlane.f32.xlu0 %v4829_v32  ;;  %v1678_v22 = vpop.xlane.xlu0 %1677  ;;  %v4834_v56 = vpop.eup %3615 }
 0x8ec   :  { %3623 = vpow2.f32 %v1729_v11  ;;  %v1697_v63 = vsub.f32 %v4778_v53, %v1678_v22 }
 0x8ed   :  { %3625 = vpow2.f32 %v1719_v29 }
 0x8ee   :  { %v1725_v52 = vmul.f32 1.442695, %v1697_v63  ;;  %v4837_v39 = vpop.eup %3617 }
 0x8ef   :  { %1747 = vadd.xlane.f32.xlu0 %v4834_v56  ;;  %v1812_v24 = vpop.permute.xlu0 %1811 }
 0x8f0   :  { %3627 = vpow2.f32 %v1725_v52  ;;  %3280 = vmatprep.subr.bf16.mxu0 %v1812_v24  ;;  %3381 = vmatprep.subr.bf16.mxu1 %v1812_v24 }
 0x8f1   :  { %3281 = vmatpush3.bf16.msra.mxu0 %v1812_v24  ;;  %3389 = vmatpush3.bf16.msra.mxu1 %v1812_v24 }
 0x8f2   :  { %v4839_v7 = vpop.eup %3619  ;;  %3282 = vmatprep.subr.bf16.mxu0 %v1814_v16  ;;  %3382 = vmatprep.subr.bf16.mxu1 %v1814_v16 }
 0x8f3   :  { %1753 = vadd.xlane.f32.xlu0 %v4837_v39  ;;  %1749 = vadd.xlane.f32.xlu1 %v4839_v7  ;;  %v4843_v53 = vpop.eup %3621 }
 0x8f5   :  { %3283 = vmatpush3.bf16.msra.mxu0 %v1814_v16  ;;  %3390 = vmatpush3.bf16.msra.mxu1 %v1814_v16 }
 0x8f6   :  { %v4845_v21 = vpop.eup %3623 }
 0x8f7   :  { %1755 = vadd.xlane.f32.xlu0 %v4843_v53  ;;  %1761 = vadd.xlane.f32.xlu1 %v4845_v21  ;;  %v4849_v41 = vpop.eup %3625 }
 0x8fa   :  { %v4851_v44 = vpop.eup %3627 }
 0x8fb   :  { %1751 = vadd.xlane.f32.xlu0 %v4849_v41  ;;  %1757 = vadd.xlane.f32.xlu1 %v4851_v44 }
 0x90c   :  { %1819 = vrot.lane.b32.xlu1 %v4377_v58, %s3733_s29 }
 0x911   :  { %1817 = vrot.lane.b32.xlu0 %v4379_v57, %s3733_s29 }
 0x916   :  { %v1684_v43 = vpop.xlane.xlu1 %1683 }
 0x917   :  { %v1700_v38 = vsub.f32 %v4788_v14, %v1684_v43 }
 0x919   :  { %v1731_v35 = vmul.f32 1.442695, %v1700_v38 }
 0x91a   :  { %v1680_v61 = vpop.xlane.xlu1 %1679 }
 0x91b   :  { %v1698_v47 = vsub.f32 %v4794_v45, %v1680_v61 }
 0x91d   :  { %v1727_v17 = vmul.f32 1.442695, %v1698_v47 }
 0x91e   :  { %v1816_v30 = vpop.permute.xlu1 %1815 }
 0x91f   :  { %3284 = vmatprep.subr.bf16.mxu0 %v1816_v30  ;;  %3383 = vmatprep.subr.bf16.mxu1 %v1816_v30  ;;  %3629 = vpow2.f32 %v1727_v17 }
 0x920   :  { %3285 = vmatpush3.bf16.msra.mxu0 %v1816_v30  ;;  %3391 = vmatpush3.bf16.msra.mxu1 %v1816_v30  ;;  %3631 = vpow2.f32 %v1731_v35 }
 0x929   :  { %v4861_v11 = vpop.eup %3629 }
 0x92a   :  { %v4864_v58 = vpop.eup %3631 }
 0x930   :  { %1759 = vadd.xlane.f32.xlu0 %v4861_v11 }
 0x934   :  { %1763 = vadd.xlane.f32.xlu0 %v4864_v58 }
 0x968   :  { %v1738_v57 = vpop.xlane.xlu1 %1737 }
 0x96c   :  { %v1734_v45 = vpop.xlane.xlu1 %1733 }
 0x96d   :  { %3633 = vrcp.f32 %v1734_v45 }
 0x970   :  { %v1740_v29 = vpop.xlane.xlu1 %1739 }
 0x974   :  { %v1736_v22 = vpop.xlane.xlu1 %1735  ;;  %v1746_v63 = vpop.xlane.xlu0 %1745 }
 0x975   :  { %3635 = vrcp.f32 %v1736_v22 }
 0x977   :  { %v3634_v16 = vpop.eup %3633 }
 0x978   :  { %v1744_v14 = vpop.xlane.xlu1 %1743  ;;  %v1742_v52 = vpop.xlane.xlu0 %1741  ;;  %v1781_v30 = vmul.f32 %v3634_v16, %v4810_v31 }
 0x979   :  { %3637 = vrcp.f32 %v1744_v14 }
 0x97a   :  { %3639 = vrcp.f32 %v1742_v52 }
 0x97b   :  { %3641 = vrcp.f32 %v1740_v29 }
 0x97c   :  { %v1748_v24 = vpop.xlane.xlu0 %1747 }
 0x97d   :  { %3643 = vrcp.f32 %v1748_v24 }
 0x97e   :  { %3645 = vrcp.f32 %v1738_v57 }
 0x97f   :  { %v3636_v43 = vpop.eup %3635  ;;  %3647 = vrcp.f32 %v1746_v63 }
 0x980   :  { %v1750_v61 = vpop.xlane.xlu1 %1749  ;;  %v1754_v47 = vpop.xlane.xlu0 %1753  ;;  %v1782_v38 = vmul.f32 %v3636_v43, %v4819_v23 }
 0x981   :  { %3649 = vrcp.f32 %v1750_v61 }
 0x982   :  { %v1797_v17 = vpack.c.bf16 %v1782_v38, %v1781_v30 }
 0x983   :  { %v3638_v35 = vpop.eup %3637 }
 0x984   :  { %v3640_v45 = vpop.eup %3639  ;;  %3290 = vmatprep.mubr.bf16.mxu0 %v1797_v17  ;;  %v1762_v22 = vpop.xlane.xlu1 %1761  ;;  %v1786_v52 = vmul.f32 %v3638_v35, %v4827_v12 }
 0x985   :  { %v1756_v14 = vpop.xlane.xlu0 %1755  ;;  %v1785_v60 = vmul.f32 %v3640_v45, %v4829_v32  ;;  %v3642_v23 = vpop.eup %3641 }
 0x986   :  { %3651 = vrcp.f32 %v1756_v14  ;;  %v1784_v12 = vmul.f32 %v3642_v23, %v4814_v36 }
 0x987   :  { %v1799_v19 = vpack.c.bf16 %v1786_v52, %v1785_v60  ;;  %v3644_v29 = vpop.eup %3643 }
 0x988   :  { %v1758_v25 = vpop.xlane.xlu1 %1757  ;;  %v3646_v24 = vpop.eup %3645  ;;  %v1788_v60 = vmul.f32 %v3644_v29, %v4834_v56 }
 0x989   :  { %v1752_v31 = vpop.xlane.xlu0 %1751  ;;  %3294 = vmatprep.mubr.bf16.mxu1 %v1799_v19  ;;  %v3648_v63 = vpop.eup %3647  ;;  %v1783_v19 = vmul.f32 %v3646_v24, %v4804_v4 }
 0x98a   :  { %3653 = vrcp.f32 %v1752_v31  ;;  %v1787_v32 = vmul.f32 %v3648_v63, %v4821_v28 }
 0x98b   :  { %3655 = vrcp.f32 %v1754_v47  ;;  %v3650_v43 = vpop.eup %3649  ;;  %v1798_v47 = vpack.c.bf16 %v1784_v12, %v1783_v19 }
 0x98c   :  { %v1820_v16 = vpop.permute.xlu1 %1819  ;;  %v1800_v30 = vpack.c.bf16 %v1788_v60, %v1787_v32  ;;  %v1789_v17 = vmul.f32 %v3650_v43, %v4839_v7  ;;  %3657 = vrcp.f32 %v1758_v25 }
 0x98d   :  { %v1818_v57 = vpop.permute.xlu0 %1817 }
 0x98e   :  { %3286 = vmatprep.subr.bf16.mxu0 %v1818_v57  ;;  %3384 = vmatprep.subr.bf16.mxu1 %v1818_v57 }
 0x98f   :  { %3287 = vmatpush3.bf16.msra.mxu0 %v1818_v57  ;;  %3392 = vmatpush3.bf16.msra.mxu1 %v1818_v57 }
 0x990   :  { %3288 = vmatprep.subr.bf16.mxu0 %v1820_v16  ;;  %3385 = vmatprep.subr.bf16.mxu1 %v1820_v16  ;;  %v3652_v61 = vpop.eup %3651 }
 0x991   :  { %v1792_v45 = vmul.f32 %v3652_v61, %v4843_v53 }
 0x993   :  { %3289 = vmatpush3.bf16.msra.mxu0 %v1820_v16  ;;  %3393 = vmatpush3.bf16.msra.mxu1 %v1820_v16 }
 0x994   :  { %v3654_v38 = vpop.eup %3653 }
 0x995   :  { %v1790_v36 = vmul.f32 %v3654_v38, %v4849_v41  ;;  %v3656_v56 = vpop.eup %3655 }
 0x996   :  { %3291 = vmatmul.mubr.bf16.vlgmr.msra.gmra.mrb[48].mxu0 %v1798_v47  ;;  %3295 = vmatmul.mubr.bf16.vlgmr.msra.gmra.mrb[32].mxu1 %v1800_v30  ;;  %v1791_v4 = vmul.f32 %v3656_v56, %v4837_v39  ;;  %v3658_v31 = vpop.eup %3657 }
 0x997   :  { %v1801_v35 = vpack.c.bf16 %v1790_v36, %v1789_v17  ;;  %v1793_v7 = vmul.f32 %v3658_v31, %v4851_v44  ;;  %v3462_v44 = vld [vmem:[%s5438_s9 + $0x8] sm:$0xff]  }
 0x998   :  { %v1802_v28 = vpack.c.bf16 %v1792_v45, %v1791_v4 }
 0x999   :  { %3298 = vmatprep.mubr.bf16.mxu1 %v1801_v35 }
 0x99e   :  { %3299 = vmatmul.mubr.bf16.gmra.mrb[36].mxu1 %v1802_v28 }
 0x9bd   :  { %v1760_v14 = vpop.xlane.xlu0 %1759 }
 0x9be   :  { %3659 = vrcp.f32 %v1760_v14 }
 0x9bf   :  { %3661 = vrcp.f32 %v1762_v22  ;;  %v3461_v22 = vld [vmem:[%s5438_s9] sm:$0xff]  }
 0x9c0   :  { %3306 = vmatprep.subr.bf16.mxu1 %v3461_v22 }
 0x9c1   :  { %v1764_v52 = vpop.xlane.xlu0 %1763  ;;  %3307 = vmatpush3.bf16.msra.mxu1 %v3461_v22 }
 0x9c2   :  { %3663 = vrcp.f32 %v1764_v52  ;;  %3308 = vmatprep.subr.bf16.mxu1 %v3462_v44 }
 0x9c5   :  { %3309 = vmatpush3.bf16.msra.mxu1 %v3462_v44 }
 0x9c8   :  { %v3660_v23 = vpop.eup %3659 }
 0x9c9   :  { %v1794_v41 = vmul.f32 %v3660_v23, %v4861_v11  ;;  %v3662_v29 = vpop.eup %3661 }
 0x9ca   :  { %v1795_v39 = vmul.f32 %v3662_v29, %v4845_v21 }
 0x9cb   :  { %v1803_v57 = vpack.c.bf16 %v1794_v41, %v1793_v7 }
 0x9cc   :  { %v3664_v53 = vpop.eup %3663 }
 0x9cd   :  { %3302 = vmatprep.mubr.bf16.mxu1 %v1803_v57  ;;  %v1796_v24 = vmul.f32 %v3664_v53, %v4864_v58 }
 0x9cf   :  { %v1804_v25 = vpack.c.bf16 %v1796_v24, %v1795_v39 }
 0x9d1   :  { %3303 = vmatmul.mubr.bf16.gmra.mrb[40].mxu1 %v1804_v25 }
 0xa69   :  { %v3292_v11 = vpop.f32.mrb[48].mxu0  ;;  %v3296_v63 = vpop.f32.mrb[32].mxu1 }
 0xa6a   :  { %v1863_v16 = vpop.f32.mrb[49].mxu0  ;;  %v1879_v21 = vpop.f32.mrb[33].mxu1 }
 0xa6b   :  { %v3293_v12 = vpop.f32.mrb[50].mxu0  ;;  %v3297_v58 = vpop.f32.mrb[34].mxu1 }
 0xa6c   :  { %v3421_v60 = vpack.i.bf16 %v3293_v12, %v3292_v11  ;;  %v3431_v19 = vpack.i.bf16 %v3297_v58, %v3296_v63  ;;  %v1866_v32 = vpop.f32.mrb[51].mxu0  ;;  %v1882_v43 = vpop.f32.mrb[35].mxu1 }
 0xa6d   :  { %v3416_v61 = vpack.i.bf16 %v1866_v32, %v1863_v16  ;;  %v3426_v47 = vpack.i.bf16 %v1882_v43, %v1879_v21 }
 0xa6e   :  { %3422 = vrot.lane.b32.xlu1 %v3421_v60, %s3734_s30 }
 0xa6f   :  { %3417 = vrot.lane.b32.xlu0 %v3416_v61, %s3734_s30 }
 0xa71   :  { %v3300_v30 = vpop.f32.mrb[36].mxu1 }
 0xa72   :  { %v1895_v38 = vpop.f32.mrb[37].mxu1  ;;  %3427 = vrot.lane.b32.xlu1 %v3426_v47, %s3734_s30 }
 0xa73   :  { %v3301_v17 = vpop.f32.mrb[38].mxu1 }
 0xa74   :  { %v3441_v36 = vpack.i.bf16 %v3301_v17, %v3300_v30  ;;  %v1898_v56 = vpop.f32.mrb[39].mxu1 }
 0xa75   :  { %v3436_v35 = vpack.i.bf16 %v1898_v56, %v1895_v38 }
 0xa76   :  { %3432 = vrot.lane.b32.xlu1 %v3431_v19, %s3734_s30 }
 0xa77   :  { %3437 = vrot.lane.b32.xlu0 %v3436_v35, %s3734_s30 }
 0xa7a   :  { %3442 = vrot.lane.b32.xlu1 %v3441_v36, %s3734_s30 }
 0xaa4   :  { %v3304_v45 = vpop.f32.mrb[40].mxu1 }
 0xaa5   :  { %v1911_v4 = vpop.f32.mrb[41].mxu1 }
 0xaa6   :  { %v3305_v28 = vpop.f32.mrb[42].mxu1 }
 0xaa7   :  { %v3451_v14 = vpack.i.bf16 %v3305_v28, %v3304_v45  ;;  %v1914_v52 = vpop.f32.mrb[43].mxu1 }
 0xaa8   :  { %v3446_v31 = vpack.i.bf16 %v1914_v52, %v1911_v4 }
 0xaa9   :  { %3452 = vrot.lane.b32.xlu1 %v3451_v14, %s3734_s30 }
 0xaaa   :  { %3447 = vrot.lane.b32.xlu0 %v3446_v31, %s3734_s30 }
 0xae0   :  { %v3423_v23 = vpop.permute.xlu1 %3422 }
 0xae1   :  { %v3425_v7 = vunpack.i.h.bf16 %v3423_v23  ;;  %v3424_v41 = vunpack.i.l.bf16 %v3423_v23  ;;  %v3418_v29 = vpop.permute.xlu0 %3417 }
 0xae2   :  { %v3420_v57 = vunpack.i.h.bf16 %v3418_v29  ;;  %v3419_v53 = vunpack.i.l.bf16 %v3418_v29 }
 0xae3   :  { %v1993_v39 = vsel %vm960_vm2, %v4669_v18, %v3425_v7  ;;  %v1992_v24 = vsel %vm960_vm2, %v4665_v40, %v3424_v41  ;;  %v4932_v7 = vld [vmem:[%s5439_s10] ss:$0 sm:$0xff] }
 0xae4   :  { %v2007_v25 = vpack.c.bf16 %v1993_v39, %v1992_v24  ;;  %v1991_v22 = vsel %vm960_vm2, %v4671_v50, %v3420_v57  ;;  %v1990_v44 = vsel %vm960_vm2, %v4667_v15, %v3419_v53  ;;  %v3428_v11 = vpop.permute.xlu1 %3427 }
 0xae5   :  { %v2006_v63 = vpack.c.bf16 %v1991_v22, %v1990_v44  ;;  %v3430_v16 = vunpack.i.h.bf16 %v3428_v11  ;;  %v3429_v21 = vunpack.i.l.bf16 %v3428_v11 }
 0xae7   :  { %v1995_v12 = vsel %vm960_vm2, %v4679_v62, %v3430_v16  ;;  %v1994_v18 = vsel %vm960_vm2, %v4675_v10, %v3429_v21  ;;  %3310 = vmatprep.mubr.msk.bf16.mxu1 %vm239_vm1, %v2006_v63 }
 0xae8   :  { %v2008_v40 = vpack.c.bf16 %v1995_v12, %v1994_v18  ;;  %v3433_v58 = vpop.permute.xlu1 %3432  ;;  %3311 = vmatmul.mubr.msk.bf16.vlgmr.msra.gmra.mrb[44].mxu1 %vm239_vm1, %v2007_v25 }
 0xae9   :  { %v3435_v50 = vunpack.i.h.bf16 %v3433_v58  ;;  %v3434_v60 = vunpack.i.l.bf16 %v3433_v58  ;;  %v3438_v19 = vpop.permute.xlu0 %3437 }
 0xaea   :  { %v3440_v15 = vunpack.i.h.bf16 %v3438_v19  ;;  %v3439_v32 = vunpack.i.l.bf16 %v3438_v19  ;;  %3314 = vmatprep.mubr.msk.bf16.mxu1 %vm239_vm1, %v2008_v40 }
 0xaeb   :  { %v1997_v43 = vsel %vm960_vm2, %v4677_v2, %v3435_v50  ;;  %v1996_v62 = vsel %vm960_vm2, %v4673_v49, %v3434_v60 }
 0xaec   :  { %v2009_v10 = vpack.c.bf16 %v1997_v43, %v1996_v62  ;;  %v1999_v61 = vsel %vm960_vm2, %v4687_v55, %v3440_v15  ;;  %v1998_v47 = vsel %vm960_vm2, %v4683_v0, %v3439_v32  ;;  %v3443_v30 = vpop.permute.xlu1 %3442 }
 0xaed   :  { %v2010_v38 = vpack.c.bf16 %v1999_v61, %v1998_v47  ;;  %v3445_v17 = vunpack.i.h.bf16 %v3443_v30  ;;  %v3444_v36 = vunpack.i.l.bf16 %v3443_v30 }
 0xaef   :  { %v2001_v56 = vsel %vm960_vm2, %v4685_v37, %v3445_v17  ;;  %v2000_v2 = vsel %vm960_vm2, %v4681_v27, %v3444_v36 }
 0xaf0   :  { %v2011_v35 = vpack.c.bf16 %v2001_v56, %v2000_v2  ;;  %3315 = vmatmul.mubr.msk.bf16.gmra.mrb[48].mxu1 %vm239_vm1, %v2009_v10 }
 0xaf1   :  { %3318 = vmatprep.mubr.msk.bf16.mxu1 %vm239_vm1, %v2010_v38 }
 0xaf8   :  { %3319 = vmatmul.mubr.msk.bf16.gmra.mrb[52].mxu1 %vm239_vm1, %v2011_v35 }
 0xb1b   :  { %v3453_v49 = vpop.permute.xlu1 %3452 }
 0xb1c   :  { %v3455_v55 = vunpack.i.h.bf16 %v3453_v49  ;;  %v3454_v0 = vunpack.i.l.bf16 %v3453_v49  ;;  %v3448_v45 = vpop.permute.xlu0 %3447 }
 0xb1d   :  { %v3450_v4 = vunpack.i.h.bf16 %v3448_v45  ;;  %v3449_v28 = vunpack.i.l.bf16 %v3448_v45 }
 0xb1e   :  { %v2005_v14 = vsel %vm960_vm2, %v4693_v48, %v3455_v55  ;;  %v2004_v37 = vsel %vm960_vm2, %v4689_v8, %v3454_v0 }
 0xb1f   :  { %v2013_v27 = vpack.c.bf16 %v2005_v14, %v2004_v37  ;;  %v2003_v52 = vsel %vm960_vm2, %v4695_v42, %v3450_v4  ;;  %v2002_v31 = vsel %vm960_vm2, %v4691_v5, %v3449_v28  ;;  %v5461_v37 = vld [vmem:[#allocation3_spill] sm:$0xff] }
 0xb20   :  { %v2012_v23 = vpack.c.bf16 %v2003_v52, %v2002_v31  ;;  %v5462_v52 = vld [vmem:[#allocation2_spill] sm:$0xff] }
 0xb22   :  { %3322 = vmatprep.mubr.msk.bf16.mxu1 %vm239_vm1, %v2012_v23 }
 0xb23   :  { %3323 = vmatmul.mubr.msk.bf16.gmra.mrb[56].mxu1 %vm239_vm1, %v2013_v27 }
 0xbbb   :  { %v3312_v48 = vpop.f32.mrb[44].mxu1 }
 0xbbc   :  { %v2090_v41 = vpop.f32.mrb[45].mxu1  ;;  %v2099_v8 = vadd.f32 %v3312_v48, %v4932_v7  ;;  %v5463_v48 = vld [vmem:[#allocation4_spill] sm:$0xff] }
 0xbbd   :  { %v2091_v29 = vadd.f32 %v4932_v7, %v2090_v41  ;;  %v3313_v42 = vpop.f32.mrb[46].mxu1 }
 0xbbe   :  { %v2093_v57 = vpop.f32.mrb[47].mxu1  ;;  %v4941_v39 = vadd.f32 %v2099_v8, %v4084_v6  ;;  %v2102_v24 = vadd.f32 %v3313_v42, %v4932_v7 }
 0xbbf   :  { %v4937_v5 = vadd.f32 %v2091_v29, %v4071_v20  ;;  %v2094_v53 = vadd.f32 %v4932_v7, %v2093_v57 }
 0xbc0   :  { %v4952_v63 = vadd.f32 %v2102_v24, %v4093_v51 }
 0xbc1   :  { %v4945_v25 = vadd.f32 %v2094_v53, %v4080_v34  ;;  %v2169_v22 = vsel %vm239_vm1, %v4937_v5, 0.0  ;;  %v2175_v34 = vsel %vm239_vm1, %v4941_v39, 0.0 }
 0xbc2   :  { %2170 = vadd.xlane.f32.xlu0 %v2169_v22  ;;  %v2178_v50 = vsel %vm239_vm1, %v4952_v63, 0.0 }
 0xbc3   :  { %v3316_v44 = vpop.f32.mrb[48].mxu1  ;;  %v2172_v11 = vsel %vm239_vm1, %v4945_v25, 0.0 }
 0xbc4   :  { %v2106_v20 = vpop.f32.mrb[49].mxu1  ;;  %2173 = vadd.xlane.f32.xlu1 %v2172_v11  ;;  %v2115_v40 = vadd.f32 %v3316_v44, %v4932_v7 }
 0xbc5   :  { %v2107_v6 = vadd.f32 %v4932_v7, %v2106_v20  ;;  %v3317_v16 = vpop.f32.mrb[50].mxu1 }
 0xbc6   :  { %v2109_v21 = vpop.f32.mrb[51].mxu1  ;;  %2176 = vadd.xlane.f32.xlu0 %v2175_v34  ;;  %v2118_v12 = vadd.f32 %v3317_v16, %v4932_v7  ;;  %v4974_v43 = vadd.f32 %v2115_v40, %v4112_v54 }
 0xbc7   :  { %v2110_v18 = vadd.f32 %v4932_v7, %v2109_v21  ;;  %v4961_v58 = vadd.f32 %v2107_v6, %v4101_v46 }
 0xbc8   :  { %v4969_v60 = vadd.f32 %v2118_v12, %v4122_v3  ;;  %v2187_v17 = vsel %vm239_vm1, %v4974_v43, 0.0 }
 0xbc9   :  { %v4964_v51 = vadd.f32 %v2110_v18, %v4108_v59  ;;  %v2181_v62 = vsel %vm239_vm1, %v4961_v58, 0.0 }
 0xbca   :  { %2179 = vadd.xlane.f32.xlu0 %v2178_v50  ;;  %v2190_v47 = vsel %vm239_vm1, %v4969_v60, 0.0 }
 0xbcb   :  { %v3320_v19 = vpop.f32.mrb[52].mxu1  ;;  %v2184_v15 = vsel %vm239_vm1, %v4964_v51, 0.0 }
 0xbcc   :  { %v2122_v32 = vpop.f32.mrb[53].mxu1  ;;  %2185 = vadd.xlane.f32.xlu1 %v2184_v15  ;;  %v2131_v30 = vadd.f32 %v3320_v19, %v4932_v7 }
 0xbcd   :  { %v2123_v46 = vadd.f32 %v4932_v7, %v2122_v32  ;;  %v3321_v59 = vpop.f32.mrb[54].mxu1 }
 0xbce   :  { %v2125_v10 = vpop.f32.mrb[55].mxu1  ;;  %2182 = vadd.xlane.f32.xlu0 %v2181_v62  ;;  %v2134_v3 = vadd.f32 %v3321_v59, %v4932_v7  ;;  %v4998_v2 = vadd.f32 %v2131_v30, %v4140_v1 }
 0xbcf   :  { %v2126_v61 = vadd.f32 %v4932_v7, %v2125_v10  ;;  %v4985_v54 = vadd.f32 %v2123_v46, %v4126_v26 }
 0xbd0   :  { %2191 = vadd.xlane.f32.xlu1 %v2190_v47  ;;  %v4993_v36 = vadd.f32 %v2134_v3, %v4150_v9  ;;  %v2199_v35 = vsel %vm239_vm1, %v4998_v2, 0.0 }
 0xbd1   :  { %v4988_v38 = vadd.f32 %v2126_v61, %v4136_v33  ;;  %v2193_v26 = vsel %vm239_vm1, %v4985_v54, 0.0 }
 0xbd2   :  { %2188 = vadd.xlane.f32.xlu0 %v2187_v17  ;;  %v2202_v33 = vsel %vm239_vm1, %v4993_v36, 0.0 }
 0xbd3   :  { %v2196_v56 = vsel %vm239_vm1, %v4988_v38, 0.0 }
 0xbd4   :  { %2197 = vadd.xlane.f32.xlu1 %v2196_v56 }
 0xbd6   :  { %2194 = vadd.xlane.f32.xlu0 %v2193_v26 }
 0xbd8   :  { %2203 = vadd.xlane.f32.xlu1 %v2202_v33 }
 0xbda   :  { %2200 = vadd.xlane.f32.xlu0 %v2199_v35 }
 0xbf6   :  { %v3324_v9 = vpop.f32.mrb[56].mxu1 }
 0xbf7   :  { %v2147_v49 = vadd.f32 %v3324_v9, %v4932_v7  ;;  %v2138_v55 = vpop.f32.mrb[57].mxu1 }
 0xbf8   :  { %v2139_v0 = vadd.f32 %v4932_v7, %v2138_v55  ;;  %v3325_v1 = vpop.f32.mrb[58].mxu1 }
 0xbf9   :  { %v2150_v45 = vadd.f32 %v3325_v1, %v4932_v7  ;;  %v2141_v4 = vpop.f32.mrb[59].mxu1  ;;  %v5014_v27 = vadd.f32 %v2147_v49, %v5461_v37 }
 0xbfa   :  { %v5010_v28 = vadd.f32 %v2139_v0, %v4154_v13  ;;  %v2142_v14 = vadd.f32 %v4932_v7, %v2141_v4 }
 0xbfb   :  { %v5022_v41 = vadd.f32 %v2150_v45, %v5463_v48  ;;  %v2211_v13 = vsel %vm239_vm1, %v5014_v27, 0.0 }
 0xbfc   :  { %v5017_v31 = vadd.f32 %v2142_v14, %v5462_v52  ;;  %v2205_v23 = vsel %vm239_vm1, %v5010_v28, 0.0 }
 0xbfd   :  { %2206 = vadd.xlane.f32.xlu0 %v2205_v23  ;;  %v2214_v7 = vsel %vm239_vm1, %v5022_v41, 0.0 }
 0xbfe   :  { %v2208_v8 = vsel %vm239_vm1, %v5017_v31, 0.0 }
 0xbff   :  { %2209 = vadd.xlane.f32.xlu1 %v2208_v8 }
 0xc01   :  { %2212 = vadd.xlane.f32.xlu0 %v2211_v13 }
 0xc03   :  { %2215 = vadd.xlane.f32.xlu1 %v2214_v7 }
 0xc4f   :  { %v2171_v29 = vpop.xlane.xlu0 %2170 }
 0xc50   :  { %v2217_v42 = vmul.f32 0.03125, %v2171_v29 }
 0xc51   :  { %v2174_v57 = vpop.xlane.xlu1 %2173 }
 0xc52   :  { %v5031_v53 = vsub.f32 %v4937_v5, %v2217_v42  ;;  %v2218_v24 = vmul.f32 0.03125, %v2174_v57 }
 0xc53   :  { %v2177_v22 = vpop.xlane.xlu0 %2176 }
 0xc54   :  { %v5034_v44 = vsub.f32 %v4945_v25, %v2218_v24  ;;  %v2219_v11 = vmul.f32 0.03125, %v2177_v22  ;;  %v2249_v20 = vmul.f32 %v5031_v53, %v5031_v53 }
 0xc56   :  { %v5039_v6 = vsub.f32 %v4941_v39, %v2219_v11  ;;  %v2265_v16 = vsel %vm239_vm1, %v2249_v20, 0.0  ;;  %v2250_v34 = vmul.f32 %v5034_v44, %v5034_v44 }
 0xc57   :  { %2266 = vadd.xlane.f32.xlu0 %v2265_v16  ;;  %v2180_v21 = vpop.xlane.xlu0 %2179 }
 0xc58   :  { %v2220_v12 = vmul.f32 0.03125, %v2180_v21  ;;  %v2268_v18 = vsel %vm239_vm1, %v2250_v34, 0.0  ;;  %v2251_v40 = vmul.f32 %v5039_v6, %v5039_v6 }
 0xc59   :  { %2269 = vadd.xlane.f32.xlu1 %v2268_v18  ;;  %v2186_v50 = vpop.xlane.xlu1 %2185 }
 0xc5a   :  { %v5048_v19 = vsub.f32 %v4952_v63, %v2220_v12  ;;  %v2222_v15 = vmul.f32 0.03125, %v2186_v50  ;;  %v2271_v32 = vsel %vm239_vm1, %v2251_v40, 0.0  ;;  %v3463_v40 = vld [vmem:[%s5440_s13] sm:$0xff]   ;;  %v3464_v50 = vld [vmem:[%s5440_s13 + $0x8] sm:$0xff]  }
 0xc5b   :  { %2272 = vadd.xlane.f32.xlu0 %v2271_v32  ;;  %v2183_v46 = vpop.xlane.xlu0 %2182  ;;  %3326 = vmatprep.subr.bf16.mxu0 %v3463_v40 }
 0xc5c   :  { %v5052_v59 = vsub.f32 %v4964_v51, %v2222_v15  ;;  %v2221_v62 = vmul.f32 0.03125, %v2183_v46  ;;  %v2252_v10 = vmul.f32 %v5048_v19, %v5048_v19  ;;  %3327 = vmatpush3.bf16.msra.mxu0 %v3463_v40 }
 0xc5d   :  { %v2192_v3 = vpop.xlane.xlu1 %2191  ;;  %3328 = vmatprep.subr.bf16.mxu0 %v3464_v50 }
 0xc5e   :  { %v5057_v61 = vsub.f32 %v4961_v58, %v2221_v62  ;;  %v2224_v47 = vmul.f32 0.03125, %v2192_v3  ;;  %v2274_v30 = vsel %vm239_vm1, %v2252_v10, 0.0  ;;  %v2254_v17 = vmul.f32 %v5052_v59, %v5052_v59 }
 0xc5f   :  { %2275 = vadd.xlane.f32.xlu1 %v2274_v30  ;;  %v2189_v56 = vpop.xlane.xlu0 %2188 }
 0xc60   :  { %v5063_v26 = vsub.f32 %v4969_v60, %v2224_v47  ;;  %v2223_v33 = vmul.f32 0.03125, %v2189_v56  ;;  %v2253_v35 = vmul.f32 %v5057_v61, %v5057_v61  ;;  %v2280_v49 = vsel %vm239_vm1, %v2254_v17, 0.0  ;;  %3329 = vmatpush3.bf16.msra.mxu0 %v3464_v50 }
 0xc61   :  { %v2198_v9 = vpop.xlane.xlu1 %2197 }
 0xc62   :  { %v5069_v55 = vsub.f32 %v4974_v43, %v2223_v33  ;;  %v2226_v0 = vmul.f32 0.03125, %v2198_v9  ;;  %v2277_v1 = vsel %vm239_vm1, %v2253_v35, 0.0  ;;  %v2256_v45 = vmul.f32 %v5063_v26, %v5063_v26 }
 0xc63   :  { %2281 = vadd.xlane.f32.xlu1 %v2280_v49  ;;  %2278 = vadd.xlane.f32.xlu0 %v2277_v1  ;;  %v2195_v4 = vpop.xlane.xlu0 %2194 }
 0xc64   :  { %v5075_v14 = vsub.f32 %v4988_v38, %v2226_v0  ;;  %v2225_v37 = vmul.f32 0.03125, %v2195_v4  ;;  %v2255_v52 = vmul.f32 %v5069_v55, %v5069_v55  ;;  %v2286_v48 = vsel %vm239_vm1, %v2256_v45, 0.0 }
 0xc65   :  { %v2204_v23 = vpop.xlane.xlu1 %2203 }
 0xc66   :  { %v5081_v8 = vsub.f32 %v4985_v54, %v2225_v37  ;;  %v2228_v13 = vmul.f32 0.03125, %v2204_v23  ;;  %v2283_v7 = vsel %vm239_vm1, %v2255_v52, 0.0  ;;  %v2258_v29 = vmul.f32 %v5075_v14, %v5075_v14 }
 0xc67   :  { %2287 = vadd.xlane.f32.xlu1 %v2286_v48  ;;  %2284 = vadd.xlane.f32.xlu0 %v2283_v7  ;;  %v2201_v42 = vpop.xlane.xlu0 %2200 }
 0xc68   :  { %v5087_v57 = vsub.f32 %v4993_v36, %v2228_v13  ;;  %v2227_v24 = vmul.f32 0.03125, %v2201_v42  ;;  %v2257_v22 = vmul.f32 %v5081_v8, %v5081_v8  ;;  %v2292_v20 = vsel %vm239_vm1, %v2258_v29, 0.0 }
 0xc6a   :  { %v5092_v11 = vsub.f32 %v4998_v2, %v2227_v24  ;;  %v2289_v16 = vsel %vm239_vm1, %v2257_v22, 0.0  ;;  %v2260_v34 = vmul.f32 %v5087_v57, %v5087_v57 }
 0xc6b   :  { %2293 = vadd.xlane.f32.xlu1 %v2292_v20  ;;  %2290 = vadd.xlane.f32.xlu0 %v2289_v16 }
 0xc6c   :  { %v2259_v21 = vmul.f32 %v5092_v11, %v5092_v11  ;;  %v2298_v12 = vsel %vm239_vm1, %v2260_v34, 0.0 }
 0xc6e   :  { %v2295_v18 = vsel %vm239_vm1, %v2259_v21, 0.0 }
 0xc6f   :  { %2299 = vadd.xlane.f32.xlu1 %v2298_v12  ;;  %2296 = vadd.xlane.f32.xlu0 %v2295_v18 }
 0xc8a   :  { %v2207_v15 = vpop.xlane.xlu0 %2206 }
 0xc8b   :  { %v2229_v32 = vmul.f32 0.03125, %v2207_v15 }
 0xc8c   :  { %v2210_v46 = vpop.xlane.xlu1 %2209 }
 0xc8d   :  { %v5109_v62 = vsub.f32 %v5010_v28, %v2229_v32  ;;  %v2230_v10 = vmul.f32 0.03125, %v2210_v46  ;;  %v5135_v32 = vld [vmem:[%s5441_s11] ss:$0 sm:$0xff] }
 0xc8e   :  { %v2213_v3 = vpop.xlane.xlu0 %2212 }
 0xc8f   :  { %v5112_v47 = vsub.f32 %v5017_v31, %v2230_v10  ;;  %v2231_v30 = vmul.f32 0.03125, %v2213_v3  ;;  %v2261_v17 = vmul.f32 %v5109_v62, %v5109_v62 }
 0xc90   :  { %v2216_v56 = vpop.xlane.xlu1 %2215 }
 0xc91   :  { %v5117_v33 = vsub.f32 %v5014_v27, %v2231_v30  ;;  %v2232_v35 = vmul.f32 0.03125, %v2216_v56  ;;  %v2301_v9 = vsel %vm239_vm1, %v2261_v17, 0.0  ;;  %v2262_v49 = vmul.f32 %v5112_v47, %v5112_v47 }
 0xc92   :  { %2302 = vadd.xlane.f32.xlu0 %v2301_v9 }
 0xc93   :  { %v5123_v0 = vsub.f32 %v5022_v41, %v2232_v35  ;;  %v2304_v1 = vsel %vm239_vm1, %v2262_v49, 0.0  ;;  %v2263_v45 = vmul.f32 %v5117_v33, %v5117_v33 }
 0xc94   :  { %2305 = vadd.xlane.f32.xlu1 %v2304_v1 }
 0xc95   :  { %v2307_v4 = vsel %vm239_vm1, %v2263_v45, 0.0  ;;  %v2264_v37 = vmul.f32 %v5123_v0, %v5123_v0 }
 0xc96   :  { %2308 = vadd.xlane.f32.xlu0 %v2307_v4 }
 0xc97   :  { %v2310_v52 = vsel %vm239_vm1, %v2264_v37, 0.0 }
 0xc98   :  { %2311 = vadd.xlane.f32.xlu1 %v2310_v52  ;;  %v5143_v52 = vld [vmem:[%s5442_s12] ss:$0 sm:$0xff] }
 0xce4   :  { %v2267_v23 = vpop.xlane.xlu0 %2266 }
 0xce5   :  { %v2313_v48 = vmul.f32 0.03125, %v2267_v23 }
 0xce6   :  { %v2270_v13 = vpop.xlane.xlu1 %2269 }
 0xce7   :  { %v2329_v7 = vadd.f32 1e-05, %v2313_v48  ;;  %v2314_v29 = vmul.f32 0.03125, %v2270_v13 }
 0xce8   :  { %v2273_v42 = vpop.xlane.xlu0 %2272 }
 0xce9   :  { %3665 = vrsqrt.f32 %v2329_v7  ;;  %v2330_v24 = vadd.f32 1e-05, %v2314_v29  ;;  %v2315_v22 = vmul.f32 0.03125, %v2273_v42 }
 0xceb   :  { %3667 = vrsqrt.f32 %v2330_v24  ;;  %v2331_v20 = vadd.f32 1e-05, %v2315_v22 }
 0xcec   :  { %v2276_v16 = vpop.xlane.xlu1 %2275 }
 0xced   :  { %3669 = vrsqrt.f32 %v2331_v20  ;;  %v2316_v34 = vmul.f32 0.03125, %v2276_v16 }
 0xcef   :  { %v2332_v21 = vadd.f32 1e-05, %v2316_v34 }
 0xcf0   :  { %v2282_v12 = vpop.xlane.xlu1 %2281  ;;  %v2279_v18 = vpop.xlane.xlu0 %2278 }
 0xcf1   :  { %3671 = vrsqrt.f32 %v2332_v21  ;;  %v2318_v40 = vmul.f32 0.03125, %v2282_v12  ;;  %v2317_v50 = vmul.f32 0.03125, %v2279_v18 }
 0xcf3   :  { %v3666_v15 = vpop.eup %3665  ;;  %v2334_v46 = vadd.f32 1e-05, %v2318_v40  ;;  %v2333_v10 = vadd.f32 1e-05, %v2317_v50 }
 0xcf4   :  { %v2361_v3 = vmul.f32 %v3666_v15, %v5031_v53  ;;  %v2288_v30 = vpop.xlane.xlu1 %2287  ;;  %v2285_v17 = vpop.xlane.xlu0 %2284 }
 0xcf5   :  { %v3668_v56 = vpop.eup %3667  ;;  %3673 = vrsqrt.f32 %v2334_v46  ;;  %v2320_v35 = vmul.f32 0.03125, %v2288_v30  ;;  %v2319_v9 = vmul.f32 0.03125, %v2285_v17 }
 0xcf6   :  { %v2362_v49 = vmul.f32 %v3668_v56, %v5034_v44  ;;  %3675 = vrsqrt.f32 %v2333_v10  ;;  %v2383_v1 = vmul.f32 %v5135_v32, %v2361_v3 }
 0xcf7   :  { %v3670_v45 = vpop.eup %3669  ;;  %v2336_v4 = vadd.f32 1e-05, %v2320_v35  ;;  %v2335_v37 = vadd.f32 1e-05, %v2319_v9 }
 0xcf8   :  { %v2363_v53 = vmul.f32 %v3670_v45, %v5039_v6  ;;  %v2294_v23 = vpop.xlane.xlu1 %2293  ;;  %v2291_v48 = vpop.xlane.xlu0 %2290  ;;  %v2384_v13 = vmul.f32 %v5135_v32, %v2362_v49  ;;  %v2405_v29 = vadd.f32 %v5143_v52, %v2383_v1 }
 0xcf9   :  { %3677 = vrsqrt.f32 %v2336_v4  ;;  %v2322_v7 = vmul.f32 0.03125, %v2294_v23  ;;  %v2321_v44 = vmul.f32 0.03125, %v2291_v48 }
 0xcfa   :  { %3679 = vrsqrt.f32 %v2335_v37  ;;  %v2406_v42 = vadd.f32 %v5143_v52, %v2384_v13  ;;  %v2385_v16 = vmul.f32 %v5135_v32, %v2363_v53 }
 0xcfb   :  { %v3672_v24 = vpop.eup %3671  ;;  %v2338_v22 = vadd.f32 1e-05, %v2322_v7  ;;  %v2337_v20 = vadd.f32 1e-05, %v2321_v44 }
 0xcfc   :  { %v2364_v34 = vmul.f32 %v3672_v24, %v5048_v19  ;;  %v2300_v6 = vpop.xlane.xlu1 %2299  ;;  %v2297_v21 = vpop.xlane.xlu0 %2296  ;;  %v2421_v12 = vpack.c.bf16 %v2406_v42, %v2405_v29  ;;  %v2407_v17 = vadd.f32 %v5143_v52, %v2385_v16 }
 0xcfd   :  { %3681 = vrsqrt.f32 %v2338_v22  ;;  %v2324_v18 = vmul.f32 0.03125, %v2300_v6  ;;  %v2323_v40 = vmul.f32 0.03125, %v2297_v21 }
 0xcfe   :  { %v2386_v50 = vmul.f32 %v5135_v32, %v2364_v34  ;;  %3683 = vrsqrt.f32 %v2337_v20  ;;  %3330 = vmatprep.mubr.msk.bf16.mxu0 %vm239_vm1, %v2421_v12 }
 0xcff   :  { %v3674_v15 = vpop.eup %3673  ;;  %v2340_v46 = vadd.f32 1e-05, %v2324_v18  ;;  %v2339_v10 = vadd.f32 1e-05, %v2323_v40 }
 0xd00   :  { %v3676_v3 = vpop.eup %3675  ;;  %v2366_v30 = vmul.f32 %v3674_v15, %v5052_v59  ;;  %v2408_v19 = vadd.f32 %v5143_v52, %v2386_v50 }
 0xd01   :  { %v2365_v56 = vmul.f32 %v3676_v3, %v5057_v61  ;;  %3685 = vrsqrt.f32 %v2340_v46 }
 0xd02   :  { %3687 = vrsqrt.f32 %v2339_v10  ;;  %v2422_v35 = vpack.c.bf16 %v2408_v19, %v2407_v17  ;;  %v2388_v9 = vmul.f32 %v5135_v32, %v2366_v30 }
 0xd03   :  { %v3678_v49 = vpop.eup %3677  ;;  %v2387_v1 = vmul.f32 %v5135_v32, %v2365_v56 }
 0xd04   :  { %v3680_v45 = vpop.eup %3679  ;;  %v2368_v4 = vmul.f32 %v3678_v49, %v5063_v26  ;;  %3331 = vmatmul.mubr.msk.bf16.vlgmr.msra.gmra.mrb[52].mxu0 %vm239_vm1, %v2422_v35  ;;  %v2410_v59 = vadd.f32 %v5143_v52, %v2388_v9 }
 0xd05   :  { %v2367_v37 = vmul.f32 %v3680_v45, %v5069_v55  ;;  %v2409_v53 = vadd.f32 %v5143_v52, %v2387_v1 }
 0xd06   :  { %v2390_v61 = vmul.f32 %v5135_v32, %v2368_v4 }
 0xd07   :  { %v3682_v23 = vpop.eup %3681  ;;  %v2423_v48 = vpack.c.bf16 %v2410_v59, %v2409_v53  ;;  %v2389_v13 = vmul.f32 %v5135_v32, %v2367_v37 }
 0xd08   :  { %v3684_v7 = vpop.eup %3683  ;;  %v2370_v44 = vmul.f32 %v3682_v23, %v5075_v14  ;;  %v2412_v29 = vadd.f32 %v5143_v52, %v2390_v61 }
 0xd09   :  { %v2369_v26 = vmul.f32 %v3684_v7, %v5081_v8  ;;  %3334 = vmatprep.mubr.msk.bf16.mxu0 %vm239_vm1, %v2423_v48  ;;  %v2411_v42 = vadd.f32 %v5143_v52, %v2389_v13 }
 0xd0a   :  { %v2392_v55 = vmul.f32 %v5135_v32, %v2370_v44 }
 0xd0b   :  { %v3686_v24 = vpop.eup %3685  ;;  %v2424_v22 = vpack.c.bf16 %v2412_v29, %v2411_v42  ;;  %v2391_v20 = vmul.f32 %v5135_v32, %v2369_v26 }
 0xd0c   :  { %v3688_v16 = vpop.eup %3687  ;;  %v2372_v34 = vmul.f32 %v3686_v24, %v5087_v57  ;;  %v2414_v6 = vadd.f32 %v5143_v52, %v2392_v55  ;;  %v3466_v55 = vld [vmem:[%s5443_s15 + $0x8] sm:$0xff]   ;;  %v3469_v24 = vld [vmem:[%s5443_s15 + $0x20] sm:$0xff]  }
 0xd0d   :  { %v2371_v14 = vmul.f32 %v3688_v16, %v5092_v11  ;;  %3335 = vmatmul.mubr.msk.bf16.gmra.mrb[56].mxu0 %vm239_vm1, %v2424_v22  ;;  %v2413_v8 = vadd.f32 %v5143_v52, %v2391_v20  ;;  %v3470_v22 = vld [vmem:[%s5443_s15 + $0x28] sm:$0xff]   ;;  %v3471_v20 = vld [vmem:[%s5443_s15 + $0x30] sm:$0xff]   ;;  %v3472_v16 = vld [vmem:[%s5443_s15 + $0x38] sm:$0xff]  }
 0xd0e   :  { %v2394_v21 = vmul.f32 %v5135_v32, %v2372_v34  ;;  %v5225_v34 = vld [vmem:[%s5444_s14] ss:$0 sm:$0xff] }
 0xd0f   :  { %v2425_v12 = vpack.c.bf16 %v2414_v6, %v2413_v8  ;;  %v2393_v18 = vmul.f32 %v5135_v32, %v2371_v14 }
 0xd10   :  { %v2416_v40 = vadd.f32 %v5143_v52, %v2394_v21 }
 0xd11   :  { %3338 = vmatprep.mubr.msk.bf16.mxu0 %vm239_vm1, %v2425_v12  ;;  %v2415_v50 = vadd.f32 %v5143_v52, %v2393_v18 }
 0xd13   :  { %v2426_v57 = vpack.c.bf16 %v2416_v40, %v2415_v50 }
 0xd15   :  { %3339 = vmatmul.mubr.msk.bf16.gmra.mrb[60].mxu0 %vm239_vm1, %v2426_v57 }
 0xd1f   :  { %v2303_v15 = vpop.xlane.xlu0 %2302 }
 0xd20   :  { %v2325_v11 = vmul.f32 0.03125, %v2303_v15 }
 0xd21   :  { %v2306_v46 = vpop.xlane.xlu1 %2305 }
 0xd22   :  { %v2341_v10 = vadd.f32 1e-05, %v2325_v11  ;;  %v2326_v3 = vmul.f32 0.03125, %v2306_v46 }
 0xd23   :  { %v2309_v30 = vpop.xlane.xlu0 %2308 }
 0xd24   :  { %3689 = vrsqrt.f32 %v2341_v10  ;;  %v2342_v17 = vadd.f32 1e-05, %v2326_v3  ;;  %v2327_v19 = vmul.f32 0.03125, %v2309_v30 }
 0xd25   :  { %v2312_v56 = vpop.xlane.xlu1 %2311 }
 0xd26   :  { %3691 = vrsqrt.f32 %v2342_v17  ;;  %v2343_v35 = vadd.f32 1e-05, %v2327_v19  ;;  %v2328_v9 = vmul.f32 0.03125, %v2312_v56 }
 0xd28   :  { %3693 = vrsqrt.f32 %v2343_v35  ;;  %v2344_v49 = vadd.f32 1e-05, %v2328_v9 }
 0xd2a   :  { %3695 = vrsqrt.f32 %v2344_v49 }
 0xd2e   :  { %v3690_v1 = vpop.eup %3689 }
 0xd2f   :  { %v2373_v45 = vmul.f32 %v3690_v1, %v5109_v62 }
 0xd30   :  { %v3692_v4 = vpop.eup %3691 }
 0xd31   :  { %v2374_v59 = vmul.f32 %v3692_v4, %v5112_v47  ;;  %v2395_v37 = vmul.f32 %v5135_v32, %v2373_v45 }
 0xd32   :  { %v3694_v53 = vpop.eup %3693 }
 0xd33   :  { %v2375_v61 = vmul.f32 %v3694_v53, %v5117_v33  ;;  %v2396_v23 = vmul.f32 %v5135_v32, %v2374_v59  ;;  %v2417_v7 = vadd.f32 %v5143_v52, %v2395_v37 }
 0xd34   :  { %v3696_v48 = vpop.eup %3695 }
 0xd35   :  { %v2376_v13 = vmul.f32 %v3696_v48, %v5123_v0  ;;  %v2418_v44 = vadd.f32 %v5143_v52, %v2396_v23  ;;  %v2397_v29 = vmul.f32 %v5135_v32, %v2375_v61  ;;  %v3465_v0 = vld [vmem:[%s5443_s15] sm:$0xff]  }
 0xd36   :  { %3346 = vmatprep.subr.bf16.mxu1 %v3465_v0 }
 0xd37   :  { %v2427_v62 = vpack.c.bf16 %v2418_v44, %v2417_v7  ;;  %v2398_v26 = vmul.f32 %v5135_v32, %v2376_v13  ;;  %v2419_v47 = vadd.f32 %v5143_v52, %v2397_v29  ;;  %3347 = vmatpush3.bf16.msra.mxu1 %v3465_v0  ;;  %v3467_v32 = vld [vmem:[%s5443_s15 + $0x10] sm:$0xff]  }
 0xd38   :  { %3348 = vmatprep.subr.bf16.mxu1 %v3466_v55 }
 0xd39   :  { %3342 = vmatprep.mubr.msk.bf16.mxu0 %vm239_vm1, %v2427_v62  ;;  %v2420_v33 = vadd.f32 %v5143_v52, %v2398_v26  ;;  %v3468_v52 = vld [vmem:[%s5443_s15 + $0x18] sm:$0xff]  }
 0xd3b   :  { %v2428_v42 = vpack.c.bf16 %v2420_v33, %v2419_v47  ;;  %3349 = vmatpush3.bf16.msra.mxu1 %v3466_v55 }
 0xd3c   :  { %3350 = vmatprep.subr.bf16.mxu1 %v3467_v32 }
 0xd3d   :  { %3343 = vmatmul.mubr.msk.bf16.gmra.mrb[64].mxu0 %vm239_vm1, %v2428_v42 }
 0xd3f   :  { %3351 = vmatpush3.bf16.msra.mxu1 %v3467_v32 }
 0xd40   :  { %3352 = vmatprep.subr.bf16.mxu1 %v3468_v52 }
 0xd43   :  { %3353 = vmatpush3.bf16.msra.mxu1 %v3468_v52 }
 0xd44   :  { %3354 = vmatprep.subr.bf16.mxu1 %v3469_v24 }
 0xd47   :  { %3355 = vmatpush3.bf16.msra.mxu1 %v3469_v24 }
 0xd48   :  { %3356 = vmatprep.subr.bf16.mxu1 %v3470_v22 }
 0xd4b   :  { %3357 = vmatpush3.bf16.msra.mxu1 %v3470_v22 }
 0xd4c   :  { %3358 = vmatprep.subr.bf16.mxu1 %v3471_v20 }
 0xd4f   :  { %3359 = vmatpush3.bf16.msra.mxu1 %v3471_v20 }
 0xd50   :  { %3360 = vmatprep.subr.bf16.mxu1 %v3472_v16 }
 0xd53   :  { %3361 = vmatpush3.bf16.msra.mxu1 %v3472_v16 }
 0xdd7   :  { %v3332_v6 = vpop.f32.mrb[52].mxu0 }
 0xdd8   :  { %v5228_v14 = vadd.f32 %v3332_v6, %v5225_v34  ;;  %v2505_v8 = vpop.f32.mrb[53].mxu0 }
 0xdd9   :  { %v5231_v21 = vadd.f32 %v5225_v34, %v2505_v8  ;;  %v3333_v12 = vpop.f32.mrb[54].mxu0 }
 0xdda   :  { %v2570_v18 = vmul.f32 %v5228_v14, %v5228_v14  ;;  %v5236_v40 = vadd.f32 %v3333_v12, %v5225_v34  ;;  %v2508_v50 = vpop.f32.mrb[55].mxu0 }
 0xddb   :  { %v2568_v57 = vmul.f32 %v5231_v21, %v5231_v21  ;;  %v5241_v15 = vadd.f32 %v5225_v34, %v2508_v50 }
 0xddc   :  { %v2586_v11 = vmul.f32 %v2570_v18, %v5228_v14  ;;  %v2571_v46 = vmul.f32 %v5236_v40, %v5236_v40 }
 0xddd   :  { %v2584_v10 = vmul.f32 %v2568_v57, %v5231_v21  ;;  %v2569_v3 = vmul.f32 %v5241_v15, %v5241_v15 }
 0xdde   :  { %v2602_v30 = vmul.f32 0.044715, %v2586_v11  ;;  %v2587_v17 = vmul.f32 %v2571_v46, %v5236_v40 }
 0xddf   :  { %v2600_v19 = vmul.f32 0.044715, %v2584_v10  ;;  %v2585_v56 = vmul.f32 %v2569_v3, %v5241_v15 }
 0xde0   :  { %v2618_v35 = vadd.f32 %v2602_v30, %v5228_v14  ;;  %v2603_v9 = vmul.f32 0.044715, %v2587_v17  ;;  %v3336_v49 = vpop.f32.mrb[56].mxu0 }
 0xde1   :  { %v2616_v1 = vadd.f32 %v2600_v19, %v5231_v21  ;;  %v2601_v45 = vmul.f32 0.044715, %v2585_v56  ;;  %v5254_v4 = vadd.f32 %v3336_v49, %v5225_v34  ;;  %v2521_v59 = vpop.f32.mrb[57].mxu0 }
 0xde2   :  { %v2634_v37 = vmul.f32 0.7978846, %v2618_v35  ;;  %v2619_v53 = vadd.f32 %v2603_v9, %v5236_v40  ;;  %v5258_v61 = vadd.f32 %v5225_v34, %v2521_v59  ;;  %v3337_v23 = vpop.f32.mrb[58].mxu0 }
 0xde3   :  { %v2632_v48 = vmul.f32 0.7978846, %v2616_v1  ;;  %v2617_v13 = vadd.f32 %v2601_v45, %v5241_v15  ;;  %v2574_v7 = vmul.f32 %v5254_v4, %v5254_v4  ;;  %v5264_v44 = vadd.f32 %v3337_v23, %v5225_v34  ;;  %v2524_v29 = vpop.f32.mrb[59].mxu0 }
 0xde4   :  { %3697 = vtanh.f32 %v2634_v37  ;;  %v2635_v62 = vmul.f32 0.7978846, %v2619_v53  ;;  %v2572_v26 = vmul.f32 %v5258_v61, %v5258_v61  ;;  %v5269_v47 = vadd.f32 %v5225_v34, %v2524_v29 }
 0xde5   :  { %3699 = vtanh.f32 %v2632_v48  ;;  %v2633_v33 = vmul.f32 0.7978846, %v2617_v13  ;;  %v2590_v42 = vmul.f32 %v2574_v7, %v5254_v4  ;;  %v2575_v0 = vmul.f32 %v5264_v44, %v5264_v44 }
 0xde6   :  { %3701 = vtanh.f32 %v2635_v62  ;;  %v2588_v55 = vmul.f32 %v2572_v26, %v5258_v61  ;;  %v2573_v32 = vmul.f32 %v5269_v47, %v5269_v47 }
 0xde7   :  { %3703 = vtanh.f32 %v2633_v33  ;;  %v2606_v52 = vmul.f32 0.044715, %v2590_v42  ;;  %v2591_v24 = vmul.f32 %v2575_v0, %v5264_v44 }
 0xde8   :  { %v2604_v22 = vmul.f32 0.044715, %v2588_v55  ;;  %v2589_v20 = vmul.f32 %v2573_v32, %v5269_v47  ;;  %v3340_v16 = vpop.f32.mrb[60].mxu0 }
 0xde9   :  { %v2622_v6 = vadd.f32 %v2606_v52, %v5254_v4  ;;  %v2607_v8 = vmul.f32 0.044715, %v2591_v24  ;;  %v5281_v12 = vadd.f32 %v3340_v16, %v5225_v34  ;;  %v2537_v18 = vpop.f32.mrb[61].mxu0 }
 0xdea   :  { %v2620_v50 = vadd.f32 %v2604_v22, %v5258_v61  ;;  %v2605_v57 = vmul.f32 0.044715, %v2589_v20  ;;  %v5285_v11 = vadd.f32 %v5225_v34, %v2537_v18  ;;  %v3341_v46 = vpop.f32.mrb[62].mxu0 }
 0xdeb   :  { %v2638_v10 = vmul.f32 0.7978846, %v2622_v6  ;;  %v2623_v3 = vadd.f32 %v2607_v8, %v5264_v44  ;;  %v2578_v30 = vmul.f32 %v5281_v12, %v5281_v12  ;;  %v5291_v17 = vadd.f32 %v3341_v46, %v5225_v34  ;;  %v2540_v19 = vpop.f32.mrb[63].mxu0 }
 0xdec   :  { %v2636_v56 = vmul.f32 0.7978846, %v2620_v50  ;;  %v2621_v35 = vadd.f32 %v2605_v57, %v5269_v47  ;;  %v2576_v9 = vmul.f32 %v5285_v11, %v5285_v11  ;;  %v5297_v49 = vadd.f32 %v5225_v34, %v2540_v19 }
 0xded   :  { %3705 = vtanh.f32 %v2638_v10  ;;  %v2639_v1 = vmul.f32 0.7978846, %v2623_v3  ;;  %v2594_v45 = vmul.f32 %v2578_v30, %v5281_v12  ;;  %v2579_v59 = vmul.f32 %v5291_v17, %v5291_v17 }
 0xdee   :  { %v3698_v37 = vpop.eup %3697  ;;  %3707 = vtanh.f32 %v2636_v56  ;;  %v2637_v53 = vmul.f32 0.7978846, %v2621_v35  ;;  %v2592_v23 = vmul.f32 %v2576_v9, %v5285_v11  ;;  %v2577_v48 = vmul.f32 %v5297_v49, %v5297_v49 }
 0xdef   :  { %v3700_v13 = vpop.eup %3699  ;;  %v2666_v7 = vadd.f32 1.0, %v3698_v37  ;;  %3709 = vtanh.f32 %v2639_v1  ;;  %v2610_v29 = vmul.f32 0.044715, %v2594_v45  ;;  %v2595_v62 = vmul.f32 %v2579_v59, %v5291_v17 }
 0xdf0   :  { %v3702_v26 = vpop.eup %3701  ;;  %3711 = vtanh.f32 %v2637_v53  ;;  %v2608_v33 = vmul.f32 0.044715, %v2592_v23  ;;  %v2593_v42 = vmul.f32 %v2577_v48, %v5297_v49  ;;  %v2664_v0 = vadd.f32 1.0, %v3700_v13 }
 0xdf1   :  { %v3704_v55 = vpop.eup %3703  ;;  %v2682_v32 = vmul.f32 0.5, %v2666_v7  ;;  %v2667_v52 = vadd.f32 1.0, %v3702_v26  ;;  %v2626_v24 = vadd.f32 %v2610_v29, %v5281_v12  ;;  %v2611_v22 = vmul.f32 0.044715, %v2595_v62 }
 0xdf2   :  { %v2624_v20 = vadd.f32 %v2608_v33, %v5285_v11  ;;  %v2609_v16 = vmul.f32 0.044715, %v2593_v42  ;;  %v2665_v6 = vadd.f32 1.0, %v3704_v55  ;;  %v2680_v8 = vmul.f32 0.5, %v2664_v0 }
 0xdf3   :  { %v2683_v18 = vmul.f32 0.5, %v2667_v52  ;;  %v2642_v50 = vmul.f32 0.7978846, %v2626_v24  ;;  %v2627_v57 = vadd.f32 %v2611_v22, %v5291_v17  ;;  %v2698_v30 = vmul.f32 %v2682_v32, %v5228_v14 }
 0xdf4   :  { %v2640_v46 = vmul.f32 0.7978846, %v2624_v20  ;;  %v2625_v10 = vadd.f32 %v2609_v16, %v5297_v49  ;;  %v2681_v3 = vmul.f32 0.5, %v2665_v6  ;;  %v2696_v9 = vmul.f32 %v2680_v8, %v5231_v21 }
 0xdf5   :  { %v2699_v19 = vmul.f32 %v2683_v18, %v5236_v40  ;;  %3713 = vtanh.f32 %v2642_v50  ;;  %v2643_v56 = vmul.f32 0.7978846, %v2627_v57 }
 0xdf6   :  { %3715 = vtanh.f32 %v2640_v46  ;;  %v2641_v35 = vmul.f32 0.7978846, %v2625_v10  ;;  %v2697_v1 = vmul.f32 %v2681_v3, %v5241_v15 }
 0xdf7   :  { %v3706_v45 = vpop.eup %3705  ;;  %v2713_v59 = vpack.c.bf16 %v2699_v19, %v2698_v30  ;;  %3717 = vtanh.f32 %v2643_v56 }
 0xdf8   :  { %v3708_v37 = vpop.eup %3707  ;;  %3719 = vtanh.f32 %v2641_v35  ;;  %v2712_v53 = vpack.c.bf16 %v2697_v1, %v2696_v9  ;;  %v2670_v23 = vadd.f32 1.0, %v3706_v45 }
 0xdf9   :  { %v3710_v48 = vpop.eup %3709  ;;  %v2668_v13 = vadd.f32 1.0, %v3708_v37 }
 0xdfa   :  { %v3712_v14 = vpop.eup %3711  ;;  %3362 = vmatprep.mubr.bf16.mxu1 %v2712_v53  ;;  %v2671_v40 = vadd.f32 1.0, %v3710_v48  ;;  %v2686_v7 = vmul.f32 0.5, %v2670_v23 }
 0xdfb   :  { %3363 = vmatmul.mubr.bf16.vlgmr.msra.gmra.mrb[60].mxu1 %v2713_v59  ;;  %v2669_v29 = vadd.f32 1.0, %v3712_v14  ;;  %v2684_v62 = vmul.f32 0.5, %v2668_v13 }
 0xdfc   :  { %v2687_v26 = vmul.f32 0.5, %v2671_v40  ;;  %v2702_v15 = vmul.f32 %v2686_v7, %v5254_v4 }
 0xdfd   :  { %v2685_v21 = vmul.f32 0.5, %v2669_v29  ;;  %v2700_v0 = vmul.f32 %v2684_v62, %v5258_v61 }
 0xdfe   :  { %v2703_v33 = vmul.f32 %v2687_v26, %v5264_v44 }
 0xdff   :  { %v3714_v42 = vpop.eup %3713  ;;  %v2701_v55 = vmul.f32 %v2685_v21, %v5269_v47 }
 0xe00   :  { %v3716_v32 = vpop.eup %3715  ;;  %v2715_v52 = vpack.c.bf16 %v2703_v33, %v2702_v15  ;;  %v2674_v24 = vadd.f32 1.0, %v3714_v42 }
 0xe01   :  { %v3718_v22 = vpop.eup %3717  ;;  %v2714_v20 = vpack.c.bf16 %v2701_v55, %v2700_v0  ;;  %v2672_v16 = vadd.f32 1.0, %v3716_v32 }
 0xe02   :  { %v3720_v6 = vpop.eup %3719  ;;  %v2675_v8 = vadd.f32 1.0, %v3718_v22  ;;  %v2690_v18 = vmul.f32 0.5, %v2674_v24 }
 0xe03   :  { %3366 = vmatprep.mubr.bf16.mxu1 %v2714_v20  ;;  %v2673_v50 = vadd.f32 1.0, %v3720_v6  ;;  %v2688_v57 = vmul.f32 0.5, %v2672_v16 }
 0xe04   :  { %3367 = vmatmul.mubr.bf16.gmra.mrb[64].mxu1 %v2715_v52  ;;  %v2691_v4 = vmul.f32 0.5, %v2675_v8  ;;  %v2706_v46 = vmul.f32 %v2690_v18, %v5281_v12 }
 0xe05   :  { %v2689_v44 = vmul.f32 0.5, %v2673_v50  ;;  %v2704_v47 = vmul.f32 %v2688_v57, %v5285_v11 }
 0xe06   :  { %v2707_v61 = vmul.f32 %v2691_v4, %v5291_v17 }
 0xe07   :  { %v2705_v10 = vmul.f32 %v2689_v44, %v5297_v49 }
 0xe08   :  { %v2717_v3 = vpack.c.bf16 %v2707_v61, %v2706_v46 }
 0xe09   :  { %v2716_v30 = vpack.c.bf16 %v2705_v10, %v2704_v47 }
 0xe0b   :  { %3370 = vmatprep.mubr.bf16.mxu1 %v2716_v30 }
 0xe0c   :  { %3371 = vmatmul.mubr.bf16.gmra.mrb[68].mxu1 %v2717_v3  ;;  %v5330_v3 = vld [vmem:[%s5445_s16] ss:$0 sm:$0xff] }
 0xe10   :  { %v3344_v19 = vpop.f32.mrb[64].mxu0 }
 0xe11   :  { %v2562_v56 = vadd.f32 %v3344_v19, %v5225_v34  ;;  %v2553_v35 = vpop.f32.mrb[65].mxu0 }
 0xe12   :  { %v2554_v9 = vadd.f32 %v5225_v34, %v2553_v35  ;;  %v3345_v1 = vpop.f32.mrb[66].mxu0 }
 0xe13   :  { %v2582_v45 = vmul.f32 %v2562_v56, %v2562_v56  ;;  %v2565_v12 = vadd.f32 %v3345_v1, %v5225_v34  ;;  %v2556_v59 = vpop.f32.mrb[67].mxu0 }
 0xe14   :  { %v2580_v17 = vmul.f32 %v2554_v9, %v2554_v9  ;;  %v2557_v11 = vadd.f32 %v5225_v34, %v2556_v59 }
 0xe15   :  { %v2598_v37 = vmul.f32 %v2582_v45, %v2562_v56  ;;  %v2583_v49 = vmul.f32 %v2565_v12, %v2565_v12 }
 0xe16   :  { %v2596_v53 = vmul.f32 %v2580_v17, %v2554_v9  ;;  %v2581_v23 = vmul.f32 %v2557_v11, %v2557_v11 }
 0xe17   :  { %v2614_v48 = vmul.f32 0.044715, %v2598_v37  ;;  %v2599_v13 = vmul.f32 %v2583_v49, %v2565_v12 }
 0xe18   :  { %v2612_v14 = vmul.f32 0.044715, %v2596_v53  ;;  %v2597_v40 = vmul.f32 %v2581_v23, %v2557_v11 }
 0xe19   :  { %v2630_v7 = vadd.f32 %v2614_v48, %v2562_v56  ;;  %v2615_v29 = vmul.f32 0.044715, %v2599_v13 }
 0xe1a   :  { %v2628_v62 = vadd.f32 %v2612_v14, %v2554_v9  ;;  %v2613_v26 = vmul.f32 0.044715, %v2597_v40 }
 0xe1b   :  { %v2646_v21 = vmul.f32 0.7978846, %v2630_v7  ;;  %v2631_v15 = vadd.f32 %v2615_v29, %v2565_v12 }
 0xe1c   :  { %v2644_v33 = vmul.f32 0.7978846, %v2628_v62  ;;  %v2629_v42 = vadd.f32 %v2613_v26, %v2557_v11 }
 0xe1d   :  { %3721 = vtanh.f32 %v2646_v21  ;;  %v2647_v0 = vmul.f32 0.7978846, %v2631_v15 }
 0xe1e   :  { %3723 = vtanh.f32 %v2644_v33  ;;  %v2645_v34 = vmul.f32 0.7978846, %v2629_v42 }
 0xe1f   :  { %3725 = vtanh.f32 %v2647_v0 }
 0xe20   :  { %3727 = vtanh.f32 %v2645_v34 }
 0xe27   :  { %v3722_v55 = vpop.eup %3721 }
 0xe28   :  { %v3724_v32 = vpop.eup %3723  ;;  %v2678_v52 = vadd.f32 1.0, %v3722_v55 }
 0xe29   :  { %v3726_v24 = vpop.eup %3725  ;;  %v2676_v22 = vadd.f32 1.0, %v3724_v32 }
 0xe2a   :  { %v3728_v20 = vpop.eup %3727  ;;  %v2679_v16 = vadd.f32 1.0, %v3726_v24  ;;  %v2694_v6 = vmul.f32 0.5, %v2678_v52 }
 0xe2b   :  { %v2677_v8 = vadd.f32 1.0, %v3728_v20  ;;  %v2692_v18 = vmul.f32 0.5, %v2676_v22 }
 0xe2c   :  { %v2695_v50 = vmul.f32 0.5, %v2679_v16  ;;  %v2710_v4 = vmul.f32 %v2694_v6, %v2562_v56 }
 0xe2d   :  { %v2693_v57 = vmul.f32 0.5, %v2677_v8  ;;  %v2708_v46 = vmul.f32 %v2692_v18, %v2554_v9 }
 0xe2e   :  { %v2711_v44 = vmul.f32 %v2695_v50, %v2565_v12 }
 0xe2f   :  { %v2709_v61 = vmul.f32 %v2693_v57, %v2557_v11 }
 0xe30   :  { %v2719_v47 = vpack.c.bf16 %v2711_v44, %v2710_v4 }
 0xe31   :  { %v2718_v10 = vpack.c.bf16 %v2709_v61, %v2708_v46 }
 0xe33   :  { %3374 = vmatprep.mubr.bf16.mxu1 %v2718_v10 }
 0xe34   :  { %3375 = vmatmul.mubr.bf16.gmra.mrb[72].mxu1 %v2719_v47 }
 0xece   :  { %v3364_v30 = vpop.f32.mrb[60].mxu1 }
 0xecf   :  { %v2867_v19 = vadd.f32 %v3364_v30, %v4941_v39  ;;  %v2802_v35 = vpop.f32.mrb[61].mxu1 }
 0xed0   :  { %v2865_v1 = vadd.f32 %v2802_v35, %v4937_v5  ;;  %v3365_v45 = vpop.f32.mrb[62].mxu1 }
 0xed1   :  { %v2889_v56 = vadd.f32 %v5330_v3, %v2867_v19  ;;  %v2868_v9 = vadd.f32 %v3365_v45, %v4952_v63  ;;  %v2805_v12 = vpop.f32.mrb[63].mxu1 }
 0xed2   :  { %v2887_v59 = vadd.f32 %v5330_v3, %v2865_v1  ;;  %v2866_v17 = vadd.f32 %v2805_v12, %v4945_v25 }
 0xed3   :  { %2905 = vst.msk [vmem:[%s5446_s18 + $0x10] sm:$0xff] %vm239_vm1, %v2889_v56  ;;  %v2890_v39 = vadd.f32 %v5330_v3, %v2868_v9 }
 0xed4   :  { %2903 = vst.msk [vmem:[%s5446_s18] sm:$0xff] %vm239_vm1, %v2887_v59  ;;  %v2888_v5 = vadd.f32 %v5330_v3, %v2866_v17 }
 0xed5   :  { %2906 = vst.msk [vmem:[%s5446_s18 + $0x18] sm:$0xff] %vm239_vm1, %v2890_v39 }
 0xed6   :  { %2904 = vst.msk [vmem:[%s5446_s18 + $0x8] sm:$0xff] %vm239_vm1, %v2888_v5 }
 0xed7   :  { %v3368_v25 = vpop.f32.mrb[64].mxu1 }
 0xed8   :  { %v2871_v63 = vadd.f32 %v3368_v25, %v4974_v43  ;;  %v2818_v11 = vpop.f32.mrb[65].mxu1 }
 0xed9   :  { %v2869_v37 = vadd.f32 %v2818_v11, %v4961_v58  ;;  %v3369_v49 = vpop.f32.mrb[66].mxu1 }
 0xeda   :  { %v2893_v53 = vadd.f32 %v5330_v3, %v2871_v63  ;;  %v2872_v23 = vadd.f32 %v3369_v49, %v4969_v60  ;;  %v2821_v48 = vpop.f32.mrb[67].mxu1 }
 0xedb   :  { %v2891_v13 = vadd.f32 %v5330_v3, %v2869_v37  ;;  %v2870_v14 = vadd.f32 %v2821_v48, %v4964_v51 }
 0xedc   :  { %2909 = vst.msk [vmem:[%s5446_s18 + $0x30] sm:$0xff] %vm239_vm1, %v2893_v53  ;;  %v2894_v43 = vadd.f32 %v5330_v3, %v2872_v23 }
 0xedd   :  { %2907 = vst.msk [vmem:[%s5446_s18 + $0x20] sm:$0xff] %vm239_vm1, %v2891_v13  ;;  %v2892_v58 = vadd.f32 %v5330_v3, %v2870_v14 }
 0xede   :  { %2910 = vst.msk [vmem:[%s5446_s18 + $0x38] sm:$0xff] %vm239_vm1, %v2894_v43 }
 0xedf   :  { %2908 = vst.msk [vmem:[%s5446_s18 + $0x28] sm:$0xff] %vm239_vm1, %v2892_v58  ;;  %v3372_v51 = vpop.f32.mrb[68].mxu1 }
 0xee0   :  { %v2875_v60 = vadd.f32 %v3372_v51, %v4998_v2  ;;  %v2834_v40 = vpop.f32.mrb[69].mxu1 }
 0xee1   :  { %v2873_v7 = vadd.f32 %v2834_v40, %v4985_v54  ;;  %v3373_v29 = vpop.f32.mrb[70].mxu1 }
 0xee2   :  { %v2897_v62 = vadd.f32 %v5330_v3, %v2875_v60  ;;  %v2876_v26 = vadd.f32 %v3373_v29, %v4993_v36  ;;  %v2837_v21 = vpop.f32.mrb[71].mxu1 }
 0xee3   :  { %v2895_v15 = vadd.f32 %v5330_v3, %v2873_v7  ;;  %v2874_v33 = vadd.f32 %v2837_v21, %v4988_v38 }
 0xee4   :  { %2913 = vst.msk [vmem:[%s5446_s18 + $0x50] sm:$0xff] %vm239_vm1, %v2897_v62  ;;  %v2898_v2 = vadd.f32 %v5330_v3, %v2876_v26 }
 0xee5   :  { %2911 = vst.msk [vmem:[%s5446_s18 + $0x40] sm:$0xff] %vm239_vm1, %v2895_v15  ;;  %v2896_v54 = vadd.f32 %v5330_v3, %v2874_v33 }
 0xee6   :  { %2914 = vst.msk [vmem:[%s5446_s18 + $0x58] sm:$0xff] %vm239_vm1, %v2898_v2 }
 0xee7   :  { %2912 = vst.msk [vmem:[%s5446_s18 + $0x48] sm:$0xff] %vm239_vm1, %v2896_v54 }
 0xf07   :  { %v3376_v38 = vpop.f32.mrb[72].mxu1 }
 0xf08   :  { %v2879_v36 = vadd.f32 %v3376_v38, %v5014_v27  ;;  %v2850_v42 = vpop.f32.mrb[73].mxu1 }
 0xf09   :  { %v2877_v0 = vadd.f32 %v2850_v42, %v5010_v28  ;;  %v3377_v34 = vpop.f32.mrb[74].mxu1 }
 0xf0a   :  { %v2901_v55 = vadd.f32 %v5330_v3, %v2879_v36  ;;  %v2880_v32 = vadd.f32 %v3377_v34, %v5022_v41  ;;  %v2853_v52 = vpop.f32.mrb[75].mxu1 }
 0xf0b   :  { %v2899_v24 = vadd.f32 %v5330_v3, %v2877_v0  ;;  %v2878_v22 = vadd.f32 %v2853_v52, %v5017_v31 }
 0xf0c   :  { %2917 = vst.msk [vmem:[%s5446_s18 + $0x70] sm:$0xff] %vm239_vm1, %v2901_v55  ;;  %v2902_v27 = vadd.f32 %v5330_v3, %v2880_v32 }
 0xf0d   :  { %2915 = vst.msk [vmem:[%s5446_s18 + $0x60] sm:$0xff] %vm239_vm1, %v2899_v24  ;;  %v2900_v28 = vadd.f32 %v5330_v3, %v2878_v22 }
 0xf0e   :  { %2918 = vst.msk [vmem:[%s5446_s18 + $0x78] sm:$0xff] %vm239_vm1, %v2902_v27 }
 0xf0f   :  { %2916 = vst.msk [vmem:[%s5446_s18 + $0x68] sm:$0xff] %vm239_vm1, %v2900_v28 }

// kernel: swin_forward.6
= control target key start
LH: loop header
LB: loop body
LE: loop exit
PB: predicated region body
PF: predicated region fallthrough
CT: control target
= control target key end

     0   :  { %vm307_vm0 = vcmask 523264   ;;  %vm501_vm1 = vcmask 130048   ;;  %s2289_s24 = smov 112   ;;  %s2290_s25 = smov 96   ;;  %vm575_vm2 = vcmask 261120   ;;  %vm1304_vm3 = vcmask 392192   ;;  %s3025_s0 = inlined_call_operand.vmem [shape: f32[32,128], index: 0, kind: input, shape index: {}]   ;;  %s3026_s3 = inlined_call_operand.vmem [shape: bf16[128,64], index: 3, kind: input, shape index: {}]   ;;  %s3027_s1 = inlined_call_operand.vmem [shape: f32[1,128], index: 1, kind: input, shape index: {}]   ;;  %s3028_s2 = inlined_call_operand.vmem [shape: f32[1,128], index: 2, kind: input, shape index: {}]   ;;  %s3029_s6 = inlined_call_operand.vmem [shape: bf16[64,192], index: 6, kind: input, shape index: {}]   ;;  %s3030_s4 = inlined_call_operand.vmem [shape: f32[1,64], index: 4, kind: input, shape index: {}]   ;;  %s3031_s5 = inlined_call_operand.vmem [shape: f32[1,64], index: 5, kind: input, shape index: {}]   ;;  %s3032_s7 = inlined_call_operand.vmem [shape: f32[1,192], index: 7, kind: input, shape index: {}]   ;;  %s3033_s16 = inlined_call_operand.vmem [shape: f32[4,32,32], index: 16, kind: input, shape index: {}]   ;;  %s3034_s8 = inlined_call_operand.vmem [shape: bf16[64,64], index: 8, kind: input, shape index: {}]   ;;  %s3035_s9 = inlined_call_operand.vmem [shape: f32[1,64], index: 9, kind: input, shape index: {}]   ;;  %s3036_s12 = inlined_call_operand.vmem [shape: bf16[64,256], index: 12, kind: input, shape index: {}]   ;;  %s3037_s10 = inlined_call_operand.vmem [shape: f32[1,64], index: 10, kind: input, shape index: {}]   ;;  %s3038_s11 = inlined_call_operand.vmem [shape: f32[1,64], index: 11, kind: input, shape index: {}]   ;;  %s3039_s14 = inlined_call_operand.vmem [shape: bf16[256,64], index: 14, kind: input, shape index: {}]   ;;  %s3040_s13 = inlined_call_operand.vmem [shape: f32[1,256], index: 13, kind: input, shape index: {}]   ;;  %s3041_s15 = inlined_call_operand.vmem [shape: f32[1,64], index: 15, kind: input, shape index: {}]   ;;  %s3042_s17 = inlined_call_operand.vmem [shape: f32[32,64], index: 17, kind: output, shape index: {}]  }
   0x1   :  { %3045 = sst [smem:[#allocation2_spill]] %s3025_s0  ;;  %v1827_v42 = vld [vmem:[%s3027_s1] ss:$0 sm:$0xff]  ;;  %s2292_s27 = smov 32  }
   0x2   :  { %3046 = sst [smem:[#allocation3_spill]] %s3026_s3  ;;  %s3047_s26 = sld [smem:[#allocation2_spill]]  ;;  %v1828_v47 = vld [vmem:[%s3028_s2] ss:$0 sm:$0xff] }
   0x3   :  { %s3048_s20 = sld [smem:[#allocation3_spill]]  ;;  %s2293_s21 = smov 16  }
   0x4   :  { %s2294_s22 = smov 80  }
   0x8   :  { %v57_v0 = vld [vmem:[%s3047_s26] sm:$0xff]  ;;  %v59_v1 = vld [vmem:[%s3047_s26 + $0x10] sm:$0xff]  ;;  %v58_v2 = vld [vmem:[%s3047_s26 + $0x8] sm:$0xff] }
   0x9   :  { %63 = vadd.xlane.f32.xlu0 %v57_v0  ;;  %67 = vadd.xlane.f32.xlu1 %v59_v1  ;;  %v60_v3 = vld [vmem:[%s3047_s26 + $0x18] sm:$0xff]  ;;  %v2131_v4 = vld [vmem:[%s3048_s20] sm:$0xff]   ;;  %v2132_v21 = vld [vmem:[%s3048_s20 + $0x8] sm:$0xff]   ;;  %s2291_s26 = smov 48  }
   0xa   :  { %1989 = vmatprep.subr.bf16.mxu0 %v2131_v4  ;;  %v2133_v22 = vld [vmem:[%s3048_s20 + $0x10] sm:$0xff]   ;;  %v2134_v23 = vld [vmem:[%s3048_s20 + $0x18] sm:$0xff]   ;;  %v2135_v24 = vld [vmem:[%s3048_s20 + $0x20] sm:$0xff]  }
   0xb   :  { %1990 = vmatpush3.bf16.msra.mxu0 %v2131_v4  ;;  %v2136_v25 = vld [vmem:[%s3048_s20 + $0x28] sm:$0xff]   ;;  %v2137_v26 = vld [vmem:[%s3048_s20 + $0x30] sm:$0xff]   ;;  %v2138_v27 = vld [vmem:[%s3048_s20 + $0x38] sm:$0xff]  }
   0xc   :  { %1991 = vmatprep.subr.bf16.mxu0 %v2132_v21 }
   0xd   :  { %65 = vadd.xlane.f32.xlu0 %v58_v2  ;;  %69 = vadd.xlane.f32.xlu1 %v60_v3 }
   0xf   :  { %1992 = vmatpush3.bf16.msra.mxu0 %v2132_v21 }
  0x10   :  { %1993 = vmatprep.subr.bf16.mxu0 %v2133_v22 }
  0x13   :  { %1994 = vmatpush3.bf16.msra.mxu0 %v2133_v22 }
  0x14   :  { %1995 = vmatprep.subr.bf16.mxu0 %v2134_v23 }
  0x17   :  { %1996 = vmatpush3.bf16.msra.mxu0 %v2134_v23 }
  0x18   :  { %1997 = vmatprep.subr.bf16.mxu0 %v2135_v24 }
  0x1b   :  { %1998 = vmatpush3.bf16.msra.mxu0 %v2135_v24  ;;  %v2139_v24 = vld [vmem:[%s3029_s6 + $0x4] ss:$8 sps:$4 sm:$0xff]  }
  0x1c   :  { %1999 = vmatprep.subr.bf16.mxu0 %v2136_v25  ;;  %440 = vmatprep.subr.bf16.mxu1 %v2139_v24 }
  0x1f   :  { %2000 = vmatpush3.bf16.msra.mxu0 %v2136_v25  ;;  %v2141_v25 = vld [vmem:[%s3029_s6] ss:$8 sps:$4 sm:$0xff]  }
  0x20   :  { %2001 = vmatprep.subr.bf16.mxu0 %v2137_v26  ;;  %441 = vmatpush1.bf16.msra.mxu1 %v2141_v25 }
  0x23   :  { %2002 = vmatpush3.bf16.msra.mxu0 %v2137_v26  ;;  %v2142_v26 = vld [vmem:[%s3029_s6 + $0x14] ss:$8 sps:$4 sm:$0xff]  }
  0x24   :  { %2003 = vmatprep.subr.bf16.mxu0 %v2138_v27  ;;  %442 = vmatprep.subr.bf16.mxu1 %v2142_v26 }
  0x27   :  { %2004 = vmatpush3.bf16.msra.mxu0 %v2138_v27  ;;  %v2144_v27 = vld [vmem:[%s3029_s6 + $0x10] ss:$8 sps:$4 sm:$0xff]  }
  0x28   :  { %443 = vmatpush1.bf16.msra.mxu1 %v2144_v27 }
  0x96   :  { %v64_v5 = vpop.xlane.xlu0 %63  ;;  %v68_v6 = vpop.xlane.xlu1 %67 }
  0x97   :  { %v72_v7 = vmul.f32 0.0078125, %v64_v5  ;;  %v74_v8 = vmul.f32 0.0078125, %v68_v6 }
  0x99   :  { %v76_v9 = vsub.f32 %v57_v0, %v72_v7  ;;  %v78_v10 = vsub.f32 %v59_v1, %v74_v8 }
  0x9a   :  { %v66_v11 = vpop.xlane.xlu0 %65  ;;  %v70_v12 = vpop.xlane.xlu1 %69 }
  0x9b   :  { %v73_v13 = vmul.f32 0.0078125, %v66_v11  ;;  %v80_v14 = vmul.f32 %v76_v9, %v76_v9  ;;  %v75_v15 = vmul.f32 0.0078125, %v70_v12  ;;  %v82_v18 = vmul.f32 %v78_v10, %v78_v10 }
  0x9d   :  { %v77_v16 = vsub.f32 %v58_v2, %v73_v13  ;;  %84 = vadd.xlane.f32.xlu0 %v80_v14  ;;  %v79_v17 = vsub.f32 %v60_v3, %v75_v15 }
  0x9f   :  { %v81_v19 = vmul.f32 %v77_v16, %v77_v16  ;;  %v83_v20 = vmul.f32 %v79_v17, %v79_v17 }
  0xa1   :  { %88 = vadd.xlane.f32.xlu0 %v82_v18  ;;  %86 = vadd.xlane.f32.xlu1 %v81_v19 }
  0xa5   :  { %90 = vadd.xlane.f32.xlu1 %v83_v20 }
 0x12a   :  { %v85_v28 = vpop.xlane.xlu0 %84 }
 0x12b   :  { %v92_v29 = vmul.f32 0.0078125, %v85_v28  ;;  %v2145_v28 = vld [vmem:[%s3029_s6 + $0x24] ss:$8 sps:$4 sm:$0xff]  }
 0x12c   :  { %444 = vmatprep.subr.bf16.mxu1 %v2145_v28 }
 0x12d   :  { %v96_v30 = vadd.f32 1e-05, %v92_v29  ;;  %v2147_v29 = vld [vmem:[%s3029_s6 + $0x20] ss:$8 sps:$4 sm:$0xff]  }
 0x12e   :  { %v87_v31 = vpop.xlane.xlu1 %86  ;;  %v89_v32 = vpop.xlane.xlu0 %88  ;;  %445 = vmatpush1.bf16.msra.mxu1 %v2147_v29 }
 0x12f   :  { %2183 = vrsqrt.f32 %v96_v30  ;;  %v93_v33 = vmul.f32 0.0078125, %v87_v31  ;;  %v94_v34 = vmul.f32 0.0078125, %v89_v32  ;;  %v2148_v30 = vld [vmem:[%s3029_s6 + $0x34] ss:$8 sps:$4 sm:$0xff]   ;;  %v2150_v31 = vld [vmem:[%s3029_s6 + $0x30] ss:$8 sps:$4 sm:$0xff]  }
 0x130   :  { %446 = vmatprep.subr.bf16.mxu1 %v2148_v30  ;;  %v2287_v32 = vmov 0  }
 0x131   :  { %v97_v35 = vadd.f32 1e-05, %v93_v33  ;;  %v98_v36 = vadd.f32 1e-05, %v94_v34  ;;  %472 = vmatprep.mubr.bf16.mxu1 %v2287_v32 }
 0x132   :  { %v91_v37 = vpop.xlane.xlu1 %90  ;;  %447 = vmatpush1.bf16.msra.mxu1 %v2150_v31 }
 0x133   :  { %2185 = vrsqrt.f32 %v97_v35  ;;  %v95_v38 = vmul.f32 0.0078125, %v91_v37 }
 0x134   :  { %2187 = vrsqrt.f32 %v98_v36 }
 0x135   :  { %v99_v39 = vadd.f32 1e-05, %v95_v38 }
 0x137   :  { %2189 = vrsqrt.f32 %v99_v39 }
 0x139   :  { %v2184_v40 = vpop.eup %2183 }
 0x13a   :  { %v104_v41 = vmul.f32 %v2184_v40, %v76_v9 }
 0x13c   :  { %v114_v46 = vmul.f32 %v1827_v42, %v104_v41 }
 0x13d   :  { %v2186_v43 = vpop.eup %2185 }
 0x13e   :  { %v2188_v44 = vpop.eup %2187  ;;  %v105_v45 = vmul.f32 %v2186_v43, %v77_v16  ;;  %v124_v51 = vadd.f32 %v1828_v47, %v114_v46  ;;  %v1837_v46 = vld [vmem:[%s3030_s4] ss:$0 sm:$0xff] }
 0x13f   :  { %v106_v48 = vmul.f32 %v2188_v44, %v78_v10 }
 0x140   :  { %v115_v49 = vmul.f32 %v1827_v42, %v105_v45 }
 0x141   :  { %v2190_v50 = vpop.eup %2189  ;;  %v116_v54 = vmul.f32 %v1827_v42, %v106_v48 }
 0x142   :  { %v125_v52 = vadd.f32 %v1828_v47, %v115_v49  ;;  %v107_v53 = vmul.f32 %v2190_v50, %v79_v17 }
 0x143   :  { %v126_v57 = vadd.f32 %v1828_v47, %v116_v54 }
 0x144   :  { %v144_v55 = vpack.c.bf16 %v125_v52, %v124_v51  ;;  %v117_v56 = vmul.f32 %v1827_v42, %v107_v53  ;;  %v1838_v52 = vld [vmem:[%s3031_s5] ss:$0 sm:$0xff] }
 0x146   :  { %2005 = vmatprep.mubr.bf16.mxu0 %v144_v55  ;;  %v127_v58 = vadd.f32 %v1828_v47, %v117_v56 }
 0x148   :  { %v145_v59 = vpack.c.bf16 %v127_v58, %v126_v57 }
 0x14a   :  { %2006 = vmatmul.mubr.bf16.vlgmr.msra.gmra.mrb[0].mxu0 %v145_v59 }
 0x21d   :  { %v2427_v60 = vpop.f32.mrb[0].mxu0 }
 0x21e   :  { %v2429_v61 = vpop.f32.mrb[1].mxu0  ;;  %v314_v2 = vsel %vm307_vm0, %v2427_v60, 0.0 }
 0x21f   :  { %v2431_v62 = vpop.f32.mrb[2].mxu0  ;;  %v308_v63 = vsel %vm307_vm0, %v2429_v61, 0.0 }
 0x220   :  { %309 = vadd.xlane.f32.xlu0 %v308_v63  ;;  %v2435_v0 = vpop.f32.mrb[3].mxu0  ;;  %v317_v3 = vsel %vm307_vm0, %v2431_v62, 0.0 }
 0x221   :  { %v311_v1 = vsel %vm307_vm0, %v2435_v0, 0.0 }
 0x222   :  { %312 = vadd.xlane.f32.xlu1 %v311_v1 }
 0x224   :  { %315 = vadd.xlane.f32.xlu0 %v314_v2 }
 0x226   :  { %318 = vadd.xlane.f32.xlu1 %v317_v3 }
 0x2ad   :  { %v310_v4 = vpop.xlane.xlu0 %309 }
 0x2ae   :  { %v321_v5 = vmul.f32 0.015625, %v310_v4 }
 0x2af   :  { %v313_v6 = vpop.xlane.xlu1 %312 }
 0x2b0   :  { %v325_v7 = vsub.f32 %v2429_v61, %v321_v5  ;;  %v322_v8 = vmul.f32 0.015625, %v313_v6  ;;  %v384_v5 = vlaneseq }
 0x2b1   :  { %v316_v9 = vpop.xlane.xlu0 %315 }
 0x2b2   :  { %v326_v10 = vsub.f32 %v2435_v0, %v322_v8  ;;  %v323_v11 = vmul.f32 0.015625, %v316_v9  ;;  %v329_v12 = vmul.f32 %v325_v7, %v325_v7  ;;  %v2485_v6 = vshrl.u32 %v384_v5, 7  ;;  %v253_v8 = vld [vmem:[%s3032_s7] sm:$0x3]  ;;  %s2288_s7 = smov 64   ;;  %v1865_v5 = vld [vmem:[%s3033_s16 + $0x50] sm:$0xff] }
 0x2b3   :  { %v319_v13 = vpop.xlane.xlu1 %318 }
 0x2b4   :  { %v327_v14 = vsub.f32 %v2427_v60, %v323_v11  ;;  %v324_v15 = vmul.f32 0.015625, %v319_v13  ;;  %v333_v16 = vsel %vm307_vm0, %v329_v12, 0.0  ;;  %v330_v17 = vmul.f32 %v326_v10, %v326_v10 }
 0x2b5   :  { %334 = vadd.xlane.f32.xlu0 %v333_v16  ;;  %v390_v9 = vsub.s32 1, %v2485_v6 }
 0x2b6   :  { %v328_v18 = vsub.f32 %v2431_v62, %v324_v15  ;;  %v336_v19 = vsel %vm307_vm0, %v330_v17, 0.0  ;;  %v331_v20 = vmul.f32 %v327_v14, %v327_v14 }
 0x2b7   :  { %337 = vadd.xlane.f32.xlu1 %v336_v19  ;;  %v391_v12 = vrot.slane %v253_v8, %v390_v9 }
 0x2b8   :  { %v339_v21 = vsel %vm307_vm0, %v331_v20, 0.0  ;;  %v332_v22 = vmul.f32 %v328_v18, %v328_v18 }
 0x2b9   :  { %340 = vadd.xlane.f32.xlu0 %v339_v21 }
 0x2ba   :  { %v342_v23 = vsel %vm307_vm0, %v332_v22, 0.0 }
 0x2bb   :  { %343 = vadd.xlane.f32.xlu1 %v342_v23 }
 0x342   :  { %v335_v33 = vpop.xlane.xlu0 %334 }
 0x343   :  { %v345_v34 = vmul.f32 0.015625, %v335_v33 }
 0x344   :  { %v338_v35 = vpop.xlane.xlu1 %337 }
 0x345   :  { %v349_v36 = vadd.f32 1e-05, %v345_v34  ;;  %v346_v37 = vmul.f32 0.015625, %v338_v35 }
 0x346   :  { %v341_v38 = vpop.xlane.xlu0 %340 }
 0x347   :  { %2191 = vrsqrt.f32 %v349_v36  ;;  %v350_v39 = vadd.f32 1e-05, %v346_v37  ;;  %v347_v40 = vmul.f32 0.015625, %v341_v38 }
 0x348   :  { %v344_v41 = vpop.xlane.xlu1 %343 }
 0x349   :  { %2193 = vrsqrt.f32 %v350_v39  ;;  %v351_v42 = vadd.f32 1e-05, %v347_v40  ;;  %v348_v43 = vmul.f32 0.015625, %v344_v41 }
 0x34b   :  { %2195 = vrsqrt.f32 %v351_v42  ;;  %v352_v44 = vadd.f32 1e-05, %v348_v43 }
 0x34d   :  { %2197 = vrsqrt.f32 %v352_v44 }
 0x351   :  { %v2192_v45 = vpop.eup %2191 }
 0x352   :  { %v357_v47 = vmul.f32 %v2192_v45, %v325_v7  ;;  %v386_v7 = vsub.s32 0, %v2485_v6 }
 0x353   :  { %v2194_v48 = vpop.eup %2193 }
 0x354   :  { %v358_v49 = vmul.f32 %v2194_v48, %v326_v10  ;;  %v367_v50 = vmul.f32 %v1837_v46, %v357_v47  ;;  %v387_v10 = vrot.slane %v253_v8, %v386_v7 }
 0x355   :  { %v2196_v51 = vpop.eup %2195 }
 0x356   :  { %v368_v53 = vmul.f32 %v1837_v46, %v358_v49  ;;  %v359_v55 = vmul.f32 %v2196_v51, %v327_v14  ;;  %v377_v57 = vadd.f32 %v1838_v52, %v367_v50 }
 0x357   :  { %v2198_v54 = vpop.eup %2197 }
 0x358   :  { %v360_v56 = vmul.f32 %v2198_v54, %v328_v18  ;;  %v378_v58 = vadd.f32 %v1838_v52, %v368_v53  ;;  %v369_v1 = vmul.f32 %v1837_v46, %v359_v55 }
 0x35a   :  { %v381_v59 = vpack.c.bf16 %v378_v58, %v377_v57  ;;  %v370_v63 = vmul.f32 %v1837_v46, %v360_v56  ;;  %v379_v3 = vadd.f32 %v1838_v52, %v369_v1 }
 0x35c   :  { %1847 = vmatmul.mubr.msk.bf16.vlgmr.msra.gmra.mrb[0].mxu1 %vm307_vm0, %v381_v59  ;;  %v380_v2 = vadd.f32 %v1838_v52, %v370_v63  ;;  %v1863_v59 = vld [vmem:[%s3033_s16 + $0x40] sm:$0xff] }
 0x35d   :  { %482 = vmatprep.mubr.bf16.mxu1 %v2287_v32 }
 0x35e   :  { %v382_v4 = vpack.c.bf16 %v380_v2, %v379_v3 }
 0x364   :  { %1848 = vmatmul.mubr.msk.bf16.gmra.mrb[4].mxu1 %vm307_vm0, %v382_v4  ;;  %v1864_v4 = vld [vmem:[%s3033_s16 + $0x48] sm:$0xff] }
 0x42f   :  { %v474_v11 = vpop.f32.mrb[0].mxu1 }
 0x430   :  { %v476_v13 = vpop.f32.mrb[1].mxu1  ;;  %v475_v15 = vadd.f32 %v474_v11, %v387_v10 }
 0x431   :  { %v478_v14 = vpop.f32.mrb[2].mxu1  ;;  %v477_v18 = vadd.f32 %v476_v13, %v391_v12 }
 0x432   :  { %v479_v16 = vadd.f32 %v478_v14, %v387_v10  ;;  %v480_v17 = vpop.f32.mrb[3].mxu1 }
 0x433   :  { %v481_v19 = vadd.f32 %v480_v17, %v391_v12 }
 0x434   :  { %v2496_v20 = vpack.c.bf16 %v479_v16, %v475_v15  ;;  %v1866_v15 = vld [vmem:[%s3033_s16 + $0x58] sm:$0xff] }
 0x435   :  { %v2498_v21 = vpack.c.bf16 %v481_v19, %v477_v18 }
 0x436   :  { %497 = vrot.lane.b32.xlu0 %v2496_v20, %s2288_s7  ;;  %2013 = vmatprep.mubr.msk.bf16.mxu1 %vm501_vm1, %v2496_v20 }
 0x437   :  { %v484_v22 = vpop.f32.mrb[4].mxu1  ;;  %2017 = vmatprep.subr.bf16.mxu0 %v2498_v21 }
 0x438   :  { %v486_v23 = vpop.f32.mrb[5].mxu1  ;;  %2018 = vmatpush3.bf16.msra.mxu0 %v2498_v21  ;;  %v485_v25 = vadd.f32 %v484_v22, %v387_v10 }
 0x439   :  { %v488_v24 = vpop.f32.mrb[6].mxu1  ;;  %v487_v28 = vadd.f32 %v486_v23, %v391_v12 }
 0x43a   :  { %v489_v26 = vadd.f32 %v488_v24, %v387_v10  ;;  %679 = vrot.lane.b32.xlu0 %v2496_v20, %s2289_s24  ;;  %v490_v27 = vpop.f32.mrb[7].mxu1 }
 0x43b   :  { %v491_v29 = vadd.f32 %v490_v27, %v391_v12 }
 0x43c   :  { %v2507_v30 = vpack.c.bf16 %v489_v26, %v485_v25 }
 0x43d   :  { %v2509_v31 = vpack.c.bf16 %v491_v29, %v487_v28 }
 0x43e   :  { %681 = vrot.lane.b32.xlu0 %v2507_v30, %s2289_s24  ;;  %499 = vrot.lane.b32.xlu1 %v2507_v30, %s2288_s7 }
 0x43f   :  { %2019 = vmatprep.subr.bf16.mxu0 %v2509_v31 }
 0x440   :  { %2020 = vmatpush3.bf16.msra.mxu0 %v2509_v31 }
 0x442   :  { %870 = vrot.lane.b32.xlu0 %v2496_v20, %s2290_s25  ;;  %683 = vrot.lane.b32.xlu1 %v2496_v20, %s2291_s26 }
 0x446   :  { %685 = vrot.lane.b32.xlu1 %v2507_v30, %s2291_s26 }
 0x44a   :  { %874 = vrot.lane.b32.xlu1 %v2496_v20, %s2292_s27 }
 0x44e   :  { %876 = vrot.lane.b32.xlu1 %v2507_v30, %s2292_s27 }
 0x452   :  { %872 = vrot.lane.b32.xlu1 %v2507_v30, %s2290_s25 }
 0x4a8   :  { %v498_v33 = vpop.permute.xlu0 %497 }
 0x4a9   :  { %v509_v34 = vsel %vm501_vm1, %v498_v33, 0  ;;  %2085 = vmatprep.subr.msk.bf16.mxu1 %vm501_vm1, %v498_v33 }
 0x4aa   :  { %2010 = vmatpush3.bf16.xpose.msra.mxu1 %v509_v34 }
 0x4ac   :  { %v680_v38 = vpop.permute.xlu0 %679 }
 0x4b0   :  { %v500_v35 = vpop.permute.xlu1 %499  ;;  %v682_v43 = vpop.permute.xlu0 %681 }
 0x4b1   :  { %v512_v36 = vsel %vm501_vm1, %v500_v35, 0  ;;  %2086 = vmatprep.subr.msk.bf16.mxu1 %vm501_vm1, %v500_v35 }
 0x4b2   :  { %2012 = vmatpush3.bf16.xpose.msra.mxu1 %v512_v36 }
 0x4b4   :  { %v684_v37 = vpop.permute.xlu1 %683  ;;  %v871_v44 = vpop.permute.xlu0 %870 }
 0x4b5   :  { %2087 = vmatprep.subr.msk.bf16.mxu1 %vm501_vm1, %v684_v37  ;;  %v694_v39 = vsel %vm501_vm1, %v684_v37, 0 }
 0x4b8   :  { %v686_v40 = vpop.permute.xlu1 %685 }
 0x4b9   :  { %2014 = vmatmul.mubr.msk.bf16.vlgmr.msra.gmra.mrb[8].mxu1 %vm501_vm1, %v2507_v30  ;;  %v697_v41 = vsel %vm501_vm1, %v686_v40, 0 }
 0x4ba   :  { %2026 = vmatpush3.bf16.xpose.msra.mxu1 %v694_v39  ;;  %2029 = vmatprep.mubr.msk.bf16.mxu1 %vm501_vm1, %v680_v38 }
 0x4bb   :  { %2088 = vmatprep.subr.msk.bf16.mxu1 %vm501_vm1, %v686_v40 }
 0x4bc   :  { %v875_v42 = vpop.permute.xlu1 %874 }
 0x4bd   :  { %v885_v45 = vsel %vm501_vm1, %v875_v42, 0 }
 0x4c0   :  { %v877_v46 = vpop.permute.xlu1 %876 }
 0x4c1   :  { %v888_v47 = vsel %vm501_vm1, %v877_v46, 0 }
 0x4c2   :  { %2028 = vmatpush3.bf16.xpose.msra.mxu1 %v697_v41 }
 0x4c3   :  { %2089 = vmatprep.subr.msk.bf16.mxu1 %vm501_vm1, %v875_v42 }
 0x4c4   :  { %v873_v48 = vpop.permute.xlu1 %872 }
 0x4c9   :  { %2030 = vmatmul.mubr.msk.bf16.vlgmr.msra.gmra.mrb[12].mxu1 %vm501_vm1, %v682_v43 }
 0x4ca   :  { %2042 = vmatpush3.bf16.xpose.msra.mxu1 %v885_v45  ;;  %2045 = vmatprep.mubr.msk.bf16.mxu1 %vm501_vm1, %v871_v44 }
 0x4cb   :  { %2090 = vmatprep.subr.msk.bf16.mxu1 %vm501_vm1, %v877_v46  ;;  %v567_v46 = vld [vmem:[%s3033_s16] sm:$0xff] }
 0x4d2   :  { %2044 = vmatpush3.bf16.xpose.msra.mxu1 %v888_v47 }
 0x4d9   :  { %2046 = vmatmul.mubr.msk.bf16.vlgmr.msra.gmra.mrb[16].mxu1 %vm501_vm1, %v873_v48 }
 0x58c   :  { %v2546_v49 = vpop.f32.mrb[8].mxu1 }
 0x58d   :  { %v2548_v50 = vpop.f32.mrb[9].mxu1  ;;  %v565_v47 = vmul.f32 0.25, %v2546_v49  ;;  %v568_v49 = vld [vmem:[%s3033_s16 + $0x8] sm:$0xff] }
 0x58e   :  { %v2550_v51 = vpop.f32.mrb[10].mxu1  ;;  %v563_v45 = vmul.f32 0.25, %v2548_v50 }
 0x58f   :  { %v2552_v52 = vpop.f32.mrb[11].mxu1 }
 0x590   :  { %v2611_v48 = vadd.f32 %v567_v46, %v563_v45 }
 0x59c   :  { %v2554_v53 = vpop.f32.mrb[12].mxu1 }
 0x59d   :  { %v2556_v54 = vpop.f32.mrb[13].mxu1 }
 0x59e   :  { %v2558_v55 = vpop.f32.mrb[14].mxu1 }
 0x59f   :  { %v2560_v56 = vpop.f32.mrb[15].mxu1 }
 0x5ac   :  { %v2047_v57 = vpop.f32.mrb[16].mxu1 }
 0x5ad   :  { %v924_v58 = vpop.f32.mrb[17].mxu1  ;;  %v941_v63 = vmul.f32 0.25, %v2047_v57  ;;  %v569_v57 = vld [vmem:[%s3033_s16 + $0x10] sm:$0xff] }
 0x5ae   :  { %v939_v1 = vmul.f32 0.25, %v924_v58  ;;  %v2048_v2 = vpop.f32.mrb[18].mxu1  ;;  %v566_v58 = vmul.f32 0.25, %v2550_v51  ;;  %v2620_v50 = vadd.f32 %v569_v57, %v565_v47  ;;  %v748_v51 = vmul.f32 0.25, %v2556_v54 }
 0x5af   :  { %v927_v3 = vpop.f32.mrb[19].mxu1  ;;  %v942_v11 = vmul.f32 0.25, %v2048_v2  ;;  %v950_v14 = vadd.f32 %v1865_v5, %v941_v63 }
 0x5b0   :  { %v940_v8 = vmul.f32 0.25, %v927_v3  ;;  %v948_v10 = vadd.f32 %v1863_v59, %v939_v1  ;;  %v570_v59 = vld [vmem:[%s3033_s16 + $0x18] sm:$0xff]  ;;  %v582_v2 = vsel %vm575_vm2, %v2620_v50, -inf  ;;  %v1855_v3 = vld [vmem:[%s3033_s16 + $0x20] sm:$0xff] }
 0x5b1   :  { %v958_v17 = vsel %vm575_vm2, %v950_v14, -inf  ;;  %v951_v18 = vadd.f32 %v1866_v15, %v942_v11  ;;  %v2628_v63 = vadd.f32 %v570_v59, %v566_v58 }
 0x5b2   :  { %v952_v12 = vsel %vm575_vm2, %v948_v10, -inf  ;;  %v949_v13 = vadd.f32 %v1864_v4, %v940_v8  ;;  %v1856_v4 = vld [vmem:[%s3033_s16 + $0x28] sm:$0xff]  ;;  %v751_v8 = vmul.f32 0.25, %v2558_v55 }
 0x5b3   :  { %953 = vmax.xlane.f32.xlu0 %v952_v12  ;;  %v961_v19 = vsel %vm575_vm2, %v951_v18, -inf  ;;  %v585_v5 = vsel %vm575_vm2, %v2628_v63, -inf  ;;  %v1857_v12 = vld [vmem:[%s3033_s16 + $0x30] sm:$0xff] }
 0x5b4   :  { %v955_v16 = vsel %vm575_vm2, %v949_v13, -inf }
 0x5b5   :  { %956 = vmax.xlane.f32.xlu1 %v955_v16 }
 0x5b7   :  { %959 = vmax.xlane.f32.xlu0 %v958_v17 }
 0x5bb   :  { %962 = vmax.xlane.f32.xlu0 %v961_v19 }
 0x5c6   :  { %1000 = vrot.lane.b32.xlu1 %v2509_v31, %s2290_s25 }
 0x640   :  { %v954_v22 = vpop.xlane.xlu0 %953 }
 0x641   :  { %v964_v23 = vsub.f32 %v948_v10, %v954_v22  ;;  %v2648_v10 = vadd.f32 %v1855_v3, %v748_v51 }
 0x642   :  { %v957_v24 = vpop.xlane.xlu1 %956 }
 0x643   :  { %v968_v27 = vmul.f32 1.442695, %v964_v23  ;;  %v965_v28 = vsub.f32 %v949_v13, %v957_v24  ;;  %v1858_v13 = vld [vmem:[%s3033_s16 + $0x38] sm:$0xff] }
 0x644   :  { %v960_v25 = vpop.xlane.xlu0 %959  ;;  %v2664_v15 = vadd.f32 %v1858_v13, %v751_v8 }
 0x645   :  { %v966_v26 = vsub.f32 %v950_v14, %v960_v25  ;;  %v970_v35 = vmul.f32 1.442695, %v965_v28  ;;  %v761_v14 = vsel %vm575_vm2, %v2648_v10, -inf }
 0x646   :  { %v770_v17 = vsel %vm575_vm2, %v2664_v15, -inf }
 0x647   :  { %v972_v29 = vmul.f32 1.442695, %v966_v26 }
 0x648   :  { %v963_v33 = vpop.xlane.xlu0 %962 }
 0x649   :  { %2199 = vpow2.f32 %v972_v29  ;;  %v967_v34 = vsub.f32 %v951_v18, %v963_v33  ;;  %v1001_v18 = vpop.permute.xlu1 %1000 }
 0x64a   :  { %2201 = vpow2.f32 %v968_v27 }
 0x64b   :  { %v974_v36 = vmul.f32 1.442695, %v967_v34 }
 0x64d   :  { %2203 = vpow2.f32 %v974_v36 }
 0x64e   :  { %2205 = vpow2.f32 %v970_v35 }
 0x653   :  { %v2580_v37 = vpop.eup %2199 }
 0x654   :  { %v982_v38 = vsel %vm575_vm2, %v2580_v37, 0.0  ;;  %v2584_v39 = vpop.eup %2201 }
 0x655   :  { %983 = vadd.xlane.f32.xlu0 %v982_v38  ;;  %v976_v41 = vsel %vm575_vm2, %v2584_v39, 0.0 }
 0x657   :  { %v2586_v40 = vpop.eup %2203 }
 0x658   :  { %v985_v42 = vsel %vm575_vm2, %v2586_v40, 0.0  ;;  %v2592_v43 = vpop.eup %2205 }
 0x659   :  { %977 = vadd.xlane.f32.xlu0 %v976_v41  ;;  %986 = vadd.xlane.f32.xlu1 %v985_v42  ;;  %v979_v44 = vsel %vm575_vm2, %v2592_v43, 0.0 }
 0x65d   :  { %980 = vadd.xlane.f32.xlu1 %v979_v44 }
 0x66e   :  { %1063 = vrot.lane.b32.xlu1 %v2496_v20, %s2293_s21 }
 0x66f   :  { %998 = vrot.lane.b32.xlu0 %v2498_v21, %s2290_s25 }
 0x672   :  { %1065 = vrot.lane.b32.xlu1 %v2507_v30, %s2293_s21 }
 0x673   :  { %1059 = vrot.lane.b32.xlu0 %v2496_v20, %s2294_s22  ;;  %v564_v20 = vmul.f32 0.25, %v2552_v52  ;;  %v749_v52 = vmul.f32 0.25, %v2560_v56  ;;  %v750_v56 = vmul.f32 0.25, %v2554_v53 }
 0x675   :  { %v2630_v1 = vadd.f32 %v568_v49, %v564_v20  ;;  %v2650_v11 = vadd.f32 %v1856_v4, %v749_v52  ;;  %v2662_v55 = vadd.f32 %v1857_v12, %v750_v56 }
 0x676   :  { %1061 = vrot.lane.b32.xlu1 %v2507_v30, %s2294_s22  ;;  %v576_v30 = vsel %vm575_vm2, %v2611_v48, -inf }
 0x677   :  { %v579_v54 = vsel %vm575_vm2, %v2630_v1, -inf  ;;  %v764_v53 = vsel %vm575_vm2, %v2650_v11, -inf  ;;  %v767_v16 = vsel %vm575_vm2, %v2662_v55, -inf }
 0x692   :  { %577 = vmax.xlane.f32.xlu0 %v576_v30 }
 0x696   :  { %583 = vmax.xlane.f32.xlu0 %v582_v2 }
 0x69a   :  { %586 = vmax.xlane.f32.xlu0 %v585_v5  ;;  %580 = vmax.xlane.f32.xlu1 %v579_v54 }
 0x69e   :  { %762 = vmax.xlane.f32.xlu0 %v761_v14  ;;  %765 = vmax.xlane.f32.xlu1 %v764_v53 }
 0x6a2   :  { %768 = vmax.xlane.f32.xlu0 %v767_v16  ;;  %771 = vmax.xlane.f32.xlu1 %v770_v17 }
 0x6e2   :  { %v984_v19 = vpop.xlane.xlu0 %983 }
 0x6e6   :  { %v978_v22 = vpop.xlane.xlu0 %977  ;;  %v987_v23 = vpop.xlane.xlu1 %986 }
 0x6e7   :  { %2207 = vrcp.f32 %v987_v23 }
 0x6e8   :  { %2209 = vrcp.f32 %v978_v22  ;;  %v1872_v22 = vld [vmem:[%s3033_s16 + $0x68] sm:$0xff] }
 0x6e9   :  { %2211 = vrcp.f32 %v984_v19 }
 0x6ea   :  { %v999_v24 = vpop.permute.xlu0 %998  ;;  %v981_v25 = vpop.xlane.xlu1 %980 }
 0x6eb   :  { %2213 = vrcp.f32 %v981_v25  ;;  %2049 = vmatprep.subr.bf16.mxu1 %v999_v24 }
 0x6ec   :  { %2050 = vmatpush3.bf16.msra.mxu1 %v999_v24 }
 0x6ed   :  { %2051 = vmatprep.subr.bf16.mxu1 %v1001_v18 }
 0x6ee   :  { %v1064_v26 = vpop.permute.xlu1 %1063  ;;  %v1060_v44 = vpop.permute.xlu0 %1059 }
 0x6ef   :  { %v1074_v45 = vsel %vm501_vm1, %v1064_v26, 0 }
 0x6f0   :  { %2052 = vmatpush3.bf16.msra.mxu1 %v1001_v18 }
 0x6f1   :  { %2091 = vmatprep.subr.msk.bf16.mxu1 %vm501_vm1, %v1064_v26  ;;  %v2208_v27 = vpop.eup %2207 }
 0x6f2   :  { %v2210_v28 = vpop.eup %2209  ;;  %v995_v34 = vmul.f32 %v2208_v27, %v2586_v40  ;;  %v1066_v46 = vpop.permute.xlu1 %1065 }
 0x6f3   :  { %v2212_v29 = vpop.eup %2211  ;;  %v992_v35 = vmul.f32 %v2210_v28, %v2584_v39  ;;  %v1077_v39 = vsel %vm501_vm1, %v1066_v46, 0 }
 0x6f4   :  { %v994_v38 = vmul.f32 %v2212_v29, %v2580_v37 }
 0x6f5   :  { %v2214_v33 = vpop.eup %2213 }
 0x6f6   :  { %v993_v36 = vmul.f32 %v2214_v33, %v2592_v43  ;;  %v997_v42 = vpack.c.bf16 %v995_v34, %v994_v38  ;;  %v1062_v40 = vpop.permute.xlu1 %1061 }
 0x6f8   :  { %v996_v41 = vpack.c.bf16 %v993_v36, %v992_v35 }
 0x6fa   :  { %2053 = vmatprep.mubr.msk.bf16.mxu1 %vm575_vm2, %v996_v41 }
 0x6fb   :  { %2054 = vmatmul.mubr.msk.bf16.vlgmr.msra.gmra.mrb[20].mxu1 %vm575_vm2, %v997_v42 }
 0x6fc   :  { %2058 = vmatpush3.bf16.xpose.msra.mxu1 %v1074_v45  ;;  %2061 = vmatprep.mubr.msk.bf16.mxu1 %vm501_vm1, %v1060_v44 }
 0x6fd   :  { %2092 = vmatprep.subr.msk.bf16.mxu1 %vm501_vm1, %v1066_v46 }
 0x704   :  { %2060 = vmatpush3.bf16.xpose.msra.mxu1 %v1077_v39 }
 0x70b   :  { %2062 = vmatmul.mubr.msk.bf16.vlgmr.msra.gmra.mrb[24].mxu1 %vm501_vm1, %v1062_v40 }
 0x70c   :  { %1563 = vmatprep.mubr.bf16.mxu1 %v2287_v32 }
 0x71f   :  { %v578_v37 = vpop.xlane.xlu0 %577 }
 0x720   :  { %v588_v52 = vsub.f32 %v2611_v48, %v578_v37  ;;  %v1871_v48 = vld [vmem:[%s3033_s16 + $0x60] sm:$0xff] }
 0x722   :  { %v592_v4 = vmul.f32 1.442695, %v588_v52 }
 0x723   :  { %v584_v43 = vpop.xlane.xlu0 %583 }
 0x724   :  { %v590_v5 = vsub.f32 %v2620_v50, %v584_v43  ;;  %2215 = vpow2.f32 %v592_v4 }
 0x726   :  { %v596_v13 = vmul.f32 1.442695, %v590_v5 }
 0x727   :  { %v587_v49 = vpop.xlane.xlu0 %586  ;;  %v581_v51 = vpop.xlane.xlu1 %580 }
 0x728   :  { %v589_v2 = vsub.f32 %v2630_v1, %v581_v51  ;;  %v591_v56 = vsub.f32 %v2628_v63, %v587_v49 }
 0x72a   :  { %v594_v8 = vmul.f32 1.442695, %v589_v2  ;;  %v598_v19 = vmul.f32 1.442695, %v591_v56 }
 0x72b   :  { %v763_v3 = vpop.xlane.xlu0 %762  ;;  %v766_v54 = vpop.xlane.xlu1 %765 }
 0x72c   :  { %v773_v14 = vsub.f32 %v2648_v10, %v763_v3  ;;  %2217 = vpow2.f32 %v594_v8  ;;  %v774_v50 = vsub.f32 %v2650_v11, %v766_v54  ;;  %v1873_v10 = vld [vmem:[%s3033_s16 + $0x70] sm:$0xff]  ;;  %v1874_v11 = vld [vmem:[%s3033_s16 + $0x78] sm:$0xff] }
 0x72d   :  { %2219 = vpow2.f32 %v596_v13 }
 0x72e   :  { %v777_v27 = vmul.f32 1.442695, %v773_v14  ;;  %2221 = vpow2.f32 %v598_v19  ;;  %v779_v35 = vmul.f32 1.442695, %v774_v50  ;;  %v2718_v44 = vpop.eup %2215 }
 0x72f   :  { %v769_v16 = vpop.xlane.xlu0 %768  ;;  %v772_v23 = vpop.xlane.xlu1 %771 }
 0x730   :  { %v775_v28 = vsub.f32 %v2662_v55, %v769_v16  ;;  %v776_v36 = vsub.f32 %v2664_v15, %v772_v23  ;;  %2223 = vpow2.f32 %v777_v27  ;;  %v600_v15 = vsel %vm575_vm2, %v2718_v44, 0.0 }
 0x731   :  { %2225 = vpow2.f32 %v779_v35 }
 0x732   :  { %v781_v42 = vmul.f32 1.442695, %v775_v28  ;;  %v783_v45 = vmul.f32 1.442695, %v776_v36 }
 0x734   :  { %2227 = vpow2.f32 %v781_v42 }
 0x735   :  { %2229 = vpow2.f32 %v783_v45 }
 0x736   :  { %v2721_v39 = vpop.eup %2217 }
 0x737   :  { %v2725_v40 = vpop.eup %2219  ;;  %v603_v37 = vsel %vm575_vm2, %v2721_v39, 0.0 }
 0x738   :  { %v2729_v43 = vpop.eup %2221  ;;  %v606_v49 = vsel %vm575_vm2, %v2725_v40, 0.0 }
 0x739   :  { %v609_v52 = vsel %vm575_vm2, %v2729_v43, 0.0 }
 0x73a   :  { %v2733_v51 = vpop.eup %2223 }
 0x73b   :  { %v2737_v2 = vpop.eup %2225  ;;  %v785_v3 = vsel %vm575_vm2, %v2733_v51, 0.0 }
 0x73c   :  { %v788_v5 = vsel %vm575_vm2, %v2737_v2, 0.0 }
 0x73e   :  { %v2741_v4 = vpop.eup %2227 }
 0x73f   :  { %v2745_v54 = vpop.eup %2229  ;;  %v791_v56 = vsel %vm575_vm2, %v2741_v4, 0.0 }
 0x740   :  { %v794_v8 = vsel %vm575_vm2, %v2745_v54, 0.0 }
 0x7ce   :  { %v2683_v47 = vpop.f32.mrb[20].mxu1 }
 0x7cf   :  { %v2685_v57 = vpop.f32.mrb[21].mxu1 }
 0x7d0   :  { %v2687_v58 = vpop.f32.mrb[22].mxu1 }
 0x7d1   :  { %v2116_v20 = vpack.i.bf16 %v2687_v58, %v2683_v47  ;;  %v2691_v30 = vpop.f32.mrb[23].mxu1 }
 0x7d2   :  { %v2111_v59 = vpack.i.bf16 %v2691_v30, %v2685_v57 }
 0x7de   :  { %v2063_v12 = vpop.f32.mrb[24].mxu1 }
 0x7df   :  { %v1113_v53 = vpop.f32.mrb[25].mxu1  ;;  %v1130_v1 = vmul.f32 0.25, %v2063_v12 }
 0x7e0   :  { %v1128_v17 = vmul.f32 0.25, %v1113_v53  ;;  %v2064_v18 = vpop.f32.mrb[26].mxu1 }
 0x7e1   :  { %v1116_v63 = vpop.f32.mrb[27].mxu1  ;;  %v1131_v24 = vmul.f32 0.25, %v2064_v18  ;;  %v1139_v34 = vadd.f32 %v1873_v10, %v1130_v1 }
 0x7e2   :  { %v1129_v25 = vmul.f32 0.25, %v1116_v63  ;;  %v1137_v26 = vadd.f32 %v1871_v48, %v1128_v17 }
 0x7e3   :  { %v1140_v41 = vadd.f32 %v1874_v11, %v1131_v24  ;;  %v1147_v55 = vsel %vm575_vm2, %v1139_v34, -inf }
 0x7e4   :  { %v1141_v29 = vsel %vm575_vm2, %v1137_v26, -inf  ;;  %v1138_v33 = vadd.f32 %v1872_v22, %v1129_v25 }
 0x7e5   :  { %1142 = vmax.xlane.f32.xlu0 %v1141_v29  ;;  %v1150_v46 = vsel %vm575_vm2, %v1140_v41, -inf }
 0x7e6   :  { %v1144_v38 = vsel %vm575_vm2, %v1138_v33, -inf }
 0x7e7   :  { %1145 = vmax.xlane.f32.xlu1 %v1144_v38 }
 0x7e9   :  { %1148 = vmax.xlane.f32.xlu0 %v1147_v55 }
 0x7eb   :  { %1151 = vmax.xlane.f32.xlu1 %v1150_v46 }
 0x7ed   :  { %601 = vadd.xlane.f32.xlu0 %v600_v15 }
 0x7ef   :  { %604 = vadd.xlane.f32.xlu1 %v603_v37 }
 0x7f1   :  { %607 = vadd.xlane.f32.xlu0 %v606_v49 }
 0x7f3   :  { %610 = vadd.xlane.f32.xlu1 %v609_v52 }
 0x7f5   :  { %786 = vadd.xlane.f32.xlu0 %v785_v3 }
 0x7f7   :  { %789 = vadd.xlane.f32.xlu1 %v788_v5 }
 0x7f9   :  { %792 = vadd.xlane.f32.xlu0 %v791_v56 }
 0x7fb   :  { %795 = vadd.xlane.f32.xlu1 %v794_v8 }
 0x80c   :  { %811 = vrot.lane.b32.xlu1 %v2509_v31, %s2289_s24 }
 0x810   :  { %1187 = vrot.lane.b32.xlu1 %v2498_v21, %s2294_s22 }
 0x872   :  { %v1143_v12 = vpop.xlane.xlu0 %1142 }
 0x873   :  { %v1153_v13 = vsub.f32 %v1137_v26, %v1143_v12 }
 0x874   :  { %v1146_v14 = vpop.xlane.xlu1 %1145 }
 0x875   :  { %v1157_v53 = vmul.f32 1.442695, %v1153_v13  ;;  %v1154_v48 = vsub.f32 %v1138_v33, %v1146_v14 }
 0x876   :  { %v1149_v16 = vpop.xlane.xlu0 %1148 }
 0x877   :  { %v1159_v1 = vmul.f32 1.442695, %v1154_v48  ;;  %v1155_v17 = vsub.f32 %v1139_v34, %v1149_v16  ;;  %2231 = vpow2.f32 %v1157_v53 }
 0x878   :  { %v1152_v18 = vpop.xlane.xlu1 %1151 }
 0x879   :  { %v1161_v19 = vmul.f32 1.442695, %v1155_v17  ;;  %v1156_v50 = vsub.f32 %v1140_v41, %v1152_v18  ;;  %2233 = vpow2.f32 %v1159_v1 }
 0x87a   :  { %v602_v63 = vpop.xlane.xlu0 %601 }
 0x87b   :  { %2235 = vpow2.f32 %v1161_v19  ;;  %v1163_v22 = vmul.f32 1.442695, %v1156_v50 }
 0x87c   :  { %2237 = vrcp.f32 %v602_v63  ;;  %v605_v10 = vpop.xlane.xlu1 %604 }
 0x87d   :  { %2239 = vpow2.f32 %v1163_v22 }
 0x87e   :  { %2241 = vrcp.f32 %v605_v10  ;;  %v608_v23 = vpop.xlane.xlu0 %607 }
 0x87f   :  { %2243 = vrcp.f32 %v608_v23 }
 0x880   :  { %v611_v24 = vpop.xlane.xlu1 %610 }
 0x881   :  { %2245 = vrcp.f32 %v611_v24  ;;  %v2755_v26 = vpop.eup %2231 }
 0x882   :  { %v787_v25 = vpop.xlane.xlu0 %786  ;;  %v1165_v55 = vsel %vm575_vm2, %v2755_v26, 0.0 }
 0x883   :  { %2247 = vrcp.f32 %v787_v25  ;;  %v2757_v27 = vpop.eup %2233 }
 0x884   :  { %v790_v28 = vpop.xlane.xlu1 %789  ;;  %v1168_v49 = vsel %vm575_vm2, %v2757_v27, 0.0 }
 0x885   :  { %v2759_v11 = vpop.eup %2235  ;;  %2249 = vrcp.f32 %v790_v28 }
 0x886   :  { %v2238_v29 = vpop.eup %2237  ;;  %v1171_v33 = vsel %vm575_vm2, %v2759_v11, 0.0  ;;  %v793_v8 = vpop.xlane.xlu0 %792 }
 0x887   :  { %v2240_v34 = vpop.eup %2239  ;;  %1172 = vadd.xlane.f32.xlu0 %v1171_v33  ;;  %v616_v41 = vmul.f32 %v2238_v29, %v2718_v44 }
 0x888   :  { %v2242_v35 = vpop.eup %2241  ;;  %v1174_v36 = vsel %vm575_vm2, %v2240_v34, 0.0 }
 0x889   :  { %v2244_v38 = vpop.eup %2243  ;;  %1175 = vadd.xlane.f32.xlu1 %v1174_v36  ;;  %v617_v42 = vmul.f32 %v2242_v35, %v2721_v39 }
 0x88a   :  { %v618_v15 = vmul.f32 %v2244_v38, %v2725_v40  ;;  %v796_v40 = vpop.xlane.xlu1 %795  ;;  %v2154_v38 = vld [vmem:[%s3034_s8 + $0x18] sm:$0xff]  }
 0x88b   :  { %v2246_v45 = vpop.eup %2245  ;;  %1166 = vadd.xlane.f32.xlu0 %v1165_v55  ;;  %v620_v46 = vpack.c.bf16 %v617_v42, %v616_v41  ;;  %2251 = vrcp.f32 %v796_v40 }
 0x88c   :  { %v619_v37 = vmul.f32 %v2246_v45, %v2729_v43  ;;  %2253 = vrcp.f32 %v793_v8 }
 0x88d   :  { %v2248_v52 = vpop.eup %2247  ;;  %2021 = vmatprep.mubr.msk.bf16.mxu0 %vm575_vm2, %v620_v46  ;;  %1169 = vadd.xlane.f32.xlu1 %v1168_v49 }
 0x88e   :  { %v621_v44 = vpack.c.bf16 %v619_v37, %v618_v15  ;;  %v801_v39 = vmul.f32 %v2248_v52, %v2733_v51  ;;  %v812_v43 = vpop.permute.xlu1 %811 }
 0x88f   :  { %v2250_v3 = vpop.eup %2249 }
 0x890   :  { %2022 = vmatmul.mubr.msk.bf16.vlgmr.msra.gmra.mrb[4].mxu0 %vm575_vm2, %v621_v44  ;;  %v802_v5 = vmul.f32 %v2250_v3, %v2737_v2 }
 0x892   :  { %v805_v56 = vpack.c.bf16 %v802_v5, %v801_v39  ;;  %v1188_v12 = vpop.permute.xlu1 %1187 }
 0x894   :  { %2037 = vmatprep.mubr.msk.bf16.mxu0 %vm575_vm2, %v805_v56 }
 0x895   :  { %v2252_v53 = vpop.eup %2251 }
 0x89e   :  { %1189 = vrot.lane.b32.xlu1 %v2509_v31, %s2294_s22  ;;  %v2254_v31 = vpop.eup %2253 }
 0x89f   :  { %v803_v16 = vmul.f32 %v2254_v31, %v2741_v4 }
 0x8a1   :  { %809 = vrot.lane.b32.xlu0 %v2498_v21, %s2289_s24  ;;  %v804_v21 = vmul.f32 %v2252_v53, %v2745_v54 }
 0x8a3   :  { %v806_v17 = vpack.c.bf16 %v804_v21, %v803_v16 }
 0x914   :  { %v1173_v13 = vpop.xlane.xlu0 %1172 }
 0x916   :  { %v1176_v14 = vpop.xlane.xlu1 %1175 }
 0x918   :  { %v1167_v51 = vpop.xlane.xlu0 %1166 }
 0x919   :  { %2255 = vrcp.f32 %v1167_v51 }
 0x91a   :  { %2257 = vrcp.f32 %v1176_v14  ;;  %v1170_v2 = vpop.xlane.xlu1 %1169 }
 0x91b   :  { %2259 = vrcp.f32 %v1170_v2 }
 0x91c   :  { %2261 = vrcp.f32 %v1173_v13  ;;  %v810_v48 = vpop.permute.xlu0 %809 }
 0x91d   :  { %2033 = vmatprep.subr.bf16.mxu0 %v810_v48 }
 0x91e   :  { %2034 = vmatpush3.bf16.msra.mxu0 %v810_v48  ;;  %v1190_v63 = vpop.permute.xlu1 %1189 }
 0x91f   :  { %2035 = vmatprep.subr.bf16.mxu0 %v812_v43 }
 0x922   :  { %2036 = vmatpush3.bf16.msra.mxu0 %v812_v43 }
 0x923   :  { %v2256_v1 = vpop.eup %2255  ;;  %2065 = vmatprep.subr.bf16.mxu0 %v1188_v12 }
 0x924   :  { %v2258_v18 = vpop.eup %2257  ;;  %v1181_v22 = vmul.f32 %v2256_v1, %v2755_v26  ;;  %v2151_v26 = vld [vmem:[%s3034_s8] sm:$0xff]  }
 0x925   :  { %v2260_v19 = vpop.eup %2259  ;;  %2038 = vmatmul.mubr.msk.bf16.vlgmr.msra.gmra.mrb[8].mxu0 %vm575_vm2, %v806_v17  ;;  %v1184_v23 = vmul.f32 %v2258_v18, %v2240_v34 }
 0x926   :  { %v2262_v50 = vpop.eup %2261  ;;  %2066 = vmatpush3.bf16.msra.mxu0 %v1188_v12  ;;  %v1182_v10 = vmul.f32 %v2260_v19, %v2757_v27  ;;  %v2152_v27 = vld [vmem:[%s3034_s8 + $0x8] sm:$0xff]  }
 0x927   :  { %2067 = vmatprep.subr.bf16.mxu0 %v1190_v63  ;;  %v1183_v4 = vmul.f32 %v2262_v50, %v2759_v11  ;;  %v2153_v11 = vld [vmem:[%s3034_s8 + $0x10] sm:$0xff]  }
 0x928   :  { %v1185_v54 = vpack.c.bf16 %v1182_v10, %v1181_v22 }
 0x929   :  { %v1186_v24 = vpack.c.bf16 %v1184_v23, %v1183_v4  ;;  %v1877_v23 = vld [vmem:[%s3035_s9] ss:$0 sm:$0xff] }
 0x92a   :  { %2068 = vmatpush3.bf16.msra.mxu0 %v1190_v63  ;;  %2069 = vmatprep.mubr.msk.bf16.mxu0 %vm575_vm2, %v1185_v54 }
 0x92b   :  { %2073 = vmatprep.subr.bf16.mxu0 %v2151_v26 }
 0x92d   :  { %2070 = vmatmul.mubr.msk.bf16.vlgmr.msra.gmra.mrb[12].mxu0 %vm575_vm2, %v1186_v24 }
 0x92e   :  { %2074 = vmatpush3.bf16.msra.mxu0 %v2151_v26 }
 0x92f   :  { %2075 = vmatprep.subr.bf16.mxu0 %v2152_v27 }
 0x932   :  { %2076 = vmatpush3.bf16.msra.mxu0 %v2152_v27 }
 0x933   :  { %2077 = vmatprep.subr.bf16.mxu0 %v2153_v11 }
 0x936   :  { %2078 = vmatpush3.bf16.msra.mxu0 %v2153_v11 }
 0x937   :  { %2079 = vmatprep.subr.bf16.mxu0 %v2154_v38 }
 0x93a   :  { %2080 = vmatpush3.bf16.msra.mxu0 %v2154_v38 }
 0x963   :  { %v2023_v25 = vpop.f32.mrb[4].mxu0 }
 0x964   :  { %v664_v28 = vpop.f32.mrb[5].mxu0 }
 0x965   :  { %v2024_v29 = vpop.f32.mrb[6].mxu0 }
 0x966   :  { %v667_v33 = vpop.f32.mrb[7].mxu0 }
 0x9f8   :  { %v2039_v34 = vpop.f32.mrb[8].mxu0 }
 0x9f9   :  { %v855_v35 = vpop.f32.mrb[9].mxu0 }
 0x9fa   :  { %v2040_v36 = vpop.f32.mrb[10].mxu0 }
 0x9fb   :  { %v2106_v41 = vpack.i.bf16 %v2040_v36, %v2039_v34  ;;  %v858_v42 = vpop.f32.mrb[11].mxu0 }
 0x9fc   :  { %v2101_v55 = vpack.i.bf16 %v858_v42, %v855_v35 }
 0x9fd   :  { %2107 = vrot.lane.b32.xlu1 %v2106_v41, %s2293_s21 }
 0x9fe   :  { %2102 = vrot.lane.b32.xlu0 %v2101_v55, %s2293_s21 }
 0xa00   :  { %v2071_v45 = vpop.f32.mrb[12].mxu0 }
 0xa01   :  { %2117 = vrot.lane.b32.xlu1 %v2116_v20, %s2292_s27  ;;  %v1233_v46 = vpop.f32.mrb[13].mxu0 }
 0xa02   :  { %2112 = vrot.lane.b32.xlu0 %v2111_v59, %s2292_s27  ;;  %v2072_v15 = vpop.f32.mrb[14].mxu0 }
 0xa03   :  { %v2126_v37 = vpack.i.bf16 %v2072_v15, %v2071_v45  ;;  %v1236_v49 = vpop.f32.mrb[15].mxu0 }
 0xa04   :  { %v2121_v52 = vpack.i.bf16 %v1236_v49, %v1233_v46 }
 0xa05   :  { %2127 = vrot.lane.b32.xlu1 %v2126_v37, %s2291_s26 }
 0xa06   :  { %2122 = vrot.lane.b32.xlu0 %v2121_v52, %s2291_s26 }
 0xa6f   :  { %v2108_v44 = vpop.permute.xlu1 %2107 }
 0xa70   :  { %v2103_v3 = vpop.permute.xlu0 %2102  ;;  %v2110_v39 = vunpack.i.h.bf16 %v2108_v44  ;;  %v2109_v5 = vunpack.i.l.bf16 %v2108_v44 }
 0xa71   :  { %v2105_v58 = vunpack.i.h.bf16 %v2103_v3  ;;  %v2104_v20 = vunpack.i.l.bf16 %v2103_v3 }
 0xa72   :  { %v1299_v59 = vsel %vm501_vm1, %v2024_v29, %v2110_v39  ;;  %v1298_v8 = vsel %vm501_vm1, %v2023_v25, %v2109_v5 }
 0xa73   :  { %v2118_v47 = vpop.permute.xlu1 %2117  ;;  %v1297_v13 = vsel %vm501_vm1, %v667_v33, %v2105_v58  ;;  %v1296_v14 = vsel %vm501_vm1, %v664_v28, %v2104_v20 }
 0xa74   :  { %v2113_v56 = vpop.permute.xlu0 %2112  ;;  %v2120_v40 = vunpack.i.h.bf16 %v2118_v47  ;;  %v2119_v43 = vunpack.i.l.bf16 %v2118_v47 }
 0xa75   :  { %v2115_v57 = vunpack.i.h.bf16 %v2113_v56  ;;  %v2114_v30 = vunpack.i.l.bf16 %v2113_v56 }
 0xa76   :  { %v1302_v48 = vsel %vm575_vm2, %v1298_v8, %v2119_v43  ;;  %v1303_v31 = vsel %vm575_vm2, %v1299_v59, %v2120_v40  ;;  %v2157_v43 = vld [vmem:[%s3036_s12 + $0x4] ss:$8 sps:$4 sm:$0xff]   ;;  %v2158_v59 = vld [vmem:[%s3036_s12 + $0x10] ss:$8 sps:$4 sm:$0xff]  }
 0xa77   :  { %v2128_v12 = vpop.permute.xlu1 %2127  ;;  %v1300_v1 = vsel %vm575_vm2, %v1296_v14, %v2114_v30  ;;  %v1301_v17 = vsel %vm575_vm2, %v1297_v13, %v2115_v57  ;;  %v2155_v57 = vld [vmem:[%s3036_s12] ss:$8 sps:$4 sm:$0xff]   ;;  %1531 = vmatprep.subr.bf16.mxu1 %v2157_v43  ;;  %v2160_v30 = vld [vmem:[%s3036_s12 + $0x14] ss:$8 sps:$4 sm:$0xff]   ;;  %v2163_v8 = vld [vmem:[%s3036_s12 + $0x24] ss:$8 sps:$4 sm:$0xff]  }
 0xa78   :  { %v2130_v51 = vunpack.i.h.bf16 %v2128_v12  ;;  %v2129_v2 = vunpack.i.l.bf16 %v2128_v12  ;;  %v2123_v53 = vpop.permute.xlu0 %2122  ;;  %1532 = vmatpush1.bf16.msra.mxu1 %v2155_v57  ;;  %v2161_v12 = vld [vmem:[%s3036_s12 + $0x20] ss:$8 sps:$4 sm:$0xff]   ;;  %v2166_v13 = vld [vmem:[%s3036_s12 + $0x34] ss:$8 sps:$4 sm:$0xff]   ;;  %v2164_v14 = vld [vmem:[%s3036_s12 + $0x30] ss:$8 sps:$4 sm:$0xff]  }
 0xa79   :  { %v2125_v21 = vunpack.i.h.bf16 %v2123_v53  ;;  %v2124_v16 = vunpack.i.l.bf16 %v2123_v53  ;;  %1533 = vmatprep.subr.bf16.mxu1 %v2160_v30 }
 0xa7a   :  { %v1307_v18 = vsel %vm1304_vm3, %v1302_v48, %v2129_v2  ;;  %v1308_v19 = vsel %vm1304_vm3, %v1303_v31, %v2130_v51 }
 0xa7b   :  { %v1310_v50 = vpack.c.bf16 %v1308_v19, %v1307_v18  ;;  %v1306_v63 = vsel %vm1304_vm3, %v1301_v17, %v2125_v21  ;;  %v1305_v22 = vsel %vm1304_vm3, %v1300_v1, %v2124_v16 }
 0xa7c   :  { %v1309_v10 = vpack.c.bf16 %v1306_v63, %v1305_v22  ;;  %1534 = vmatpush1.bf16.msra.mxu1 %v2158_v59  ;;  %v1884_v22 = vld [vmem:[%s3037_s10] ss:$0 sm:$0xff] }
 0xa7d   :  { %1535 = vmatprep.subr.bf16.mxu1 %v2163_v8 }
 0xa7e   :  { %2081 = vmatprep.mubr.msk.bf16.mxu0 %vm307_vm0, %v1309_v10 }
 0xa7f   :  { %2082 = vmatmul.mubr.msk.bf16.vlgmr.msra.gmra.mrb[16].mxu0 %vm307_vm0, %v1310_v50 }
 0xa80   :  { %1536 = vmatpush1.bf16.msra.mxu1 %v2161_v12 }
 0xa81   :  { %1537 = vmatprep.subr.bf16.mxu1 %v2166_v13 }
 0xa84   :  { %1538 = vmatpush1.bf16.msra.mxu1 %v2164_v14 }
 0xb52   :  { %v2083_v54 = vpop.f32.mrb[16].mxu0 }
 0xb53   :  { %v1390_v4 = vadd.f32 %v2083_v54, %v1877_v23  ;;  %v1381_v24 = vpop.f32.mrb[17].mxu0 }
 0xb54   :  { %v1382_v25 = vadd.f32 %v1877_v23, %v1381_v24  ;;  %v2084_v28 = vpop.f32.mrb[18].mxu0 }
 0xb55   :  { %v2831_v29 = vadd.f32 %v2427_v60, %v1390_v4  ;;  %v1393_v33 = vadd.f32 %v2084_v28, %v1877_v23  ;;  %v1384_v26 = vpop.f32.mrb[19].mxu0 }
 0xb56   :  { %v2834_v27 = vadd.f32 %v1382_v25, %v2429_v61  ;;  %v1385_v11 = vadd.f32 %v1877_v23, %v1384_v26  ;;  %v1885_v25 = vld [vmem:[%s3038_s11] ss:$0 sm:$0xff] }
 0xb57   :  { %v2837_v34 = vadd.f32 %v2431_v62, %v1393_v33  ;;  %v1406_v38 = vsel %vm307_vm0, %v2831_v29, 0.0 }
 0xb58   :  { %v2840_v35 = vadd.f32 %v1385_v11, %v2435_v0  ;;  %v1400_v36 = vsel %vm307_vm0, %v2834_v27, 0.0 }
 0xb59   :  { %1401 = vadd.xlane.f32.xlu0 %v1400_v36  ;;  %v1409_v61 = vsel %vm307_vm0, %v2837_v34, 0.0 }
 0xb5a   :  { %v1403_v60 = vsel %vm307_vm0, %v2840_v35, 0.0 }
 0xb5b   :  { %1404 = vadd.xlane.f32.xlu1 %v1403_v60 }
 0xb5d   :  { %1407 = vadd.xlane.f32.xlu0 %v1406_v38 }
 0xb61   :  { %1410 = vadd.xlane.f32.xlu0 %v1409_v61 }
 0xbe6   :  { %v1402_v62 = vpop.xlane.xlu0 %1401 }
 0xbe7   :  { %v1412_v41 = vmul.f32 0.015625, %v1402_v62 }
 0xbe8   :  { %v1405_v0 = vpop.xlane.xlu1 %1404 }
 0xbe9   :  { %v1416_v42 = vsub.f32 %v2834_v27, %v1412_v41  ;;  %v1413_v55 = vmul.f32 0.015625, %v1405_v0 }
 0xbea   :  { %v1408_v45 = vpop.xlane.xlu0 %1407 }
 0xbeb   :  { %v1417_v46 = vsub.f32 %v2840_v35, %v1413_v55  ;;  %v1414_v15 = vmul.f32 0.015625, %v1408_v45  ;;  %v1420_v37 = vmul.f32 %v1416_v42, %v1416_v42  ;;  %v2167_v55 = vld [vmem:[%s3039_s14 + $0x40] sm:$0xff]  }
 0xbec   :  { %v2168_v45 = vld [vmem:[%s3039_s14] sm:$0xff]   ;;  %1961 = vmatprep.subr.bf16.mxu0 %v2167_v55 }
 0xbed   :  { %v1418_v49 = vsub.f32 %v2831_v29, %v1414_v15  ;;  %v1424_v52 = vsel %vm307_vm0, %v1420_v37, 0.0  ;;  %v1421_v44 = vmul.f32 %v1417_v46, %v1417_v46  ;;  %1962 = vmatpush3.bf16.msra.mxu0 %v2168_v45  ;;  %v2171_v15 = vld [vmem:[%s3039_s14 + $0x50] sm:$0xff]  }
 0xbee   :  { %1425 = vadd.xlane.f32.xlu0 %v1424_v52  ;;  %v1411_v3 = vpop.xlane.xlu0 %1410  ;;  %v2172_v37 = vld [vmem:[%s3039_s14 + $0x10] sm:$0xff]   ;;  %v2174_v52 = vld [vmem:[%s3039_s14 + $0x18] sm:$0xff]  }
 0xbef   :  { %v1415_v39 = vmul.f32 0.015625, %v1411_v3  ;;  %v1427_v5 = vsel %vm307_vm0, %v1421_v44, 0.0  ;;  %v1422_v47 = vmul.f32 %v1418_v49, %v1418_v49  ;;  %v2175_v44 = vld [vmem:[%s3039_s14 + $0x60] sm:$0xff]  }
 0xbf0   :  { %1428 = vadd.xlane.f32.xlu1 %v1427_v5  ;;  %v2176_v3 = vld [vmem:[%s3039_s14 + $0x20] sm:$0xff]   ;;  %v2178_v5 = vld [vmem:[%s3039_s14 + $0x28] sm:$0xff]  }
 0xbf1   :  { %v1419_v58 = vsub.f32 %v2837_v34, %v1415_v39  ;;  %v1430_v20 = vsel %vm307_vm0, %v1422_v47, 0.0  ;;  %v2177_v39 = vld [vmem:[%s3039_s14 + $0x68] sm:$0xff]   ;;  %v2179_v47 = vld [vmem:[%s3039_s14 + $0x70] sm:$0xff]  }
 0xbf2   :  { %1431 = vadd.xlane.f32.xlu0 %v1430_v20  ;;  %v2181_v20 = vld [vmem:[%s3039_s14 + $0x78] sm:$0xff]  }
 0xbf3   :  { %v1423_v56 = vmul.f32 %v1419_v58, %v1419_v58 }
 0xbf5   :  { %v1433_v40 = vsel %vm307_vm0, %v1423_v56, 0.0  ;;  %v2182_v56 = vld [vmem:[%s3039_s14 + $0x38] sm:$0xff]  }
 0xbf6   :  { %1434 = vadd.xlane.f32.xlu1 %v1433_v40  ;;  %v273_v40 = vld [vmem:[%s3040_s13] sm:$0x3] }
 0xbf7   :  { %v1478_v43 = vrot.slane %v273_v40, %v386_v7  ;;  %v1482_v57 = vrot.slane %v273_v40, %v390_v9 }
 0xc7b   :  { %v1426_v51 = vpop.xlane.xlu0 %1425 }
 0xc7c   :  { %v1436_v2 = vmul.f32 0.015625, %v1426_v51 }
 0xc7d   :  { %v1429_v53 = vpop.xlane.xlu1 %1428 }
 0xc7e   :  { %v1440_v48 = vadd.f32 1e-05, %v1436_v2  ;;  %v1437_v31 = vmul.f32 0.015625, %v1429_v53 }
 0xc7f   :  { %v1432_v21 = vpop.xlane.xlu0 %1431 }
 0xc80   :  { %2263 = vrsqrt.f32 %v1440_v48  ;;  %v1441_v16 = vadd.f32 1e-05, %v1437_v31  ;;  %v1438_v1 = vmul.f32 0.015625, %v1432_v21 }
 0xc82   :  { %2265 = vrsqrt.f32 %v1441_v16  ;;  %v1442_v17 = vadd.f32 1e-05, %v1438_v1 }
 0xc83   :  { %v1435_v18 = vpop.xlane.xlu1 %1434 }
 0xc84   :  { %2267 = vrsqrt.f32 %v1442_v17  ;;  %v1439_v19 = vmul.f32 0.015625, %v1435_v18 }
 0xc86   :  { %v1443_v50 = vadd.f32 1e-05, %v1439_v19 }
 0xc88   :  { %2269 = vrsqrt.f32 %v1443_v50 }
 0xc8a   :  { %v2264_v63 = vpop.eup %2263 }
 0xc8b   :  { %v1448_v10 = vmul.f32 %v2264_v63, %v1416_v42 }
 0xc8c   :  { %v2266_v23 = vpop.eup %2265 }
 0xc8d   :  { %v1458_v54 = vmul.f32 %v1884_v22, %v1448_v10  ;;  %v1449_v4 = vmul.f32 %v2266_v23, %v1417_v46  ;;  %v2169_v46 = vld [vmem:[%s3039_s14 + $0x48] sm:$0xff]  }
 0xc8e   :  { %v2268_v24 = vpop.eup %2267  ;;  %1963 = vmatprep.subr.bf16.mxu0 %v2169_v46 }
 0xc8f   :  { %v1459_v28 = vmul.f32 %v1884_v22, %v1449_v4  ;;  %v1450_v33 = vmul.f32 %v2268_v24, %v1418_v49  ;;  %v1468_v26 = vadd.f32 %v1885_v25, %v1458_v54  ;;  %v2173_v49 = vld [vmem:[%s3039_s14 + $0x58] sm:$0xff]  }
 0xc91   :  { %v1469_v11 = vadd.f32 %v1885_v25, %v1459_v28  ;;  %v1460_v61 = vmul.f32 %v1884_v22, %v1450_v33 }
 0xc92   :  { %v2270_v36 = vpop.eup %2269 }
 0xc93   :  { %v1451_v60 = vmul.f32 %v2270_v36, %v1419_v58  ;;  %v1472_v38 = vpack.c.bf16 %v1469_v11, %v1468_v26  ;;  %v1470_v0 = vadd.f32 %v1885_v25, %v1460_v61  ;;  %v2180_v58 = vld [vmem:[%s3039_s14 + $0x30] sm:$0xff]  }
 0xc95   :  { %1894 = vmatmul.mubr.msk.bf16.vlgmr.msra.gmra.mrb[28].mxu1 %vm307_vm0, %v1472_v38  ;;  %v1461_v62 = vmul.f32 %v1884_v22, %v1451_v60 }
 0xc96   :  { %1573 = vmatprep.mubr.bf16.mxu1 %v2287_v32  ;;  %v2170_v32 = vld [vmem:[%s3039_s14 + $0x8] sm:$0xff]  }
 0xc97   :  { %v1471_v41 = vadd.f32 %v1885_v25, %v1461_v62  ;;  %1964 = vmatpush3.bf16.msra.mxu0 %v2170_v32 }
 0xc98   :  { %1965 = vmatprep.subr.bf16.mxu0 %v2171_v15 }
 0xc99   :  { %v1473_v42 = vpack.c.bf16 %v1471_v41, %v1470_v0 }
 0xc9b   :  { %1966 = vmatpush3.bf16.msra.mxu0 %v2172_v37 }
 0xc9c   :  { %1967 = vmatprep.subr.bf16.mxu0 %v2173_v49 }
 0xc9d   :  { %1895 = vmatmul.mubr.msk.bf16.gmra.mrb[32].mxu1 %vm307_vm0, %v1473_v42 }
 0xc9f   :  { %1968 = vmatpush3.bf16.msra.mxu0 %v2174_v52 }
 0xca0   :  { %1969 = vmatprep.subr.bf16.mxu0 %v2175_v44 }
 0xca3   :  { %1970 = vmatpush3.bf16.msra.mxu0 %v2176_v3 }
 0xca4   :  { %1971 = vmatprep.subr.bf16.mxu0 %v2177_v39 }
 0xca7   :  { %1972 = vmatpush3.bf16.msra.mxu0 %v2178_v5 }
 0xca8   :  { %1973 = vmatprep.subr.bf16.mxu0 %v2179_v47 }
 0xcab   :  { %1974 = vmatpush3.bf16.msra.mxu0 %v2180_v58 }
 0xcac   :  { %1975 = vmatprep.subr.bf16.mxu0 %v2181_v20 }
 0xcaf   :  { %1976 = vmatpush3.bf16.msra.mxu0 %v2182_v56 }
 0xd68   :  { %v1565_v30 = vpop.f32.mrb[28].mxu1 }
 0xd69   :  { %v2946_v59 = vadd.f32 %v1565_v30, %v1478_v43  ;;  %v1567_v8 = vpop.f32.mrb[29].mxu1 }
 0xd6a   :  { %v2948_v12 = vadd.f32 %v1567_v8, %v1482_v57  ;;  %v1569_v13 = vpop.f32.mrb[30].mxu1 }
 0xd6b   :  { %v1584_v14 = vmul.f32 %v2946_v59, %v2946_v59  ;;  %v2952_v51 = vadd.f32 %v1569_v13, %v1478_v43  ;;  %v1571_v2 = vpop.f32.mrb[31].mxu1 }
 0xd6c   :  { %v1585_v53 = vmul.f32 %v2948_v12, %v2948_v12  ;;  %v2956_v7 = vadd.f32 %v1571_v2, %v1482_v57 }
 0xd6d   :  { %v1592_v6 = vmul.f32 %v1584_v14, %v2946_v59  ;;  %v1586_v9 = vmul.f32 %v2952_v51, %v2952_v51 }
 0xd6e   :  { %v1593_v48 = vmul.f32 %v1585_v53, %v2948_v12  ;;  %v1587_v31 = vmul.f32 %v2956_v7, %v2956_v7 }
 0xd6f   :  { %v1600_v21 = vmul.f32 0.044715, %v1592_v6  ;;  %v1594_v16 = vmul.f32 %v1586_v9, %v2952_v51 }
 0xd70   :  { %v1601_v1 = vmul.f32 0.044715, %v1593_v48  ;;  %v1595_v17 = vmul.f32 %v1587_v31, %v2956_v7  ;;  %v1575_v18 = vpop.f32.mrb[32].mxu1 }
 0xd71   :  { %v1608_v19 = vadd.f32 %v1600_v21, %v2946_v59  ;;  %v1602_v50 = vmul.f32 0.044715, %v1594_v16  ;;  %v2967_v63 = vadd.f32 %v1575_v18, %v1478_v43  ;;  %v1577_v22 = vpop.f32.mrb[33].mxu1 }
 0xd72   :  { %v1609_v10 = vadd.f32 %v1601_v1, %v2948_v12  ;;  %v1603_v23 = vmul.f32 0.044715, %v1595_v17  ;;  %v2970_v54 = vadd.f32 %v1577_v22, %v1482_v57  ;;  %v1579_v4 = vpop.f32.mrb[34].mxu1 }
 0xd73   :  { %v1616_v24 = vmul.f32 0.7978846, %v1608_v19  ;;  %v1610_v25 = vadd.f32 %v1602_v50, %v2952_v51  ;;  %v1588_v28 = vmul.f32 %v2967_v63, %v2967_v63  ;;  %v2975_v33 = vadd.f32 %v1579_v4, %v1478_v43  ;;  %v1581_v26 = vpop.f32.mrb[35].mxu1 }
 0xd74   :  { %v1617_v11 = vmul.f32 0.7978846, %v1609_v10  ;;  %v1611_v36 = vadd.f32 %v1603_v23, %v2956_v7  ;;  %v1589_v60 = vmul.f32 %v2970_v54, %v2970_v54  ;;  %v2980_v38 = vadd.f32 %v1581_v26, %v1482_v57 }
 0xd75   :  { %2271 = vtanh.f32 %v1616_v24  ;;  %v1618_v61 = vmul.f32 0.7978846, %v1610_v25  ;;  %v1596_v62 = vmul.f32 %v1588_v28, %v2967_v63  ;;  %v1590_v41 = vmul.f32 %v2975_v33, %v2975_v33 }
 0xd76   :  { %2273 = vtanh.f32 %v1617_v11  ;;  %v1619_v0 = vmul.f32 0.7978846, %v1611_v36  ;;  %v1597_v42 = vmul.f32 %v1589_v60, %v2970_v54  ;;  %v1591_v55 = vmul.f32 %v2980_v38, %v2980_v38 }
 0xd77   :  { %2275 = vtanh.f32 %v1618_v61  ;;  %v1604_v45 = vmul.f32 0.044715, %v1596_v62  ;;  %v1598_v46 = vmul.f32 %v1590_v41, %v2975_v33 }
 0xd78   :  { %2277 = vtanh.f32 %v1619_v0  ;;  %v1605_v32 = vmul.f32 0.044715, %v1597_v42  ;;  %v1599_v15 = vmul.f32 %v1591_v55, %v2980_v38  ;;  %v1912_v42 = vld [vmem:[%s3041_s15] ss:$0 sm:$0xff] }
 0xd79   :  { %v1612_v37 = vadd.f32 %v1604_v45, %v2967_v63  ;;  %v1606_v49 = vmul.f32 0.044715, %v1598_v46 }
 0xd7a   :  { %v1613_v52 = vadd.f32 %v1605_v32, %v2970_v54  ;;  %v1607_v44 = vmul.f32 0.044715, %v1599_v15 }
 0xd7b   :  { %v1620_v3 = vmul.f32 0.7978846, %v1612_v37  ;;  %v1614_v39 = vadd.f32 %v1606_v49, %v2975_v33 }
 0xd7c   :  { %v1621_v5 = vmul.f32 0.7978846, %v1613_v52  ;;  %v1615_v47 = vadd.f32 %v1607_v44, %v2980_v38 }
 0xd7d   :  { %2279 = vtanh.f32 %v1620_v3  ;;  %v1622_v58 = vmul.f32 0.7978846, %v1614_v39 }
 0xd7e   :  { %2281 = vtanh.f32 %v1621_v5  ;;  %v1623_v20 = vmul.f32 0.7978846, %v1615_v47 }
 0xd7f   :  { %v2272_v56 = vpop.eup %2271  ;;  %2283 = vtanh.f32 %v1622_v58 }
 0xd80   :  { %v2274_v40 = vpop.eup %2273  ;;  %v1632_v43 = vadd.f32 1.0, %v2272_v56  ;;  %2285 = vtanh.f32 %v1623_v20 }
 0xd81   :  { %v2276_v57 = vpop.eup %2275  ;;  %v1633_v30 = vadd.f32 1.0, %v2274_v40 }
 0xd82   :  { %v2278_v8 = vpop.eup %2277  ;;  %v1640_v13 = vmul.f32 0.5, %v1632_v43  ;;  %v1634_v14 = vadd.f32 1.0, %v2276_v57 }
 0xd83   :  { %v1635_v2 = vadd.f32 1.0, %v2278_v8  ;;  %v1641_v53 = vmul.f32 0.5, %v1633_v30 }
 0xd84   :  { %v1642_v6 = vmul.f32 0.5, %v1634_v14  ;;  %v1648_v48 = vmul.f32 %v1640_v13, %v2946_v59 }
 0xd85   :  { %v1643_v9 = vmul.f32 0.5, %v1635_v2  ;;  %v1649_v16 = vmul.f32 %v1641_v53, %v2948_v12 }
 0xd86   :  { %v1650_v31 = vmul.f32 %v1642_v6, %v2952_v51 }
 0xd87   :  { %v2280_v21 = vpop.eup %2279  ;;  %v1651_v1 = vmul.f32 %v1643_v9, %v2956_v7 }
 0xd88   :  { %v2282_v17 = vpop.eup %2281  ;;  %v1656_v18 = vpack.c.bf16 %v1650_v31, %v1648_v48  ;;  %v1636_v19 = vadd.f32 1.0, %v2280_v21 }
 0xd89   :  { %v2284_v50 = vpop.eup %2283  ;;  %v1657_v22 = vpack.c.bf16 %v1651_v1, %v1649_v16  ;;  %v1637_v10 = vadd.f32 1.0, %v2282_v17 }
 0xd8a   :  { %v2286_v23 = vpop.eup %2285  ;;  %v1638_v4 = vadd.f32 1.0, %v2284_v50  ;;  %v1644_v24 = vmul.f32 0.5, %v1636_v19 }
 0xd8b   :  { %1788 = vmatprep.mubr.bf16.mxu0 %v1657_v22  ;;  %v1639_v25 = vadd.f32 1.0, %v2286_v23  ;;  %v1645_v28 = vmul.f32 0.5, %v1637_v10 }
 0xd8c   :  { %1789 = vmatmul.mubr.bf16.vlgmr.msra.gmra.mrb[20].mxu0 %v1656_v18  ;;  %v1646_v59 = vmul.f32 0.5, %v1638_v4  ;;  %v1652_v26 = vmul.f32 %v1644_v24, %v2967_v63 }
 0xd8d   :  { %v1647_v51 = vmul.f32 0.5, %v1639_v25  ;;  %v1653_v7 = vmul.f32 %v1645_v28, %v2970_v54 }
 0xd8e   :  { %v1654_v12 = vmul.f32 %v1646_v59, %v2975_v33 }
 0xd8f   :  { %v1655_v11 = vmul.f32 %v1647_v51, %v2980_v38 }
 0xd90   :  { %v1658_v36 = vpack.c.bf16 %v1654_v12, %v1652_v26 }
 0xd91   :  { %v1659_v60 = vpack.c.bf16 %v1655_v11, %v1653_v7 }
 0xd93   :  { %1796 = vmatprep.mubr.bf16.mxu0 %v1659_v60 }
 0xd94   :  { %1797 = vmatmul.mubr.bf16.gmra.mrb[24].mxu0 %v1658_v36 }
 0xe5f   :  { %v1977_v61 = vpop.f32.mrb[20].mxu0 }
 0xe60   :  { %v1978_v62 = vpop.f32.mrb[21].mxu0 }
 0xe61   :  { %v1979_v41 = vadd.f32 %v1978_v62, %v1977_v61  ;;  %v1980_v0 = vpop.f32.mrb[22].mxu0 }
 0xe62   :  { %v1981_v55 = vpop.f32.mrb[23].mxu0 }
 0xe63   :  { %v1805_v63 = vadd.f32 %v1979_v41, %v2834_v27  ;;  %v1982_v33 = vadd.f32 %v1981_v55, %v1980_v0 }
 0xe65   :  { %v1815_v45 = vadd.f32 %v1912_v42, %v1805_v63  ;;  %v1806_v54 = vadd.f32 %v1982_v33, %v2840_v35 }
 0xe67   :  { %1819 = vst.msk [vmem:[%s3042_s17] sm:$0xff] %vm307_vm0, %v1815_v45  ;;  %v1816_v38 = vadd.f32 %v1912_v42, %v1806_v54  ;;  %v1983_v46 = vpop.f32.mrb[24].mxu0 }
 0xe68   :  { %v1984_v32 = vpop.f32.mrb[25].mxu0 }
 0xe69   :  { %1820 = vst.msk [vmem:[%s3042_s17 + $0x8] sm:$0xff] %vm307_vm0, %v1816_v38  ;;  %v1985_v15 = vadd.f32 %v1984_v32, %v1983_v46  ;;  %v1986_v37 = vpop.f32.mrb[26].mxu0 }
 0xe6a   :  { %v1987_v27 = vpop.f32.mrb[27].mxu0 }
 0xe6b   :  { %v1807_v49 = vadd.f32 %v1985_v15, %v2831_v29  ;;  %v1988_v52 = vadd.f32 %v1987_v27, %v1986_v37 }
 0xe6d   :  { %v1817_v35 = vadd.f32 %v1912_v42, %v1807_v49  ;;  %v1808_v44 = vadd.f32 %v1988_v52, %v2837_v34 }
 0xe6f   :  { %1821 = vst.msk [vmem:[%s3042_s17 + $0x10] sm:$0xff] %vm307_vm0, %v1817_v35  ;;  %v1818_v3 = vadd.f32 %v1912_v42, %v1808_v44 }
 0xe71   :  { %1822 = vst.msk [vmem:[%s3042_s17 + $0x18] sm:$0xff] %vm307_vm0, %v1818_v3 }

// kernel: swin_forward.7
= control target key start
LH: loop header
LB: loop body
LE: loop exit
PB: predicated region body
PF: predicated region fallthrough
CT: control target
= control target key end

     0   :  { %s3107_s0 = inlined_call_operand.vmem [shape: f32[32,64], index: 0, kind: input, shape index: {}]   ;;  %s3108_s1 = inlined_call_operand.vmem [shape: f32[1,64], index: 1, kind: input, shape index: {}]   ;;  %s3109_s2 = inlined_call_operand.vmem [shape: f32[1,64], index: 2, kind: input, shape index: {}]   ;;  %s3110_s3 = inlined_call_operand.vmem [shape: bf16[64,192], index: 3, kind: input, shape index: {}]   ;;  %s3111_s4 = inlined_call_operand.vmem [shape: f32[1,192], index: 4, kind: input, shape index: {}]   ;;  %s3112_s5 = inlined_call_operand.vmem [shape: bf16[64,64], index: 5, kind: input, shape index: {}]   ;;  %s3113_s6 = inlined_call_operand.vmem [shape: f32[1,64], index: 6, kind: input, shape index: {}]   ;;  %s3114_s7 = inlined_call_operand.vmem [shape: f32[1,64], index: 7, kind: input, shape index: {}]   ;;  %s3115_s8 = inlined_call_operand.vmem [shape: f32[1,64], index: 8, kind: input, shape index: {}]   ;;  %s3116_s9 = inlined_call_operand.vmem [shape: bf16[64,256], index: 9, kind: input, shape index: {}]   ;;  %s3117_s10 = inlined_call_operand.vmem [shape: f32[1,256], index: 10, kind: input, shape index: {}]   ;;  %s3118_s11 = inlined_call_operand.vmem [shape: bf16[256,64], index: 11, kind: input, shape index: {}]   ;;  %s3119_s12 = inlined_call_operand.vmem [shape: f32[1,64], index: 12, kind: input, shape index: {}]   ;;  %s3120_s13 = inlined_call_operand.vmem [shape: f32[4,32,32], index: 13, kind: input, shape index: {}]   ;;  %s3121_s14 = inlined_call_operand.vmem [shape: f32[2,32], index: 14, kind: input, shape index: {}]   ;;  %s3122_s15 = inlined_call_operand.vmem [shape: f32[1,64], index: 15, kind: input, shape index: {}]   ;;  %s3123_s16 = inlined_call_operand.vmem [shape: f32[1,64], index: 16, kind: input, shape index: {}]   ;;  %s3124_s17 = inlined_call_operand.vmem [shape: bf16[64,10], index: 17, kind: input, shape index: {}]   ;;  %s3125_s18 = inlined_call_operand.vmem [shape: f32[1,10], index: 18, kind: input, shape index: {}]   ;;  %s3126_s19 = inlined_call_operand.hbm [shape: f32[2,10], index: 19, kind: output, shape index: {}]  }
   0x1   :  { %3129 = sst [smem:[#allocation5_spill]] %s3107_s0 }
   0x2   :  { %3130 = sst [smem:[#allocation6_spill]] %s3108_s1 }
   0x3   :  { %3131 = sst [smem:[#allocation7_spill]] %s3109_s2 }
   0x4   :  { %3132 = sst [smem:[#allocation8_spill]] %s3110_s3 }
   0x5   :  { %s3133_s20 = sld [smem:[#allocation5_spill]]  ;;  %vm132_vm0 = vcmask 523264  }
   0xb   :  { %v64_v0 = vld [vmem:[%s3133_s20] sm:$0xff]  ;;  %v66_v1 = vld [vmem:[%s3133_s20 + $0x10] sm:$0xff]  ;;  %v65_v2 = vld [vmem:[%s3133_s20 + $0x8] sm:$0xff] }
   0xc   :  { %v133_v3 = vsel %vm132_vm0, %v64_v0, 0.0  ;;  %v139_v4 = vsel %vm132_vm0, %v66_v1, 0.0  ;;  %v67_v5 = vld [vmem:[%s3133_s20 + $0x18] sm:$0xff]  ;;  %v136_v6 = vsel %vm132_vm0, %v65_v2, 0.0 }
   0xd   :  { %134 = vadd.xlane.f32.xlu0 %v133_v3  ;;  %140 = vadd.xlane.f32.xlu1 %v139_v4  ;;  %v142_v7 = vsel %vm132_vm0, %v67_v5, 0.0 }
  0x11   :  { %137 = vadd.xlane.f32.xlu0 %v136_v6  ;;  %143 = vadd.xlane.f32.xlu1 %v142_v7 }
  0x12   :  { %24 = vsyncpa [#allocation3], 0  ;;  %s3134_s26 = sld [smem:[#allocation8_spill]]  ;;  %v2387_v36 = vmov 0   ;;  %s3135_s29 = sld [smem:[#allocation6_spill]]  ;;  %vm326_vm1 = vcmask 130048  }
  0x13   :  { %297 = vmatprep.mubr.bf16.mxu0 %v2387_v36  ;;  %s3136_s21 = sld [smem:[#allocation7_spill]]  ;;  %s2389_s2 = smov 64   ;;  %vm400_vm2 = vcmask 261120   ;;  %vm1129_vm3 = vcmask 392192   ;;  %vm2396_vm4 = vmmov 0   ;;  %vm1875_vm5 = vcmask 74752  }
  0x14   :  { %s2390_s23 = smov 112   ;;  %s2391_s24 = smov 96  }
  0x15   :  { %s2392_s25 = smov 32   ;;  %s2394_s28 = smov 80  }
  0x18   :  { %v2207_v28 = vld [vmem:[%s3134_s26 + $0x4] ss:$8 sps:$4 sm:$0xff]   ;;  %v2209_v29 = vld [vmem:[%s3134_s26] ss:$8 sps:$4 sm:$0xff]   ;;  %v2210_v30 = vld [vmem:[%s3134_s26 + $0x14] ss:$8 sps:$4 sm:$0xff]  }
  0x19   :  { %265 = vmatprep.subr.bf16.mxu0 %v2207_v28  ;;  %v2212_v31 = vld [vmem:[%s3134_s26 + $0x10] ss:$8 sps:$4 sm:$0xff]   ;;  %v2213_v32 = vld [vmem:[%s3134_s26 + $0x24] ss:$8 sps:$4 sm:$0xff]   ;;  %v2215_v33 = vld [vmem:[%s3134_s26 + $0x20] ss:$8 sps:$4 sm:$0xff]  }
  0x1a   :  { %266 = vmatpush1.bf16.msra.mxu0 %v2209_v29  ;;  %v2216_v34 = vld [vmem:[%s3134_s26 + $0x34] ss:$8 sps:$4 sm:$0xff]   ;;  %v2218_v35 = vld [vmem:[%s3134_s26 + $0x30] ss:$8 sps:$4 sm:$0xff]   ;;  %v1891_v51 = vld [vmem:[%s3135_s29] ss:$0 sm:$0xff] }
  0x1b   :  { %267 = vmatprep.subr.bf16.mxu0 %v2210_v30  ;;  %v1892_v56 = vld [vmem:[%s3136_s21] ss:$0 sm:$0xff]  ;;  %s2393_s26 = smov 16  }
  0x1e   :  { %268 = vmatpush1.bf16.msra.mxu0 %v2212_v31 }
  0x1f   :  { %269 = vmatprep.subr.bf16.mxu0 %v2213_v32 }
  0x22   :  { %270 = vmatpush1.bf16.msra.mxu0 %v2215_v33 }
  0x23   :  { %271 = vmatprep.subr.bf16.mxu0 %v2216_v34 }
  0x26   :  { %272 = vmatpush1.bf16.msra.mxu0 %v2218_v35 }
  0x9a   :  { %v135_v8 = vpop.xlane.xlu0 %134  ;;  %v141_v9 = vpop.xlane.xlu1 %140 }
  0x9b   :  { %v146_v10 = vmul.f32 0.015625, %v135_v8  ;;  %v148_v11 = vmul.f32 0.015625, %v141_v9  ;;  %v78_v8 = vld [vmem:[%s3111_s4] sm:$0x3]  ;;  %s2388_s4 = smov 48  }
  0x9d   :  { %v150_v12 = vsub.f32 %v64_v0, %v146_v10  ;;  %v2515_v13 = vsub.f32 %v66_v1, %v148_v11 }
  0x9e   :  { %v138_v14 = vpop.xlane.xlu0 %137  ;;  %v144_v15 = vpop.xlane.xlu1 %143 }
  0x9f   :  { %v147_v16 = vmul.f32 0.015625, %v138_v14  ;;  %v149_v17 = vmul.f32 0.015625, %v144_v15  ;;  %v154_v18 = vmul.f32 %v150_v12, %v150_v12  ;;  %v156_v19 = vmul.f32 %v2515_v13, %v2515_v13 }
  0xa1   :  { %v151_v20 = vsub.f32 %v65_v2, %v147_v16  ;;  %v153_v21 = vsub.f32 %v67_v5, %v149_v17  ;;  %v158_v22 = vsel %vm132_vm0, %v154_v18, 0.0  ;;  %v164_v23 = vsel %vm132_vm0, %v156_v19, 0.0 }
  0xa2   :  { %159 = vadd.xlane.f32.xlu0 %v158_v22  ;;  %v209_v5 = vlaneseq }
  0xa3   :  { %v155_v24 = vmul.f32 %v151_v20, %v151_v20  ;;  %v157_v25 = vmul.f32 %v153_v21, %v153_v21 }
  0xa4   :  { %v2558_v6 = vshrl.u32 %v209_v5, 7 }
  0xa5   :  { %v161_v26 = vsel %vm132_vm0, %v155_v24, 0.0  ;;  %v167_v27 = vsel %vm132_vm0, %v157_v25, 0.0 }
  0xa6   :  { %165 = vadd.xlane.f32.xlu0 %v164_v23  ;;  %162 = vadd.xlane.f32.xlu1 %v161_v26  ;;  %v211_v7 = vsub.s32 0, %v2558_v6  ;;  %v215_v9 = vsub.s32 1, %v2558_v6 }
  0xa8   :  { %v212_v10 = vrot.slane %v78_v8, %v211_v7 }
  0xaa   :  { %168 = vadd.xlane.f32.xlu1 %v167_v27 }
 0x12f   :  { %v160_v37 = vpop.xlane.xlu0 %159 }
 0x130   :  { %v170_v38 = vmul.f32 0.015625, %v160_v37 }
 0x132   :  { %v174_v39 = vadd.f32 1e-05, %v170_v38 }
 0x133   :  { %v163_v40 = vpop.xlane.xlu1 %162  ;;  %v166_v41 = vpop.xlane.xlu0 %165 }
 0x134   :  { %2255 = vrsqrt.f32 %v174_v39  ;;  %v171_v42 = vmul.f32 0.015625, %v163_v40  ;;  %v172_v43 = vmul.f32 0.015625, %v166_v41 }
 0x136   :  { %v175_v44 = vadd.f32 1e-05, %v171_v42  ;;  %v176_v45 = vadd.f32 1e-05, %v172_v43 }
 0x137   :  { %v169_v46 = vpop.xlane.xlu1 %168 }
 0x138   :  { %2257 = vrsqrt.f32 %v175_v44  ;;  %v173_v47 = vmul.f32 0.015625, %v169_v46 }
 0x139   :  { %2259 = vrsqrt.f32 %v176_v45 }
 0x13a   :  { %v177_v48 = vadd.f32 1e-05, %v173_v47 }
 0x13c   :  { %2261 = vrsqrt.f32 %v177_v48 }
 0x13e   :  { %v2256_v49 = vpop.eup %2255 }
 0x13f   :  { %v182_v50 = vmul.f32 %v2256_v49, %v150_v12  ;;  %v216_v12 = vrot.slane %v78_v8, %v215_v9 }
 0x141   :  { %v192_v54 = vmul.f32 %v1891_v51, %v182_v50  ;;  %v394_v50 = vld [vmem:[%s3120_s13 + $0x10] sm:$0xff] }
 0x142   :  { %v2258_v52 = vpop.eup %2257 }
 0x143   :  { %v183_v53 = vmul.f32 %v2258_v52, %v151_v20  ;;  %v2260_v55 = vpop.eup %2259  ;;  %v202_v61 = vadd.f32 %v1892_v56, %v192_v54 }
 0x144   :  { %v184_v59 = vmul.f32 %v2260_v55, %v2515_v13  ;;  %v392_v55 = vld [vmem:[%s3120_s13] sm:$0xff] }
 0x145   :  { %v193_v57 = vmul.f32 %v1891_v51, %v183_v53 }
 0x146   :  { %v2262_v58 = vpop.eup %2261  ;;  %v194_v1 = vmul.f32 %v1891_v51, %v184_v59 }
 0x147   :  { %v185_v60 = vmul.f32 %v2262_v58, %v153_v21  ;;  %v203_v62 = vadd.f32 %v1892_v56, %v193_v57  ;;  %v393_v58 = vld [vmem:[%s3120_s13 + $0x8] sm:$0xff] }
 0x148   :  { %v204_v3 = vadd.f32 %v1892_v56, %v194_v1 }
 0x149   :  { %v206_v63 = vpack.c.bf16 %v203_v62, %v202_v61  ;;  %v195_v0 = vmul.f32 %v1891_v51, %v185_v60 }
 0x14b   :  { %1901 = vmatmul.mubr.msk.bf16.vlgmr.msra.gmra.mrb[0].mxu0 %vm132_vm0, %v206_v63  ;;  %v205_v2 = vadd.f32 %v1892_v56, %v195_v0 }
 0x14c   :  { %307 = vmatprep.mubr.bf16.mxu0 %v2387_v36 }
 0x14d   :  { %v207_v4 = vpack.c.bf16 %v205_v2, %v204_v3  ;;  %v1912_v3 = vld [vmem:[%s3120_s13 + $0x38] sm:$0xff] }
 0x153   :  { %1902 = vmatmul.mubr.msk.bf16.gmra.mrb[4].mxu0 %vm132_vm0, %v207_v4  ;;  %v395_v4 = vld [vmem:[%s3120_s13 + $0x18] sm:$0xff] }
 0x21e   :  { %v299_v11 = vpop.f32.mrb[0].mxu0 }
 0x21f   :  { %v301_v13 = vpop.f32.mrb[1].mxu0  ;;  %v300_v15 = vadd.f32 %v299_v11, %v212_v10 }
 0x220   :  { %v303_v14 = vpop.f32.mrb[2].mxu0  ;;  %v302_v18 = vadd.f32 %v301_v13, %v216_v12 }
 0x221   :  { %v304_v16 = vadd.f32 %v303_v14, %v212_v10  ;;  %v305_v17 = vpop.f32.mrb[3].mxu0 }
 0x222   :  { %v306_v19 = vadd.f32 %v305_v17, %v216_v12  ;;  %v1909_v17 = vld [vmem:[%s3120_s13 + $0x20] sm:$0xff] }
 0x223   :  { %v2569_v20 = vpack.c.bf16 %v304_v16, %v300_v15  ;;  %v1910_v16 = vld [vmem:[%s3120_s13 + $0x28] sm:$0xff] }
 0x224   :  { %v2571_v21 = vpack.c.bf16 %v306_v19, %v302_v18 }
 0x225   :  { %508 = vrot.lane.b32.xlu1 %v2569_v20, %s2388_s4  ;;  %322 = vrot.lane.b32.xlu0 %v2569_v20, %s2389_s2 }
 0x226   :  { %2056 = vmatprep.mubr.msk.bf16.mxu1 %vm326_vm1, %v2569_v20  ;;  %v309_v22 = vpop.f32.mrb[4].mxu0 }
 0x227   :  { %v311_v23 = vpop.f32.mrb[5].mxu0  ;;  %v310_v25 = vadd.f32 %v309_v22, %v212_v10 }
 0x228   :  { %v313_v24 = vpop.f32.mrb[6].mxu0  ;;  %v312_v28 = vadd.f32 %v311_v23, %v216_v12 }
 0x229   :  { %v314_v26 = vadd.f32 %v313_v24, %v212_v10  ;;  %504 = vrot.lane.b32.xlu0 %v2569_v20, %s2390_s23  ;;  %v315_v27 = vpop.f32.mrb[7].mxu0 }
 0x22a   :  { %v316_v29 = vadd.f32 %v315_v27, %v216_v12 }
 0x22b   :  { %v2580_v30 = vpack.c.bf16 %v314_v26, %v310_v25  ;;  %v1911_v25 = vld [vmem:[%s3120_s13 + $0x30] sm:$0xff] }
 0x22c   :  { %v2582_v31 = vpack.c.bf16 %v316_v29, %v312_v28 }
 0x22d   :  { %506 = vrot.lane.b32.xlu0 %v2580_v30, %s2390_s23  ;;  %324 = vrot.lane.b32.xlu1 %v2580_v30, %s2389_s2 }
 0x231   :  { %695 = vrot.lane.b32.xlu0 %v2569_v20, %s2391_s24  ;;  %510 = vrot.lane.b32.xlu1 %v2580_v30, %s2388_s4 }
 0x235   :  { %699 = vrot.lane.b32.xlu1 %v2569_v20, %s2392_s25 }
 0x239   :  { %701 = vrot.lane.b32.xlu1 %v2580_v30, %s2392_s25 }
 0x23d   :  { %697 = vrot.lane.b32.xlu1 %v2580_v30, %s2391_s24 }
 0x297   :  { %v509_v32 = vpop.permute.xlu1 %508  ;;  %v323_v33 = vpop.permute.xlu0 %322 }
 0x298   :  { %v519_v34 = vsel %vm326_vm1, %v509_v32, 0  ;;  %2157 = vmatprep.subr.msk.bf16.mxu1 %vm326_vm1, %v323_v33  ;;  %2159 = vmatprep.subr.msk.bf16.mxu0 %vm326_vm1, %v509_v32  ;;  %v334_v35 = vsel %vm326_vm1, %v323_v33, 0 }
 0x299   :  { %2053 = vmatpush3.bf16.xpose.msra.mxu1 %v334_v35  ;;  %2069 = vmatpush3.bf16.xpose.msra.mxu0 %v519_v34  ;;  %v1917_v34 = vld [vmem:[%s3120_s13 + $0x40] sm:$0xff] }
 0x29b   :  { %v505_v37 = vpop.permute.xlu0 %504 }
 0x29c   :  { %2072 = vmatprep.mubr.msk.bf16.mxu0 %vm326_vm1, %v505_v37 }
 0x29f   :  { %v325_v38 = vpop.permute.xlu1 %324  ;;  %v507_v42 = vpop.permute.xlu0 %506 }
 0x2a0   :  { %2158 = vmatprep.subr.msk.bf16.mxu1 %vm326_vm1, %v325_v38  ;;  %v337_v39 = vsel %vm326_vm1, %v325_v38, 0 }
 0x2a1   :  { %2055 = vmatpush3.bf16.xpose.msra.mxu1 %v337_v39  ;;  %v1920_v39 = vld [vmem:[%s3120_s13 + $0x58] sm:$0xff] }
 0x2a2   :  { %2060 = vmatprep.subr.bf16.mxu1 %v2571_v21 }
 0x2a3   :  { %v511_v40 = vpop.permute.xlu1 %510  ;;  %v696_v45 = vpop.permute.xlu0 %695 }
 0x2a4   :  { %v522_v41 = vsel %vm326_vm1, %v511_v40, 0  ;;  %2160 = vmatprep.subr.msk.bf16.mxu0 %vm326_vm1, %v511_v40 }
 0x2a5   :  { %2071 = vmatpush3.bf16.xpose.msra.mxu0 %v522_v41 }
 0x2a7   :  { %v700_v43 = vpop.permute.xlu1 %699 }
 0x2a8   :  { %2057 = vmatmul.mubr.msk.bf16.vlgmr.msra.gmra.mrb[0].mxu1 %vm326_vm1, %v2580_v30  ;;  %2161 = vmatprep.subr.msk.bf16.mxu0 %vm326_vm1, %v700_v43  ;;  %v710_v44 = vsel %vm326_vm1, %v700_v43, 0 }
 0x2a9   :  { %2061 = vmatpush3.bf16.msra.mxu1 %v2571_v21 }
 0x2aa   :  { %2062 = vmatprep.subr.bf16.mxu1 %v2582_v31 }
 0x2ab   :  { %v702_v46 = vpop.permute.xlu1 %701 }
 0x2ac   :  { %2073 = vmatmul.mubr.msk.bf16.vlgmr.msra.gmra.mrb[8].mxu0 %vm326_vm1, %v507_v42  ;;  %v713_v47 = vsel %vm326_vm1, %v702_v46, 0  ;;  %v1919_v42 = vld [vmem:[%s3120_s13 + $0x50] sm:$0xff] }
 0x2ad   :  { %2063 = vmatpush3.bf16.msra.mxu1 %v2582_v31  ;;  %2085 = vmatpush3.bf16.xpose.msra.mxu0 %v710_v44 }
 0x2ae   :  { %2088 = vmatprep.mubr.msk.bf16.mxu0 %vm326_vm1, %v696_v45  ;;  %2162 = vmatprep.subr.msk.bf16.mxu0 %vm326_vm1, %v702_v46  ;;  %v1918_v45 = vld [vmem:[%s3120_s13 + $0x48] sm:$0xff] }
 0x2af   :  { %v698_v48 = vpop.permute.xlu1 %697 }
 0x2b5   :  { %2087 = vmatpush3.bf16.xpose.msra.mxu0 %v713_v47 }
 0x2bc   :  { %2089 = vmatmul.mubr.msk.bf16.vlgmr.msra.gmra.mrb[12].mxu0 %vm326_vm1, %v698_v48 }
 0x37b   :  { %v2058_v49 = vpop.f32.mrb[0].mxu1 }
 0x37c   :  { %v390_v51 = vmul.f32 0.25, %v2058_v49  ;;  %v373_v52 = vpop.f32.mrb[1].mxu1 }
 0x37d   :  { %v388_v53 = vmul.f32 0.25, %v373_v52  ;;  %v2059_v54 = vpop.f32.mrb[2].mxu1 }
 0x37e   :  { %v376_v56 = vpop.f32.mrb[3].mxu1  ;;  %v2625_v57 = vadd.f32 %v394_v50, %v390_v51  ;;  %v391_v61 = vmul.f32 0.25, %v2059_v54 }
 0x37f   :  { %v389_v59 = vmul.f32 0.25, %v376_v56  ;;  %v2074_v60 = vpop.f32.mrb[8].mxu0  ;;  %v2632_v0 = vadd.f32 %v392_v55, %v388_v53 }
 0x380   :  { %v558_v62 = vpop.f32.mrb[9].mxu0  ;;  %v407_v63 = vsel %vm400_vm2, %v2625_v57, -inf  ;;  %v399_v15 = vadd.f32 %v395_v4, %v391_v61  ;;  %v575_v22 = vmul.f32 0.25, %v2074_v60 }
 0x381   :  { %408 = vmax.xlane.f32.xlu0 %v407_v63  ;;  %v2075_v1 = vpop.f32.mrb[10].mxu0  ;;  %v2634_v2 = vadd.f32 %v393_v58, %v389_v59  ;;  %v573_v12 = vmul.f32 0.25, %v558_v62  ;;  %v401_v13 = vsel %vm400_vm2, %v2632_v0, -inf }
 0x382   :  { %v576_v5 = vmul.f32 0.25, %v2075_v1  ;;  %v561_v8 = vpop.f32.mrb[11].mxu0  ;;  %v410_v23 = vsel %vm400_vm2, %v399_v15, -inf  ;;  %v584_v28 = vadd.f32 %v1911_v25, %v575_v22 }
 0x383   :  { %v574_v10 = vmul.f32 0.25, %v561_v8  ;;  %v404_v11 = vsel %vm400_vm2, %v2634_v2, -inf  ;;  %v2656_v24 = vadd.f32 %v1909_v17, %v573_v12 }
 0x384   :  { %405 = vmax.xlane.f32.xlu1 %v404_v11  ;;  %v585_v14 = vadd.f32 %v1912_v3, %v576_v5  ;;  %v592_v33 = vsel %vm400_vm2, %v584_v28, -inf }
 0x385   :  { %402 = vmax.xlane.f32.xlu0 %v401_v13  ;;  %v2653_v19 = vadd.f32 %v1910_v16, %v574_v10  ;;  %v586_v27 = vsel %vm400_vm2, %v2656_v24, -inf }
 0x386   :  { %v595_v18 = vsel %vm400_vm2, %v585_v14, -inf }
 0x387   :  { %v589_v26 = vsel %vm400_vm2, %v2653_v19, -inf }
 0x388   :  { %596 = vmax.xlane.f32.xlu1 %v595_v18 }
 0x389   :  { %411 = vmax.xlane.f32.xlu0 %v410_v23 }
 0x38c   :  { %590 = vmax.xlane.f32.xlu1 %v589_v26 }
 0x38d   :  { %587 = vmax.xlane.f32.xlu0 %v586_v27 }
 0x38f   :  { %v2090_v29 = vpop.f32.mrb[12].mxu0 }
 0x390   :  { %v749_v32 = vpop.f32.mrb[13].mxu0  ;;  %v766_v35 = vmul.f32 0.25, %v2090_v29 }
 0x391   :  { %v764_v37 = vmul.f32 0.25, %v749_v32  ;;  %593 = vmax.xlane.f32.xlu0 %v592_v33  ;;  %v2091_v38 = vpop.f32.mrb[14].mxu0 }
 0x392   :  { %v767_v40 = vmul.f32 0.25, %v2091_v38  ;;  %v752_v41 = vpop.f32.mrb[15].mxu0  ;;  %v2682_v48 = vadd.f32 %v1919_v42, %v766_v35 }
 0x393   :  { %v765_v43 = vmul.f32 0.25, %v752_v41  ;;  %v2675_v44 = vadd.f32 %v1917_v34, %v764_v37 }
 0x394   :  { %v776_v46 = vadd.f32 %v1920_v39, %v767_v40  ;;  %v783_v51 = vsel %vm400_vm2, %v2682_v48, -inf }
 0x395   :  { %v777_v47 = vsel %vm400_vm2, %v2675_v44, -inf  ;;  %v774_v50 = vadd.f32 %v1918_v45, %v765_v43 }
 0x396   :  { %778 = vmax.xlane.f32.xlu0 %v777_v47  ;;  %v786_v49 = vsel %vm400_vm2, %v776_v46, -inf }
 0x397   :  { %787 = vmax.xlane.f32.xlu1 %v786_v49  ;;  %v780_v52 = vsel %vm400_vm2, %v774_v50, -inf }
 0x39a   :  { %784 = vmax.xlane.f32.xlu0 %v783_v51 }
 0x39b   :  { %781 = vmax.xlane.f32.xlu1 %v780_v52 }
 0x3ac   :  { %636 = vrot.lane.b32.xlu1 %v2582_v31, %s2390_s23 }
 0x3b0   :  { %823 = vrot.lane.b32.xlu1 %v2571_v21, %s2391_s24 }
 0x40e   :  { %v409_v53 = vpop.xlane.xlu0 %408 }
 0x40f   :  { %v415_v54 = vsub.f32 %v2625_v57, %v409_v53 }
 0x411   :  { %v421_v55 = vmul.f32 1.442695, %v415_v54  ;;  %v406_v56 = vpop.xlane.xlu1 %405 }
 0x412   :  { %v403_v58 = vpop.xlane.xlu0 %402  ;;  %v414_v63 = vsub.f32 %v2634_v2, %v406_v56 }
 0x413   :  { %2263 = vpow2.f32 %v421_v55  ;;  %v413_v8 = vsub.f32 %v2632_v0, %v403_v58 }
 0x414   :  { %v419_v57 = vmul.f32 1.442695, %v414_v63 }
 0x415   :  { %v597_v59 = vpop.xlane.xlu1 %596  ;;  %v417_v2 = vmul.f32 1.442695, %v413_v8 }
 0x416   :  { %v601_v60 = vsub.f32 %v585_v14, %v597_v59  ;;  %v412_v61 = vpop.xlane.xlu0 %411 }
 0x417   :  { %v416_v62 = vsub.f32 %v399_v15, %v412_v61 }
 0x418   :  { %v608_v1 = vmul.f32 1.442695, %v601_v60 }
 0x419   :  { %v423_v3 = vmul.f32 1.442695, %v416_v62  ;;  %v591_v4 = vpop.xlane.xlu1 %590 }
 0x41a   :  { %v588_v5 = vpop.xlane.xlu0 %587  ;;  %v599_v11 = vsub.f32 %v2653_v19, %v591_v4 }
 0x41b   :  { %2265 = vpow2.f32 %v423_v3  ;;  %v598_v15 = vsub.f32 %v2656_v24, %v588_v5 }
 0x41c   :  { %2267 = vpow2.f32 %v608_v1  ;;  %v604_v16 = vmul.f32 1.442695, %v599_v11 }
 0x41d   :  { %v2695_v10 = vpop.eup %2263  ;;  %2269 = vpow2.f32 %v419_v57  ;;  %v602_v0 = vmul.f32 1.442695, %v598_v15 }
 0x41e   :  { %v594_v12 = vpop.xlane.xlu0 %593  ;;  %v431_v13 = vsel %vm400_vm2, %v2695_v10, 0.0 }
 0x41f   :  { %v600_v14 = vsub.f32 %v584_v28, %v594_v12  ;;  %432 = vadd.xlane.f32.xlu0 %v431_v13 }
 0x421   :  { %v606_v17 = vmul.f32 1.442695, %v600_v14 }
 0x423   :  { %2271 = vpow2.f32 %v606_v17  ;;  %v779_v49 = vpop.xlane.xlu0 %778 }
 0x424   :  { %2273 = vpow2.f32 %v417_v2  ;;  %v788_v18 = vpop.xlane.xlu1 %787  ;;  %v789_v52 = vsub.f32 %v2675_v44, %v779_v49 }
 0x425   :  { %v2701_v22 = vpop.eup %2265  ;;  %2275 = vpow2.f32 %v604_v16  ;;  %v792_v19 = vsub.f32 %v776_v46, %v788_v18 }
 0x426   :  { %v434_v23 = vsel %vm400_vm2, %v2701_v22, 0.0  ;;  %v2705_v25 = vpop.eup %2267  ;;  %2277 = vpow2.f32 %v602_v0  ;;  %v793_v54 = vmul.f32 1.442695, %v789_v52 }
 0x427   :  { %v799_v26 = vmul.f32 1.442695, %v792_v19  ;;  %435 = vadd.xlane.f32.xlu1 %v434_v23  ;;  %v619_v28 = vsel %vm400_vm2, %v2705_v25, 0.0  ;;  %v2709_v29 = vpop.eup %2269 }
 0x428   :  { %v782_v24 = vpop.xlane.xlu1 %781  ;;  %v428_v35 = vsel %vm400_vm2, %v2709_v29, 0.0 }
 0x429   :  { %2279 = vpow2.f32 %v799_v26  ;;  %v790_v27 = vsub.f32 %v774_v50, %v782_v24  ;;  %v785_v50 = vpop.xlane.xlu0 %784 }
 0x42a   :  { %v791_v51 = vsub.f32 %v2682_v48, %v785_v50 }
 0x42b   :  { %v795_v32 = vmul.f32 1.442695, %v790_v27  ;;  %620 = vadd.xlane.f32.xlu1 %v619_v28 }
 0x42c   :  { %v797_v53 = vmul.f32 1.442695, %v791_v51 }
 0x42d   :  { %v2711_v33 = vpop.eup %2271  ;;  %2281 = vpow2.f32 %v795_v32 }
 0x42e   :  { %v2713_v34 = vpop.eup %2273  ;;  %v616_v37 = vsel %vm400_vm2, %v2711_v33, 0.0  ;;  %2283 = vpow2.f32 %v797_v53 }
 0x42f   :  { %v2719_v38 = vpop.eup %2275  ;;  %429 = vadd.xlane.f32.xlu1 %v428_v35  ;;  %617 = vadd.xlane.f32.xlu0 %v616_v37  ;;  %v425_v41 = vsel %vm400_vm2, %v2713_v34, 0.0  ;;  %2285 = vpow2.f32 %v793_v54 }
 0x430   :  { %v2721_v39 = vpop.eup %2277  ;;  %v613_v40 = vsel %vm400_vm2, %v2719_v38, 0.0 }
 0x431   :  { %v610_v45 = vsel %vm400_vm2, %v2721_v39, 0.0 }
 0x433   :  { %v2727_v42 = vpop.eup %2279  ;;  %614 = vadd.xlane.f32.xlu1 %v613_v40  ;;  %426 = vadd.xlane.f32.xlu0 %v425_v41 }
 0x434   :  { %v810_v43 = vsel %vm400_vm2, %v2727_v42, 0.0 }
 0x437   :  { %v2733_v46 = vpop.eup %2281  ;;  %811 = vadd.xlane.f32.xlu1 %v810_v43  ;;  %611 = vadd.xlane.f32.xlu0 %v610_v45 }
 0x438   :  { %v804_v47 = vsel %vm400_vm2, %v2733_v46, 0.0  ;;  %v2747_v55 = vpop.eup %2283 }
 0x439   :  { %v807_v56 = vsel %vm400_vm2, %v2747_v55, 0.0  ;;  %v2751_v58 = vpop.eup %2285 }
 0x43a   :  { %v801_v59 = vsel %vm400_vm2, %v2751_v58, 0.0 }
 0x43b   :  { %805 = vadd.xlane.f32.xlu1 %v804_v47 }
 0x44c   :  { %825 = vrot.lane.b32.xlu1 %v2582_v31, %s2391_s24 }
 0x44d   :  { %634 = vrot.lane.b32.xlu0 %v2571_v21, %s2390_s23 }
 0x450   :  { %890 = vrot.lane.b32.xlu1 %v2580_v30, %s2393_s26 }
 0x454   :  { %886 = vrot.lane.b32.xlu1 %v2580_v30, %s2394_s28  ;;  %v637_v30 = vpop.permute.xlu1 %636 }
 0x458   :  { %v824_v44 = vpop.permute.xlu1 %823 }
 0x46c   :  { %808 = vadd.xlane.f32.xlu0 %v807_v56 }
 0x470   :  { %802 = vadd.xlane.f32.xlu0 %v801_v59 }
 0x486   :  { %888 = vrot.lane.b32.xlu0 %v2569_v20, %s2393_s26 }
 0x48a   :  { %884 = vrot.lane.b32.xlu0 %v2569_v20, %s2394_s28 }
 0x4ac   :  { %v433_v60 = vpop.xlane.xlu0 %432 }
 0x4b4   :  { %v436_v48 = vpop.xlane.xlu1 %435 }
 0x4b5   :  { %2287 = vrcp.f32 %v436_v48 }
 0x4b8   :  { %v621_v61 = vpop.xlane.xlu1 %620 }
 0x4bc   :  { %v430_v62 = vpop.xlane.xlu1 %429  ;;  %v618_v63 = vpop.xlane.xlu0 %617 }
 0x4bd   :  { %2289 = vrcp.f32 %v430_v62 }
 0x4be   :  { %2291 = vrcp.f32 %v433_v60 }
 0x4bf   :  { %v2288_v8 = vpop.eup %2287 }
 0x4c0   :  { %v427_v1 = vpop.xlane.xlu0 %426  ;;  %v615_v3 = vpop.xlane.xlu1 %614  ;;  %v444_v12 = vmul.f32 %v2288_v8, %v2701_v22 }
 0x4c1   :  { %2293 = vrcp.f32 %v427_v1 }
 0x4c2   :  { %2295 = vrcp.f32 %v615_v3 }
 0x4c4   :  { %v612_v4 = vpop.xlane.xlu0 %611  ;;  %v812_v16 = vpop.xlane.xlu1 %811 }
 0x4c5   :  { %2297 = vrcp.f32 %v612_v4 }
 0x4c6   :  { %2299 = vrcp.f32 %v618_v63 }
 0x4c7   :  { %2301 = vrcp.f32 %v621_v61  ;;  %v2290_v20 = vpop.eup %2289 }
 0x4c8   :  { %v635_v5 = vpop.permute.xlu0 %634  ;;  %v2292_v57 = vpop.eup %2291  ;;  %v442_v14 = vmul.f32 %v2290_v20, %v2709_v29  ;;  %v1925_v20 = vld [vmem:[%s3120_s13 + $0x60] sm:$0xff] }
 0x4c9   :  { %2076 = vmatprep.subr.bf16.mxu1 %v635_v5  ;;  %v443_v15 = vmul.f32 %v2292_v57, %v2695_v10  ;;  %v806_v10 = vpop.xlane.xlu1 %805 }
 0x4cb   :  { %v2294_v11 = vpop.eup %2293  ;;  %v446_v18 = vpack.c.bf16 %v444_v12, %v443_v15 }
 0x4cc   :  { %v441_v13 = vmul.f32 %v2294_v11, %v2713_v34  ;;  %v2296_v2 = vpop.eup %2295 }
 0x4cd   :  { %v627_v26 = vmul.f32 %v2296_v2, %v2719_v38  ;;  %v826_v32 = vpop.permute.xlu1 %825  ;;  %v1927_v2 = vld [vmem:[%s3120_s13 + $0x70] sm:$0xff] }
 0x4ce   :  { %v445_v17 = vpack.c.bf16 %v442_v14, %v441_v13  ;;  %v1926_v14 = vld [vmem:[%s3120_s13 + $0x68] sm:$0xff] }
 0x4cf   :  { %v2298_v0 = vpop.eup %2297 }
 0x4d0   :  { %v2300_v19 = vpop.eup %2299  ;;  %2064 = vmatprep.mubr.msk.bf16.mxu1 %vm400_vm2, %v445_v17  ;;  %v626_v23 = vmul.f32 %v2298_v0, %v2721_v39 }
 0x4d1   :  { %2065 = vmatmul.mubr.msk.bf16.vlgmr.msra.gmra.mrb[4].mxu1 %vm400_vm2, %v446_v18  ;;  %v2302_v22 = vpop.eup %2301  ;;  %v628_v27 = vmul.f32 %v2300_v19, %v2711_v33  ;;  %v891_v52 = vpop.permute.xlu1 %890 }
 0x4d2   :  { %2077 = vmatpush3.bf16.msra.mxu1 %v635_v5  ;;  %v630_v24 = vpack.c.bf16 %v627_v26, %v626_v23  ;;  %v629_v28 = vmul.f32 %v2302_v22, %v2705_v25  ;;  %v902_v53 = vsel %vm326_vm1, %v891_v52, 0  ;;  %v1928_v23 = vld [vmem:[%s3120_s13 + $0x78] sm:$0xff] }
 0x4d3   :  { %2078 = vmatprep.subr.bf16.mxu1 %v637_v30 }
 0x4d4   :  { %2080 = vmatprep.mubr.msk.bf16.mxu1 %vm400_vm2, %v630_v24  ;;  %v631_v29 = vpack.c.bf16 %v629_v28, %v628_v27 }
 0x4d6   :  { %2079 = vmatpush3.bf16.msra.mxu1 %v637_v30 }
 0x4d7   :  { %2092 = vmatprep.subr.bf16.mxu1 %v824_v44 }
 0x4d9   :  { %2081 = vmatmul.mubr.msk.bf16.vlgmr.msra.gmra.mrb[8].mxu1 %vm400_vm2, %v631_v29 }
 0x4da   :  { %2093 = vmatpush3.bf16.msra.mxu1 %v824_v44 }
 0x4db   :  { %2094 = vmatprep.subr.bf16.mxu1 %v826_v32 }
 0x4de   :  { %2095 = vmatpush3.bf16.msra.mxu1 %v826_v32 }
 0x4f9   :  { %v809_v34 = vpop.xlane.xlu0 %808 }
 0x4fa   :  { %2303 = vrcp.f32 %v809_v34 }
 0x4fb   :  { %2305 = vrcp.f32 %v806_v10 }
 0x4fc   :  { %2307 = vrcp.f32 %v812_v16 }
 0x4fd   :  { %v803_v33 = vpop.xlane.xlu0 %802 }
 0x4fe   :  { %2309 = vrcp.f32 %v803_v33 }
 0x501   :  { %v889_v35 = vpop.permute.xlu0 %888 }
 0x502   :  { %2163 = vmatprep.subr.msk.bf16.mxu1 %vm326_vm1, %v889_v35  ;;  %v899_v50 = vsel %vm326_vm1, %v889_v35, 0 }
 0x504   :  { %v2304_v37 = vpop.eup %2303 }
 0x505   :  { %v2306_v25 = vpop.eup %2305  ;;  %v819_v40 = vmul.f32 %v2304_v37, %v2747_v55  ;;  %v885_v51 = vpop.permute.xlu0 %884 }
 0x506   :  { %v2308_v38 = vpop.eup %2307  ;;  %v818_v43 = vmul.f32 %v2306_v25, %v2733_v46  ;;  %v887_v46 = vpop.permute.xlu1 %886 }
 0x507   :  { %v820_v45 = vmul.f32 %v2308_v38, %v2727_v42 }
 0x508   :  { %v2310_v39 = vpop.eup %2309 }
 0x509   :  { %v817_v41 = vmul.f32 %v2310_v39, %v2751_v58  ;;  %v822_v49 = vpack.c.bf16 %v820_v45, %v819_v40 }
 0x50b   :  { %v821_v47 = vpack.c.bf16 %v818_v43, %v817_v41 }
 0x50d   :  { %2096 = vmatprep.mubr.msk.bf16.mxu1 %vm400_vm2, %v821_v47 }
 0x50e   :  { %2097 = vmatmul.mubr.msk.bf16.vlgmr.msra.gmra.mrb[12].mxu1 %vm400_vm2, %v822_v49 }
 0x50f   :  { %2101 = vmatpush3.bf16.xpose.msra.mxu1 %v899_v50  ;;  %2104 = vmatprep.mubr.msk.bf16.mxu1 %vm326_vm1, %v885_v51 }
 0x510   :  { %2164 = vmatprep.subr.msk.bf16.mxu1 %vm326_vm1, %v891_v52 }
 0x517   :  { %2103 = vmatpush3.bf16.xpose.msra.mxu1 %v902_v53 }
 0x51e   :  { %2105 = vmatmul.mubr.msk.bf16.vlgmr.msra.gmra.mrb[16].mxu1 %vm326_vm1, %v887_v46 }
 0x51f   :  { %1388 = vmatprep.mubr.bf16.mxu1 %v2387_v36 }
 0x5a4   :  { %v2784_v42 = vpop.f32.mrb[4].mxu1 }
 0x5a5   :  { %v2786_v54 = vpop.f32.mrb[5].mxu1 }
 0x5a6   :  { %v2788_v55 = vpop.f32.mrb[6].mxu1 }
 0x5a7   :  { %v2790_v56 = vpop.f32.mrb[7].mxu1 }
 0x5ac   :  { %v2792_v58 = vpop.f32.mrb[8].mxu1 }
 0x5ad   :  { %v2794_v59 = vpop.f32.mrb[9].mxu1 }
 0x5ae   :  { %v2796_v30 = vpop.f32.mrb[10].mxu1 }
 0x5af   :  { %v2182_v44 = vpack.i.bf16 %v2796_v30, %v2792_v58  ;;  %v683_v48 = vpop.f32.mrb[11].mxu1 }
 0x5b0   :  { %v2177_v60 = vpack.i.bf16 %v683_v48, %v2794_v59 }
 0x5e1   :  { %v2801_v61 = vpop.f32.mrb[12].mxu1 }
 0x5e2   :  { %v869_v62 = vpop.f32.mrb[13].mxu1 }
 0x5e3   :  { %v2099_v63 = vpop.f32.mrb[14].mxu1 }
 0x5e4   :  { %v2192_v1 = vpack.i.bf16 %v2099_v63, %v2801_v61  ;;  %v872_v3 = vpop.f32.mrb[15].mxu1 }
 0x5e5   :  { %v2187_v4 = vpack.i.bf16 %v872_v3, %v869_v62 }
 0x5f1   :  { %v2106_v5 = vpop.f32.mrb[16].mxu1 }
 0x5f2   :  { %v938_v8 = vpop.f32.mrb[17].mxu1  ;;  %v955_v57 = vmul.f32 0.25, %v2106_v5  ;;  %v2219_v5 = vld [vmem:[%s3112_s5] sm:$0xff]  }
 0x5f3   :  { %v953_v11 = vmul.f32 0.25, %v938_v8  ;;  %v2107_v12 = vpop.f32.mrb[18].mxu1  ;;  %v2220_v8 = vld [vmem:[%s3112_s5 + $0x8] sm:$0xff]  }
 0x5f4   :  { %v941_v13 = vpop.f32.mrb[19].mxu1  ;;  %v956_v17 = vmul.f32 0.25, %v2107_v12  ;;  %v964_v19 = vadd.f32 %v1927_v2, %v955_v57  ;;  %v2222_v57 = vld [vmem:[%s3112_s5 + $0x18] sm:$0xff]  }
 0x5f5   :  { %v954_v15 = vmul.f32 0.25, %v941_v13  ;;  %v962_v16 = vadd.f32 %v1925_v20, %v953_v11  ;;  %v2221_v20 = vld [vmem:[%s3112_s5 + $0x10] sm:$0xff]  }
 0x5f6   :  { %v972_v22 = vsel %vm400_vm2, %v964_v19, -inf  ;;  %v965_v24 = vadd.f32 %v1928_v23, %v956_v17 }
 0x5f7   :  { %v966_v0 = vsel %vm400_vm2, %v962_v16, -inf  ;;  %v963_v18 = vadd.f32 %v1926_v14, %v954_v15 }
 0x5f8   :  { %967 = vmax.xlane.f32.xlu0 %v966_v0  ;;  %v975_v27 = vsel %vm400_vm2, %v965_v24, -inf }
 0x5f9   :  { %v969_v26 = vsel %vm400_vm2, %v963_v18, -inf }
 0x5fa   :  { %970 = vmax.xlane.f32.xlu1 %v969_v26 }
 0x5fc   :  { %973 = vmax.xlane.f32.xlu0 %v972_v22 }
 0x600   :  { %976 = vmax.xlane.f32.xlu0 %v975_v27 }
 0x685   :  { %v968_v10 = vpop.xlane.xlu0 %967 }
 0x686   :  { %v978_v28 = vsub.f32 %v962_v16, %v968_v10 }
 0x687   :  { %v971_v29 = vpop.xlane.xlu1 %970 }
 0x688   :  { %v982_v33 = vmul.f32 1.442695, %v978_v28  ;;  %v979_v35 = vsub.f32 %v963_v18, %v971_v29 }
 0x689   :  { %v974_v32 = vpop.xlane.xlu0 %973 }
 0x68a   :  { %v980_v34 = vsub.f32 %v964_v19, %v974_v32  ;;  %v984_v39 = vmul.f32 1.442695, %v979_v35 }
 0x68c   :  { %v986_v37 = vmul.f32 1.442695, %v980_v34 }
 0x68d   :  { %v977_v25 = vpop.xlane.xlu0 %976 }
 0x68e   :  { %2311 = vpow2.f32 %v986_v37  ;;  %v981_v38 = vsub.f32 %v965_v24, %v977_v25 }
 0x68f   :  { %2313 = vpow2.f32 %v982_v33 }
 0x690   :  { %v988_v40 = vmul.f32 1.442695, %v981_v38 }
 0x692   :  { %2315 = vpow2.f32 %v988_v40 }
 0x693   :  { %2317 = vpow2.f32 %v984_v39 }
 0x698   :  { %v2312_v41 = vpop.eup %2311 }
 0x699   :  { %v996_v43 = vsel %vm400_vm2, %v2312_v41, 0.0  ;;  %v2314_v45 = vpop.eup %2313 }
 0x69a   :  { %997 = vadd.xlane.f32.xlu0 %v996_v43  ;;  %v990_v49 = vsel %vm400_vm2, %v2314_v45, 0.0 }
 0x69c   :  { %v2316_v47 = vpop.eup %2315 }
 0x69d   :  { %v999_v50 = vsel %vm400_vm2, %v2316_v47, 0.0  ;;  %v2318_v51 = vpop.eup %2317 }
 0x69e   :  { %991 = vadd.xlane.f32.xlu0 %v990_v49  ;;  %1000 = vadd.xlane.f32.xlu1 %v999_v50  ;;  %v993_v52 = vsel %vm400_vm2, %v2318_v51, 0.0 }
 0x6a2   :  { %994 = vadd.xlane.f32.xlu1 %v993_v52 }
 0x6b3   :  { %1014 = vrot.lane.b32.xlu1 %v2582_v31, %s2394_s28 }
 0x6b4   :  { %1012 = vrot.lane.b32.xlu0 %v2571_v21, %s2394_s28 }
 0x6b7   :  { %2178 = vrot.lane.b32.xlu1 %v2177_v60, %s2393_s26 }
 0x6b8   :  { %2188 = vrot.lane.b32.xlu0 %v2187_v4, %s2392_s25 }
 0x6bb   :  { %2183 = vrot.lane.b32.xlu1 %v2182_v44, %s2393_s26 }
 0x6bf   :  { %2193 = vrot.lane.b32.xlu1 %v2192_v1, %s2392_s25 }
 0x727   :  { %v998_v53 = vpop.xlane.xlu0 %997 }
 0x72b   :  { %v992_v46 = vpop.xlane.xlu0 %991  ;;  %v1001_v59 = vpop.xlane.xlu1 %1000 }
 0x72c   :  { %2319 = vrcp.f32 %v1001_v59 }
 0x72d   :  { %2321 = vrcp.f32 %v992_v46 }
 0x72e   :  { %2323 = vrcp.f32 %v998_v53 }
 0x72f   :  { %v1013_v31 = vpop.permute.xlu0 %1012  ;;  %v995_v48 = vpop.xlane.xlu1 %994 }
 0x730   :  { %2325 = vrcp.f32 %v995_v48  ;;  %2108 = vmatprep.subr.bf16.mxu0 %v1013_v31 }
 0x731   :  { %2109 = vmatpush3.bf16.msra.mxu0 %v1013_v31 }
 0x733   :  { %v1015_v21 = vpop.permute.xlu1 %1014  ;;  %v2189_v18 = vpop.permute.xlu0 %2188 }
 0x734   :  { %2110 = vmatprep.subr.bf16.mxu0 %v1015_v21  ;;  %v2191_v10 = vunpack.i.h.bf16 %v2189_v18  ;;  %v2190_v28 = vunpack.i.l.bf16 %v2189_v18 }
 0x735   :  { %2111 = vmatpush3.bf16.msra.mxu0 %v1015_v21  ;;  %v2359_v21 = vld [vmem:[%s3133_s20] sm:$0xff] }
 0x736   :  { %v2320_v60 = vpop.eup %2319  ;;  %2116 = vmatprep.subr.bf16.mxu0 %v2219_v5 }
 0x737   :  { %v2322_v61 = vpop.eup %2321  ;;  %v1009_v44 = vmul.f32 %v2320_v60, %v2316_v47  ;;  %v2179_v16 = vpop.permute.xlu1 %2178 }
 0x738   :  { %v2324_v58 = vpop.eup %2323  ;;  %v1006_v62 = vmul.f32 %v2322_v61, %v2314_v45  ;;  %v2181_v19 = vunpack.i.h.bf16 %v2179_v16  ;;  %v2180_v23 = vunpack.i.l.bf16 %v2179_v16 }
 0x739   :  { %v1008_v1 = vmul.f32 %v2324_v58, %v2312_v41  ;;  %v2360_v58 = vld [vmem:[%s3133_s20 + $0x10] sm:$0xff] }
 0x73a   :  { %v2326_v30 = vpop.eup %2325  ;;  %v1122_v29 = vsel %vm326_vm1, %v2790_v56, %v2181_v19  ;;  %v1121_v32 = vsel %vm326_vm1, %v2786_v54, %v2180_v23 }
 0x73b   :  { %v1007_v63 = vmul.f32 %v2326_v30, %v2318_v51  ;;  %v1011_v4 = vpack.c.bf16 %v1009_v44, %v1008_v1  ;;  %v2184_v17 = vpop.permute.xlu1 %2183  ;;  %v1125_v45 = vsel %vm400_vm2, %v1121_v32, %v2190_v28  ;;  %v1931_v51 = vld [vmem:[%s3113_s6] ss:$0 sm:$0xff]  ;;  %v2225_v32 = vld [vmem:[%s3116_s9 + $0x4] ss:$8 sps:$4 sm:$0xff]  }
 0x73c   :  { %v2186_v26 = vunpack.i.h.bf16 %v2184_v17  ;;  %v2185_v22 = vunpack.i.l.bf16 %v2184_v17  ;;  %1356 = vmatprep.subr.bf16.mxu1 %v2225_v32 }
 0x73d   :  { %v1010_v3 = vpack.c.bf16 %v1007_v63, %v1006_v62  ;;  %v2361_v62 = vld [vmem:[%s3133_s20 + $0x8] sm:$0xff] }
 0x73e   :  { %v1124_v33 = vsel %vm326_vm1, %v2788_v55, %v2186_v26  ;;  %v1123_v35 = vsel %vm326_vm1, %v2784_v42, %v2185_v22  ;;  %v1126_v55 = vsel %vm400_vm2, %v1122_v29, %v2191_v10 }
 0x73f   :  { %2112 = vmatprep.mubr.msk.bf16.mxu0 %vm400_vm2, %v1010_v3  ;;  %v2194_v0 = vpop.permute.xlu1 %2193 }
 0x740   :  { %2113 = vmatmul.mubr.msk.bf16.vlgmr.msra.gmra.mrb[16].mxu0 %vm400_vm2, %v1011_v4  ;;  %v2196_v24 = vunpack.i.h.bf16 %v2194_v0  ;;  %v2195_v27 = vunpack.i.l.bf16 %v2194_v0  ;;  %v2362_v4 = vld [vmem:[%s3133_s20 + $0x18] sm:$0xff]  ;;  %s2398_s20 = smov [#allocation2]  }
 0x741   :  { %2117 = vmatpush3.bf16.msra.mxu0 %v2219_v5  ;;  %s1883_s13 = sshll.u32 %s2398_s20, 4  ;;  %s1884_s13 = int_to_ptr.vmem [resolvable:$true] %s1883_s13 }
 0x742   :  { %2118 = vmatprep.subr.bf16.mxu0 %v2220_v8  ;;  %v1127_v39 = vsel %vm400_vm2, %v1123_v35, %v2195_v27  ;;  %v1128_v40 = vsel %vm400_vm2, %v1124_v33, %v2196_v24  ;;  %v2228_v33 = vld [vmem:[%s3116_s9 + $0x14] ss:$8 sps:$4 sm:$0xff]   ;;  %v2226_v35 = vld [vmem:[%s3116_s9 + $0x10] ss:$8 sps:$4 sm:$0xff]   ;;  %p2368_p1 = scmp.lt.s32.totalorder %s1884_s13, %s1884_s13 }
 0x745   :  { %2119 = vmatpush3.bf16.msra.mxu0 %v2220_v8 }
 0x746   :  { %2120 = vmatprep.subr.bf16.mxu0 %v2221_v20 }
 0x749   :  { %2121 = vmatpush3.bf16.msra.mxu0 %v2221_v20 }
 0x74a   :  { %2122 = vmatprep.subr.bf16.mxu0 %v2222_v57 }
 0x74d   :  { %2123 = vmatpush3.bf16.msra.mxu0 %v2222_v57 }
 0x813   :  { %v2114_v11 = vpop.f32.mrb[16].mxu0 }
 0x814   :  { %v1058_v12 = vpop.f32.mrb[17].mxu0 }
 0x815   :  { %v2115_v13 = vpop.f32.mrb[18].mxu0 }
 0x816   :  { %v2202_v14 = vpack.i.bf16 %v2115_v13, %v2114_v11  ;;  %v1061_v2 = vpop.f32.mrb[19].mxu0 }
 0x817   :  { %v2197_v15 = vpack.i.bf16 %v1061_v2, %v1058_v12 }
 0x818   :  { %2203 = vrot.lane.b32.xlu1 %v2202_v14, %s2388_s4 }
 0x819   :  { %2198 = vrot.lane.b32.xlu0 %v2197_v15, %s2388_s4 }
 0x88a   :  { %v2204_v34 = vpop.permute.xlu1 %2203 }
 0x88b   :  { %v2206_v37 = vunpack.i.h.bf16 %v2204_v34  ;;  %v2205_v25 = vunpack.i.l.bf16 %v2204_v34  ;;  %v2199_v38 = vpop.permute.xlu0 %2198  ;;  %v2223_v34 = vld [vmem:[%s3116_s9] ss:$8 sps:$4 sm:$0xff]  }
 0x88c   :  { %v2201_v41 = vunpack.i.h.bf16 %v2199_v38  ;;  %v2200_v56 = vunpack.i.l.bf16 %v2199_v38  ;;  %1357 = vmatpush1.bf16.msra.mxu1 %v2223_v34  ;;  %v2234_v38 = vld [vmem:[%s3116_s9 + $0x34] ss:$8 sps:$4 sm:$0xff]  }
 0x88d   :  { %v1132_v43 = vsel %vm1129_vm3, %v1127_v39, %v2205_v25  ;;  %v1133_v54 = vsel %vm1129_vm3, %v1128_v40, %v2206_v37  ;;  %1358 = vmatprep.subr.bf16.mxu1 %v2228_v33  ;;  %v2231_v37 = vld [vmem:[%s3116_s9 + $0x24] ss:$8 sps:$4 sm:$0xff]   ;;  %v2229_v25 = vld [vmem:[%s3116_s9 + $0x20] ss:$8 sps:$4 sm:$0xff]   ;;  %v2232_v39 = vld [vmem:[%s3116_s9 + $0x30] ss:$8 sps:$4 sm:$0xff]  }
 0x88e   :  { %v1135_v47 = vpack.c.bf16 %v1133_v54, %v1132_v43  ;;  %v1130_v42 = vsel %vm1129_vm3, %v1125_v45, %v2200_v56  ;;  %v1131_v49 = vsel %vm1129_vm3, %v1126_v55, %v2201_v41 }
 0x88f   :  { %v1134_v50 = vpack.c.bf16 %v1131_v49, %v1130_v42 }
 0x890   :  { %1359 = vmatpush1.bf16.msra.mxu1 %v2226_v35 }
 0x891   :  { %2124 = vmatprep.mubr.msk.bf16.mxu0 %vm132_vm0, %v1134_v50  ;;  %1360 = vmatprep.subr.bf16.mxu1 %v2231_v37 }
 0x892   :  { %2125 = vmatmul.mubr.msk.bf16.vlgmr.msra.gmra.mrb[20].mxu0 %vm132_vm0, %v1135_v47 }
 0x894   :  { %1361 = vmatpush1.bf16.msra.mxu1 %v2229_v25 }
 0x895   :  { %1362 = vmatprep.subr.bf16.mxu1 %v2234_v38 }
 0x898   :  { %1363 = vmatpush1.bf16.msra.mxu1 %v2232_v39 }
 0x965   :  { %v2126_v52 = vpop.f32.mrb[20].mxu0 }
 0x966   :  { %v1206_v53 = vpop.f32.mrb[21].mxu0  ;;  %v1215_v46 = vadd.f32 %v2126_v52, %v1931_v51 }
 0x967   :  { %v1207_v59 = vadd.f32 %v1931_v51, %v1206_v53  ;;  %v2127_v31 = vpop.f32.mrb[22].mxu0  ;;  %v1938_v53 = vld [vmem:[%s3114_s7] ss:$0 sm:$0xff] }
 0x968   :  { %v1209_v48 = vpop.f32.mrb[23].mxu0  ;;  %v2880_v30 = vadd.f32 %v2360_v58, %v1215_v46  ;;  %v1218_v44 = vadd.f32 %v2127_v31, %v1931_v51 }
 0x969   :  { %v2875_v60 = vadd.f32 %v2359_v21, %v1207_v59  ;;  %v1210_v61 = vadd.f32 %v1931_v51, %v1209_v48 }
 0x96a   :  { %v2894_v5 = vadd.f32 %v2362_v4, %v1218_v44  ;;  %v1231_v8 = vsel %vm132_vm0, %v2880_v30, 0.0 }
 0x96b   :  { %v2885_v63 = vadd.f32 %v2361_v62, %v1210_v61  ;;  %v1225_v1 = vsel %vm132_vm0, %v2875_v60, 0.0  ;;  %v1939_v61 = vld [vmem:[%s3115_s8] ss:$0 sm:$0xff] }
 0x96c   :  { %1226 = vadd.xlane.f32.xlu0 %v1225_v1  ;;  %v1234_v20 = vsel %vm132_vm0, %v2894_v5, 0.0 }
 0x96d   :  { %v1228_v3 = vsel %vm132_vm0, %v2885_v63, 0.0 }
 0x96e   :  { %1229 = vadd.xlane.f32.xlu1 %v1228_v3 }
 0x970   :  { %1232 = vadd.xlane.f32.xlu0 %v1231_v8 }
 0x974   :  { %1235 = vadd.xlane.f32.xlu0 %v1234_v20 }
 0x9f9   :  { %v1227_v57 = vpop.xlane.xlu0 %1226 }
 0x9fa   :  { %v1237_v11 = vmul.f32 0.015625, %v1227_v57 }
 0x9fb   :  { %v1230_v12 = vpop.xlane.xlu1 %1229 }
 0x9fc   :  { %v1241_v13 = vsub.f32 %v2875_v60, %v1237_v11  ;;  %v1238_v14 = vmul.f32 0.015625, %v1230_v12 }
 0x9fd   :  { %v1233_v2 = vpop.xlane.xlu0 %1232 }
 0x9fe   :  { %v1242_v15 = vsub.f32 %v2885_v63, %v1238_v14  ;;  %v1239_v16 = vmul.f32 0.015625, %v1233_v2  ;;  %v1245_v17 = vmul.f32 %v1241_v13, %v1241_v13  ;;  %v2235_v14 = vld [vmem:[%s3118_s11 + $0x40] sm:$0xff]  }
 0x9ff   :  { %v2236_v2 = vld [vmem:[%s3118_s11] sm:$0xff]   ;;  %2014 = vmatprep.subr.bf16.mxu0 %v2235_v14 }
 0xa00   :  { %v1243_v0 = vsub.f32 %v2880_v30, %v1239_v16  ;;  %v1249_v18 = vsel %vm132_vm0, %v1245_v17, 0.0  ;;  %v1246_v19 = vmul.f32 %v1242_v15, %v1242_v15  ;;  %2015 = vmatpush3.bf16.msra.mxu0 %v2236_v2  ;;  %v2239_v16 = vld [vmem:[%s3118_s11 + $0x50] sm:$0xff]  }
 0xa01   :  { %1250 = vadd.xlane.f32.xlu0 %v1249_v18  ;;  %v1236_v23 = vpop.xlane.xlu0 %1235  ;;  %v2240_v17 = vld [vmem:[%s3118_s11 + $0x10] sm:$0xff]   ;;  %v2242_v18 = vld [vmem:[%s3118_s11 + $0x18] sm:$0xff]  }
 0xa02   :  { %v1240_v26 = vmul.f32 0.015625, %v1236_v23  ;;  %v1252_v22 = vsel %vm132_vm0, %v1246_v19, 0.0  ;;  %v1247_v24 = vmul.f32 %v1243_v0, %v1243_v0  ;;  %v2243_v19 = vld [vmem:[%s3118_s11 + $0x60] sm:$0xff]  }
 0xa03   :  { %1253 = vadd.xlane.f32.xlu1 %v1252_v22  ;;  %v2244_v23 = vld [vmem:[%s3118_s11 + $0x20] sm:$0xff]   ;;  %v2246_v22 = vld [vmem:[%s3118_s11 + $0x28] sm:$0xff]  }
 0xa04   :  { %v1244_v27 = vsub.f32 %v2894_v5, %v1240_v26  ;;  %v1255_v10 = vsel %vm132_vm0, %v1247_v24, 0.0  ;;  %v2245_v26 = vld [vmem:[%s3118_s11 + $0x68] sm:$0xff]   ;;  %v2247_v24 = vld [vmem:[%s3118_s11 + $0x70] sm:$0xff]  }
 0xa05   :  { %1256 = vadd.xlane.f32.xlu0 %v1255_v10  ;;  %v2249_v10 = vld [vmem:[%s3118_s11 + $0x78] sm:$0xff]  }
 0xa06   :  { %v1248_v28 = vmul.f32 %v1244_v27, %v1244_v27 }
 0xa08   :  { %v1258_v29 = vsel %vm132_vm0, %v1248_v28, 0.0  ;;  %v2250_v28 = vld [vmem:[%s3118_s11 + $0x38] sm:$0xff]  }
 0xa09   :  { %1259 = vadd.xlane.f32.xlu1 %v1258_v29  ;;  %v98_v29 = vld [vmem:[%s3117_s10] sm:$0x3] }
 0xa0a   :  { %v1303_v32 = vrot.slane %v98_v29, %v211_v7  ;;  %v1307_v34 = vrot.slane %v98_v29, %v215_v9 }
 0xa8e   :  { %v1251_v40 = vpop.xlane.xlu0 %1250 }
 0xa8f   :  { %v1261_v41 = vmul.f32 0.015625, %v1251_v40 }
 0xa90   :  { %v1254_v56 = vpop.xlane.xlu1 %1253 }
 0xa91   :  { %v1265_v43 = vadd.f32 1e-05, %v1261_v41  ;;  %v1262_v54 = vmul.f32 0.015625, %v1254_v56 }
 0xa92   :  { %v1257_v45 = vpop.xlane.xlu0 %1256 }
 0xa93   :  { %2327 = vrsqrt.f32 %v1265_v43  ;;  %v1266_v55 = vadd.f32 1e-05, %v1262_v54  ;;  %v1263_v47 = vmul.f32 0.015625, %v1257_v45 }
 0xa95   :  { %2329 = vrsqrt.f32 %v1266_v55  ;;  %v1267_v42 = vadd.f32 1e-05, %v1263_v47 }
 0xa96   :  { %v1260_v49 = vpop.xlane.xlu1 %1259 }
 0xa97   :  { %2331 = vrsqrt.f32 %v1267_v42  ;;  %v1264_v50 = vmul.f32 0.015625, %v1260_v49 }
 0xa99   :  { %v1268_v51 = vadd.f32 1e-05, %v1264_v50 }
 0xa9b   :  { %2333 = vrsqrt.f32 %v1268_v51 }
 0xa9d   :  { %v2328_v52 = vpop.eup %2327 }
 0xa9e   :  { %v1273_v46 = vmul.f32 %v2328_v52, %v1241_v13 }
 0xa9f   :  { %v2330_v59 = vpop.eup %2329 }
 0xaa0   :  { %v1283_v31 = vmul.f32 %v1938_v53, %v1273_v46  ;;  %v1274_v48 = vmul.f32 %v2330_v59, %v1242_v15  ;;  %v2237_v15 = vld [vmem:[%s3118_s11 + $0x48] sm:$0xff]  }
 0xaa1   :  { %v2332_v21 = vpop.eup %2331  ;;  %2016 = vmatprep.subr.bf16.mxu0 %v2237_v15 }
 0xaa2   :  { %v1284_v58 = vmul.f32 %v1938_v53, %v1274_v48  ;;  %v1275_v44 = vmul.f32 %v2332_v21, %v1243_v0  ;;  %v1293_v62 = vadd.f32 %v1939_v61, %v1283_v31  ;;  %v2241_v0 = vld [vmem:[%s3118_s11 + $0x58] sm:$0xff]  }
 0xaa4   :  { %v1294_v1 = vadd.f32 %v1939_v61, %v1284_v58  ;;  %v1285_v20 = vmul.f32 %v1938_v53, %v1275_v44 }
 0xaa5   :  { %v2334_v3 = vpop.eup %2333 }
 0xaa6   :  { %v1276_v4 = vmul.f32 %v2334_v3, %v1244_v27  ;;  %v1297_v8 = vpack.c.bf16 %v1294_v1, %v1293_v62  ;;  %v1295_v12 = vadd.f32 %v1939_v61, %v1285_v20  ;;  %v2248_v27 = vld [vmem:[%s3118_s11 + $0x30] sm:$0xff]  }
 0xaa8   :  { %1948 = vmatmul.mubr.msk.bf16.vlgmr.msra.gmra.mrb[20].mxu1 %vm132_vm0, %v1297_v8  ;;  %v1286_v57 = vmul.f32 %v1938_v53, %v1276_v4 }
 0xaa9   :  { %1398 = vmatprep.mubr.bf16.mxu1 %v2387_v36  ;;  %v2238_v36 = vld [vmem:[%s3118_s11 + $0x8] sm:$0xff]  }
 0xaaa   :  { %v1296_v11 = vadd.f32 %v1939_v61, %v1286_v57  ;;  %2017 = vmatpush3.bf16.msra.mxu0 %v2238_v36 }
 0xaab   :  { %2018 = vmatprep.subr.bf16.mxu0 %v2239_v16 }
 0xaac   :  { %v1298_v13 = vpack.c.bf16 %v1296_v11, %v1295_v12 }
 0xaae   :  { %2019 = vmatpush3.bf16.msra.mxu0 %v2240_v17 }
 0xaaf   :  { %2020 = vmatprep.subr.bf16.mxu0 %v2241_v0 }
 0xab0   :  { %1949 = vmatmul.mubr.msk.bf16.gmra.mrb[24].mxu1 %vm132_vm0, %v1298_v13 }
 0xab2   :  { %2021 = vmatpush3.bf16.msra.mxu0 %v2242_v18 }
 0xab3   :  { %2022 = vmatprep.subr.bf16.mxu0 %v2243_v19 }
 0xab6   :  { %2023 = vmatpush3.bf16.msra.mxu0 %v2244_v23 }
 0xab7   :  { %2024 = vmatprep.subr.bf16.mxu0 %v2245_v26 }
 0xaba   :  { %2025 = vmatpush3.bf16.msra.mxu0 %v2246_v22 }
 0xabb   :  { %2026 = vmatprep.subr.bf16.mxu0 %v2247_v24 }
 0xabe   :  { %2027 = vmatpush3.bf16.msra.mxu0 %v2248_v27 }
 0xabf   :  { %2028 = vmatprep.subr.bf16.mxu0 %v2249_v10 }
 0xac2   :  { %2029 = vmatpush3.bf16.msra.mxu0 %v2250_v28 }
 0xb7b   :  { %v1390_v33 = vpop.f32.mrb[20].mxu1 }
 0xb7c   :  { %v2996_v35 = vadd.f32 %v1390_v33, %v1303_v32  ;;  %v1392_v37 = vpop.f32.mrb[21].mxu1 }
 0xb7d   :  { %v2998_v25 = vadd.f32 %v1392_v37, %v1307_v34  ;;  %v1394_v38 = vpop.f32.mrb[22].mxu1 }
 0xb7e   :  { %v1409_v39 = vmul.f32 %v2996_v35, %v2996_v35  ;;  %v3002_v40 = vadd.f32 %v1394_v38, %v1303_v32  ;;  %v1396_v41 = vpop.f32.mrb[23].mxu1 }
 0xb7f   :  { %v1410_v56 = vmul.f32 %v2998_v25, %v2998_v25  ;;  %v3006_v7 = vadd.f32 %v1396_v41, %v1307_v34 }
 0xb80   :  { %v1417_v6 = vmul.f32 %v1409_v39, %v2996_v35  ;;  %v1411_v9 = vmul.f32 %v3002_v40, %v3002_v40 }
 0xb81   :  { %v1418_v43 = vmul.f32 %v1410_v56, %v2998_v25  ;;  %v1412_v54 = vmul.f32 %v3006_v7, %v3006_v7 }
 0xb82   :  { %v1425_v45 = vmul.f32 0.044715, %v1417_v6  ;;  %v1419_v55 = vmul.f32 %v1411_v9, %v3002_v40 }
 0xb83   :  { %v1426_v47 = vmul.f32 0.044715, %v1418_v43  ;;  %v1420_v42 = vmul.f32 %v1412_v54, %v3006_v7  ;;  %v1400_v49 = vpop.f32.mrb[24].mxu1 }
 0xb84   :  { %v1433_v50 = vadd.f32 %v1425_v45, %v2996_v35  ;;  %v1427_v51 = vmul.f32 0.044715, %v1419_v55  ;;  %v3017_v52 = vadd.f32 %v1400_v49, %v1303_v32  ;;  %v1402_v53 = vpop.f32.mrb[25].mxu1 }
 0xb85   :  { %v1434_v46 = vadd.f32 %v1426_v47, %v2998_v25  ;;  %v1428_v59 = vmul.f32 0.044715, %v1420_v42  ;;  %v3020_v31 = vadd.f32 %v1402_v53, %v1307_v34  ;;  %v1404_v48 = vpop.f32.mrb[26].mxu1 }
 0xb86   :  { %v1441_v21 = vmul.f32 0.7978846, %v1433_v50  ;;  %v1435_v61 = vadd.f32 %v1427_v51, %v3002_v40  ;;  %v1413_v58 = vmul.f32 %v3017_v52, %v3017_v52  ;;  %v3025_v44 = vadd.f32 %v1404_v48, %v1303_v32  ;;  %v1406_v62 = vpop.f32.mrb[27].mxu1 }
 0xb87   :  { %v1442_v1 = vmul.f32 0.7978846, %v1434_v46  ;;  %v1436_v3 = vadd.f32 %v1428_v59, %v3006_v7  ;;  %v1414_v4 = vmul.f32 %v3020_v31, %v3020_v31  ;;  %v3030_v8 = vadd.f32 %v1406_v62, %v1307_v34 }
 0xb88   :  { %2335 = vtanh.f32 %v1441_v21  ;;  %v1443_v20 = vmul.f32 0.7978846, %v1435_v61  ;;  %v1421_v57 = vmul.f32 %v1413_v58, %v3017_v52  ;;  %v1415_v11 = vmul.f32 %v3025_v44, %v3025_v44 }
 0xb89   :  { %2337 = vtanh.f32 %v1442_v1  ;;  %v1444_v12 = vmul.f32 0.7978846, %v1436_v3  ;;  %v1422_v13 = vmul.f32 %v1414_v4, %v3020_v31  ;;  %v1416_v14 = vmul.f32 %v3030_v8, %v3030_v8 }
 0xb8a   :  { %2339 = vtanh.f32 %v1443_v20  ;;  %v1429_v2 = vmul.f32 0.044715, %v1421_v57  ;;  %v1423_v15 = vmul.f32 %v1415_v11, %v3025_v44 }
 0xb8b   :  { %2341 = vtanh.f32 %v1444_v12  ;;  %v1430_v36 = vmul.f32 0.044715, %v1422_v13  ;;  %v1424_v16 = vmul.f32 %v1416_v14, %v3030_v8  ;;  %v1966_v14 = vld [vmem:[%s3119_s12] ss:$0 sm:$0xff] }
 0xb8c   :  { %v1437_v17 = vadd.f32 %v1429_v2, %v3017_v52  ;;  %v1431_v0 = vmul.f32 0.044715, %v1423_v15 }
 0xb8d   :  { %v1438_v18 = vadd.f32 %v1430_v36, %v3020_v31  ;;  %v1432_v19 = vmul.f32 0.044715, %v1424_v16 }
 0xb8e   :  { %v1445_v23 = vmul.f32 0.7978846, %v1437_v17  ;;  %v1439_v26 = vadd.f32 %v1431_v0, %v3025_v44 }
 0xb8f   :  { %v1446_v22 = vmul.f32 0.7978846, %v1438_v18  ;;  %v1440_v24 = vadd.f32 %v1432_v19, %v3030_v8 }
 0xb90   :  { %2343 = vtanh.f32 %v1445_v23  ;;  %v1447_v27 = vmul.f32 0.7978846, %v1439_v26 }
 0xb91   :  { %2345 = vtanh.f32 %v1446_v22  ;;  %v1448_v10 = vmul.f32 0.7978846, %v1440_v24 }
 0xb92   :  { %v2336_v28 = vpop.eup %2335  ;;  %2347 = vtanh.f32 %v1447_v27 }
 0xb93   :  { %v2338_v29 = vpop.eup %2337  ;;  %v1457_v32 = vadd.f32 1.0, %v2336_v28  ;;  %2349 = vtanh.f32 %v1448_v10 }
 0xb94   :  { %v2340_v34 = vpop.eup %2339  ;;  %v1458_v33 = vadd.f32 1.0, %v2338_v29 }
 0xb95   :  { %v2342_v37 = vpop.eup %2341  ;;  %v1465_v38 = vmul.f32 0.5, %v1457_v32  ;;  %v1459_v39 = vadd.f32 1.0, %v2340_v34 }
 0xb96   :  { %v1460_v41 = vadd.f32 1.0, %v2342_v37  ;;  %v1466_v56 = vmul.f32 0.5, %v1458_v33 }
 0xb97   :  { %v1467_v6 = vmul.f32 0.5, %v1459_v39  ;;  %v1473_v43 = vmul.f32 %v1465_v38, %v2996_v35 }
 0xb98   :  { %v1468_v9 = vmul.f32 0.5, %v1460_v41  ;;  %v1474_v55 = vmul.f32 %v1466_v56, %v2998_v25 }
 0xb99   :  { %v1475_v54 = vmul.f32 %v1467_v6, %v3002_v40 }
 0xb9a   :  { %v2344_v45 = vpop.eup %2343  ;;  %v1476_v47 = vmul.f32 %v1468_v9, %v3006_v7 }
 0xb9b   :  { %v2346_v42 = vpop.eup %2345  ;;  %v1481_v49 = vpack.c.bf16 %v1475_v54, %v1473_v43  ;;  %v1461_v50 = vadd.f32 1.0, %v2344_v45 }
 0xb9c   :  { %v2348_v51 = vpop.eup %2347  ;;  %v1482_v53 = vpack.c.bf16 %v1476_v47, %v1474_v55  ;;  %v1462_v46 = vadd.f32 1.0, %v2346_v42  ;;  %v2395_v42 = vmov 0.0|0.0  }
 0xb9d   :  { %v2350_v59 = vpop.eup %2349  ;;  %v1463_v48 = vadd.f32 1.0, %v2348_v51  ;;  %v1469_v21 = vmul.f32 0.5, %v1461_v50  ;;  %2151 = vmatprep.subr.bf16.mxu1 %v2395_v42 }
 0xb9e   :  { %1613 = vmatprep.mubr.bf16.mxu0 %v1482_v53  ;;  %v1464_v61 = vadd.f32 1.0, %v2350_v59  ;;  %v1470_v58 = vmul.f32 0.5, %v1462_v46 }
 0xb9f   :  { %1614 = vmatmul.mubr.bf16.vlgmr.msra.gmra.mrb[24].mxu0 %v1481_v49  ;;  %v1471_v35 = vmul.f32 0.5, %v1463_v48  ;;  %v1477_v62 = vmul.f32 %v1469_v21, %v3017_v52  ;;  %v2397_v49 = vmov 0.0  }
 0xba0   :  { %v1472_v40 = vmul.f32 0.5, %v1464_v61  ;;  %v1478_v7 = vmul.f32 %v1470_v58, %v3020_v31  ;;  %2136 = vmatprep.mubr.msk.f32.mxu1 %vm2396_vm4, %v2397_v49 }
 0xba1   :  { %v1479_v25 = vmul.f32 %v1471_v35, %v3025_v44 }
 0xba2   :  { %v1480_v1 = vmul.f32 %v1472_v40, %v3030_v8 }
 0xba3   :  { %v1483_v3 = vpack.c.bf16 %v1479_v25, %v1477_v62 }
 0xba4   :  { %v1484_v4 = vpack.c.bf16 %v1480_v1, %v1478_v7  ;;  %v1967_v7 = vld [vmem:[%s3122_s15] ss:$0 sm:$0xff] }
 0xba6   :  { %1621 = vmatprep.mubr.bf16.mxu0 %v1484_v4 }
 0xba7   :  { %1622 = vmatmul.mubr.bf16.gmra.mrb[28].mxu0 %v1483_v3 }
 0xc72   :  { %v2030_v20 = vpop.f32.mrb[24].mxu0 }
 0xc73   :  { %v2031_v57 = vpop.f32.mrb[25].mxu0 }
 0xc74   :  { %v2032_v11 = vadd.f32 %v2031_v57, %v2030_v20  ;;  %v2033_v12 = vpop.f32.mrb[26].mxu0  ;;  %v1968_v57 = vld [vmem:[%s3123_s16] ss:$0 sm:$0xff] }
 0xc75   :  { %v2034_v13 = vpop.f32.mrb[27].mxu0 }
 0xc76   :  { %v1630_v52 = vadd.f32 %v2032_v11, %v2875_v60  ;;  %v2035_v44 = vadd.f32 %v2034_v13, %v2033_v12 }
 0xc78   :  { %v1631_v31 = vadd.f32 %v2035_v44, %v2885_v63  ;;  %v1640_v2 = vadd.f32 %v1966_v14, %v1630_v52 }
 0xc7a   :  { %v2036_v8 = vpop.f32.mrb[28].mxu0  ;;  %v1646_v15 = vsel %vm132_vm0, %v1640_v2, 0.0  ;;  %v1641_v36 = vadd.f32 %v1966_v14, %v1631_v31 }
 0xc7b   :  { %1647 = vadd.xlane.f32.xlu0 %v1646_v15  ;;  %v2037_v16 = vpop.f32.mrb[29].mxu0 }
 0xc7c   :  { %v2038_v17 = vadd.f32 %v2037_v16, %v2036_v8  ;;  %v2039_v0 = vpop.f32.mrb[30].mxu0  ;;  %v1649_v18 = vsel %vm132_vm0, %v1641_v36, 0.0 }
 0xc7d   :  { %1650 = vadd.xlane.f32.xlu1 %v1649_v18  ;;  %v2040_v19 = vpop.f32.mrb[31].mxu0  ;;  %v2251_v18 = vld [vmem:[%s3124_s17] sm:$0xff]  }
 0xc7e   :  { %v1632_v23 = vadd.f32 %v2038_v17, %v2880_v30  ;;  %v2041_v26 = vadd.f32 %v2040_v19, %v2039_v0  ;;  %v1718_v0 = vld [vmem:[%s3121_s14] sm:$0x3]  ;;  %v2252_v19 = vld [vmem:[%s3124_s17 + $0x8] sm:$0xff]  }
 0xc80   :  { %v1633_v60 = vadd.f32 %v2041_v26, %v2894_v5  ;;  %v1642_v22 = vadd.f32 %v1966_v14, %v1632_v23  ;;  %v2253_v23 = vld [vmem:[%s3124_s17 + $0x10] sm:$0xff]   ;;  %v2254_v26 = vld [vmem:[%s3124_s17 + $0x18] sm:$0xff]   ;;  %s2363_s17 = scalar_lea.vmem %s1884_s13, 32 }
 0xc81   :  { %p2364_p0 = scmp.ne.s32.totalorder %s1884_s13, %s2363_s17  ;;  %p2369_p2 = scmp.lt.s32.totalorder %s2363_s17, %s2363_s17 }
 0xc82   :  { %v1652_v63 = vsel %vm132_vm0, %v1642_v22, 0.0  ;;  %v1643_v24 = vadd.f32 %v1966_v14, %v1633_v60 }
 0xc83   :  { %1653 = vadd.xlane.f32.xlu0 %v1652_v63  ;;  %p2370_p3 = por %p2369_p2, %p2368_p1 }
 0xc84   :  { %v1655_v27 = vsel %vm132_vm0, %v1643_v24, 0.0 }
 0xc85   :  { %1656 = vadd.xlane.f32.xlu1 %v1655_v27  ;;  %p2371_p4 = pnand %p2370_p3, %p2364_p0 }
 0xd08   :  { %v1648_v10 = vpop.xlane.xlu0 %1647 }
 0xd09   :  { %v1658_v28 = vmul.f32 0.015625, %v1648_v10 }
 0xd0a   :  { %v1651_v29 = vpop.xlane.xlu1 %1650 }
 0xd0b   :  { %v1662_v32 = vsub.f32 %v1640_v2, %v1658_v28  ;;  %v1659_v34 = vmul.f32 0.015625, %v1651_v29 }
 0xd0d   :  { %v1663_v33 = vsub.f32 %v1641_v36, %v1659_v34  ;;  %v1666_v37 = vmul.f32 %v1662_v32, %v1662_v32 }
 0xd0f   :  { %v1670_v30 = vsel %vm132_vm0, %v1666_v37, 0.0  ;;  %v1667_v38 = vmul.f32 %v1663_v33, %v1663_v33 }
 0xd10   :  { %1671 = vadd.xlane.f32.xlu0 %v1670_v30  ;;  %v1654_v5 = vpop.xlane.xlu0 %1653 }
 0xd11   :  { %v1660_v39 = vmul.f32 0.015625, %v1654_v5  ;;  %v1673_v41 = vsel %vm132_vm0, %v1667_v38, 0.0 }
 0xd12   :  { %1674 = vadd.xlane.f32.xlu1 %v1673_v41  ;;  %v1657_v56 = vpop.xlane.xlu1 %1656 }
 0xd13   :  { %v1664_v6 = vsub.f32 %v1642_v22, %v1660_v39  ;;  %v1661_v9 = vmul.f32 0.015625, %v1657_v56 }
 0xd15   :  { %v1665_v43 = vsub.f32 %v1643_v24, %v1661_v9  ;;  %v1668_v54 = vmul.f32 %v1664_v6, %v1664_v6  ;;  %v1970_v24 = vld [vmem:[%s3125_s18] ss:$0 sm:$0xff] }
 0xd17   :  { %v1676_v45 = vsel %vm132_vm0, %v1668_v54, 0.0  ;;  %v1669_v55 = vmul.f32 %v1665_v43, %v1665_v43 }
 0xd18   :  { %1677 = vadd.xlane.f32.xlu0 %v1676_v45 }
 0xd19   :  { %v1679_v47 = vsel %vm132_vm0, %v1669_v55, 0.0 }
 0xd1a   :  { %1680 = vadd.xlane.f32.xlu1 %v1679_v47 }
 0xd9d   :  { %v1672_v50 = vpop.xlane.xlu0 %1671 }
 0xd9e   :  { %v1682_v51 = vmul.f32 0.015625, %v1672_v50 }
 0xd9f   :  { %v1675_v53 = vpop.xlane.xlu1 %1674 }
 0xda0   :  { %v1686_v46 = vadd.f32 1e-05, %v1682_v51  ;;  %v1683_v59 = vmul.f32 0.015625, %v1675_v53 }
 0xda2   :  { %2351 = vrsqrt.f32 %v1686_v46  ;;  %v1687_v48 = vadd.f32 1e-05, %v1683_v59 }
 0xda4   :  { %2353 = vrsqrt.f32 %v1687_v48 }
 0xda5   :  { %v1678_v21 = vpop.xlane.xlu0 %1677 }
 0xda6   :  { %v1684_v61 = vmul.f32 0.015625, %v1678_v21 }
 0xda7   :  { %v1681_v58 = vpop.xlane.xlu1 %1680 }
 0xda8   :  { %v1688_v35 = vadd.f32 1e-05, %v1684_v61  ;;  %v1685_v40 = vmul.f32 0.015625, %v1681_v58 }
 0xdaa   :  { %2355 = vrsqrt.f32 %v1688_v35  ;;  %v1689_v62 = vadd.f32 1e-05, %v1685_v40 }
 0xdac   :  { %v2352_v25 = vpop.eup %2351  ;;  %2357 = vrsqrt.f32 %v1689_v62 }
 0xdad   :  { %v1694_v1 = vmul.f32 %v2352_v25, %v1662_v32 }
 0xdae   :  { %v2354_v3 = vpop.eup %2353 }
 0xdaf   :  { %v1695_v4 = vmul.f32 %v2354_v3, %v1663_v33  ;;  %v1704_v20 = vmul.f32 %v1967_v7, %v1694_v1 }
 0xdb1   :  { %v1705_v11 = vmul.f32 %v1967_v7, %v1695_v4  ;;  %v1714_v12 = vadd.f32 %v1968_v57, %v1704_v20 }
 0xdb3   :  { %v1715_v13 = vadd.f32 %v1968_v57, %v1705_v11 }
 0xdb4   :  { %v2356_v14 = vpop.eup %2355 }
 0xdb5   :  { %v1696_v52 = vmul.f32 %v2356_v14, %v1664_v6  ;;  %v2152_v44 = vpack.c.bf16 %v1715_v13, %v1714_v12 }
 0xdb6   :  { %v2358_v31 = vpop.eup %2357 }
 0xdb7   :  { %v1697_v2 = vmul.f32 %v2358_v31, %v1665_v43  ;;  %2153 = vmatpush3.bf16.msra.mxu1 %v2152_v44  ;;  %v1706_v8 = vmul.f32 %v1967_v7, %v1696_v52 }
 0xdb8   :  { %2154 = vmatprep.subr.bf16.mxu1 %v2395_v42 }
 0xdb9   :  { %v1707_v15 = vmul.f32 %v1967_v7, %v1697_v2  ;;  %v1716_v36 = vadd.f32 %v1968_v57, %v1706_v8 }
 0xdbb   :  { %v1717_v16 = vadd.f32 %v1968_v57, %v1707_v15 }
 0xdbd   :  { %v2155_v17 = vpack.c.bf16 %v1717_v16, %v1716_v36 }
 0xdbf   :  { %2156 = vmatpush3.bf16.msra.mxu1 %v2155_v17 }
 0xdc0   :  { %2139 = vmatprep.subr.bf16.mxu1 %v2397_v49 }
 0xdc2   :  { %2137 = vmatmul.mubr.msk.f32.vlgmr.msra.gmra.mrb[28].mxu1 %vm400_vm2, %v1718_v0 }
 0xdc3   :  { %2140 = vmatpush3.bf16.msra.mxu1 %v2251_v18  ;;  %2147 = vmatprep.mubr.msk.bf16.mxu1 %vm2396_vm4, %v2397_v49 }
 0xdc4   :  { %2141 = vmatprep.subr.bf16.mxu1 %v2397_v49 }
 0xdc7   :  { %2142 = vmatpush3.bf16.msra.mxu1 %v2252_v19 }
 0xdc8   :  { %2143 = vmatprep.subr.bf16.mxu1 %v2397_v49 }
 0xdcb   :  { %2144 = vmatpush3.bf16.msra.mxu1 %v2253_v23 }
 0xdcc   :  { %2145 = vmatprep.subr.bf16.mxu1 %v2397_v49 }
 0xdcf   :  { %2146 = vmatpush3.bf16.msra.mxu1 %v2254_v26 }
 0xe95   :  { %v1788_v60 = vpop.f32.mrb[28].mxu1 }
 0xe96   :  { %v1800_v22 = vpack.c.bf16 %v1788_v60, %v1788_v60  ;;  %v2138_v63 = vpop.f32.mrb[29].mxu1 }
 0xe98   :  { %2148 = vmatmul.mubr.msk.bf16.vlgmr.msra.gmra.mrb[32].mxu1 %vm132_vm0, %v1800_v22 }
 0xf6b   :  { %v1869_v27 = vpop.f32.mrb[32].mxu1 }
 0xf6c   :  { %v1870_v10 = vadd.f32 %v1970_v24, %v1869_v27  ;;  %v2149_v28 = vpop.f32.mrb[33].mxu1 }
 0xf6d   :  { %v1872_v29 = vpop.f32.mrb[34].mxu1 }
 0xf6e   :  { %v2150_v32 = vpop.f32.mrb[35].mxu1  ;;  %1876 = vst.msk [vmem:[#allocation2] sm:$0x3] %vm1875_vm5, %v1870_v10 }
 0xf6f   :  { %2374 = shalt.err (!%p2371_p4)
}
 0xf70   :  { %s2375_s18 = scalar_lea.hbm %s3126_s19, 32 }
 0xf71   :  { %p2376_p5 = scmp.ne.s32.totalorder %s3126_s19, %s2375_s18  ;;  %p2379_p6 = scmp.lt.u32.totalorder %s2375_s18, %s3126_s19 }
 0xf73   :  { %p2381_p7 = pnand %p2379_p6, %p2376_p5 }
 0xf75   :  { %2384 = shalt.err (!%p2381_p7)
}
 0xf76   :  { %1886 = dma.vmem_to_hbm [thread:$0]  %s1884_s13, 32, %s3126_s19, [#allocation3]  }
 0xf77   :  { %2385 = dma.done.wait [#allocation3], 32  }
 0xf78   :  { %2386 = vsyncadd [#allocation3], 4294967264 }
 0xf79   :  { %1890 = vsyncpa [#allocation3], 1 }

</bundles_post_ra>
